<compile_context>
chip_gen: v6e
topology: v6e:2x2x1
jax: 0.10.0
libtpu: 0.0.40
codegen_flags: <defaults>
</compile_context>

<pallas_src>
import jax
import jax.numpy as jnp
from jax.experimental import pallas as pl
from jax.experimental.pallas import tpu as pltpu


# --------------------------------------------------------------------------
# Kernel 1: fused complex-norm + conv/pool tower (one (batch, receiver) slab per step)
# --------------------------------------------------------------------------

def _conv_tower_kernel(x_ref, w1_ref, b1_ref, s1_ref, w2_ref, b2_ref, s2_ref,
                       w3_ref, b3_ref, o_ref):
    # torch.linalg.norm over the size-2 complex-pair axis.
    re = x_ref[0, 0, 0, :, :]                       # (F, T)
    im = x_ref[0, 1, 0, :, :]
    act = jnp.sqrt(re * re + im * im)               # (F, T) lane axis = time

    def conv_relu(a, w_ref, b_ref):
        # a:     (H, Win*Cin)  lane-dense activation, lane index = w*Cin + ci
        # w_ref: (Kh, Win*Cin, Wout*Cout) Toeplitz-expanded conv weight
        kh = w_ref.shape[0]
        ho = a.shape[0] - kh + 1
        acc = jnp.dot(a[0:ho, :], w_ref[0], preferred_element_type=jnp.float32)
        for i in range(1, kh):
            acc = acc + jnp.dot(a[i:i + ho, :], w_ref[i],
                                preferred_element_type=jnp.float32)
        return jnp.maximum(acc + b_ref[...], 0.0)

    def pool_h(a, s_ref):
        # MaxPool over H (kernel k, stride k, floor) via k row-selection matmuls + max.
        k = s_ref.shape[0]
        out = jnp.dot(s_ref[0], a, preferred_element_type=jnp.float32)
        for q in range(1, k):
            out = jnp.maximum(
                out, jnp.dot(s_ref[q], a, preferred_element_type=jnp.float32))
        return out

    act = conv_relu(act, w1_ref, b1_ref)            # (F-4,        (T-4)*16)
    act = pool_h(act, s1_ref)                       # ((F-4)//3,   (T-4)*16)
    act = conv_relu(act, w2_ref, b2_ref)            # (...-4,      (T-8)*32)
    act = pool_h(act, s2_ref)                       # (...//5,     (T-8)*32)
    act = conv_relu(act, w3_ref, b3_ref)            # (H3,         (T-10)*32)
    o_ref[...] = act.reshape((1, 1) + act.shape)


# --------------------------------------------------------------------------
# Kernel 2: fused fc_1 -> fc_2 -> fc_3 (dropouts are identity in eval)
# --------------------------------------------------------------------------

def _fc_chain_kernel(x_ref, w1_ref, b1_ref, w2_ref, b2_ref, w3_ref, b3_ref, o_ref):
    h = jnp.dot(x_ref[...], w1_ref[...], preferred_element_type=jnp.float32) + b1_ref[...]
    h = jnp.maximum(h, 0.0)
    h = jnp.dot(h, w2_ref[...], preferred_element_type=jnp.float32) + b2_ref[...]
    h = jnp.maximum(h, 0.0)
    h = jnp.dot(h, w3_ref[...], preferred_element_type=jnp.float32) + b3_ref[...]
    o_ref[...] = jnp.maximum(h, 0.0)


# --------------------------------------------------------------------------
# Kernel 3: W_ih matmul + fully-unrolled GRU + fc_out_1_1 + fc_out_1_2
# --------------------------------------------------------------------------

def _gru_head_kernel(xg_ref, wih_ref, bih_ref, whh_ref, bhh_ref,
                     wo1_ref, bo1_ref, wo2_ref, bo2_ref, o_ref):
    batch = o_ref.shape[0]
    hidden = whh_ref.shape[0]
    tn = xg_ref.shape[0] // batch                   # rows of xg are ordered (t, b)

    # gates_x = W_ih x_t + b_ih for all (t, b) rows at once.
    gx_all = jnp.dot(xg_ref[...], wih_ref[...],
                     preferred_element_type=jnp.float32) + bih_ref[...]

    h = jnp.zeros((batch, hidden), jnp.float32)     # h0 = 0
    hs = []
    for t in range(tn):                             # static, fully-unrolled time loop
        gx = gx_all[t * batch:(t + 1) * batch, :]
        gh = jnp.dot(h, whh_ref[...], preferred_element_type=jnp.float32) + bhh_ref[...]
        r = jax.nn.sigmoid(gx[:, :hidden] + gh[:, :hidden])
        z = jax.nn.sigmoid(gx[:, hidden:2 * hidden] + gh[:, hidden:2 * hidden])
        n = jnp.tanh(gx[:, 2 * hidden:] + r * gh[:, 2 * hidden:])   # b_hn inside r*(...)
        h = (1.0 - z) * n + z * h
        hs.append(h)
    hs_cat = jnp.concatenate(hs, axis=1)            # (B, Tn*hidden), feature = t*hidden + k

    o1 = jnp.dot(hs_cat, wo1_ref[...], preferred_element_type=jnp.float32) + bo1_ref[...]
    o1 = jnp.maximum(o1, 0.0)
    o_ref[...] = jnp.dot(o1, wo2_ref[...], preferred_element_type=jnp.float32) + bo2_ref[...]


# --------------------------------------------------------------------------
# Host-side weight preprocessing (tiny XLA glue, done once per call)
# --------------------------------------------------------------------------

def _conv_toeplitz(w, w_in):
    """Expand a PyTorch conv weight (Cout, Cin, Kh, Kw) into Kh Toeplitz matmul weights.

    Returns T of shape (Kh, w_in*Cin, Wout*Cout) such that for an activation `a` laid out
    as (H, w*Cin + ci) the conv output (Ho, wo*Cout + co) equals sum_i a[i:i+Ho, :] @ T[i].
    """
    co, ci, kh, kw = w.shape
    wo = w_in - kw + 1
    wt = jnp.transpose(w, (1, 2, 3, 0))                          # (Ci, Kh, Kw, Co)
    j = jnp.arange(w_in)[:, None] - jnp.arange(wo)[None, :]      # j = w - wo
    valid = (j >= 0) & (j < kw)
    jc = jnp.clip(j, 0, kw - 1)
    t = wt[:, :, jc, :]                                          # (Ci, Kh, w_in, wo, Co)
    t = jnp.where(valid[None, None, :, :, None], t, 0.0)
    t = jnp.transpose(t, (1, 2, 0, 3, 4))                        # (Kh, w_in, Ci, wo, Co)
    return t.reshape(kh, w_in * ci, wo * co)


def _pool_select(h_in, k):
    """(k, h_in//k, h_in) 0/1 matrices: sel[q] @ a picks rows q, q+k, q+2k, ... of a."""
    hp = h_in // k
    rows = jnp.arange(hp)[:, None] * k
    cols = jnp.arange(h_in)[None, :]
    sel = [(cols == rows + q).astype(jnp.float32) for q in range(k)]
    return jnp.stack(sel, axis=0)


# --------------------------------------------------------------------------
# Full forward pass
# --------------------------------------------------------------------------

def baseline_widar3_forward(x, params):
    B, _, R, F, T = x.shape
    Tn = T - 10
    H1 = F - 4
    Hp1 = H1 // 3
    H2 = Hp1 - 4
    Hp2 = H2 // 5
    H3 = Hp2 - 2                     # == 5 for F == 121 (required by the 32*5 reshape)

    # Toeplitz (time-axis) expansion of conv weights + tiled biases + pool selectors.
    w1 = _conv_toeplitz(params["conv1_w"], T)         # (5, T,        (T-4)*16)
    w2 = _conv_toeplitz(params["conv2_w"], T - 4)     # (5, (T-4)*16, (T-8)*32)
    w3 = _conv_toeplitz(params["conv3_w"], T - 8)     # (3, (T-8)*32, (T-10)*32)
    b1 = jnp.tile(params["conv1_b"], T - 4).reshape(1, -1)
    b2 = jnp.tile(params["conv2_b"], T - 8).reshape(1, -1)
    b3 = jnp.tile(params["conv3_b"], T - 10).reshape(1, -1)
    s1 = _pool_select(H1, 3)                          # (3, 39, 117)
    s2 = _pool_select(H2, 5)                          # (5, 7, 35)

    # ---- Kernel 1: norm + conv/pool tower, one (b, r) slab per (parallel) grid step ----
    conv_out = pl.pallas_call(
        _conv_tower_kernel,
        out_shape=jax.ShapeDtypeStruct((B, R, H3, Tn * 32), jnp.float32),
        grid=(B, R),
        in_specs=[
            pl.BlockSpec((1, 2, 1, F, T), lambda b, r: (b, 0, r, 0, 0)),
            pl.BlockSpec(w1.shape, lambda b, r: (0, 0, 0)),
            pl.BlockSpec(b1.shape, lambda b, r: (0, 0)),
            pl.BlockSpec(s1.shape, lambda b, r: (0, 0, 0)),
            pl.BlockSpec(w2.shape, lambda b, r: (0, 0, 0)),
            pl.BlockSpec(b2.shape, lambda b, r: (0, 0)),
            pl.BlockSpec(s2.shape, lambda b, r: (0, 0, 0)),
            pl.BlockSpec(w3.shape, lambda b, r: (0, 0, 0)),
            pl.BlockSpec(b3.shape, lambda b, r: (0, 0)),
        ],
        out_specs=pl.BlockSpec((1, 1, H3, Tn * 32), lambda b, r: (b, r, 0, 0)),
        compiler_params=pltpu.CompilerParams(
            dimension_semantics=("parallel", "parallel")),
    )(x, w1, b1, s1, w2, b2, s2, w3, b3)

    # torch: permute(0,2,4,1,3).reshape(-1, 6, Tn, 32*5) -> rows (t, b, r), feature = c*5 + h
    h = conv_out.reshape(B, R, H3, Tn, 32)
    h = jnp.transpose(h, (3, 0, 1, 4, 2)).reshape(Tn * B * R, 32 * H3)

    # ---- Kernel 2: fc_1 -> fc_2 -> fc_3 fused ----
    M = h.shape[0]
    tm = M if M <= 512 else 512
    fc_out = pl.pallas_call(
        _fc_chain_kernel,
        out_shape=jax.ShapeDtypeStruct((M, 32), jnp.float32),
        grid=(pl.cdiv(M, tm),),
        in_specs=[
            pl.BlockSpec((tm, 32 * H3), lambda i: (i, 0)),
            pl.BlockSpec(params["fc1_w"].shape, lambda i: (0, 0)),
            pl.BlockSpec((1, 128), lambda i: (0, 0)),
            pl.BlockSpec(params["fc2_w"].shape, lambda i: (0, 0)),
            pl.BlockSpec((1, 64), lambda i: (0, 0)),
            pl.BlockSpec(params["fc3_w"].shape, lambda i: (0, 0)),
            pl.BlockSpec((1, 32), lambda i: (0, 0)),
        ],
        out_specs=pl.BlockSpec((tm, 32), lambda i: (i, 0)),
        compiler_params=pltpu.CompilerParams(dimension_semantics=("parallel",)),
    )(h,
      params["fc1_w"], params["fc1_b"].reshape(1, -1),
      params["fc2_w"], params["fc2_b"].reshape(1, -1),
      params["fc3_w"], params["fc3_b"].reshape(1, -1))

    # torch: permute(0,2,1,3).reshape(-1, Tn, 6*32) -> byte-identical reshape here:
    # rows become (t, b), feature index = r*32 + c  (time-major for the GRU kernel).
    xg = fc_out.reshape(Tn * B, R * 32)

    # ---- Kernel 3: GRU (batch_first, h0=0) + output head 1, single invocation ----
    class_num = params["fco12_w"].shape[1]
    out = pl.pallas_call(
        _gru_head_kernel,
        out_shape=jax.ShapeDtypeStruct((B, class_num), jnp.float32),
    )(xg,
      params["gru_wih_t"], params["gru_bih"].reshape(1, -1),
      params["gru_whh_t"], params["gru_bhh"].reshape(1, -1),
      params["fco11_w"], params["fco11_b"].reshape(1, -1),
      params["fco12_w"], params["fco12_b"].reshape(1, -1))
    return out


# --------------------------------------------------------------------------
# Deterministic parameter initialization (PyTorch-style shapes / fan-in uniform)
# --------------------------------------------------------------------------

def init_params(key, T_MAX, class_num):
    Tn = T_MAX - 10
    ks = iter(jax.random.split(key, 32))

    def dense(fan_in, fan_out):
        lim = 1.0 / (fan_in ** 0.5)
        w = jax.random.uniform(next(ks), (fan_in, fan_out), jnp.float32, -lim, lim)
        b = jax.random.uniform(next(ks), (fan_out,), jnp.float32, -lim, lim)
        return w, b

    def conv(cout, cin, kh, kw):
        fan_in = cin * kh * kw
        lim = 1.0 / (fan_in ** 0.5)
        w = jax.random.uniform(next(ks), (cout, cin, kh, kw), jnp.float32, -lim, lim)
        b = jax.random.uniform(next(ks), (cout,), jnp.float32, -lim, lim)
        return w, b

    p = {}
    p["conv1_w"], p["conv1_b"] = conv(16, 1, 5, 5)
    p["conv2_w"], p["conv2_b"] = conv(32, 16, 5, 5)
    p["conv3_w"], p["conv3_b"] = conv(32, 32, 3, 3)
    p["fc1_w"], p["fc1_b"] = dense(32 * 5, 128)
    p["fc2_w"], p["fc2_b"] = dense(128, 64)
    p["fc3_w"], p["fc3_b"] = dense(64, 32)
    # GRU weights stored pre-transposed: W_ih^T (192, 384), W_hh^T (128, 384); gate order [r, z, n]
    p["gru_wih_t"], p["gru_bih"] = dense(6 * 32, 3 * 128)
    p["gru_whh_t"], p["gru_bhh"] = dense(128, 3 * 128)
    p["fco11_w"], p["fco11_b"] = dense(Tn * 128, 128)
    p["fco12_w"], p["fco12_b"] = dense(128, class_num)
    return p


# --------------------------------------------------------------------------

if __name__ == "__main__":
    B, R, F, T_MAX = 2, 6, 121, 16   # F=121 Doppler bins required by the hard-coded 32*5 reshape
    class_num = 10

    key = jax.random.PRNGKey(0)
    kx, kp = jax.random.split(key)
    x = jax.random.normal(kx, (B, 2, R, F, T_MAX), dtype=jnp.float32)
    params = init_params(kp, T_MAX, class_num)

    fwd = jax.jit(baseline_widar3_forward)
    out = fwd(x, params)
    jax.block_until_ready(out)
    assert out.shape == (B, class_num), out.shape
    assert bool(jnp.all(jnp.isfinite(out)))
    print("KERNEL_OK")
</pallas_src>

<mosaic_0001>
module attributes {stable_mosaic.version = 11 : i64} {
  func.func @_conv_tower_kernel(%arg0: i32, %arg1: i32, %arg2: memref<1x2x1x121x16xf32, #tpu.memory_space<vmem>>, %arg3: memref<5x16x192xf32, #tpu.memory_space<vmem>>, %arg4: memref<1x192xf32, #tpu.memory_space<vmem>>, %arg5: memref<3x39x117xf32, #tpu.memory_space<vmem>>, %arg6: memref<5x192x256xf32, #tpu.memory_space<vmem>>, %arg7: memref<1x256xf32, #tpu.memory_space<vmem>>, %arg8: memref<5x7x35xf32, #tpu.memory_space<vmem>>, %arg9: memref<3x256x192xf32, #tpu.memory_space<vmem>>, %arg10: memref<1x192xf32, #tpu.memory_space<vmem>>, %arg11: memref<1x1x5x192xf32, #tpu.memory_space<vmem>>) attributes {dimension_semantics = [#tpu.dimension_semantics<parallel>, #tpu.dimension_semantics<parallel>], iteration_bounds = array<i64: 2, 6>, scalar_prefetch = 0 : i64, scratch_operands = 0 : i64, tpu.core_type = #tpu.core_type<tc>, window_params = [{transform_indices = @transform_0, window_bounds = array<i64: 1, 2, 1, 121, 16>}, {pipeline_mode = #tpu.pipeline_mode<synchronous>, transform_indices = @transform_1, window_bounds = array<i64: 5, 16, 192>}, {pipeline_mode = #tpu.pipeline_mode<synchronous>, transform_indices = @transform_2, window_bounds = array<i64: 1, 192>}, {pipeline_mode = #tpu.pipeline_mode<synchronous>, transform_indices = @transform_3, window_bounds = array<i64: 3, 39, 117>}, {pipeline_mode = #tpu.pipeline_mode<synchronous>, transform_indices = @transform_4, window_bounds = array<i64: 5, 192, 256>}, {pipeline_mode = #tpu.pipeline_mode<synchronous>, transform_indices = @transform_5, window_bounds = array<i64: 1, 256>}, {pipeline_mode = #tpu.pipeline_mode<synchronous>, transform_indices = @transform_6, window_bounds = array<i64: 5, 7, 35>}, {pipeline_mode = #tpu.pipeline_mode<synchronous>, transform_indices = @transform_7, window_bounds = array<i64: 3, 256, 192>}, {pipeline_mode = #tpu.pipeline_mode<synchronous>, transform_indices = @transform_8, window_bounds = array<i64: 1, 192>}, {transform_indices = @transform_9, window_bounds = array<i64: 1, 1, 5, 192>}]} {
    %c0 = arith.constant 0 : index
    %c0_0 = arith.constant 0 : index
    %c0_1 = arith.constant 0 : index
    %c0_2 = arith.constant 0 : index
    %c0_3 = arith.constant 0 : index
    %0 = vector.load %arg2[%c0, %c0_0, %c0_1, %c0_2, %c0_3] : memref<1x2x1x121x16xf32, #tpu.memory_space<vmem>>, vector<1x1x1x121x16xf32>
    %1 = vector.shape_cast %0 : vector<1x1x1x121x16xf32> to vector<121x16xf32>
    %c0_4 = arith.constant 0 : index
    %c1 = arith.constant 1 : index
    %c0_5 = arith.constant 0 : index
    %c0_6 = arith.constant 0 : index
    %c0_7 = arith.constant 0 : index
    %2 = vector.load %arg2[%c0_4, %c1, %c0_5, %c0_6, %c0_7] : memref<1x2x1x121x16xf32, #tpu.memory_space<vmem>>, vector<1x1x1x121x16xf32>
    %3 = vector.shape_cast %2 : vector<1x1x1x121x16xf32> to vector<121x16xf32>
    %4 = arith.mulf %1, %1 : vector<121x16xf32>
    %5 = arith.mulf %3, %3 : vector<121x16xf32>
    %6 = arith.addf %4, %5 : vector<121x16xf32>
    %7 = math.sqrt %6 : vector<121x16xf32>
    %8 = vector.extract_strided_slice %7 {offsets = [0, 0], sizes = [117, 16], strides = [1, 1]} : vector<121x16xf32> to vector<117x16xf32>
    %c0_8 = arith.constant 0 : index
    %c0_9 = arith.constant 0 : index
    %c0_10 = arith.constant 0 : index
    %9 = vector.load %arg3[%c0_8, %c0_9, %c0_10] : memref<5x16x192xf32, #tpu.memory_space<vmem>>, vector<1x16x192xf32>
    %10 = vector.shape_cast %9 : vector<1x16x192xf32> to vector<16x192xf32>
    %cst = arith.constant dense<0.000000e+00> : vector<117x192xf32>
    %11 = tpu.matmul %8, %10, %cst {dimension_numbers = #tpu.dot_dimension_numbers<[1], [0], [0], [1], [0, 0, 1, 1], [], []>} : vector<117x16xf32>, vector<16x192xf32>, vector<117x192xf32> -> vector<117x192xf32>
    %12 = vector.extract_strided_slice %7 {offsets = [1, 0], sizes = [117, 16], strides = [1, 1]} : vector<121x16xf32> to vector<117x16xf32>
    %c1_11 = arith.constant 1 : index
    %c0_12 = arith.constant 0 : index
    %c0_13 = arith.constant 0 : index
    %13 = vector.load %arg3[%c1_11, %c0_12, %c0_13] : memref<5x16x192xf32, #tpu.memory_space<vmem>>, vector<1x16x192xf32>
    %14 = vector.shape_cast %13 : vector<1x16x192xf32> to vector<16x192xf32>
    %cst_14 = arith.constant dense<0.000000e+00> : vector<117x192xf32>
    %15 = tpu.matmul %12, %14, %cst_14 {dimension_numbers = #tpu.dot_dimension_numbers<[1], [0], [0], [1], [0, 0, 1, 1], [], []>} : vector<117x16xf32>, vector<16x192xf32>, vector<117x192xf32> -> vector<117x192xf32>
    %16 = arith.addf %11, %15 : vector<117x192xf32>
    %17 = vector.extract_strided_slice %7 {offsets = [2, 0], sizes = [117, 16], strides = [1, 1]} : vector<121x16xf32> to vector<117x16xf32>
    %c2 = arith.constant 2 : index
    %c0_15 = arith.constant 0 : index
    %c0_16 = arith.constant 0 : index
    %18 = vector.load %arg3[%c2, %c0_15, %c0_16] : memref<5x16x192xf32, #tpu.memory_space<vmem>>, vector<1x16x192xf32>
    %19 = vector.shape_cast %18 : vector<1x16x192xf32> to vector<16x192xf32>
    %cst_17 = arith.constant dense<0.000000e+00> : vector<117x192xf32>
    %20 = tpu.matmul %17, %19, %cst_17 {dimension_numbers = #tpu.dot_dimension_numbers<[1], [0], [0], [1], [0, 0, 1, 1], [], []>} : vector<117x16xf32>, vector<16x192xf32>, vector<117x192xf32> -> vector<117x192xf32>
    %21 = arith.addf %16, %20 : vector<117x192xf32>
    %22 = vector.extract_strided_slice %7 {offsets = [3, 0], sizes = [117, 16], strides = [1, 1]} : vector<121x16xf32> to vector<117x16xf32>
    %c3 = arith.constant 3 : index
    %c0_18 = arith.constant 0 : index
    %c0_19 = arith.constant 0 : index
    %23 = vector.load %arg3[%c3, %c0_18, %c0_19] : memref<5x16x192xf32, #tpu.memory_space<vmem>>, vector<1x16x192xf32>
    %24 = vector.shape_cast %23 : vector<1x16x192xf32> to vector<16x192xf32>
    %cst_20 = arith.constant dense<0.000000e+00> : vector<117x192xf32>
    %25 = tpu.matmul %22, %24, %cst_20 {dimension_numbers = #tpu.dot_dimension_numbers<[1], [0], [0], [1], [0, 0, 1, 1], [], []>} : vector<117x16xf32>, vector<16x192xf32>, vector<117x192xf32> -> vector<117x192xf32>
    %26 = arith.addf %21, %25 : vector<117x192xf32>
    %27 = vector.extract_strided_slice %7 {offsets = [4, 0], sizes = [117, 16], strides = [1, 1]} : vector<121x16xf32> to vector<117x16xf32>
    %c4 = arith.constant 4 : index
    %c0_21 = arith.constant 0 : index
    %c0_22 = arith.constant 0 : index
    %28 = vector.load %arg3[%c4, %c0_21, %c0_22] : memref<5x16x192xf32, #tpu.memory_space<vmem>>, vector<1x16x192xf32>
    %29 = vector.shape_cast %28 : vector<1x16x192xf32> to vector<16x192xf32>
    %cst_23 = arith.constant dense<0.000000e+00> : vector<117x192xf32>
    %30 = tpu.matmul %27, %29, %cst_23 {dimension_numbers = #tpu.dot_dimension_numbers<[1], [0], [0], [1], [0, 0, 1, 1], [], []>} : vector<117x16xf32>, vector<16x192xf32>, vector<117x192xf32> -> vector<117x192xf32>
    %31 = arith.addf %26, %30 : vector<117x192xf32>
    %c0_24 = arith.constant 0 : index
    %c0_25 = arith.constant 0 : index
    %32 = vector.load %arg4[%c0_24, %c0_25] : memref<1x192xf32, #tpu.memory_space<vmem>>, vector<1x192xf32>
    %33 = vector.broadcast %32 : vector<1x192xf32> to vector<117x192xf32>
    %34 = arith.addf %31, %33 : vector<117x192xf32>
    %cst_26 = arith.constant 0.000000e+00 : f32
    %35 = vector.broadcast %cst_26 : f32 to vector<117x192xf32>
    %36 = arith.maximumf %34, %35 : vector<117x192xf32>
    %c0_27 = arith.constant 0 : index
    %c0_28 = arith.constant 0 : index
    %c0_29 = arith.constant 0 : index
    %37 = vector.load %arg5[%c0_27, %c0_28, %c0_29] : memref<3x39x117xf32, #tpu.memory_space<vmem>>, vector<1x39x117xf32>
    %38 = vector.shape_cast %37 : vector<1x39x117xf32> to vector<39x117xf32>
    %cst_30 = arith.constant dense<0.000000e+00> : vector<39x192xf32>
    %39 = tpu.matmul %38, %36, %cst_30 {dimension_numbers = #tpu.dot_dimension_numbers<[1], [0], [0], [1], [0, 0, 1, 1], [], []>} : vector<39x117xf32>, vector<117x192xf32>, vector<39x192xf32> -> vector<39x192xf32>
    %c1_31 = arith.constant 1 : index
    %c0_32 = arith.constant 0 : index
    %c0_33 = arith.constant 0 : index
    %40 = vector.load %arg5[%c1_31, %c0_32, %c0_33] : memref<3x39x117xf32, #tpu.memory_space<vmem>>, vector<1x39x117xf32>
    %41 = vector.shape_cast %40 : vector<1x39x117xf32> to vector<39x117xf32>
    %cst_34 = arith.constant dense<0.000000e+00> : vector<39x192xf32>
    %42 = tpu.matmul %41, %36, %cst_34 {dimension_numbers = #tpu.dot_dimension_numbers<[1], [0], [0], [1], [0, 0, 1, 1], [], []>} : vector<39x117xf32>, vector<117x192xf32>, vector<39x192xf32> -> vector<39x192xf32>
    %43 = arith.maximumf %39, %42 : vector<39x192xf32>
    %c2_35 = arith.constant 2 : index
    %c0_36 = arith.constant 0 : index
    %c0_37 = arith.constant 0 : index
    %44 = vector.load %arg5[%c2_35, %c0_36, %c0_37] : memref<3x39x117xf32, #tpu.memory_space<vmem>>, vector<1x39x117xf32>
    %45 = vector.shape_cast %44 : vector<1x39x117xf32> to vector<39x117xf32>
    %cst_38 = arith.constant dense<0.000000e+00> : vector<39x192xf32>
    %46 = tpu.matmul %45, %36, %cst_38 {dimension_numbers = #tpu.dot_dimension_numbers<[1], [0], [0], [1], [0, 0, 1, 1], [], []>} : vector<39x117xf32>, vector<117x192xf32>, vector<39x192xf32> -> vector<39x192xf32>
    %47 = arith.maximumf %43, %46 : vector<39x192xf32>
    %48 = vector.extract_strided_slice %47 {offsets = [0, 0], sizes = [35, 192], strides = [1, 1]} : vector<39x192xf32> to vector<35x192xf32>
    %c0_39 = arith.constant 0 : index
    %c0_40 = arith.constant 0 : index
    %c0_41 = arith.constant 0 : index
    %49 = vector.load %arg6[%c0_39, %c0_40, %c0_41] : memref<5x192x256xf32, #tpu.memory_space<vmem>>, vector<1x192x256xf32>
    %50 = vector.shape_cast %49 : vector<1x192x256xf32> to vector<192x256xf32>
    %cst_42 = arith.constant dense<0.000000e+00> : vector<35x256xf32>
    %51 = tpu.matmul %48, %50, %cst_42 {dimension_numbers = #tpu.dot_dimension_numbers<[1], [0], [0], [1], [0, 0, 1, 1], [], []>} : vector<35x192xf32>, vector<192x256xf32>, vector<35x256xf32> -> vector<35x256xf32>
    %52 = vector.extract_strided_slice %47 {offsets = [1, 0], sizes = [35, 192], strides = [1, 1]} : vector<39x192xf32> to vector<35x192xf32>
    %c1_43 = arith.constant 1 : index
    %c0_44 = arith.constant 0 : index
    %c0_45 = arith.constant 0 : index
    %53 = vector.load %arg6[%c1_43, %c0_44, %c0_45] : memref<5x192x256xf32, #tpu.memory_space<vmem>>, vector<1x192x256xf32>
    %54 = vector.shape_cast %53 : vector<1x192x256xf32> to vector<192x256xf32>
    %cst_46 = arith.constant dense<0.000000e+00> : vector<35x256xf32>
    %55 = tpu.matmul %52, %54, %cst_46 {dimension_numbers = #tpu.dot_dimension_numbers<[1], [0], [0], [1], [0, 0, 1, 1], [], []>} : vector<35x192xf32>, vector<192x256xf32>, vector<35x256xf32> -> vector<35x256xf32>
    %56 = arith.addf %51, %55 : vector<35x256xf32>
    %57 = vector.extract_strided_slice %47 {offsets = [2, 0], sizes = [35, 192], strides = [1, 1]} : vector<39x192xf32> to vector<35x192xf32>
    %c2_47 = arith.constant 2 : index
    %c0_48 = arith.constant 0 : index
    %c0_49 = arith.constant 0 : index
    %58 = vector.load %arg6[%c2_47, %c0_48, %c0_49] : memref<5x192x256xf32, #tpu.memory_space<vmem>>, vector<1x192x256xf32>
    %59 = vector.shape_cast %58 : vector<1x192x256xf32> to vector<192x256xf32>
    %cst_50 = arith.constant dense<0.000000e+00> : vector<35x256xf32>
    %60 = tpu.matmul %57, %59, %cst_50 {dimension_numbers = #tpu.dot_dimension_numbers<[1], [0], [0], [1], [0, 0, 1, 1], [], []>} : vector<35x192xf32>, vector<192x256xf32>, vector<35x256xf32> -> vector<35x256xf32>
    %61 = arith.addf %56, %60 : vector<35x256xf32>
    %62 = vector.extract_strided_slice %47 {offsets = [3, 0], sizes = [35, 192], strides = [1, 1]} : vector<39x192xf32> to vector<35x192xf32>
    %c3_51 = arith.constant 3 : index
    %c0_52 = arith.constant 0 : index
    %c0_53 = arith.constant 0 : index
    %63 = vector.load %arg6[%c3_51, %c0_52, %c0_53] : memref<5x192x256xf32, #tpu.memory_space<vmem>>, vector<1x192x256xf32>
    %64 = vector.shape_cast %63 : vector<1x192x256xf32> to vector<192x256xf32>
    %cst_54 = arith.constant dense<0.000000e+00> : vector<35x256xf32>
    %65 = tpu.matmul %62, %64, %cst_54 {dimension_numbers = #tpu.dot_dimension_numbers<[1], [0], [0], [1], [0, 0, 1, 1], [], []>} : vector<35x192xf32>, vector<192x256xf32>, vector<35x256xf32> -> vector<35x256xf32>
    %66 = arith.addf %61, %65 : vector<35x256xf32>
    %67 = vector.extract_strided_slice %47 {offsets = [4, 0], sizes = [35, 192], strides = [1, 1]} : vector<39x192xf32> to vector<35x192xf32>
    %c4_55 = arith.constant 4 : index
    %c0_56 = arith.constant 0 : index
    %c0_57 = arith.constant 0 : index
    %68 = vector.load %arg6[%c4_55, %c0_56, %c0_57] : memref<5x192x256xf32, #tpu.memory_space<vmem>>, vector<1x192x256xf32>
    %69 = vector.shape_cast %68 : vector<1x192x256xf32> to vector<192x256xf32>
    %cst_58 = arith.constant dense<0.000000e+00> : vector<35x256xf32>
    %70 = tpu.matmul %67, %69, %cst_58 {dimension_numbers = #tpu.dot_dimension_numbers<[1], [0], [0], [1], [0, 0, 1, 1], [], []>} : vector<35x192xf32>, vector<192x256xf32>, vector<35x256xf32> -> vector<35x256xf32>
    %71 = arith.addf %66, %70 : vector<35x256xf32>
    %c0_59 = arith.constant 0 : index
    %c0_60 = arith.constant 0 : index
    %72 = vector.load %arg7[%c0_59, %c0_60] : memref<1x256xf32, #tpu.memory_space<vmem>>, vector<1x256xf32>
    %73 = vector.broadcast %72 : vector<1x256xf32> to vector<35x256xf32>
    %74 = arith.addf %71, %73 : vector<35x256xf32>
    %cst_61 = arith.constant 0.000000e+00 : f32
    %75 = vector.broadcast %cst_61 : f32 to vector<35x256xf32>
    %76 = arith.maximumf %74, %75 : vector<35x256xf32>
    %c0_62 = arith.constant 0 : index
    %c0_63 = arith.constant 0 : index
    %c0_64 = arith.constant 0 : index
    %77 = vector.load %arg8[%c0_62, %c0_63, %c0_64] : memref<5x7x35xf32, #tpu.memory_space<vmem>>, vector<1x7x35xf32>
    %78 = vector.shape_cast %77 : vector<1x7x35xf32> to vector<7x35xf32>
    %cst_65 = arith.constant dense<0.000000e+00> : vector<7x256xf32>
    %79 = tpu.matmul %78, %76, %cst_65 {dimension_numbers = #tpu.dot_dimension_numbers<[1], [0], [0], [1], [0, 0, 1, 1], [], []>} : vector<7x35xf32>, vector<35x256xf32>, vector<7x256xf32> -> vector<7x256xf32>
    %c1_66 = arith.constant 1 : index
    %c0_67 = arith.constant 0 : index
    %c0_68 = arith.constant 0 : index
    %80 = vector.load %arg8[%c1_66, %c0_67, %c0_68] : memref<5x7x35xf32, #tpu.memory_space<vmem>>, vector<1x7x35xf32>
    %81 = vector.shape_cast %80 : vector<1x7x35xf32> to vector<7x35xf32>
    %cst_69 = arith.constant dense<0.000000e+00> : vector<7x256xf32>
    %82 = tpu.matmul %81, %76, %cst_69 {dimension_numbers = #tpu.dot_dimension_numbers<[1], [0], [0], [1], [0, 0, 1, 1], [], []>} : vector<7x35xf32>, vector<35x256xf32>, vector<7x256xf32> -> vector<7x256xf32>
    %83 = arith.maximumf %79, %82 : vector<7x256xf32>
    %c2_70 = arith.constant 2 : index
    %c0_71 = arith.constant 0 : index
    %c0_72 = arith.constant 0 : index
    %84 = vector.load %arg8[%c2_70, %c0_71, %c0_72] : memref<5x7x35xf32, #tpu.memory_space<vmem>>, vector<1x7x35xf32>
    %85 = vector.shape_cast %84 : vector<1x7x35xf32> to vector<7x35xf32>
    %cst_73 = arith.constant dense<0.000000e+00> : vector<7x256xf32>
    %86 = tpu.matmul %85, %76, %cst_73 {dimension_numbers = #tpu.dot_dimension_numbers<[1], [0], [0], [1], [0, 0, 1, 1], [], []>} : vector<7x35xf32>, vector<35x256xf32>, vector<7x256xf32> -> vector<7x256xf32>
    %87 = arith.maximumf %83, %86 : vector<7x256xf32>
    %c3_74 = arith.constant 3 : index
    %c0_75 = arith.constant 0 : index
    %c0_76 = arith.constant 0 : index
    %88 = vector.load %arg8[%c3_74, %c0_75, %c0_76] : memref<5x7x35xf32, #tpu.memory_space<vmem>>, vector<1x7x35xf32>
    %89 = vector.shape_cast %88 : vector<1x7x35xf32> to vector<7x35xf32>
    %cst_77 = arith.constant dense<0.000000e+00> : vector<7x256xf32>
    %90 = tpu.matmul %89, %76, %cst_77 {dimension_numbers = #tpu.dot_dimension_numbers<[1], [0], [0], [1], [0, 0, 1, 1], [], []>} : vector<7x35xf32>, vector<35x256xf32>, vector<7x256xf32> -> vector<7x256xf32>
    %91 = arith.maximumf %87, %90 : vector<7x256xf32>
    %c4_78 = arith.constant 4 : index
    %c0_79 = arith.constant 0 : index
    %c0_80 = arith.constant 0 : index
    %92 = vector.load %arg8[%c4_78, %c0_79, %c0_80] : memref<5x7x35xf32, #tpu.memory_space<vmem>>, vector<1x7x35xf32>
    %93 = vector.shape_cast %92 : vector<1x7x35xf32> to vector<7x35xf32>
    %cst_81 = arith.constant dense<0.000000e+00> : vector<7x256xf32>
    %94 = tpu.matmul %93, %76, %cst_81 {dimension_numbers = #tpu.dot_dimension_numbers<[1], [0], [0], [1], [0, 0, 1, 1], [], []>} : vector<7x35xf32>, vector<35x256xf32>, vector<7x256xf32> -> vector<7x256xf32>
    %95 = arith.maximumf %91, %94 : vector<7x256xf32>
    %96 = vector.extract_strided_slice %95 {offsets = [0, 0], sizes = [5, 256], strides = [1, 1]} : vector<7x256xf32> to vector<5x256xf32>
    %c0_82 = arith.constant 0 : index
    %c0_83 = arith.constant 0 : index
    %c0_84 = arith.constant 0 : index
    %97 = vector.load %arg9[%c0_82, %c0_83, %c0_84] : memref<3x256x192xf32, #tpu.memory_space<vmem>>, vector<1x256x192xf32>
    %98 = vector.shape_cast %97 : vector<1x256x192xf32> to vector<256x192xf32>
    %cst_85 = arith.constant dense<0.000000e+00> : vector<5x192xf32>
    %99 = tpu.matmul %96, %98, %cst_85 {dimension_numbers = #tpu.dot_dimension_numbers<[1], [0], [0], [1], [0, 0, 1, 1], [], []>} : vector<5x256xf32>, vector<256x192xf32>, vector<5x192xf32> -> vector<5x192xf32>
    %100 = vector.extract_strided_slice %95 {offsets = [1, 0], sizes = [5, 256], strides = [1, 1]} : vector<7x256xf32> to vector<5x256xf32>
    %c1_86 = arith.constant 1 : index
    %c0_87 = arith.constant 0 : index
    %c0_88 = arith.constant 0 : index
    %101 = vector.load %arg9[%c1_86, %c0_87, %c0_88] : memref<3x256x192xf32, #tpu.memory_space<vmem>>, vector<1x256x192xf32>
    %102 = vector.shape_cast %101 : vector<1x256x192xf32> to vector<256x192xf32>
    %cst_89 = arith.constant dense<0.000000e+00> : vector<5x192xf32>
    %103 = tpu.matmul %100, %102, %cst_89 {dimension_numbers = #tpu.dot_dimension_numbers<[1], [0], [0], [1], [0, 0, 1, 1], [], []>} : vector<5x256xf32>, vector<256x192xf32>, vector<5x192xf32> -> vector<5x192xf32>
    %104 = arith.addf %99, %103 : vector<5x192xf32>
    %105 = vector.extract_strided_slice %95 {offsets = [2, 0], sizes = [5, 256], strides = [1, 1]} : vector<7x256xf32> to vector<5x256xf32>
    %c2_90 = arith.constant 2 : index
    %c0_91 = arith.constant 0 : index
    %c0_92 = arith.constant 0 : index
    %106 = vector.load %arg9[%c2_90, %c0_91, %c0_92] : memref<3x256x192xf32, #tpu.memory_space<vmem>>, vector<1x256x192xf32>
    %107 = vector.shape_cast %106 : vector<1x256x192xf32> to vector<256x192xf32>
    %cst_93 = arith.constant dense<0.000000e+00> : vector<5x192xf32>
    %108 = tpu.matmul %105, %107, %cst_93 {dimension_numbers = #tpu.dot_dimension_numbers<[1], [0], [0], [1], [0, 0, 1, 1], [], []>} : vector<5x256xf32>, vector<256x192xf32>, vector<5x192xf32> -> vector<5x192xf32>
    %109 = arith.addf %104, %108 : vector<5x192xf32>
    %c0_94 = arith.constant 0 : index
    %c0_95 = arith.constant 0 : index
    %110 = vector.load %arg10[%c0_94, %c0_95] : memref<1x192xf32, #tpu.memory_space<vmem>>, vector<1x192xf32>
    %111 = vector.broadcast %110 : vector<1x192xf32> to vector<5x192xf32>
    %112 = arith.addf %109, %111 : vector<5x192xf32>
    %cst_96 = arith.constant 0.000000e+00 : f32
    %113 = vector.broadcast %cst_96 : f32 to vector<5x192xf32>
    %114 = arith.maximumf %112, %113 : vector<5x192xf32>
    %115 = vector.shape_cast %114 : vector<5x192xf32> to vector<1x1x5x192xf32>
    %c0_97 = arith.constant 0 : index
    %c0_98 = arith.constant 0 : index
    %c0_99 = arith.constant 0 : index
    %c0_100 = arith.constant 0 : index
    %116 = vector.load %arg11[%c0_97, %c0_98, %c0_99, %c0_100] : memref<1x1x5x192xf32, #tpu.memory_space<vmem>>, vector<1x1x5x192xf32>
    tpu.vector_store %arg11[%c0_97, %c0_98, %c0_99, %c0_100], %115 {strides = array<i32>} : memref<1x1x5x192xf32, #tpu.memory_space<vmem>>, vector<1x1x5x192xf32>,
    return
  }
  func.func @transform_0(%arg0: i32, %arg1: i32) -> (i32, i32, i32, i32, i32) {
    %c0_i32 = arith.constant 0 : i32
    %c0_i32_0 = arith.constant 0 : i32
    %c0_i32_1 = arith.constant 0 : i32
    %c0_i32_2 = arith.constant 0 : i32
    return %arg0, %c0_i32, %arg1, %c0_i32_0, %c0_i32_1 : i32, i32, i32, i32, i32
  }
  func.func @transform_1(%arg0: i32, %arg1: i32) -> (i32, i32, i32) {
    %c0_i32 = arith.constant 0 : i32
    %c0_i32_0 = arith.constant 0 : i32
    %c0_i32_1 = arith.constant 0 : i32
    %c0_i32_2 = arith.constant 0 : i32
    return %c0_i32, %c0_i32_0, %c0_i32_1 : i32, i32, i32
  }
  func.func @transform_2(%arg0: i32, %arg1: i32) -> (i32, i32) {
    %c0_i32 = arith.constant 0 : i32
    %c0_i32_0 = arith.constant 0 : i32
    %c0_i32_1 = arith.constant 0 : i32
    return %c0_i32, %c0_i32_0 : i32, i32
  }
  func.func @transform_3(%arg0: i32, %arg1: i32) -> (i32, i32, i32) {
    %c0_i32 = arith.constant 0 : i32
    %c0_i32_0 = arith.constant 0 : i32
    %c0_i32_1 = arith.constant 0 : i32
    %c0_i32_2 = arith.constant 0 : i32
    return %c0_i32, %c0_i32_0, %c0_i32_1 : i32, i32, i32
  }
  func.func @transform_4(%arg0: i32, %arg1: i32) -> (i32, i32, i32) {
    %c0_i32 = arith.constant 0 : i32
    %c0_i32_0 = arith.constant 0 : i32
    %c0_i32_1 = arith.constant 0 : i32
    %c0_i32_2 = arith.constant 0 : i32
    return %c0_i32, %c0_i32_0, %c0_i32_1 : i32, i32, i32
  }
  func.func @transform_5(%arg0: i32, %arg1: i32) -> (i32, i32) {
    %c0_i32 = arith.constant 0 : i32
    %c0_i32_0 = arith.constant 0 : i32
    %c0_i32_1 = arith.constant 0 : i32
    return %c0_i32, %c0_i32_0 : i32, i32
  }
  func.func @transform_6(%arg0: i32, %arg1: i32) -> (i32, i32, i32) {
    %c0_i32 = arith.constant 0 : i32
    %c0_i32_0 = arith.constant 0 : i32
    %c0_i32_1 = arith.constant 0 : i32
    %c0_i32_2 = arith.constant 0 : i32
    return %c0_i32, %c0_i32_0, %c0_i32_1 : i32, i32, i32
  }
  func.func @transform_7(%arg0: i32, %arg1: i32) -> (i32, i32, i32) {
    %c0_i32 = arith.constant 0 : i32
    %c0_i32_0 = arith.constant 0 : i32
    %c0_i32_1 = arith.constant 0 : i32
    %c0_i32_2 = arith.constant 0 : i32
    return %c0_i32, %c0_i32_0, %c0_i32_1 : i32, i32, i32
  }
  func.func @transform_8(%arg0: i32, %arg1: i32) -> (i32, i32) {
    %c0_i32 = arith.constant 0 : i32
    %c0_i32_0 = arith.constant 0 : i32
    %c0_i32_1 = arith.constant 0 : i32
    return %c0_i32, %c0_i32_0 : i32, i32
  }
  func.func @transform_9(%arg0: i32, %arg1: i32) -> (i32, i32, i32, i32) {
    %c0_i32 = arith.constant 0 : i32
    %c0_i32_0 = arith.constant 0 : i32
    %c0_i32_1 = arith.constant 0 : i32
    return %arg0, %arg1, %c0_i32, %c0_i32_0 : i32, i32, i32, i32
  }
}

module attributes {stable_mosaic.version = 11 : i64} {
  func.func @_fc_chain_kernel(%arg0: i32, %arg1: memref<72x160xf32, #tpu.memory_space<vmem>>, %arg2: memref<160x128xf32, #tpu.memory_space<vmem>>, %arg3: memref<1x128xf32, #tpu.memory_space<vmem>>, %arg4: memref<128x64xf32, #tpu.memory_space<vmem>>, %arg5: memref<1x64xf32, #tpu.memory_space<vmem>>, %arg6: memref<64x32xf32, #tpu.memory_space<vmem>>, %arg7: memref<1x32xf32, #tpu.memory_space<vmem>>, %arg8: memref<72x32xf32, #tpu.memory_space<vmem>>) attributes {dimension_semantics = [#tpu.dimension_semantics<parallel>], iteration_bounds = array<i64: 1>, scalar_prefetch = 0 : i64, scratch_operands = 0 : i64, tpu.core_type = #tpu.core_type<tc>, window_params = [{transform_indices = @transform_0, window_bounds = array<i64: 72, 160>}, {pipeline_mode = #tpu.pipeline_mode<synchronous>, transform_indices = @transform_1, window_bounds = array<i64: 160, 128>}, {pipeline_mode = #tpu.pipeline_mode<synchronous>, transform_indices = @transform_2, window_bounds = array<i64: 1, 128>}, {pipeline_mode = #tpu.pipeline_mode<synchronous>, transform_indices = @transform_3, window_bounds = array<i64: 128, 64>}, {pipeline_mode = #tpu.pipeline_mode<synchronous>, transform_indices = @transform_4, window_bounds = array<i64: 1, 64>}, {pipeline_mode = #tpu.pipeline_mode<synchronous>, transform_indices = @transform_5, window_bounds = array<i64: 64, 32>}, {pipeline_mode = #tpu.pipeline_mode<synchronous>, transform_indices = @transform_6, window_bounds = array<i64: 1, 32>}, {transform_indices = @transform_7, window_bounds = array<i64: 72, 32>}]} {
    %c0 = arith.constant 0 : index
    %c0_0 = arith.constant 0 : index
    %0 = vector.load %arg1[%c0, %c0_0] : memref<72x160xf32, #tpu.memory_space<vmem>>, vector<72x160xf32>
    %c0_1 = arith.constant 0 : index
    %c0_2 = arith.constant 0 : index
    %1 = vector.load %arg2[%c0_1, %c0_2] : memref<160x128xf32, #tpu.memory_space<vmem>>, vector<160x128xf32>
    %cst = arith.constant dense<0.000000e+00> : vector<72x128xf32>
    %2 = tpu.matmul %0, %1, %cst {dimension_numbers = #tpu.dot_dimension_numbers<[1], [0], [0], [1], [0, 0, 1, 1], [], []>} : vector<72x160xf32>, vector<160x128xf32>, vector<72x128xf32> -> vector<72x128xf32>
    %c0_3 = arith.constant 0 : index
    %c0_4 = arith.constant 0 : index
    %3 = vector.load %arg3[%c0_3, %c0_4] : memref<1x128xf32, #tpu.memory_space<vmem>>, vector<1x128xf32>
    %4 = vector.broadcast %3 : vector<1x128xf32> to vector<72x128xf32>
    %5 = arith.addf %2, %4 : vector<72x128xf32>
    %cst_5 = arith.constant 0.000000e+00 : f32
    %6 = vector.broadcast %cst_5 : f32 to vector<72x128xf32>
    %7 = arith.maximumf %5, %6 : vector<72x128xf32>
    %c0_6 = arith.constant 0 : index
    %c0_7 = arith.constant 0 : index
    %8 = vector.load %arg4[%c0_6, %c0_7] : memref<128x64xf32, #tpu.memory_space<vmem>>, vector<128x64xf32>
    %cst_8 = arith.constant dense<0.000000e+00> : vector<72x64xf32>
    %9 = tpu.matmul %7, %8, %cst_8 {dimension_numbers = #tpu.dot_dimension_numbers<[1], [0], [0], [1], [0, 0, 1, 1], [], []>} : vector<72x128xf32>, vector<128x64xf32>, vector<72x64xf32> -> vector<72x64xf32>
    %c0_9 = arith.constant 0 : index
    %c0_10 = arith.constant 0 : index
    %10 = vector.load %arg5[%c0_9, %c0_10] : memref<1x64xf32, #tpu.memory_space<vmem>>, vector<1x64xf32>
    %11 = vector.broadcast %10 : vector<1x64xf32> to vector<72x64xf32>
    %12 = arith.addf %9, %11 : vector<72x64xf32>
    %cst_11 = arith.constant 0.000000e+00 : f32
    %13 = vector.broadcast %cst_11 : f32 to vector<72x64xf32>
    %14 = arith.maximumf %12, %13 : vector<72x64xf32>
    %c0_12 = arith.constant 0 : index
    %c0_13 = arith.constant 0 : index
    %15 = vector.load %arg6[%c0_12, %c0_13] : memref<64x32xf32, #tpu.memory_space<vmem>>, vector<64x32xf32>
    %cst_14 = arith.constant dense<0.000000e+00> : vector<72x32xf32>
    %16 = tpu.matmul %14, %15, %cst_14 {dimension_numbers = #tpu.dot_dimension_numbers<[1], [0], [0], [1], [0, 0, 1, 1], [], []>} : vector<72x64xf32>, vector<64x32xf32>, vector<72x32xf32> -> vector<72x32xf32>
    %c0_15 = arith.constant 0 : index
    %c0_16 = arith.constant 0 : index
    %17 = vector.load %arg7[%c0_15, %c0_16] : memref<1x32xf32, #tpu.memory_space<vmem>>, vector<1x32xf32>
    %18 = vector.broadcast %17 : vector<1x32xf32> to vector<72x32xf32>
    %19 = arith.addf %16, %18 : vector<72x32xf32>
    %cst_17 = arith.constant 0.000000e+00 : f32
    %20 = vector.broadcast %cst_17 : f32 to vector<72x32xf32>
    %21 = arith.maximumf %19, %20 : vector<72x32xf32>
    %c0_18 = arith.constant 0 : index
    %c0_19 = arith.constant 0 : index
    %22 = vector.load %arg8[%c0_18, %c0_19] : memref<72x32xf32, #tpu.memory_space<vmem>>, vector<72x32xf32>
    tpu.vector_store %arg8[%c0_18, %c0_19], %21 {strides = array<i32>} : memref<72x32xf32, #tpu.memory_space<vmem>>, vector<72x32xf32>,
    return
  }
  func.func @transform_0(%arg0: i32) -> (i32, i32) {
    %c0_i32 = arith.constant 0 : i32
    %c0_i32_0 = arith.constant 0 : i32
    return %arg0, %c0_i32 : i32, i32
  }
  func.func @transform_1(%arg0: i32) -> (i32, i32) {
    %c0_i32 = arith.constant 0 : i32
    %c0_i32_0 = arith.constant 0 : i32
    %c0_i32_1 = arith.constant 0 : i32
    return %c0_i32, %c0_i32_0 : i32, i32
  }
  func.func @transform_2(%arg0: i32) -> (i32, i32) {
    %c0_i32 = arith.constant 0 : i32
    %c0_i32_0 = arith.constant 0 : i32
    %c0_i32_1 = arith.constant 0 : i32
    return %c0_i32, %c0_i32_0 : i32, i32
  }
  func.func @transform_3(%arg0: i32) -> (i32, i32) {
    %c0_i32 = arith.constant 0 : i32
    %c0_i32_0 = arith.constant 0 : i32
    %c0_i32_1 = arith.constant 0 : i32
    return %c0_i32, %c0_i32_0 : i32, i32
  }
  func.func @transform_4(%arg0: i32) -> (i32, i32) {
    %c0_i32 = arith.constant 0 : i32
    %c0_i32_0 = arith.constant 0 : i32
    %c0_i32_1 = arith.constant 0 : i32
    return %c0_i32, %c0_i32_0 : i32, i32
  }
  func.func @transform_5(%arg0: i32) -> (i32, i32) {
    %c0_i32 = arith.constant 0 : i32
    %c0_i32_0 = arith.constant 0 : i32
    %c0_i32_1 = arith.constant 0 : i32
    return %c0_i32, %c0_i32_0 : i32, i32
  }
  func.func @transform_6(%arg0: i32) -> (i32, i32) {
    %c0_i32 = arith.constant 0 : i32
    %c0_i32_0 = arith.constant 0 : i32
    %c0_i32_1 = arith.constant 0 : i32
    return %c0_i32, %c0_i32_0 : i32, i32
  }
  func.func @transform_7(%arg0: i32) -> (i32, i32) {
    %c0_i32 = arith.constant 0 : i32
    %c0_i32_0 = arith.constant 0 : i32
    return %arg0, %c0_i32 : i32, i32
  }
}

module attributes {stable_mosaic.version = 11 : i64} {
  func.func @_gru_head_kernel(%arg0: memref<12x192xf32, #tpu.memory_space<vmem>>, %arg1: memref<192x384xf32, #tpu.memory_space<vmem>>, %arg2: memref<1x384xf32, #tpu.memory_space<vmem>>, %arg3: memref<128x384xf32, #tpu.memory_space<vmem>>, %arg4: memref<1x384xf32, #tpu.memory_space<vmem>>, %arg5: memref<768x128xf32, #tpu.memory_space<vmem>>, %arg6: memref<1x128xf32, #tpu.memory_space<vmem>>, %arg7: memref<128x10xf32, #tpu.memory_space<vmem>>, %arg8: memref<1x10xf32, #tpu.memory_space<vmem>>, %arg9: memref<2x10xf32, #tpu.memory_space<vmem>>) attributes {dimension_semantics = [], scalar_prefetch = 0 : i64, scratch_operands = 0 : i64, tpu.core_type = #tpu.core_type<tc>} {
    %c0 = arith.constant 0 : index
    %c0_0 = arith.constant 0 : index
    %0 = vector.load %arg0[%c0, %c0_0] : memref<12x192xf32, #tpu.memory_space<vmem>>, vector<12x192xf32>
    %c0_1 = arith.constant 0 : index
    %c0_2 = arith.constant 0 : index
    %1 = vector.load %arg1[%c0_1, %c0_2] : memref<192x384xf32, #tpu.memory_space<vmem>>, vector<192x384xf32>
    %cst = arith.constant dense<0.000000e+00> : vector<12x384xf32>
    %2 = tpu.matmul %0, %1, %cst {dimension_numbers = #tpu.dot_dimension_numbers<[1], [0], [0], [1], [0, 0, 1, 1], [], []>} : vector<12x192xf32>, vector<192x384xf32>, vector<12x384xf32> -> vector<12x384xf32>
    %c0_3 = arith.constant 0 : index
    %c0_4 = arith.constant 0 : index
    %3 = vector.load %arg2[%c0_3, %c0_4] : memref<1x384xf32, #tpu.memory_space<vmem>>, vector<1x384xf32>
    %4 = vector.broadcast %3 : vector<1x384xf32> to vector<12x384xf32>
    %5 = arith.addf %2, %4 : vector<12x384xf32>
    %cst_5 = arith.constant 0.000000e+00 : f32
    %6 = vector.broadcast %cst_5 : f32 to vector<2x128xf32>
    %7 = vector.extract_strided_slice %5 {offsets = [0, 0], sizes = [2, 384], strides = [1, 1]} : vector<12x384xf32> to vector<2x384xf32>
    %c0_6 = arith.constant 0 : index
    %c0_7 = arith.constant 0 : index
    %8 = vector.load %arg3[%c0_6, %c0_7] : memref<128x384xf32, #tpu.memory_space<vmem>>, vector<128x384xf32>
    %cst_8 = arith.constant dense<0.000000e+00> : vector<2x384xf32>
    %9 = tpu.matmul %6, %8, %cst_8 {dimension_numbers = #tpu.dot_dimension_numbers<[1], [0], [0], [1], [0, 0, 1, 1], [], []>} : vector<2x128xf32>, vector<128x384xf32>, vector<2x384xf32> -> vector<2x384xf32>
    %c0_9 = arith.constant 0 : index
    %c0_10 = arith.constant 0 : index
    %10 = vector.load %arg4[%c0_9, %c0_10] : memref<1x384xf32, #tpu.memory_space<vmem>>, vector<1x384xf32>
    %11 = vector.broadcast %10 : vector<1x384xf32> to vector<2x384xf32>
    %12 = arith.addf %9, %11 : vector<2x384xf32>
    %13 = vector.extract_strided_slice %7 {offsets = [0, 0], sizes = [2, 128], strides = [1, 1]} : vector<2x384xf32> to vector<2x128xf32>
    %14 = vector.extract_strided_slice %12 {offsets = [0, 0], sizes = [2, 128], strides = [1, 1]} : vector<2x384xf32> to vector<2x128xf32>
    %15 = arith.addf %13, %14 : vector<2x128xf32>
    %16 = arith.negf %15 : vector<2x128xf32>
    %17 = math.exp %16 : vector<2x128xf32>
    %cst_11 = arith.constant 1.000000e+00 : f32
    %18 = vector.broadcast %cst_11 : f32 to vector<2x128xf32>
    %19 = arith.addf %18, %17 : vector<2x128xf32>
    %20 = arith.divf %18, %19 : vector<2x128xf32>
    %21 = vector.extract_strided_slice %7 {offsets = [0, 128], sizes = [2, 128], strides = [1, 1]} : vector<2x384xf32> to vector<2x128xf32>
    %22 = vector.extract_strided_slice %12 {offsets = [0, 128], sizes = [2, 128], strides = [1, 1]} : vector<2x384xf32> to vector<2x128xf32>
    %23 = arith.addf %21, %22 : vector<2x128xf32>
    %24 = arith.negf %23 : vector<2x128xf32>
    %25 = math.exp %24 : vector<2x128xf32>
    %cst_12 = arith.constant 1.000000e+00 : f32
    %26 = vector.broadcast %cst_12 : f32 to vector<2x128xf32>
    %27 = arith.addf %26, %25 : vector<2x128xf32>
    %28 = arith.divf %26, %27 : vector<2x128xf32>
    %29 = vector.extract_strided_slice %7 {offsets = [0, 256], sizes = [2, 128], strides = [1, 1]} : vector<2x384xf32> to vector<2x128xf32>
    %30 = vector.extract_strided_slice %12 {offsets = [0, 256], sizes = [2, 128], strides = [1, 1]} : vector<2x384xf32> to vector<2x128xf32>
    %31 = arith.mulf %20, %30 : vector<2x128xf32>
    %32 = arith.addf %29, %31 : vector<2x128xf32>
    %33 = math.tanh %32 : vector<2x128xf32>
    %cst_13 = arith.constant 1.000000e+00 : f32
    %34 = vector.broadcast %cst_13 : f32 to vector<2x128xf32>
    %35 = arith.subf %34, %28 : vector<2x128xf32>
    %36 = arith.mulf %35, %33 : vector<2x128xf32>
    %37 = arith.mulf %28, %6 : vector<2x128xf32>
    %38 = arith.addf %36, %37 : vector<2x128xf32>
    %39 = vector.extract_strided_slice %5 {offsets = [2, 0], sizes = [2, 384], strides = [1, 1]} : vector<12x384xf32> to vector<2x384xf32>
    %c0_14 = arith.constant 0 : index
    %c0_15 = arith.constant 0 : index
    %40 = vector.load %arg3[%c0_14, %c0_15] : memref<128x384xf32, #tpu.memory_space<vmem>>, vector<128x384xf32>
    %cst_16 = arith.constant dense<0.000000e+00> : vector<2x384xf32>
    %41 = tpu.matmul %38, %40, %cst_16 {dimension_numbers = #tpu.dot_dimension_numbers<[1], [0], [0], [1], [0, 0, 1, 1], [], []>} : vector<2x128xf32>, vector<128x384xf32>, vector<2x384xf32> -> vector<2x384xf32>
    %c0_17 = arith.constant 0 : index
    %c0_18 = arith.constant 0 : index
    %42 = vector.load %arg4[%c0_17, %c0_18] : memref<1x384xf32, #tpu.memory_space<vmem>>, vector<1x384xf32>
    %43 = vector.broadcast %42 : vector<1x384xf32> to vector<2x384xf32>
    %44 = arith.addf %41, %43 : vector<2x384xf32>
    %45 = vector.extract_strided_slice %39 {offsets = [0, 0], sizes = [2, 128], strides = [1, 1]} : vector<2x384xf32> to vector<2x128xf32>
    %46 = vector.extract_strided_slice %44 {offsets = [0, 0], sizes = [2, 128], strides = [1, 1]} : vector<2x384xf32> to vector<2x128xf32>
    %47 = arith.addf %45, %46 : vector<2x128xf32>
    %48 = arith.negf %47 : vector<2x128xf32>
    %49 = math.exp %48 : vector<2x128xf32>
    %cst_19 = arith.constant 1.000000e+00 : f32
    %50 = vector.broadcast %cst_19 : f32 to vector<2x128xf32>
    %51 = arith.addf %50, %49 : vector<2x128xf32>
    %52 = arith.divf %50, %51 : vector<2x128xf32>
    %53 = vector.extract_strided_slice %39 {offsets = [0, 128], sizes = [2, 128], strides = [1, 1]} : vector<2x384xf32> to vector<2x128xf32>
    %54 = vector.extract_strided_slice %44 {offsets = [0, 128], sizes = [2, 128], strides = [1, 1]} : vector<2x384xf32> to vector<2x128xf32>
    %55 = arith.addf %53, %54 : vector<2x128xf32>
    %56 = arith.negf %55 : vector<2x128xf32>
    %57 = math.exp %56 : vector<2x128xf32>
    %cst_20 = arith.constant 1.000000e+00 : f32
    %58 = vector.broadcast %cst_20 : f32 to vector<2x128xf32>
    %59 = arith.addf %58, %57 : vector<2x128xf32>
    %60 = arith.divf %58, %59 : vector<2x128xf32>
    %61 = vector.extract_strided_slice %39 {offsets = [0, 256], sizes = [2, 128], strides = [1, 1]} : vector<2x384xf32> to vector<2x128xf32>
    %62 = vector.extract_strided_slice %44 {offsets = [0, 256], sizes = [2, 128], strides = [1, 1]} : vector<2x384xf32> to vector<2x128xf32>
    %63 = arith.mulf %52, %62 : vector<2x128xf32>
    %64 = arith.addf %61, %63 : vector<2x128xf32>
    %65 = math.tanh %64 : vector<2x128xf32>
    %cst_21 = arith.constant 1.000000e+00 : f32
    %66 = vector.broadcast %cst_21 : f32 to vector<2x128xf32>
    %67 = arith.subf %66, %60 : vector<2x128xf32>
    %68 = arith.mulf %67, %65 : vector<2x128xf32>
    %69 = arith.mulf %60, %38 : vector<2x128xf32>
    %70 = arith.addf %68, %69 : vector<2x128xf32>
    %71 = vector.extract_strided_slice %5 {offsets = [4, 0], sizes = [2, 384], strides = [1, 1]} : vector<12x384xf32> to vector<2x384xf32>
    %c0_22 = arith.constant 0 : index
    %c0_23 = arith.constant 0 : index
    %72 = vector.load %arg3[%c0_22, %c0_23] : memref<128x384xf32, #tpu.memory_space<vmem>>, vector<128x384xf32>
    %cst_24 = arith.constant dense<0.000000e+00> : vector<2x384xf32>
    %73 = tpu.matmul %70, %72, %cst_24 {dimension_numbers = #tpu.dot_dimension_numbers<[1], [0], [0], [1], [0, 0, 1, 1], [], []>} : vector<2x128xf32>, vector<128x384xf32>, vector<2x384xf32> -> vector<2x384xf32>
    %c0_25 = arith.constant 0 : index
    %c0_26 = arith.constant 0 : index
    %74 = vector.load %arg4[%c0_25, %c0_26] : memref<1x384xf32, #tpu.memory_space<vmem>>, vector<1x384xf32>
    %75 = vector.broadcast %74 : vector<1x384xf32> to vector<2x384xf32>
    %76 = arith.addf %73, %75 : vector<2x384xf32>
    %77 = vector.extract_strided_slice %71 {offsets = [0, 0], sizes = [2, 128], strides = [1, 1]} : vector<2x384xf32> to vector<2x128xf32>
    %78 = vector.extract_strided_slice %76 {offsets = [0, 0], sizes = [2, 128], strides = [1, 1]} : vector<2x384xf32> to vector<2x128xf32>
    %79 = arith.addf %77, %78 : vector<2x128xf32>
    %80 = arith.negf %79 : vector<2x128xf32>
    %81 = math.exp %80 : vector<2x128xf32>
    %cst_27 = arith.constant 1.000000e+00 : f32
    %82 = vector.broadcast %cst_27 : f32 to vector<2x128xf32>
    %83 = arith.addf %82, %81 : vector<2x128xf32>
    %84 = arith.divf %82, %83 : vector<2x128xf32>
    %85 = vector.extract_strided_slice %71 {offsets = [0, 128], sizes = [2, 128], strides = [1, 1]} : vector<2x384xf32> to vector<2x128xf32>
    %86 = vector.extract_strided_slice %76 {offsets = [0, 128], sizes = [2, 128], strides = [1, 1]} : vector<2x384xf32> to vector<2x128xf32>
    %87 = arith.addf %85, %86 : vector<2x128xf32>
    %88 = arith.negf %87 : vector<2x128xf32>
    %89 = math.exp %88 : vector<2x128xf32>
    %cst_28 = arith.constant 1.000000e+00 : f32
    %90 = vector.broadcast %cst_28 : f32 to vector<2x128xf32>
    %91 = arith.addf %90, %89 : vector<2x128xf32>
    %92 = arith.divf %90, %91 : vector<2x128xf32>
    %93 = vector.extract_strided_slice %71 {offsets = [0, 256], sizes = [2, 128], strides = [1, 1]} : vector<2x384xf32> to vector<2x128xf32>
    %94 = vector.extract_strided_slice %76 {offsets = [0, 256], sizes = [2, 128], strides = [1, 1]} : vector<2x384xf32> to vector<2x128xf32>
    %95 = arith.mulf %84, %94 : vector<2x128xf32>
    %96 = arith.addf %93, %95 : vector<2x128xf32>
    %97 = math.tanh %96 : vector<2x128xf32>
    %cst_29 = arith.constant 1.000000e+00 : f32
    %98 = vector.broadcast %cst_29 : f32 to vector<2x128xf32>
    %99 = arith.subf %98, %92 : vector<2x128xf32>
    %100 = arith.mulf %99, %97 : vector<2x128xf32>
    %101 = arith.mulf %92, %70 : vector<2x128xf32>
    %102 = arith.addf %100, %101 : vector<2x128xf32>
    %103 = vector.extract_strided_slice %5 {offsets = [6, 0], sizes = [2, 384], strides = [1, 1]} : vector<12x384xf32> to vector<2x384xf32>
    %c0_30 = arith.constant 0 : index
    %c0_31 = arith.constant 0 : index
    %104 = vector.load %arg3[%c0_30, %c0_31] : memref<128x384xf32, #tpu.memory_space<vmem>>, vector<128x384xf32>
    %cst_32 = arith.constant dense<0.000000e+00> : vector<2x384xf32>
    %105 = tpu.matmul %102, %104, %cst_32 {dimension_numbers = #tpu.dot_dimension_numbers<[1], [0], [0], [1], [0, 0, 1, 1], [], []>} : vector<2x128xf32>, vector<128x384xf32>, vector<2x384xf32> -> vector<2x384xf32>
    %c0_33 = arith.constant 0 : index
    %c0_34 = arith.constant 0 : index
    %106 = vector.load %arg4[%c0_33, %c0_34] : memref<1x384xf32, #tpu.memory_space<vmem>>, vector<1x384xf32>
    %107 = vector.broadcast %106 : vector<1x384xf32> to vector<2x384xf32>
    %108 = arith.addf %105, %107 : vector<2x384xf32>
    %109 = vector.extract_strided_slice %103 {offsets = [0, 0], sizes = [2, 128], strides = [1, 1]} : vector<2x384xf32> to vector<2x128xf32>
    %110 = vector.extract_strided_slice %108 {offsets = [0, 0], sizes = [2, 128], strides = [1, 1]} : vector<2x384xf32> to vector<2x128xf32>
    %111 = arith.addf %109, %110 : vector<2x128xf32>
    %112 = arith.negf %111 : vector<2x128xf32>
    %113 = math.exp %112 : vector<2x128xf32>
    %cst_35 = arith.constant 1.000000e+00 : f32
    %114 = vector.broadcast %cst_35 : f32 to vector<2x128xf32>
    %115 = arith.addf %114, %113 : vector<2x128xf32>
    %116 = arith.divf %114, %115 : vector<2x128xf32>
    %117 = vector.extract_strided_slice %103 {offsets = [0, 128], sizes = [2, 128], strides = [1, 1]} : vector<2x384xf32> to vector<2x128xf32>
    %118 = vector.extract_strided_slice %108 {offsets = [0, 128], sizes = [2, 128], strides = [1, 1]} : vector<2x384xf32> to vector<2x128xf32>
    %119 = arith.addf %117, %118 : vector<2x128xf32>
    %120 = arith.negf %119 : vector<2x128xf32>
    %121 = math.exp %120 : vector<2x128xf32>
    %cst_36 = arith.constant 1.000000e+00 : f32
    %122 = vector.broadcast %cst_36 : f32 to vector<2x128xf32>
    %123 = arith.addf %122, %121 : vector<2x128xf32>
    %124 = arith.divf %122, %123 : vector<2x128xf32>
    %125 = vector.extract_strided_slice %103 {offsets = [0, 256], sizes = [2, 128], strides = [1, 1]} : vector<2x384xf32> to vector<2x128xf32>
    %126 = vector.extract_strided_slice %108 {offsets = [0, 256], sizes = [2, 128], strides = [1, 1]} : vector<2x384xf32> to vector<2x128xf32>
    %127 = arith.mulf %116, %126 : vector<2x128xf32>
    %128 = arith.addf %125, %127 : vector<2x128xf32>
    %129 = math.tanh %128 : vector<2x128xf32>
    %cst_37 = arith.constant 1.000000e+00 : f32
    %130 = vector.broadcast %cst_37 : f32 to vector<2x128xf32>
    %131 = arith.subf %130, %124 : vector<2x128xf32>
    %132 = arith.mulf %131, %129 : vector<2x128xf32>
    %133 = arith.mulf %124, %102 : vector<2x128xf32>
    %134 = arith.addf %132, %133 : vector<2x128xf32>
    %135 = vector.extract_strided_slice %5 {offsets = [8, 0], sizes = [2, 384], strides = [1, 1]} : vector<12x384xf32> to vector<2x384xf32>
    %c0_38 = arith.constant 0 : index
    %c0_39 = arith.constant 0 : index
    %136 = vector.load %arg3[%c0_38, %c0_39] : memref<128x384xf32, #tpu.memory_space<vmem>>, vector<128x384xf32>
    %cst_40 = arith.constant dense<0.000000e+00> : vector<2x384xf32>
    %137 = tpu.matmul %134, %136, %cst_40 {dimension_numbers = #tpu.dot_dimension_numbers<[1], [0], [0], [1], [0, 0, 1, 1], [], []>} : vector<2x128xf32>, vector<128x384xf32>, vector<2x384xf32> -> vector<2x384xf32>
    %c0_41 = arith.constant 0 : index
    %c0_42 = arith.constant 0 : index
    %138 = vector.load %arg4[%c0_41, %c0_42] : memref<1x384xf32, #tpu.memory_space<vmem>>, vector<1x384xf32>
    %139 = vector.broadcast %138 : vector<1x384xf32> to vector<2x384xf32>
    %140 = arith.addf %137, %139 : vector<2x384xf32>
    %141 = vector.extract_strided_slice %135 {offsets = [0, 0], sizes = [2, 128], strides = [1, 1]} : vector<2x384xf32> to vector<2x128xf32>
    %142 = vector.extract_strided_slice %140 {offsets = [0, 0], sizes = [2, 128], strides = [1, 1]} : vector<2x384xf32> to vector<2x128xf32>
    %143 = arith.addf %141, %142 : vector<2x128xf32>
    %144 = arith.negf %143 : vector<2x128xf32>
    %145 = math.exp %144 : vector<2x128xf32>
    %cst_43 = arith.constant 1.000000e+00 : f32
    %146 = vector.broadcast %cst_43 : f32 to vector<2x128xf32>
    %147 = arith.addf %146, %145 : vector<2x128xf32>
    %148 = arith.divf %146, %147 : vector<2x128xf32>
    %149 = vector.extract_strided_slice %135 {offsets = [0, 128], sizes = [2, 128], strides = [1, 1]} : vector<2x384xf32> to vector<2x128xf32>
    %150 = vector.extract_strided_slice %140 {offsets = [0, 128], sizes = [2, 128], strides = [1, 1]} : vector<2x384xf32> to vector<2x128xf32>
    %151 = arith.addf %149, %150 : vector<2x128xf32>
    %152 = arith.negf %151 : vector<2x128xf32>
    %153 = math.exp %152 : vector<2x128xf32>
    %cst_44 = arith.constant 1.000000e+00 : f32
    %154 = vector.broadcast %cst_44 : f32 to vector<2x128xf32>
    %155 = arith.addf %154, %153 : vector<2x128xf32>
    %156 = arith.divf %154, %155 : vector<2x128xf32>
    %157 = vector.extract_strided_slice %135 {offsets = [0, 256], sizes = [2, 128], strides = [1, 1]} : vector<2x384xf32> to vector<2x128xf32>
    %158 = vector.extract_strided_slice %140 {offsets = [0, 256], sizes = [2, 128], strides = [1, 1]} : vector<2x384xf32> to vector<2x128xf32>
    %159 = arith.mulf %148, %158 : vector<2x128xf32>
    %160 = arith.addf %157, %159 : vector<2x128xf32>
    %161 = math.tanh %160 : vector<2x128xf32>
    %cst_45 = arith.constant 1.000000e+00 : f32
    %162 = vector.broadcast %cst_45 : f32 to vector<2x128xf32>
    %163 = arith.subf %162, %156 : vector<2x128xf32>
    %164 = arith.mulf %163, %161 : vector<2x128xf32>
    %165 = arith.mulf %156, %134 : vector<2x128xf32>
    %166 = arith.addf %164, %165 : vector<2x128xf32>
    %167 = vector.extract_strided_slice %5 {offsets = [10, 0], sizes = [2, 384], strides = [1, 1]} : vector<12x384xf32> to vector<2x384xf32>
    %c0_46 = arith.constant 0 : index
    %c0_47 = arith.constant 0 : index
    %168 = vector.load %arg3[%c0_46, %c0_47] : memref<128x384xf32, #tpu.memory_space<vmem>>, vector<128x384xf32>
    %cst_48 = arith.constant dense<0.000000e+00> : vector<2x384xf32>
    %169 = tpu.matmul %166, %168, %cst_48 {dimension_numbers = #tpu.dot_dimension_numbers<[1], [0], [0], [1], [0, 0, 1, 1], [], []>} : vector<2x128xf32>, vector<128x384xf32>, vector<2x384xf32> -> vector<2x384xf32>
    %c0_49 = arith.constant 0 : index
    %c0_50 = arith.constant 0 : index
    %170 = vector.load %arg4[%c0_49, %c0_50] : memref<1x384xf32, #tpu.memory_space<vmem>>, vector<1x384xf32>
    %171 = vector.broadcast %170 : vector<1x384xf32> to vector<2x384xf32>
    %172 = arith.addf %169, %171 : vector<2x384xf32>
    %173 = vector.extract_strided_slice %167 {offsets = [0, 0], sizes = [2, 128], strides = [1, 1]} : vector<2x384xf32> to vector<2x128xf32>
    %174 = vector.extract_strided_slice %172 {offsets = [0, 0], sizes = [2, 128], strides = [1, 1]} : vector<2x384xf32> to vector<2x128xf32>
    %175 = arith.addf %173, %174 : vector<2x128xf32>
    %176 = arith.negf %175 : vector<2x128xf32>
    %177 = math.exp %176 : vector<2x128xf32>
    %cst_51 = arith.constant 1.000000e+00 : f32
    %178 = vector.broadcast %cst_51 : f32 to vector<2x128xf32>
    %179 = arith.addf %178, %177 : vector<2x128xf32>
    %180 = arith.divf %178, %179 : vector<2x128xf32>
    %181 = vector.extract_strided_slice %167 {offsets = [0, 128], sizes = [2, 128], strides = [1, 1]} : vector<2x384xf32> to vector<2x128xf32>
    %182 = vector.extract_strided_slice %172 {offsets = [0, 128], sizes = [2, 128], strides = [1, 1]} : vector<2x384xf32> to vector<2x128xf32>
    %183 = arith.addf %181, %182 : vector<2x128xf32>
    %184 = arith.negf %183 : vector<2x128xf32>
    %185 = math.exp %184 : vector<2x128xf32>
    %cst_52 = arith.constant 1.000000e+00 : f32
    %186 = vector.broadcast %cst_52 : f32 to vector<2x128xf32>
    %187 = arith.addf %186, %185 : vector<2x128xf32>
    %188 = arith.divf %186, %187 : vector<2x128xf32>
    %189 = vector.extract_strided_slice %167 {offsets = [0, 256], sizes = [2, 128], strides = [1, 1]} : vector<2x384xf32> to vector<2x128xf32>
    %190 = vector.extract_strided_slice %172 {offsets = [0, 256], sizes = [2, 128], strides = [1, 1]} : vector<2x384xf32> to vector<2x128xf32>
    %191 = arith.mulf %180, %190 : vector<2x128xf32>
    %192 = arith.addf %189, %191 : vector<2x128xf32>
    %193 = math.tanh %192 : vector<2x128xf32>
    %cst_53 = arith.constant 1.000000e+00 : f32
    %194 = vector.broadcast %cst_53 : f32 to vector<2x128xf32>
    %195 = arith.subf %194, %188 : vector<2x128xf32>
    %196 = arith.mulf %195, %193 : vector<2x128xf32>
    %197 = arith.mulf %188, %166 : vector<2x128xf32>
    %198 = arith.addf %196, %197 : vector<2x128xf32>
    %199 = tpu.concatenate %38, %70, %102, %134, %166, %198 in 1 : vector<2x128xf32>, vector<2x128xf32>, vector<2x128xf32>, vector<2x128xf32>, vector<2x128xf32>, vector<2x128xf32> -> vector<2x768xf32>
    %c0_54 = arith.constant 0 : index
    %c0_55 = arith.constant 0 : index
    %200 = vector.load %arg5[%c0_54, %c0_55] : memref<768x128xf32, #tpu.memory_space<vmem>>, vector<768x128xf32>
    %cst_56 = arith.constant dense<0.000000e+00> : vector<2x128xf32>
    %201 = tpu.matmul %199, %200, %cst_56 {dimension_numbers = #tpu.dot_dimension_numbers<[1], [0], [0], [1], [0, 0, 1, 1], [], []>} : vector<2x768xf32>, vector<768x128xf32>, vector<2x128xf32> -> vector<2x128xf32>
    %c0_57 = arith.constant 0 : index
    %c0_58 = arith.constant 0 : index
    %202 = vector.load %arg6[%c0_57, %c0_58] : memref<1x128xf32, #tpu.memory_space<vmem>>, vector<1x128xf32>
    %203 = vector.broadcast %202 : vector<1x128xf32> to vector<2x128xf32>
    %204 = arith.addf %201, %203 : vector<2x128xf32>
    %cst_59 = arith.constant 0.000000e+00 : f32
    %205 = vector.broadcast %cst_59 : f32 to vector<2x128xf32>
    %206 = arith.maximumf %204, %205 : vector<2x128xf32>
    %c0_60 = arith.constant 0 : index
    %c0_61 = arith.constant 0 : index
    %207 = vector.load %arg7[%c0_60, %c0_61] : memref<128x10xf32, #tpu.memory_space<vmem>>, vector<128x10xf32>
    %cst_62 = arith.constant dense<0.000000e+00> : vector<2x10xf32>
    %208 = tpu.matmul %206, %207, %cst_62 {dimension_numbers = #tpu.dot_dimension_numbers<[1], [0], [0], [1], [0, 0, 1, 1], [], []>} : vector<2x128xf32>, vector<128x10xf32>, vector<2x10xf32> -> vector<2x10xf32>
    %c0_63 = arith.constant 0 : index
    %c0_64 = arith.constant 0 : index
    %209 = vector.load %arg8[%c0_63, %c0_64] : memref<1x10xf32, #tpu.memory_space<vmem>>, vector<1x10xf32>
    %210 = vector.broadcast %209 : vector<1x10xf32> to vector<2x10xf32>
    %211 = arith.addf %208, %210 : vector<2x10xf32>
    %c0_65 = arith.constant 0 : index
    %c0_66 = arith.constant 0 : index
    %212 = vector.load %arg9[%c0_65, %c0_66] : memref<2x10xf32, #tpu.memory_space<vmem>>, vector<2x10xf32>
    tpu.vector_store %arg9[%c0_65, %c0_66], %211 {strides = array<i32>} : memref<2x10xf32, #tpu.memory_space<vmem>>, vector<2x10xf32>,
    return
  }
}

</mosaic_0001>

<bundles_post_ra>
// kernel: tile.18
= control target key start
LH: loop header
LB: loop body
LE: loop exit
PB: predicated region body
PF: predicated region fallthrough
CT: control target
= control target key end

     0   :  { %s28_s0 = inlined_call_operand.vmem [shape: f32[16], index: 0, kind: input, shape index: {}]   ;;  %s29_s1 = inlined_call_operand.vmem [shape: f32[12,16], index: 1, kind: output, shape index: {}]  }
   0x1   :  { %v4_v0 = vld [vmem:[%s28_s0] ss:$0 sm:$0xff] }
   0x2   :  { %5 = vst [vmem:[%s29_s1] sm:$0xff] %v4_v0  ;;  %8 = vst [vmem:[%s29_s1 + $0x8] sm:$0xff] %v4_v0 }

// kernel: tile.19
= control target key start
LH: loop header
LB: loop body
LE: loop exit
PB: predicated region body
PF: predicated region fallthrough
CT: control target
= control target key end

     0   :  { %s80_s10 = smov 112   ;;  %s81_s11 = smov 80   ;;  %vm4_vm0 = vcmask 130048   ;;  %vm10_vm1 = vcmask 1048448   ;;  %vm16_vm2 = vcmask 917248   ;;  %vm22_vm3 = vcmask 786048   ;;  %s127_s0 = inlined_call_operand.vmem [shape: f32[12,16], index: 0, kind: input, shape index: {}]   ;;  %s128_s1 = inlined_call_operand.vmem [shape: f32[1,192], index: 1, kind: output, shape index: {}]  }
   0x1   :  { %v65_v0 = vld [vmem:[%s127_s0 + $0x7] sm:$0x1]   ;;  %v67_v1 = vld [vmem:[%s127_s0 + $0x5] sm:$0x1]   ;;  %v66_v2 = vld [vmem:[%s127_s0 + $0x6] sm:$0x1]  }
   0x2   :  { %8 = vrot.lane.b32.xlu0 %v65_v0, %s80_s10  ;;  %20 = vrot.lane.b32.xlu1 %v67_v1, %s81_s11  ;;  %v68_v3 = vld [vmem:[%s127_s0 + $0x4] sm:$0x1]   ;;  %s31_s16 = smov 3  ;;  %s38_s17 = smov 3  ;;  %vm28_vm4 = vcmask 654848   ;;  %vm35_vm5 = vcmask 523648  }
   0x3   :  { %s82_s18 = smov 96   ;;  %s83_s19 = smov 64   ;;  %v69_v4 = vld [vmem:[%s127_s0 + $0x3] ss:$8 sm:%s31_s16]   ;;  %v70_v5 = vld [vmem:[%s127_s0 + $0x2] ss:$8 sm:%s38_s17]  }
   0x4   :  { %s2_s22 = smov 3  ;;  %s45_s27 = smov 3  ;;  %vm42_vm6 = vcmask 392448   ;;  %vm49_vm7 = vcmask 261248  }
   0x5   :  { %v3_v6 = vld [vmem:[%s127_s0] ss:$8 sm:%s2_s22]   ;;  %s84_s28 = smov 48   ;;  %s85_s29 = smov 32   ;;  %v71_v7 = vld [vmem:[%s127_s0 + $0x1] ss:$8 sm:%s45_s27]  }
   0x6   :  { %14 = vrot.lane.b32.xlu0 %v66_v2, %s82_s18  ;;  %26 = vrot.lane.b32.xlu1 %v68_v3, %s83_s19  ;;  %5 = vst.msk [vmem:[#allocation0] ss:$8 sm:$0x3] %vm4_vm0, %v3_v6   ;;  %s86_s0 = smov 16  }
   0xa   :  { %33 = vrot.lane.b32.xlu0 %v69_v4, %s84_s28  ;;  %40 = vrot.lane.b32.xlu1 %v70_v5, %s85_s29 }
   0xe   :  { %47 = vrot.lane.b32.xlu0 %v71_v7, %s86_s0 }
  0x74   :  { %v9_v8 = vpop.permute.xlu0 %8   ;;  %v21_v9 = vpop.permute.xlu1 %20  }
  0x75   :  { %11 = vst.msk [vmem:[#allocation0] sm:$0x1] %vm10_vm1, %v9_v8  }
  0x78   :  { %v15_v10 = vpop.permute.xlu0 %14   ;;  %v27_v11 = vpop.permute.xlu1 %26  }
  0x79   :  { %17 = vst.msk [vmem:[#allocation0] sm:$0x1] %vm16_vm2, %v15_v10  }
  0x7a   :  { %23 = vst.msk [vmem:[#allocation0] sm:$0x1] %vm22_vm3, %v21_v9  }
  0x7b   :  { %29 = vst.msk [vmem:[#allocation0] sm:$0x1] %vm28_vm4, %v27_v11  }
  0x7c   :  { %v34_v12 = vpop.permute.xlu0 %33   ;;  %v41_v13 = vpop.permute.xlu1 %40  }
  0x7d   :  { %36 = vst.msk [vmem:[#allocation0] ss:$8 sm:$0x3] %vm35_vm5, %v34_v12  }
  0x7e   :  { %43 = vst.msk [vmem:[#allocation0] ss:$8 sm:$0x3] %vm42_vm6, %v41_v13  }
  0x80   :  { %v48_v14 = vpop.permute.xlu0 %47  }
  0x81   :  { %50 = vst.msk [vmem:[#allocation0] ss:$8 sm:$0x3] %vm49_vm7, %v48_v14  }
  0x88   :  { %v55_v15 = vld [vmem:[#allocation0] sm:$0x1]  ;;  %v60_v16 = vld [vmem:[#allocation0 + $0x8] sm:$0x1] }
  0x89   :  { %58 = vst [vmem:[%s128_s1] sm:$0x1] %v55_v15  ;;  %72 = vst [vmem:[%s128_s1 + $0x1] sm:$0x1] %v60_v16 }

// kernel: tile.23
= control target key start
LH: loop header
LB: loop body
LE: loop exit
PB: predicated region body
PF: predicated region fallthrough
CT: control target
= control target key end

     0   :  { %s22_s0 = inlined_call_operand.vmem [shape: f32[32], index: 0, kind: input, shape index: {}]   ;;  %s23_s1 = inlined_call_operand.vmem [shape: f32[8,32], index: 1, kind: output, shape index: {}]  }
   0x1   :  { %v4_v0 = vld [vmem:[%s22_s0] ss:$0 sm:$0xff] }
   0x2   :  { %5 = vst [vmem:[%s23_s1] sm:$0xff] %v4_v0 }

// kernel: tile.24
= control target key start
LH: loop header
LB: loop body
LE: loop exit
PB: predicated region body
PF: predicated region fallthrough
CT: control target
= control target key end

     0   :  { %s7_s6 = smov 3  ;;  %s14_s9 = smov 3  ;;  %vm4_vm0 = vcmask 261120   ;;  %vm11_vm1 = vcmask 1048320   ;;  %vm18_vm2 = vcmask 785920   ;;  %vm25_vm3 = vcmask 523520   ;;  %s79_s0 = inlined_call_operand.vmem [shape: f32[8,32], index: 0, kind: input, shape index: {}]   ;;  %s80_s1 = inlined_call_operand.vmem [shape: f32[1,256], index: 1, kind: output, shape index: {}]  }
   0x1   :  { %v41_v0 = vld [vmem:[%s79_s0 + $0x3] ss:$4 sm:%s7_s6]   ;;  %s48_s10 = smov 96   ;;  %s21_s11 = smov 3  ;;  %v42_v1 = vld [vmem:[%s79_s0 + $0x2] ss:$4 sm:%s14_s9]  }
   0x2   :  { %9 = vrot.lane.b32.xlu0 %v41_v0, %s48_s10  ;;  %v43_v2 = vld [vmem:[%s79_s0 + $0x1] ss:$4 sm:%s21_s11]   ;;  %s2_s16 = smov 3  ;;  %s49_s17 = smov 32  }
   0x3   :  { %23 = vrot.lane.b32.xlu1 %v43_v2, %s49_s17  ;;  %v3_v3 = vld [vmem:[%s79_s0] ss:$4 sm:%s2_s16]   ;;  %s50_s0 = smov 64  }
   0x4   :  { %5 = vst.msk [vmem:[#allocation0] ss:$8 sm:$0x3] %vm4_vm0, %v3_v3  }
   0x6   :  { %16 = vrot.lane.b32.xlu0 %v42_v1, %s50_s0 }
  0x74   :  { %v10_v4 = vpop.permute.xlu0 %9  }
  0x75   :  { %12 = vst.msk [vmem:[#allocation0] ss:$8 sm:$0x3] %vm11_vm1, %v10_v4   ;;  %v24_v5 = vpop.permute.xlu1 %23  }
  0x78   :  { %v17_v6 = vpop.permute.xlu0 %16  }
  0x79   :  { %19 = vst.msk [vmem:[#allocation0] ss:$8 sm:$0x3] %vm18_vm2, %v17_v6  }
  0x7a   :  { %26 = vst.msk [vmem:[#allocation0] ss:$8 sm:$0x3] %vm25_vm3, %v24_v5  }
  0x81   :  { %v31_v7 = vld [vmem:[#allocation0] sm:$0x1]  ;;  %v36_v8 = vld [vmem:[#allocation0 + $0x8] sm:$0x1] }
  0x82   :  { %34 = vst [vmem:[%s80_s1] sm:$0x1] %v31_v7  ;;  %44 = vst [vmem:[%s80_s1 + $0x1] sm:$0x1] %v36_v8 }

// kernel: tile.28
= control target key start
LH: loop header
LB: loop body
LE: loop exit
PB: predicated region body
PF: predicated region fallthrough
CT: control target
= control target key end

     0   :  { %s22_s0 = inlined_call_operand.vmem [shape: f32[32], index: 0, kind: input, shape index: {}]   ;;  %s23_s1 = inlined_call_operand.vmem [shape: f32[6,32], index: 1, kind: output, shape index: {}]  }
   0x1   :  { %v4_v0 = vld [vmem:[%s22_s0] ss:$0 sm:$0xff] }
   0x2   :  { %5 = vst [vmem:[%s23_s1] sm:$0xff] %v4_v0 }

// kernel: tile.29
= control target key start
LH: loop header
LB: loop body
LE: loop exit
PB: predicated region body
PF: predicated region fallthrough
CT: control target
= control target key end

     0   :  { %s46_s8 = smov 96   ;;  %s19_s9 = smov 3  ;;  %vm4_vm0 = vcmask 261120   ;;  %vm10_vm1 = vcmask 1048320   ;;  %vm16_vm2 = vcmask 785920   ;;  %vm23_vm3 = vcmask 523520   ;;  %s77_s0 = inlined_call_operand.vmem [shape: f32[6,32], index: 0, kind: input, shape index: {}]   ;;  %s78_s1 = inlined_call_operand.vmem [shape: f32[1,192], index: 1, kind: output, shape index: {}]  }
   0x1   :  { %v39_v0 = vld [vmem:[%s77_s0 + $0x3] sm:$0x1]   ;;  %v40_v1 = vld [vmem:[%s77_s0 + $0x2] sm:$0x1]   ;;  %v41_v2 = vld [vmem:[%s77_s0 + $0x1] ss:$4 sm:%s19_s9]  }
   0x2   :  { %8 = vrot.lane.b32.xlu0 %v39_v0, %s46_s8  ;;  %s2_s14 = smov 3  ;;  %s47_s15 = smov 32  }
   0x3   :  { %21 = vrot.lane.b32.xlu1 %v41_v2, %s47_s15  ;;  %v3_v3 = vld [vmem:[%s77_s0] ss:$4 sm:%s2_s14]   ;;  %s48_s0 = smov 64  }
   0x4   :  { %5 = vst.msk [vmem:[#allocation0] ss:$8 sm:$0x3] %vm4_vm0, %v3_v3  }
   0x6   :  { %14 = vrot.lane.b32.xlu0 %v40_v1, %s48_s0 }
  0x74   :  { %v9_v4 = vpop.permute.xlu0 %8  }
  0x75   :  { %11 = vst.msk [vmem:[#allocation0] sm:$0x1] %vm10_vm1, %v9_v4   ;;  %v22_v5 = vpop.permute.xlu1 %21  }
  0x78   :  { %v15_v6 = vpop.permute.xlu0 %14  }
  0x79   :  { %17 = vst.msk [vmem:[#allocation0] sm:$0x1] %vm16_vm2, %v15_v6  }
  0x7a   :  { %24 = vst.msk [vmem:[#allocation0] ss:$8 sm:$0x3] %vm23_vm3, %v22_v5  }
  0x81   :  { %v29_v7 = vld [vmem:[#allocation0] sm:$0x1]  ;;  %v34_v8 = vld [vmem:[#allocation0 + $0x8] sm:$0x1] }
  0x82   :  { %32 = vst [vmem:[%s78_s1] sm:$0x1] %v29_v7  ;;  %42 = vst [vmem:[%s78_s1 + $0x1] sm:$0x1] %v34_v8 }

// kernel: baseline_widar3_forward.3
= control target key start
LH: loop header
LB: loop body
LE: loop exit
PB: predicated region body
PF: predicated region fallthrough
CT: control target
= control target key end

     0   :  { %s4915_s30 = smov 0   ;;  %s4917_s10 = smov 0   ;;  %s7826_s0 = inlined_call_operand.vmem [shape: f32[2,2,6,121,16], index: 0, kind: input, shape index: {}]   ;;  %s7827_s1 = inlined_call_operand.vmem [shape: f32[5,16,192], index: 1, kind: input, shape index: {}]   ;;  %s7828_s2 = inlined_call_operand.vmem [shape: f32[1,192], index: 2, kind: input, shape index: {}]   ;;  %s7829_s3 = inlined_call_operand.vmem [shape: f32[3,39,117], index: 3, kind: input, shape index: {}]   ;;  %s7830_s4 = inlined_call_operand.vmem [shape: f32[5,192,256], index: 4, kind: input, shape index: {}]   ;;  %s7831_s5 = inlined_call_operand.vmem [shape: f32[1,256], index: 5, kind: input, shape index: {}]   ;;  %s7832_s6 = inlined_call_operand.vmem [shape: f32[5,7,35], index: 6, kind: input, shape index: {}]   ;;  %s7833_s7 = inlined_call_operand.vmem [shape: f32[3,256,192], index: 7, kind: input, shape index: {}]   ;;  %s7834_s8 = inlined_call_operand.vmem [shape: f32[1,192], index: 8, kind: input, shape index: {}]   ;;  %s7835_s9 = inlined_call_operand.vmem [shape: f32[2,6,5,192], index: 9, kind: output, shape index: {}]  }
   0x1   :  { %s4919_s11 = smov 0   ;;  %s4921_s12 = smov 0  }
   0x2   :  { %s4923_s13 = smov 0   ;;  %s4925_s14 = smov 0  }
   0x3   :  { %s4927_s15 = smov 0  }
   0x4 LB: > { %s28_s16 = sadd.s32 1, %s4854_s13  ;;  %s31_s17 = sadd.s32 1, %s4858_s14  ;;  %s4862_s15 = sphi %s4927_s15, %s19_s15   ;;  %s4858_s14 = sphi %s4925_s14, %s7901_s14   ;;  %s4854_s13 = sphi %s4923_s13, %s7900_s13   ;;  %s4850_s12 = sphi %s4921_s12, %s7899_s12   ;;  %s4846_s11 = sphi %s4919_s11, %s7898_s11   ;;  %s4842_s10 = sphi %s4917_s10, %s7897_s10   ;;  %s4838_s30 = sphi %s4915_s30, %s7896_s30  }
   0x5   : > { %p29_p0 = scmp.ge.s32.totalorder %s28_s16, 6  ;;  %p47_p1 = scmp.ne.s32.totalorder %s4842_s10, %s4838_s30 }
   0x6   : > { %p48_p2 = scmp.eq.s32.totalorder %s4862_s15, 0  ;;  %s40_s21 = sadd.s32 1, %s4842_s10 }
   0x7   : > { %s7903_s16 = smov (%p29_p0, %s28_s16), 0  ;;  %s7905_s17 = smov (!%p29_p0, %s31_s17), %s4858_s14 }
   0x8   : > { %p49_p3 = por %p48_p2, %p47_p1  ;;  %p33_p4 = scmp.ge.s32.totalorder %s7905_s17, 2 }
   0x9   : > { %s36_s18 = ssub.s32 %s4854_s13, %s7903_s16  ;;  %p4201_p6 = scmp.ge.s32.totalorder %s4862_s15, 12 }
   0xa   : > { %s7907_s17 = smov (%p33_p4, %s7905_s17), 0 }
   0xb   : > { %7840 = sst [smem:[#allocation3_spill]] %s7907_s17  ;;  %s35_s19 = ssub.s32 %s4858_s14, %s7907_s17 }
   0xc   : > { %s37_s20 = sor.u32 %s36_s18, %s35_s19  ;;  %293 = sbr.rel (%p4201_p6) target bundleno = 41 (0x29), region = 48 }
   0xd   : > { %p38_p5 = scmp.eq.s32.totalorder %s37_s20, 0 }
   0xf   : > { %s4966_s22 = scalar_select %p38_p5, %s4842_s10, %s40_s21  }
  0x11   : > { %296 = sbr.rel (!%p49_p3) target bundleno = 41 (0x29), region = 52  ;;  %s298_s23 = sand.u32 (%p49_p3), 1, %s4842_s10  }
  0x12   : > { %s4203_s24 = sshll.u32 (%p49_p3), %s4854_s13, 4  ;;  %s4202_s25 = sshll.u32 (%p49_p3), %s298_s23, 8 }
  0x13   : > { %s4717_s26 = smul.u32 (%p49_p3), 192, %s4858_s14  ;;  %s4980_s19 = scalar_lea.vmem (%p49_p3), [#allocation2], %s4202_s25 }
  0x15   : > { %s303_s27 = sadd.s32 (%p49_p3), %s4717_s26, %s4203_s24 }
  0x16   : > { %s4204_s28 = sshll.u32 %s303_s27, 3 }
  0x17   : > { %s4975_s18 = scalar_lea.vmem %s7826_s0, %s4204_s28 }
  0x18   : > { %v396_v0 = vld [vmem:[%s4975_s18] sm:$0xff]  ;;  %v398_v1 = vld [vmem:[%s4975_s18 + $0x8] sm:$0xff]  ;;  %v400_v2 = vld [vmem:[%s4975_s18 + $0x10] sm:$0xff] }
  0x19   : > { %397 = vst [vmem:[%s4980_s19] sm:$0xff] %v396_v0  ;;  %399 = vst [vmem:[%s4980_s19 + $0x8] sm:$0xff] %v398_v1  ;;  %v402_v3 = vld [vmem:[%s4975_s18 + $0x18] sm:$0xff]  ;;  %v404_v4 = vld [vmem:[%s4975_s18 + $0x20] sm:$0xff] }
  0x1a   : > { %401 = vst [vmem:[%s4980_s19 + $0x10] sm:$0xff] %v400_v2  ;;  %v406_v5 = vld [vmem:[%s4975_s18 + $0x28] sm:$0xff]  ;;  %403 = vst [vmem:[%s4980_s19 + $0x18] sm:$0xff] %v402_v3  ;;  %v408_v6 = vld [vmem:[%s4975_s18 + $0x30] sm:$0xff] }
  0x1b   : > { %405 = vst [vmem:[%s4980_s19 + $0x20] sm:$0xff] %v404_v4  ;;  %407 = vst [vmem:[%s4980_s19 + $0x28] sm:$0xff] %v406_v5  ;;  %v410_v7 = vld [vmem:[%s4975_s18 + $0x38] sm:$0xff]  ;;  %v412_v8 = vld [vmem:[%s4975_s18 + $0x40] sm:$0xff] }
  0x1c   : > { %409 = vst [vmem:[%s4980_s19 + $0x30] sm:$0xff] %v408_v6  ;;  %411 = vst [vmem:[%s4980_s19 + $0x38] sm:$0xff] %v410_v7  ;;  %v414_v9 = vld [vmem:[%s4975_s18 + $0x48] sm:$0xff]  ;;  %v416_v10 = vld [vmem:[%s4975_s18 + $0x50] sm:$0xff] }
  0x1d   : > { %413 = vst [vmem:[%s4980_s19 + $0x40] sm:$0xff] %v412_v8  ;;  %v418_v11 = vld [vmem:[%s4975_s18 + $0x58] sm:$0xff]  ;;  %415 = vst [vmem:[%s4980_s19 + $0x48] sm:$0xff] %v414_v9  ;;  %v420_v12 = vld [vmem:[%s4975_s18 + $0x60] sm:$0xff] }
  0x1e   : > { %417 = vst [vmem:[%s4980_s19 + $0x50] sm:$0xff] %v416_v10  ;;  %419 = vst [vmem:[%s4980_s19 + $0x58] sm:$0xff] %v418_v11  ;;  %v422_v13 = vld [vmem:[%s4975_s18 + $0x68] sm:$0xff]  ;;  %v424_v14 = vld [vmem:[%s4975_s18 + $0x70] sm:$0xff] }
  0x1f   : > { %421 = vst [vmem:[%s4980_s19 + $0x60] sm:$0xff] %v420_v12  ;;  %423 = vst [vmem:[%s4980_s19 + $0x68] sm:$0xff] %v422_v13  ;;  %v426_v15 = vld [vmem:[%s4975_s18 + $0x78] sm:$0xff]  ;;  %v428_v16 = vld [vmem:[%s4975_s18 + $0x300] sm:$0xff] }
  0x20   : > { %425 = vst [vmem:[%s4980_s19 + $0x70] sm:$0xff] %v424_v14  ;;  %v430_v17 = vld [vmem:[%s4975_s18 + $0x308] sm:$0xff]  ;;  %427 = vst [vmem:[%s4980_s19 + $0x78] sm:$0xff] %v426_v15  ;;  %v432_v18 = vld [vmem:[%s4975_s18 + $0x310] sm:$0xff] }
  0x21   : > { %429 = vst [vmem:[%s4980_s19 + $0x80] sm:$0xff] %v428_v16  ;;  %431 = vst [vmem:[%s4980_s19 + $0x88] sm:$0xff] %v430_v17  ;;  %v434_v19 = vld [vmem:[%s4975_s18 + $0x318] sm:$0xff]  ;;  %v436_v20 = vld [vmem:[%s4975_s18 + $0x320] sm:$0xff] }
  0x22   : > { %433 = vst [vmem:[%s4980_s19 + $0x90] sm:$0xff] %v432_v18  ;;  %435 = vst [vmem:[%s4980_s19 + $0x98] sm:$0xff] %v434_v19  ;;  %v438_v21 = vld [vmem:[%s4975_s18 + $0x328] sm:$0xff]  ;;  %v440_v22 = vld [vmem:[%s4975_s18 + $0x330] sm:$0xff] }
  0x23   : > { %437 = vst [vmem:[%s4980_s19 + $0xa0] sm:$0xff] %v436_v20  ;;  %v442_v23 = vld [vmem:[%s4975_s18 + $0x338] sm:$0xff]  ;;  %439 = vst [vmem:[%s4980_s19 + $0xa8] sm:$0xff] %v438_v21  ;;  %v444_v24 = vld [vmem:[%s4975_s18 + $0x340] sm:$0xff] }
  0x24   : > { %441 = vst [vmem:[%s4980_s19 + $0xb0] sm:$0xff] %v440_v22  ;;  %443 = vst [vmem:[%s4980_s19 + $0xb8] sm:$0xff] %v442_v23  ;;  %v446_v25 = vld [vmem:[%s4975_s18 + $0x348] sm:$0xff]  ;;  %v448_v26 = vld [vmem:[%s4975_s18 + $0x350] sm:$0xff] }
  0x25   : > { %445 = vst [vmem:[%s4980_s19 + $0xc0] sm:$0xff] %v444_v24  ;;  %447 = vst [vmem:[%s4980_s19 + $0xc8] sm:$0xff] %v446_v25  ;;  %v450_v27 = vld [vmem:[%s4975_s18 + $0x358] sm:$0xff]  ;;  %v452_v28 = vld [vmem:[%s4975_s18 + $0x360] sm:$0xff] }
  0x26   : > { %449 = vst [vmem:[%s4980_s19 + $0xd0] sm:$0xff] %v448_v26  ;;  %v454_v29 = vld [vmem:[%s4975_s18 + $0x368] sm:$0xff]  ;;  %451 = vst [vmem:[%s4980_s19 + $0xd8] sm:$0xff] %v450_v27  ;;  %v456_v30 = vld [vmem:[%s4975_s18 + $0x370] sm:$0xff] }
  0x27   : > { %453 = vst [vmem:[%s4980_s19 + $0xe0] sm:$0xff] %v452_v28  ;;  %455 = vst [vmem:[%s4980_s19 + $0xe8] sm:$0xff] %v454_v29  ;;  %v458_v31 = vld [vmem:[%s4975_s18 + $0x378] sm:$0xff] }
  0x28   : > { %457 = vst [vmem:[%s4980_s19 + $0xf0] sm:$0xff] %v456_v30  ;;  %459 = vst [vmem:[%s4980_s19 + $0xf8] sm:$0xff] %v458_v31 }
  0x29 PF: > { %p4205_p7 = scmp.ge.s32.totalorder %s4862_s15, 1  ;;  %p464_p8 = scmp.lt.s32.totalorder %s4862_s15, 13 }
  0x2b   : > { %p465_p9 = pnand %p4205_p7, %p464_p8 }
  0x2d   : > { %468 = sbr.rel (%p465_p9) target bundleno = 1530 (0x5fa), region = 90 }
  0x32   : > { %v4228_v32 = vld [vmem:[%s7827_s1 + $0x38] sm:$0xff]  ;;  %v4227_v33 = vld [vmem:[%s7827_s1 + $0x30] sm:$0xff]  ;;  %v4226_v34 = vld [vmem:[%s7827_s1 + $0x28] sm:$0xff]  ;;  %s471_s26 = sand.u32 1, %s4838_s30   ;;  %v7837_v47 = vmov 0.0   ;;  %vm736_vm4 = vcmask 1046528  }
  0x33   : > { %825 = vmatprep.subr.mxu0 %v4228_v32  ;;  %4713 = vmatprep.subr.mxu1 %v4228_v32  ;;  %v4225_v35 = vld [vmem:[%s7827_s1 + $0x20] sm:$0xff]  ;;  %s4206_s29 = sshll.u32 %s471_s26, 8  ;;  %v715_v36 = vld [vmem:[%s7827_s1 + $0x18] sm:$0xff]  ;;  %vm766_vm7 = vcmask 130048   ;;  %p510_p10 = scmp.lt.s32.totalorder %s4850_s12, 1 }
  0x34   : > { %826 = vmatpush1.msra.mxu0 %v4227_v33  ;;  %4715 = vmatpush1.msra.mxu1 %v4227_v33  ;;  %v4262_v37 = vld [vmem:[%s7827_s1 + $0x58] sm:$0xff]  ;;  %s5064_s30 = scalar_lea.vmem [#allocation2], %s4206_s29  ;;  %p512_p11 = scmp.lt.s32.totalorder %s4846_s11, 5 }
  0x35   : > { %827 = vmatprep.subr.mxu0 %v4226_v34  ;;  %4714 = vmatprep.subr.mxu1 %v4226_v34  ;;  %v519_v38 = vld [vmem:[%s5064_s30] sm:$0xff]  ;;  %v520_v39 = vld [vmem:[%s5064_s30 + $0x8] sm:$0xff]  ;;  %v521_v53 = vld [vmem:[%s5064_s30 + $0x10] sm:$0xff]  ;;  %s7909_s12 = smov (!%p510_p10, %s4850_s12), 1 }
  0x36   : > { %v4209_v40 = vld [vmem:[%s5064_s30 + $0x80] sm:$0xff]  ;;  %828 = vmatpush1.msra.mxu0 %v4225_v35  ;;  %4716 = vmatpush1.msra.mxu1 %v4225_v35  ;;  %v4210_v41 = vld [vmem:[%s5064_s30 + $0x88] sm:$0xff]  ;;  %v552_v42 = vmul.f32 %v519_v38, %v519_v38  ;;  %v553_v43 = vmul.f32 %v520_v39, %v520_v39  ;;  %v4211_v57 = vld [vmem:[%s5064_s30 + $0x90] sm:$0xff]  ;;  %v554_v58 = vmul.f32 %v521_v53, %v521_v53  ;;  %s7911_s11 = smov (!%p512_p11, %s4846_s11), 5  ;;  %s4718_s24 = smul.u32 12, %s7909_s12 }
  0x37   : > { %v568_v44 = vmul.f32 %v4209_v40, %v4209_v40  ;;  %v527_v45 = vld [vmem:[%s5064_s30 + $0x40] sm:$0xff]  ;;  %v528_v46 = vld [vmem:[%s5064_s30 + $0x48] sm:$0xff]  ;;  %861 = vmatprep.mubr.f32.mxu0 %v7837_v47  ;;  %909 = vmatprep.mubr.f32.mxu1 %v7837_v47  ;;  %v569_v48 = vmul.f32 %v4210_v41, %v4210_v41  ;;  %v529_v59 = vld [vmem:[%s5064_s30 + $0x50] sm:$0xff]  ;;  %v570_v62 = vmul.f32 %v4211_v57, %v4211_v57  ;;  %s4207_s25 = sshll.u32 %s7911_s11, 1 }
  0x38   : > { %v4217_v49 = vld [vmem:[%s5064_s30 + $0xc0] sm:$0xff]  ;;  %v4218_v50 = vld [vmem:[%s5064_s30 + $0xc8] sm:$0xff]  ;;  %v560_v51 = vmul.f32 %v527_v45, %v527_v45  ;;  %v561_v52 = vmul.f32 %v528_v46, %v528_v46  ;;  %v4219_v60 = vld [vmem:[%s5064_s30 + $0xd0] sm:$0xff]  ;;  %1010 = vmatprep.subr.mxu1 %v715_v36  ;;  %v562_v63 = vmul.f32 %v529_v59, %v529_v59  ;;  %1230 = vmatprep.subr.mxu0 %v4262_v37  ;;  %s516_s27 = sadd.s32 %s4718_s24, %s4207_s25 }
  0x39   : > { %v5077_v54 = vadd.f32 %v568_v44, %v552_v42  ;;  %v576_v55 = vmul.f32 %v4217_v49, %v4217_v49  ;;  %v577_v56 = vmul.f32 %v4218_v50, %v4218_v50  ;;  %v5082_v61 = vadd.f32 %v569_v48, %v553_v43  ;;  %v522_v1 = vld [vmem:[%s5064_s30 + $0x18] sm:$0xff]  ;;  %v523_v13 = vld [vmem:[%s5064_s30 + $0x20] sm:$0xff]  ;;  %v524_v18 = vld [vmem:[%s5064_s30 + $0x28] sm:$0xff]  ;;  %s4208_s28 = sshll.u32 %s516_s27, 3 }
  0x3a   : > { %v578_v0 = vmul.f32 %v4219_v60, %v4219_v60  ;;  %v4212_v2 = vld [vmem:[%s5064_s30 + $0x98] sm:$0xff]  ;;  %v5094_v7 = vadd.f32 %v570_v62, %v554_v58  ;;  %v555_v9 = vmul.f32 %v522_v1, %v522_v1  ;;  %v4213_v14 = vld [vmem:[%s5064_s30 + $0xa0] sm:$0xff]  ;;  %v4214_v19 = vld [vmem:[%s5064_s30 + $0xa8] sm:$0xff]  ;;  %v556_v23 = vmul.f32 %v523_v13, %v523_v13  ;;  %s518_s29 = scalar_lea.vmem %s7835_s9, %s4208_s28 }
  0x3b   : > { %4776 = vrsqrt.f32 %v5077_v54  ;;  %v530_v3 = vld [vmem:[%s5064_s30 + $0x58] sm:$0xff]  ;;  %v5090_v5 = vadd.f32 %v576_v55, %v560_v51  ;;  %v5092_v6 = vadd.f32 %v577_v56, %v561_v52  ;;  %v571_v10 = vmul.f32 %v4212_v2, %v4212_v2  ;;  %v531_v15 = vld [vmem:[%s5064_s30 + $0x60] sm:$0xff]  ;;  %v532_v34 = vld [vmem:[%s5064_s30 + $0x68] sm:$0xff] }
  0x3c   : > { %4778 = vrsqrt.f32 %v5082_v61  ;;  %v4220_v4 = vld [vmem:[%s5064_s30 + $0xd8] sm:$0xff]  ;;  %v5096_v8 = vadd.f32 %v578_v0, %v562_v63  ;;  %v563_v11 = vmul.f32 %v530_v3, %v530_v3  ;;  %vm602_vm0 = vcmp.eq.f32.partialorder %v5077_v54, inf  ;;  %v4221_v17 = vld [vmem:[%s5064_s30 + $0xe0] sm:$0xff]  ;;  %v4222_v35 = vld [vmem:[%s5064_s30 + $0xe8] sm:$0xff] }
  0x3d   : > { %4780 = vrsqrt.f32 %v5090_v5  ;;  %v579_v12 = vmul.f32 %v4220_v4, %v4220_v4  ;;  %vm604_vm1 = vcmp.eq.f32.partialorder %v5077_v54, 0.0  ;;  %v605_v16 = vand.u32 2147483648, %v5077_v54  ;;  %v525_v38 = vld [vmem:[%s5064_s30 + $0x30] sm:$0xff] }
  0x3e   : > { %4782 = vrsqrt.f32 %v5092_v6  ;;  %vm609_vm2 = vcmp.eq.f32.partialorder %v5082_v61, inf  ;;  %vm611_vm3 = vcmp.eq.f32.partialorder %v5082_v61, 0.0  ;;  %v612_v20 = vand.u32 2147483648, %v5082_v61  ;;  %v4215_v39 = vld [vmem:[%s5064_s30 + $0xb0] sm:$0xff] }
  0x3f   : > { %4784 = vrsqrt.f32 %v5094_v7  ;;  %v5114_v21 = vadd.f32 %v571_v10, %v555_v9  ;;  %v5116_v22 = vadd.f32 %v579_v12, %v563_v11  ;;  %v572_v24 = vmul.f32 %v4213_v14, %v4213_v14  ;;  %v533_v48 = vld [vmem:[%s5064_s30 + $0x70] sm:$0xff] }
  0x40   : > { %4786 = vrsqrt.f32 %v5096_v8  ;;  %v564_v25 = vmul.f32 %v531_v15, %v531_v15  ;;  %v580_v26 = vmul.f32 %v4221_v17, %v4221_v17  ;;  %v557_v27 = vmul.f32 %v524_v18, %v524_v18  ;;  %v4261_v10 = vld [vmem:[%s7827_s1 + $0x50] sm:$0xff]  ;;  %v4260_v15 = vld [vmem:[%s7827_s1 + $0x48] sm:$0xff] }
  0x41   : > { %v573_v28 = vmul.f32 %v4214_v19, %v4214_v19  ;;  %vm658_vm5 = vcmp.eq.f32.partialorder %v5090_v5, inf  ;;  %vm660_vm6 = vcmp.eq.f32.partialorder %v5090_v5, 0.0  ;;  %v661_v29 = vand.u32 2147483648, %v5090_v5  ;;  %v4223_v18 = vld [vmem:[%s5064_s30 + $0xf0] sm:$0xff]  ;;  %v4259_v19 = vld [vmem:[%s7827_s1 + $0x40] sm:$0xff] }
  0x42   : > { %4788 = vrsqrt.f32 %v5114_v21  ;;  %vm665_vm8 = vcmp.eq.f32.partialorder %v5092_v6, inf  ;;  %vm667_vm9 = vcmp.eq.f32.partialorder %v5092_v6, 0.0  ;;  %v668_v30 = vand.u32 2147483648, %v5092_v6 }
  0x43   : > { %4790 = vrsqrt.f32 %v5116_v22  ;;  %vm616_vm10 = vcmp.eq.f32.partialorder %v5094_v7, inf  ;;  %v5127_v31 = vadd.f32 %v572_v24, %v556_v23  ;;  %v5129_v32 = vadd.f32 %v580_v26, %v564_v25  ;;  %v4300_v25 = vld [vmem:[%s7827_s1 + $0x98] sm:$0xff] }
  0x44   : > { %v5131_v33 = vadd.f32 %v573_v28, %v557_v27  ;;  %vm618_vm11 = vcmp.eq.f32.partialorder %v5094_v7, 0.0  ;;  %v619_v37 = vand.u32 2147483648, %v5094_v7  ;;  %vm672_vm12 = vcmp.eq.f32.partialorder %v5096_v8, inf }
  0x45   : > { %v675_v42 = vand.u32 2147483648, %v5096_v8  ;;  %v626_v43 = vand.u32 2147483648, %v5114_v21  ;;  %4792 = vrsqrt.f32 %v5127_v31  ;;  %v565_v45 = vmul.f32 %v532_v34, %v532_v34 }
  0x46   : > { %4794 = vrsqrt.f32 %v5129_v32  ;;  %v581_v46 = vmul.f32 %v4222_v35, %v4222_v35  ;;  %vm625_vm15 = vcmp.eq.f32.partialorder %v5114_v21, 0.0  ;;  %vm679_vm13 = vcmp.eq.f32.partialorder %v5116_v22, inf }
  0x47   : > { %4796 = vrsqrt.f32 %v5131_v33  ;;  %v558_v50 = vmul.f32 %v525_v38, %v525_v38  ;;  %v574_v51 = vmul.f32 %v4215_v39, %v4215_v39  ;;  %vm681_vm14 = vcmp.eq.f32.partialorder %v5116_v22, 0.0  ;;  %v526_v39 = vld [vmem:[%s5064_s30 + $0x38] sm:$0xff] }
  0x48   : > { %v4777_v36 = vpop.eup %4776  ;;  %v682_v56 = vand.u32 2147483648, %v5116_v22  ;;  %v633_v1 = vand.u32 2147483648, %v5127_v31  ;;  %v5176_v2 = vadd.f32 %v581_v46, %v565_v45  ;;  %v4216_v46 = vld [vmem:[%s5064_s30 + $0xb8] sm:$0xff] }
  0x49   : > { %v4779_v40 = vpop.eup %4778  ;;  %v601_v41 = vmul.f32 %v4777_v36, %v5077_v54  ;;  %v5184_v9 = vadd.f32 %v574_v51, %v558_v50  ;;  %v582_v36 = vmul.f32 %v4223_v18, %v4223_v18 }
  0x4a   : > { %v608_v44 = vmul.f32 %v4779_v40, %v5082_v61  ;;  %v4781_v52 = vpop.eup %4780  ;;  %4798 = vrsqrt.f32 %v5176_v2  ;;  %v713_v40 = vld [vmem:[%s7827_s1 + $0x8] sm:$0xff] }
  0x4b   : > { %v603_v49 = vsel %vm602_vm0, %v5077_v54, %v601_v41  ;;  %v4783_v57 = vpop.eup %4782  ;;  %v657_v60 = vmul.f32 %v4781_v52, %v5090_v5  ;;  %v5170_v54 = vmul.f32 %v533_v48, %v533_v48  ;;  %vm630_vm0 = vcmp.eq.f32.partialorder %v5127_v31, inf }
  0x4c   : > { %v5157_v53 = vsel %vm604_vm1, %v605_v16, %v603_v49  ;;  %v610_v55 = vsel %vm609_vm2, %v5082_v61, %v608_v44  ;;  %v4785_v62 = vpop.eup %4784  ;;  %v664_v0 = vmul.f32 %v4783_v57, %v5092_v6  ;;  %vm632_vm1 = vcmp.eq.f32.partialorder %v5127_v31, 0.0 }
  0x4d   : > { %v5166_v58 = vsel %vm611_vm3, %v612_v20, %v610_v55  ;;  %v737_v59 = vrot.slane %v5157_v53, 1  ;;  %v4787_v61 = vpop.eup %4786  ;;  %v659_v3 = vsel %vm658_vm5, %v5090_v5, %v657_v60  ;;  %v615_v4 = vmul.f32 %v4785_v62, %v5094_v7 }
  0x4e   : > { %v738_v63 = vrot.slane %v5166_v58, 1  ;;  %vm686_vm2 = vcmp.eq.f32.partialorder %v5129_v32, inf  ;;  %v5192_v12 = vsel %vm660_vm6, %v661_v29, %v659_v3  ;;  %v666_v13 = vsel %vm665_vm8, %v5092_v6, %v664_v0 }
  0x4f   : > { %v671_v14 = vmul.f32 %v4787_v61, %v5096_v8  ;;  %v5204_v16 = vsel %vm667_vm9, %v668_v30, %v666_v13  ;;  %v752_v5 = vrot.slane %v5192_v12, 1  ;;  %v617_v17 = vsel %vm616_vm10, %v5094_v7, %v615_v4  ;;  %v4789_v20 = vpop.eup %4788 }
  0x50   : > { %v739_v11 = vsel %vm736_vm4, %v737_v59, %v738_v63  ;;  %v754_v23 = vrot.slane %v5204_v16, 1  ;;  %v5219_v6 = vsel %vm618_vm11, %v619_v37, %v617_v17  ;;  %vm688_vm3 = vcmp.eq.f32.partialorder %v5129_v32, 0.0  ;;  %v4791_v26 = vpop.eup %4790 }
  0x51   : > { %4229 = vmatmul.mubr.msk.f32.vlgmr.msra.gmra.mxu0 %vm766_vm7, %v739_v11  ;;  %v673_v24 = vsel %vm672_vm12, %v5096_v8, %v671_v14  ;;  %v740_v27 = vrot.slane %v5219_v6, 1  ;;  %vm7841_vm5 = vcmp.eq.f32.partialorder %v5096_v8, 0.0  ;;  %v622_v28 = vmul.f32 %v4789_v20, %v5114_v21  ;;  %v714_v8 = vld [vmem:[%s7827_s1 + $0x10] sm:$0xff] }
  0x52   : > { %867 = vmatprep.mubr.f32.mxu0 %v7837_v47  ;;  %1231 = vmatpush1.msra.mxu0 %v4261_v10  ;;  %v5231_v7 = vsel %vm7841_vm5, %v675_v42, %v673_v24  ;;  %v689_v29 = vand.u32 2147483648, %v5129_v32  ;;  %v755_v30 = vsel %vm736_vm4, %v752_v5, %v754_v23  ;;  %v678_v35 = vmul.f32 %v4791_v26, %v5116_v22  ;;  %v4793_v41 = vpop.eup %4792 }
  0x53   : > { %1232 = vmatprep.subr.mxu0 %v4260_v15  ;;  %v756_v34 = vrot.slane %v5231_v7, 1  ;;  %4237 = vmatmul.mubr.msk.f32.vlgmr.msra.gmra.mxu1 %vm766_vm7, %v755_v30  ;;  %v741_v37 = vsel %vm736_vm4, %v738_v63, %v740_v27  ;;  %vm7842_vm6 = vcmp.eq.f32.partialorder %v5114_v21, inf  ;;  %vm637_vm8 = vcmp.eq.f32.partialorder %v5131_v33, inf  ;;  %v4795_v48 = vpop.eup %4794 }
  0x54   : > { %1233 = vmatpush1.msra.mxu0 %v4259_v19  ;;  %v624_v38 = vsel %vm7842_vm6, %v5114_v21, %v622_v28  ;;  %4800 = vrsqrt.f32 %v5184_v9  ;;  %915 = vmatprep.mubr.f32.mxu1 %v7837_v47  ;;  %v680_v45 = vsel %vm679_vm13, %v5116_v22, %v678_v35  ;;  %vm639_vm9 = vcmp.eq.f32.partialorder %v5131_v33, 0.0  ;;  %v4797_v51 = vpop.eup %4796  ;;  %v712_v22 = vld [vmem:[%s7827_s1] sm:$0xff] }
  0x55   : > { %1733 = vmatprep.subr.mxu0 %v4300_v25  ;;  %4230 = vmatmul.mubr.msk.f32.gmra.mxu0 %vm766_vm7, %v741_v37  ;;  %v757_v42 = vsel %vm736_vm4, %v754_v23, %v756_v34  ;;  %v5261_v44 = vsel %vm625_vm15, %v626_v43, %v624_v38  ;;  %v5274_v50 = vsel %vm681_vm14, %v682_v56, %v680_v45  ;;  %v640_v43 = vand.u32 2147483648, %v5131_v33 }
  0x56   : > { %873 = vmatprep.mubr.f32.mxu0 %v7837_v47  ;;  %v742_v49 = vrot.slane %v5261_v44, 1  ;;  %v629_v21 = vmul.f32 %v4793_v41, %v5127_v31  ;;  %1011 = vmatpush1.msra.mxu1 %v714_v8  ;;  %v758_v52 = vrot.slane %v5274_v50, 1  ;;  %v685_v55 = vmul.f32 %v4795_v48, %v5129_v32 }
  0x57   : > { %v5281_v57 = vadd.f32 %v582_v36, %v5170_v54  ;;  %v559_v59 = vmul.f32 %v526_v39, %v526_v39  ;;  %1012 = vmatprep.subr.mxu1 %v713_v40  ;;  %4238 = vmatmul.mubr.msk.f32.gmra.mxu1 %vm766_vm7, %v757_v42  ;;  %v636_v62 = vmul.f32 %v4797_v51, %v5131_v33  ;;  %v4281_v54 = vld [vmem:[%s7827_s1 + $0x78] sm:$0xff]  ;;  %v4799_v15 = vpop.eup %4798  ;;  %vm693_vm10 = vcmp.eq.f32.partialorder %v5176_v2, inf }
  0x58   : > { %v743_v56 = vsel %vm736_vm4, %v740_v27, %v742_v49  ;;  %v631_v60 = vsel %vm630_vm0, %v5127_v31, %v629_v21  ;;  %v575_v63 = vmul.f32 %v4216_v46, %v4216_v46  ;;  %921 = vmatprep.mubr.f32.mxu1 %v7837_v47  ;;  %v759_v0 = vsel %vm736_vm4, %v756_v34, %v758_v52 }
  0x59   : > { %4231 = vmatmul.mubr.msk.f32.gmra.mxu0 %vm766_vm7, %v743_v56  ;;  %v5302_v61 = vsel %vm632_vm1, %v633_v1, %v631_v60  ;;  %v687_v3 = vsel %vm686_vm2, %v5129_v32, %v685_v55  ;;  %4802 = vrsqrt.f32 %v5281_v57  ;;  %v638_v31 = vsel %vm637_vm8, %v5131_v33, %v636_v62  ;;  %1013 = vmatpush1.msra.mxu1 %v712_v22 }
  0x5a   : > { %879 = vmatprep.mubr.f32.mxu0 %v7837_v47  ;;  %v744_v4 = vrot.slane %v5302_v61, 1  ;;  %v5312_v10 = vsel %vm688_vm3, %v689_v29, %v687_v3  ;;  %v5320_v11 = vsel %vm639_vm9, %v640_v43, %v638_v31  ;;  %1480 = vmatprep.subr.mxu1 %v4281_v54  ;;  %v5325_v14 = vadd.f32 %v575_v63, %v559_v59 }
  0x5b   : > { %v760_v1 = vrot.slane %v5312_v10, 1  ;;  %4239 = vmatmul.mubr.msk.f32.gmra.mxu1 %vm766_vm7, %v759_v0  ;;  %v746_v32 = vrot.slane %v5320_v11, 1  ;;  %v696_v33 = vand.u32 2147483648, %v5176_v2  ;;  %v692_v19 = vmul.f32 %v4799_v15, %v5176_v2 }
  0x5c   : > { %v745_v13 = vsel %vm736_vm4, %v742_v49, %v744_v4  ;;  %927 = vmatprep.mubr.f32.mxu1 %v7837_v47  ;;  %vm695_vm11 = vcmp.eq.f32.partialorder %v5176_v2, 0.0  ;;  %4804 = vrsqrt.f32 %v5325_v14  ;;  %vm644_vm12 = vcmp.eq.f32.partialorder %v5184_v9, inf }
  0x5d   : > { %4232 = vmatmul.mubr.msk.f32.gmra.mxu0 %vm766_vm7, %v745_v13  ;;  %v761_v17 = vsel %vm736_vm4, %v758_v52, %v760_v1  ;;  %v747_v18 = vsel %vm736_vm4, %v744_v4, %v746_v32  ;;  %v694_v20 = vsel %vm693_vm10, %v5176_v2, %v692_v19  ;;  %v647_v25 = vand.u32 2147483648, %v5184_v9 }
  0x5e   : > { %885 = vmatprep.mubr.f32.mxu0 %v7837_v47  ;;  %v5341_v24 = vsel %vm695_vm11, %v696_v33, %v694_v20  ;;  %vm646_vm13 = vcmp.eq.f32.partialorder %v5184_v9, 0.0  ;;  %vm1392_vm14 = vcmask 1044480   ;;  %vm1643_vm15 = vcmask 1043456  }
  0x5f   : > { %4240 = vmatmul.mubr.msk.f32.gmra.mxu1 %vm766_vm7, %v761_v17  ;;  %v762_v26 = vrot.slane %v5341_v24, 1  ;;  %vm700_vm0 = vcmp.eq.f32.partialorder %v5281_v57, inf  ;;  %v1393_v29 = vrot.slane %v5157_v53, 3  ;;  %vm702_vm1 = vcmp.eq.f32.partialorder %v5281_v57, 0.0 }
  0x60   : > { %933 = vmatprep.mubr.f32.mxu1 %v7837_v47  ;;  %v703_v34 = vand.u32 2147483648, %v5281_v57  ;;  %v1394_v35 = vrot.slane %v5166_v58, 3  ;;  %vm651_vm2 = vcmp.eq.f32.partialorder %v5325_v14, inf  ;;  %v1644_v37 = vrot.slane %v5157_v53, 4 }
  0x61   : > { %v4801_v23 = vpop.eup %4800  ;;  %4233 = vmatmul.mubr.msk.f32.gmra.mxu0 %vm766_vm7, %v747_v18  ;;  %v763_v2 = vsel %vm736_vm4, %v760_v1, %v762_v26  ;;  %v1645_v40 = vrot.slane %v5166_v58, 4  ;;  %v1398_v41 = vrot.slane %v5261_v44, 3  ;;  %vm653_vm3 = vcmp.eq.f32.partialorder %v5325_v14, 0.0 }
  0x62   : > { %891 = vmatprep.mubr.f32.mxu0 %v7837_v47  ;;  %v643_v27 = vmul.f32 %v4801_v23, %v5184_v9  ;;  %v5366_v39 = vsel %vm1392_vm14, %v1393_v29, %v1394_v35  ;;  %v1647_v46 = vrot.slane %v5219_v6, 4  ;;  %v1400_v43 = vrot.slane %v5302_v61, 3  ;;  %v4280_v29 = vld [vmem:[%s7827_s1 + $0x70] sm:$0xff] }
  0x63   : > { %4241 = vmatmul.mubr.msk.f32.gmra.mxu1 %vm766_vm7, %v763_v2  ;;  %v5381_v49 = vsel %vm1643_vm15, %v1644_v37, %v1645_v40  ;;  %v1649_v55 = vrot.slane %v5261_v44, 4  ;;  %v1402_v59 = vrot.slane %v5320_v11, 3  ;;  %v654_v60 = vand.u32 2147483648, %v5325_v14 }
  0x64   : > { %v645_v28 = vsel %vm644_vm12, %v5184_v9, %v643_v27  ;;  %939 = vmatprep.mubr.f32.mxu1 %v7837_v47  ;;  %v1396_v9 = vrot.slane %v5219_v6, 3  ;;  %v5393_v52 = vsel %vm1643_vm15, %v1645_v40, %v1647_v46  ;;  %v5400_v62 = vsel %vm1392_vm14, %v1398_v41, %v1400_v43 }
  0x65   : > { %v5354_v30 = vsel %vm646_vm13, %v647_v25, %v645_v28  ;;  %v5405_v54 = vsel %vm1643_vm15, %v1647_v46, %v1649_v55  ;;  %v5408_v0 = vsel %vm1392_vm14, %v1400_v43, %v1402_v59  ;;  %v1653_v1 = vrot.slane %v5320_v11, 4 }
  0x66   : > { %v4803_v36 = vpop.eup %4802  ;;  %v748_v8 = vrot.slane %v5354_v30, 1  ;;  %v5373_v45 = vsel %vm1392_vm14, %v1394_v35, %v1396_v9  ;;  %v5384_v21 = vsel %vm1392_vm14, %v1396_v9, %v1398_v41  ;;  %v1404_v3 = vrot.slane %v5354_v30, 3  ;;  %v4297_v9 = vld [vmem:[%s7827_s1 + $0x80] sm:$0xff] }
  0x67   : > { %v699_v38 = vmul.f32 %v4803_v36, %v5281_v57  ;;  %v1655_v15 = vrot.slane %v5354_v30, 4  ;;  %v1143_v2 = vrot.slane %v5157_v53, 2  ;;  %v1144_v28 = vrot.slane %v5166_v58, 2  ;;  %v4299_v36 = vld [vmem:[%s7827_s1 + $0x90] sm:$0xff] }
  0x68   : > { %v749_v42 = vsel %vm736_vm4, %v746_v32, %v748_v8  ;;  %v5421_v32 = vsel %vm1392_vm14, %v1402_v59, %v1404_v3  ;;  %vm1142_vm5 = vcmask 1045504   ;;  %v1146_v35 = vrot.slane %v5219_v6, 2 }
  0x69   : > { %4234 = vmatmul.mubr.msk.f32.gmra.mxu0 %vm766_vm7, %v749_v42  ;;  %v701_v48 = vsel %vm700_vm0, %v5281_v57, %v699_v38  ;;  %v4805_v22 = vpop.eup %4804  ;;  %v1651_v57 = vrot.slane %v5302_v61, 4  ;;  %v5435_v20 = vsel %vm1643_vm15, %v1653_v1, %v1655_v15  ;;  %v1148_v37 = vrot.slane %v5261_v44, 2 }
  0x6a   : > { %v5389_v51 = vsel %vm702_vm1, %v703_v34, %v701_v48  ;;  %897 = vmatprep.mubr.f32.mxu0 %v7837_v47  ;;  %v650_v63 = vmul.f32 %v4805_v22, %v5325_v14  ;;  %v4279_v34 = vld [vmem:[%s7827_s1 + $0x68] sm:$0xff]  ;;  %v1150_v40 = vrot.slane %v5302_v61, 2  ;;  %v1152_v41 = vrot.slane %v5320_v11, 2 }
  0x6b   : > { %v764_v56 = vrot.slane %v5389_v51, 1  ;;  %v5413_v31 = vsel %vm1643_vm15, %v1649_v55, %v1651_v57  ;;  %v5430_v33 = vsel %vm1643_vm15, %v1651_v57, %v1653_v1  ;;  %v1149_v38 = vsel %vm1142_vm5, %v1146_v35, %v1148_v37 }
  0x6c   : > { %v652_v13 = vsel %vm651_vm2, %v5325_v14, %v650_v63  ;;  %v1154_v42 = vrot.slane %v5354_v30, 2  ;;  %v1158_v48 = vrot.slane %v5192_v12, 2  ;;  %v1160_v43 = vrot.slane %v5204_v16, 2 }
  0x6d   : > { %v765_v4 = vsel %vm736_vm4, %v762_v26, %v764_v56  ;;  %v5427_v17 = vsel %vm653_vm3, %v654_v60, %v652_v13  ;;  %v1162_v59 = vrot.slane %v5231_v7, 2  ;;  %v1166_v57 = vrot.slane %v5312_v10, 2 }
  0x6e   : > { %4242 = vmatmul.mubr.msk.f32.gmra.mxu1 %vm766_vm7, %v765_v4  ;;  %v750_v18 = vrot.slane %v5427_v17, 1  ;;  %v1406_v19 = vrot.slane %v5427_v17, 3  ;;  %v1657_v23 = vrot.slane %v5427_v17, 4  ;;  %v1156_v46 = vrot.slane %v5427_v17, 2 }
  0x6f   : > { %945 = vmatprep.mubr.f32.mxu1 %v7837_v47  ;;  %v1161_v55 = vsel %vm1142_vm5, %v1158_v48, %v1160_v43  ;;  %v1163_v22 = vsel %vm1142_vm5, %v1160_v43, %v1162_v59  ;;  %v1170_v1 = vrot.slane %v5389_v51, 2  ;;  %vm2466_vm9 = vcmask 523264  }
  0x70   : > { %v751_v25 = vsel %vm736_vm4, %v748_v8, %v750_v18  ;;  %v5445_v14 = vsel %vm1392_vm14, %v1404_v3, %v1406_v19  ;;  %v5450_v26 = vsel %vm1643_vm15, %v1655_v15, %v1657_v23  ;;  %v753_v27 = vsel %vm736_vm4, %v750_v18, %v752_v5  ;;  %v4298_v8 = vld [vmem:[%s7827_s1 + $0x88] sm:$0xff] }
  0x71   : > { %4235 = vmatmul.mubr.msk.f32.gmra.mxu0 %vm766_vm7, %v751_v25  ;;  %v1145_v5 = vsel %vm1142_vm5, %v1143_v2, %v1144_v28  ;;  %v1168_v3 = vrot.slane %v5341_v24, 2  ;;  %v1412_v15 = vrot.slane %v5231_v7, 3  ;;  %vm3271_vm10 = vcmask 285696  }
  0x72   : > { %4243 = vmatmul.mubr.msk.f32.gmra.mxu1 %vm766_vm7, %v764_v56  ;;  %903 = vmatprep.mubr.f32.mxu0 %v7837_v47  ;;  %v1164_v56 = vrot.slane %v5274_v50, 2  ;;  %vm4101_vm11 = vcmask 520192  }
  0x73   : > { %1046 = vmatprep.mubr.f32.mxu1 %v7837_v47  ;;  %v1169_v4 = vsel %vm1142_vm5, %v1166_v57, %v1168_v3  ;;  %v1171_v13 = vsel %vm1142_vm5, %v1168_v3, %v1170_v1 }
  0x74   : > { %v1165_v60 = vsel %vm1142_vm5, %v1162_v59, %v1164_v56  ;;  %v1167_v63 = vsel %vm1142_vm5, %v1164_v56, %v1166_v57 }
  0x75   : > { %4236 = vmatmul.mubr.msk.f32.gmra.mxu0 %vm766_vm7, %v753_v27  ;;  %v1418_v27 = vrot.slane %v5341_v24, 3 }
  0x76   : > { %4244 = vmatmul.mubr.msk.f32.vlgmr.msra.gmra.mxu1 %vm766_vm7, %v5157_v53  ;;  %1266 = vmatprep.mubr.f32.mxu0 %v7837_v47  ;;  %v4278_v53 = vld [vmem:[%s7827_s1 + $0x60] sm:$0xff] }
  0x77   : > { %1052 = vmatprep.mubr.f32.mxu1 %v7837_v47  ;;  %1481 = vmatpush1.msra.mxu1 %v4280_v29 }
  0x78   : > { %1482 = vmatprep.subr.mxu1 %v4279_v34  ;;  %v1420_v34 = vrot.slane %v5389_v51, 3 }
  0x79   : > { %4263 = vmatmul.mubr.msk.f32.vlgmr.msra.gmra.mxu0 %vm766_vm7, %v1145_v5  ;;  %1483 = vmatpush1.msra.mxu1 %v4278_v53 }
  0x7a   : > { %4245 = vmatmul.mubr.msk.f32.gmra.mxu1 %vm766_vm7, %v5166_v58  ;;  %1272 = vmatprep.mubr.f32.mxu0 %v7837_v47  ;;  %v1147_v58 = vsel %vm1142_vm5, %v1144_v28, %v1146_v35  ;;  %v1667_v28 = vrot.slane %v5312_v10, 4  ;;  %v1421_v53 = vsel %vm1392_vm14, %v1418_v27, %v1420_v34 }
  0x7b   : > { %1058 = vmatprep.mubr.f32.mxu1 %v7837_v47  ;;  %1734 = vmatpush1.msra.mxu0 %v4299_v36 }
  0x7c   : > { %1735 = vmatprep.subr.mxu0 %v4298_v8 }
  0x7d   : > { %1736 = vmatpush1.msra.mxu0 %v4297_v9 }
  0x7e   : > { %4246 = vmatmul.mubr.msk.f32.gmra.mxu1 %vm766_vm7, %v5219_v6  ;;  %4264 = vmatmul.mubr.msk.f32.gmra.mxu0 %vm766_vm7, %v1147_v58  ;;  %v1151_v6 = vsel %vm1142_vm5, %v1148_v37, %v1150_v40 }
  0x7f   : > { %1064 = vmatprep.mubr.f32.mxu1 %v7837_v47  ;;  %1278 = vmatprep.mubr.f32.mxu0 %v7837_v47 }
  0x82   : > { %4247 = vmatmul.mubr.msk.f32.gmra.mxu1 %vm766_vm7, %v5261_v44  ;;  %4265 = vmatmul.mubr.msk.f32.gmra.mxu0 %vm766_vm7, %v1149_v38  ;;  %v1153_v44 = vsel %vm1142_vm5, %v1150_v40, %v1152_v41 }
  0x83   : > { %1070 = vmatprep.mubr.f32.mxu1 %v7837_v47  ;;  %1284 = vmatprep.mubr.f32.mxu0 %v7837_v47 }
  0x86   : > { %4248 = vmatmul.mubr.msk.f32.gmra.mxu1 %vm766_vm7, %v5302_v61  ;;  %4266 = vmatmul.mubr.msk.f32.gmra.mxu0 %vm766_vm7, %v1151_v6  ;;  %v1155_v61 = vsel %vm1142_vm5, %v1152_v41, %v1154_v42 }
  0x87   : > { %1076 = vmatprep.mubr.f32.mxu1 %v7837_v47  ;;  %1290 = vmatprep.mubr.f32.mxu0 %v7837_v47 }
  0x8a   : > { %4249 = vmatmul.mubr.msk.f32.gmra.mxu1 %vm766_vm7, %v5320_v11  ;;  %4267 = vmatmul.mubr.msk.f32.gmra.mxu0 %vm766_vm7, %v1153_v44  ;;  %v1157_v11 = vsel %vm1142_vm5, %v1154_v42, %v1156_v46 }
  0x8b   : > { %1082 = vmatprep.mubr.f32.mxu1 %v7837_v47  ;;  %1296 = vmatprep.mubr.f32.mxu0 %v7837_v47 }
  0x8e   : > { %4250 = vmatmul.mubr.msk.f32.gmra.mxu1 %vm766_vm7, %v5354_v30  ;;  %4268 = vmatmul.mubr.msk.f32.gmra.mxu0 %vm766_vm7, %v1155_v61  ;;  %v1159_v30 = vsel %vm1142_vm5, %v1156_v46, %v1158_v48 }
  0x8f   : > { %1088 = vmatprep.mubr.f32.mxu1 %v7837_v47  ;;  %1302 = vmatprep.mubr.f32.mxu0 %v7837_v47 }
  0x92   : > { %4251 = vmatmul.mubr.msk.f32.gmra.mxu1 %vm766_vm7, %v5427_v17  ;;  %4269 = vmatmul.mubr.msk.f32.gmra.mxu0 %vm766_vm7, %v1157_v11  ;;  %v1663_v17 = vrot.slane %v5231_v7, 4 }
  0x93   : > { %1094 = vmatprep.mubr.f32.mxu1 %v7837_v47  ;;  %1308 = vmatprep.mubr.f32.mxu0 %v7837_v47 }
  0x96   : > { %4252 = vmatmul.mubr.msk.f32.gmra.mxu1 %vm766_vm7, %v5192_v12  ;;  %4270 = vmatmul.mubr.msk.f32.gmra.mxu0 %vm766_vm7, %v1159_v30 }
  0x97   : > { %1100 = vmatprep.mubr.f32.mxu1 %v7837_v47  ;;  %1314 = vmatprep.mubr.f32.mxu0 %v7837_v47 }
  0x9a   : > { %4253 = vmatmul.mubr.msk.f32.gmra.mxu1 %vm766_vm7, %v5204_v16  ;;  %4271 = vmatmul.mubr.msk.f32.gmra.mxu0 %vm766_vm7, %v1161_v55 }
  0x9b   : > { %1106 = vmatprep.mubr.f32.mxu1 %v7837_v47  ;;  %1320 = vmatprep.mubr.f32.mxu0 %v7837_v47 }
  0x9e   : > { %4254 = vmatmul.mubr.msk.f32.gmra.mxu1 %vm766_vm7, %v5231_v7  ;;  %4272 = vmatmul.mubr.msk.f32.gmra.mxu0 %vm766_vm7, %v1163_v22 }
  0x9f   : > { %1112 = vmatprep.mubr.f32.mxu1 %v7837_v47  ;;  %1326 = vmatprep.mubr.f32.mxu0 %v7837_v47 }
  0xa2   : > { %4255 = vmatmul.mubr.msk.f32.gmra.mxu1 %vm766_vm7, %v5274_v50  ;;  %4273 = vmatmul.mubr.msk.f32.gmra.mxu0 %vm766_vm7, %v1165_v60 }
  0xa3   : > { %1118 = vmatprep.mubr.f32.mxu1 %v7837_v47  ;;  %1332 = vmatprep.mubr.f32.mxu0 %v7837_v47 }
  0xa6   : > { %4256 = vmatmul.mubr.msk.f32.gmra.mxu1 %vm766_vm7, %v5312_v10  ;;  %4274 = vmatmul.mubr.msk.f32.gmra.mxu0 %vm766_vm7, %v1167_v63 }
  0xa7   : > { %1124 = vmatprep.mubr.f32.mxu1 %v7837_v47  ;;  %1338 = vmatprep.mubr.f32.mxu0 %v7837_v47 }
  0xaa   : > { %4257 = vmatmul.mubr.msk.f32.gmra.mxu1 %vm766_vm7, %v5341_v24  ;;  %4275 = vmatmul.mubr.msk.f32.gmra.mxu0 %vm766_vm7, %v1169_v4 }
  0xab   : > { %1130 = vmatprep.mubr.f32.mxu1 %v7837_v47  ;;  %1344 = vmatprep.mubr.f32.mxu0 %v7837_v47 }
  0xae   : > { %4258 = vmatmul.mubr.msk.f32.gmra.mxu1 %vm766_vm7, %v5389_v51  ;;  %4276 = vmatmul.mubr.msk.f32.gmra.mxu0 %vm766_vm7, %v1171_v13 }
  0xaf   : > { %1516 = vmatprep.mubr.f32.mxu1 %v7837_v47  ;;  %1350 = vmatprep.mubr.f32.mxu0 %v7837_v47 }
  0xb2   : > { %4282 = vmatmul.mubr.msk.f32.vlgmr.msra.gmra.mxu1 %vm766_vm7, %v5366_v39  ;;  %4277 = vmatmul.mubr.msk.f32.gmra.mxu0 %vm766_vm7, %v1170_v1  ;;  %v534_v39 = vld [vmem:[%s5064_s30 + $0x78] sm:$0x1] }
  0xb3   : > { %1522 = vmatprep.mubr.f32.mxu1 %v7837_v47  ;;  %1769 = vmatprep.mubr.f32.mxu0 %v7837_v47 }
  0xb6   : > { %4283 = vmatmul.mubr.msk.f32.gmra.mxu1 %vm766_vm7, %v5373_v45  ;;  %4301 = vmatmul.mubr.msk.f32.vlgmr.msra.gmra.mxu0 %vm766_vm7, %v5381_v49  ;;  %v4224_v45 = vld [vmem:[%s5064_s30 + $0xf8] sm:$0x1]  ;;  %v567_v49 = vmul.f32 %v534_v39, %v534_v39 }
  0xb7   : > { %1528 = vmatprep.mubr.f32.mxu1 %v7837_v47  ;;  %1775 = vmatprep.mubr.f32.mxu0 %v7837_v47 }
  0xba   : > { %4284 = vmatmul.mubr.msk.f32.gmra.mxu1 %vm766_vm7, %v5384_v21  ;;  %4302 = vmatmul.mubr.msk.f32.gmra.mxu0 %vm766_vm7, %v5393_v52  ;;  %v583_v21 = vmul.f32 %v4224_v45, %v4224_v45  ;;  %v1408_v52 = vrot.slane %v5192_v12, 3 }
  0xbb   : > { %1534 = vmatprep.mubr.f32.mxu1 %v7837_v47  ;;  %1781 = vmatprep.mubr.f32.mxu0 %v7837_v47 }
  0xbe   : > { %4285 = vmatmul.mubr.msk.f32.gmra.mxu1 %vm766_vm7, %v5400_v62  ;;  %4303 = vmatmul.mubr.msk.f32.gmra.mxu0 %vm766_vm7, %v5405_v54  ;;  %v5618_v62 = vadd.f32 %v583_v21, %v567_v49  ;;  %v1409_v54 = vsel %vm1392_vm14, %v1406_v19, %v1408_v52  ;;  %v1414_v19 = vrot.slane %v5274_v50, 3 }
  0xbf   : > { %1540 = vmatprep.mubr.f32.mxu1 %v7837_v47  ;;  %1787 = vmatprep.mubr.f32.mxu0 %v7837_v47 }
  0xc0   : > { %4806 = vrsqrt.f32 %v5618_v62  ;;  %vm707_vm6 = vcmp.eq.f32.partialorder %v5618_v62, inf  ;;  %v710_v35 = vand.u32 2147483648, %v5618_v62  ;;  %vm709_vm8 = vcmp.eq.f32.partialorder %v5618_v62, 0.0 }
  0xc2   : > { %4286 = vmatmul.mubr.msk.f32.gmra.mxu1 %vm766_vm7, %v5408_v0  ;;  %4304 = vmatmul.mubr.msk.f32.gmra.mxu0 %vm766_vm7, %v5413_v31  ;;  %v1410_v0 = vrot.slane %v5204_v16, 3  ;;  %v1659_v31 = vrot.slane %v5192_v12, 4  ;;  %v1661_v12 = vrot.slane %v5204_v16, 4  ;;  %v1415_v16 = vsel %vm1392_vm14, %v1412_v15, %v1414_v19 }
  0xc3   : > { %1546 = vmatprep.mubr.f32.mxu1 %v7837_v47  ;;  %1793 = vmatprep.mubr.f32.mxu0 %v7837_v47 }
  0xc4   : > { %v1413_v18 = vsel %vm1392_vm14, %v1410_v0, %v1412_v15  ;;  %v1664_v25 = vsel %vm1643_vm15, %v1661_v12, %v1663_v17 }
  0xc6   : > { %4287 = vmatmul.mubr.msk.f32.gmra.mxu1 %vm766_vm7, %v5421_v32  ;;  %4305 = vmatmul.mubr.msk.f32.gmra.mxu0 %vm766_vm7, %v5430_v33  ;;  %v1411_v32 = vsel %vm1392_vm14, %v1408_v52, %v1410_v0  ;;  %v1660_v33 = vsel %vm1643_vm15, %v1657_v23, %v1659_v31  ;;  %v1416_v23 = vrot.slane %v5312_v10, 3  ;;  %v1669_v10 = vrot.slane %v5341_v24, 4 }
  0xc7   : > { %1552 = vmatprep.mubr.f32.mxu1 %v7837_v47  ;;  %1799 = vmatprep.mubr.f32.mxu0 %v7837_v47  ;;  %v1671_v24 = vrot.slane %v5389_v51, 4 }
  0xc8   : > { %v1417_v7 = vsel %vm1392_vm14, %v1414_v19, %v1416_v23  ;;  %v1419_v29 = vsel %vm1392_vm14, %v1416_v23, %v1418_v27  ;;  %v1670_v8 = vsel %vm1643_vm15, %v1667_v28, %v1669_v10 }
  0xc9   : > { %v1672_v58 = vsel %vm1643_vm15, %v1669_v10, %v1671_v24 }
  0xca   : > { %4288 = vmatmul.mubr.msk.f32.gmra.mxu1 %vm766_vm7, %v5445_v14  ;;  %4306 = vmatmul.mubr.msk.f32.gmra.mxu0 %vm766_vm7, %v5435_v20  ;;  %v1662_v20 = vsel %vm1643_vm15, %v1659_v31, %v1661_v12  ;;  %v1665_v14 = vrot.slane %v5274_v50, 4 }
  0xcb   : > { %1558 = vmatprep.mubr.f32.mxu1 %v7837_v47  ;;  %1805 = vmatprep.mubr.f32.mxu0 %v7837_v47 }
  0xcc   : > { %v1666_v2 = vsel %vm1643_vm15, %v1663_v17, %v1665_v14  ;;  %v1668_v5 = vsel %vm1643_vm15, %v1665_v14, %v1667_v28 }
  0xce   : > { %4289 = vmatmul.mubr.msk.f32.gmra.mxu1 %vm766_vm7, %v1409_v54  ;;  %4307 = vmatmul.mubr.msk.f32.gmra.mxu0 %vm766_vm7, %v5450_v26  ;;  %v4807_v26 = vpop.eup %4806 }
  0xcf   : > { %1564 = vmatprep.mubr.f32.mxu1 %v7837_v47  ;;  %1811 = vmatprep.mubr.f32.mxu0 %v7837_v47  ;;  %v706_v50 = vmul.f32 %v4807_v26, %v5618_v62 }
  0xd1   : > { %v708_v36 = vsel %vm707_vm6, %v5618_v62, %v706_v50 }
  0xd2   : > { %4290 = vmatmul.mubr.msk.f32.gmra.mxu1 %vm766_vm7, %v1411_v32  ;;  %4308 = vmatmul.mubr.msk.f32.gmra.mxu0 %vm766_vm7, %v1660_v33  ;;  %v711_v9 = vsel %vm709_vm8, %v710_v35, %v708_v36 }
  0xd3   : > { %1570 = vmatprep.mubr.f32.mxu1 %v7837_v47  ;;  %1817 = vmatprep.mubr.f32.mxu0 %v7837_v47  ;;  %v1673_v37 = vrot.slane %v711_v9, 4 }
  0xd5   : > { %v1674_v51 = vsel %vm1643_vm15, %v1671_v24, %v1673_v37 }
  0xd6   : > { %4291 = vmatmul.mubr.msk.f32.gmra.mxu1 %vm766_vm7, %v1413_v18  ;;  %4309 = vmatmul.mubr.msk.f32.gmra.mxu0 %vm766_vm7, %v1662_v20 }
  0xd7   : > { %1576 = vmatprep.mubr.f32.mxu1 %v7837_v47  ;;  %1823 = vmatprep.mubr.f32.mxu0 %v7837_v47 }
  0xda   : > { %4292 = vmatmul.mubr.msk.f32.gmra.mxu1 %vm766_vm7, %v1415_v16  ;;  %4310 = vmatmul.mubr.msk.f32.gmra.mxu0 %vm766_vm7, %v1664_v25 }
  0xdb   : > { %1582 = vmatprep.mubr.f32.mxu1 %v7837_v47  ;;  %1829 = vmatprep.mubr.f32.mxu0 %v7837_v47 }
  0xde   : > { %4293 = vmatmul.mubr.msk.f32.gmra.mxu1 %vm766_vm7, %v1417_v7  ;;  %4311 = vmatmul.mubr.msk.f32.gmra.mxu0 %vm766_vm7, %v1666_v2 }
  0xdf   : > { %1588 = vmatprep.mubr.f32.mxu1 %v7837_v47  ;;  %1835 = vmatprep.mubr.f32.mxu0 %v7837_v47 }
  0xe2   : > { %4294 = vmatmul.mubr.msk.f32.gmra.mxu1 %vm766_vm7, %v1419_v29  ;;  %4312 = vmatmul.mubr.msk.f32.gmra.mxu0 %vm766_vm7, %v1668_v5 }
  0xe3   : > { %1594 = vmatprep.mubr.f32.mxu1 %v7837_v47  ;;  %1841 = vmatprep.mubr.f32.mxu0 %v7837_v47 }
  0xe6   : > { %4295 = vmatmul.mubr.msk.f32.gmra.mxu1 %vm766_vm7, %v1421_v53  ;;  %4313 = vmatmul.mubr.msk.f32.gmra.mxu0 %vm766_vm7, %v1670_v8 }
  0xe7   : > { %1600 = vmatprep.mubr.f32.mxu1 %v7837_v47  ;;  %1847 = vmatprep.mubr.f32.mxu0 %v7837_v47 }
  0xea   : > { %4296 = vmatmul.mubr.msk.f32.gmra.mxu1 %vm766_vm7, %v1420_v34  ;;  %4314 = vmatmul.mubr.msk.f32.gmra.mxu0 %vm766_vm7, %v1672_v58 }
  0xeb   : > { %2053 = vmatprep.mubr.f32.mxu1 %v7837_v47  ;;  %1853 = vmatprep.mubr.f32.mxu0 %v7837_v47 }
  0xee   : > { %4315 = vmatmul.mubr.msk.f32.gmra.mxu0 %vm766_vm7, %v1674_v51  ;;  %vm1967_vm7 = vcmask 957440  }
  0xef   : > { %2295 = vmatprep.mubr.f32.mxu0 %v7837_v47 }
 0x111   : > { %v863_v38 = vpop.f32.mrf.mxu0 }
 0x113   : > { %v5697_v40 = vpop.f32.mrf.mxu0  ;;  %v5699_v6 = vpop.f32.mrf.mxu1 }
 0x115   : > { %v869_v41 = vpop.f32.mrf.mxu0  ;;  %v5701_v44 = vpop.f32.mrf.mxu1 }
 0x117   : > { %v5703_v42 = vpop.f32.mrf.mxu0  ;;  %v5705_v61 = vpop.f32.mrf.mxu1 }
 0x119   : > { %v875_v46 = vpop.f32.mrf.mxu0  ;;  %v5707_v11 = vpop.f32.mrf.mxu1 }
 0x11b   : > { %v877_v48 = vpop.f32.mrf.mxu0  ;;  %v5709_v30 = vpop.f32.mrf.mxu1 }
 0x11d   : > { %v881_v43 = vpop.f32.mrf.mxu0  ;;  %v5711_v55 = vpop.f32.mrf.mxu1 }
 0x11f   : > { %v883_v59 = vpop.f32.mrf.mxu0  ;;  %v5713_v22 = vpop.f32.mrf.mxu1 }
 0x121   : > { %v5715_v56 = vpop.f32.mrf.mxu1  ;;  %v887_v60 = vpop.f32.mrf.mxu0 }
 0x123   : > { %v5717_v57 = vpop.f32.mrf.mxu1  ;;  %v889_v63 = vpop.f32.mrf.mxu0 }
 0x125   : > { %v5719_v3 = vpop.f32.mrf.mxu1 }
 0x129   : > { %v893_v4 = vpop.f32.mrf.mxu0 }
 0x12b   : > { %v895_v13 = vpop.f32.mrf.mxu0 }
 0x12e   : > { %v5721_v1 = vpop.f32.mrf.mxu1 }
 0x130   : > { %v5723_v39 = vpop.f32.mrf.mxu1 }
 0x131   : > { %v899_v49 = vpop.f32.mrf.mxu0 }
 0x132   : > { %v5725_v45 = vpop.f32.mrf.mxu1 }
 0x133   : > { %v901_v52 = vpop.f32.mrf.mxu0 }
 0x134   : > { %v5727_v21 = vpop.f32.mrf.mxu1 }
 0x135   : > { %v905_v54 = vpop.f32.mrf.mxu0 }
 0x136   : > { %v1048_v62 = vpop.f32.mrf.mxu1 }
 0x137   : > { %v1049_v0 = vadd.f32 %v1048_v62, %v863_v38  ;;  %v907_v32 = vpop.f32.mrf.mxu0 }
 0x138   : > { %v5729_v31 = vpop.f32.mrf.mxu1 }
 0x139   : > { %v1268_v12 = vpop.f32.mrf.mxu0 }
 0x13a   : > { %v1054_v15 = vpop.f32.mrf.mxu1  ;;  %v5731_v18 = vadd.f32 %v1268_v12, %v1049_v0 }
 0x13b   : > { %v1055_v33 = vadd.f32 %v1054_v15, %v869_v41  ;;  %v5735_v20 = vpop.f32.mrf.mxu0 }
 0x13c   : > { %v5733_v19 = vpop.f32.mrf.mxu1 }
 0x13e   : > { %v1060_v17 = vpop.f32.mrf.mxu1  ;;  %v1274_v23 = vpop.f32.mrf.mxu0 }
 0x13f   : > { %v1061_v16 = vadd.f32 %v1060_v17, %v875_v46  ;;  %v5737_v25 = vadd.f32 %v1274_v23, %v1055_v33 }
 0x140   : > { %v1062_v14 = vpop.f32.mrf.mxu1  ;;  %v5739_v7 = vpop.f32.mrf.mxu0 }
 0x141   : > { %v1063_v26 = vadd.f32 %v1062_v14, %v877_v48 }
 0x142   : > { %v1066_v27 = vpop.f32.mrf.mxu1  ;;  %v1280_v28 = vpop.f32.mrf.mxu0 }
 0x143   : > { %v1067_v2 = vadd.f32 %v1066_v27, %v881_v43  ;;  %v5741_v50 = vadd.f32 %v1280_v28, %v1061_v16 }
 0x144   : > { %v1068_v29 = vpop.f32.mrf.mxu1  ;;  %v1282_v5 = vpop.f32.mrf.mxu0 }
 0x145   : > { %v1069_v34 = vadd.f32 %v1068_v29, %v883_v59  ;;  %v5743_v10 = vadd.f32 %v1282_v5, %v1063_v26 }
 0x146   : > { %v1072_v35 = vpop.f32.mrf.mxu1  ;;  %v1286_v53 = vpop.f32.mrf.mxu0 }
 0x147   : > { %v1073_v36 = vadd.f32 %v1072_v35, %v887_v60  ;;  %v5745_v8 = vadd.f32 %v1286_v53, %v1067_v2 }
 0x148   : > { %v1074_v24 = vpop.f32.mrf.mxu1  ;;  %v1288_v58 = vpop.f32.mrf.mxu0 }
 0x149   : > { %v1075_v9 = vadd.f32 %v1074_v24, %v889_v63  ;;  %v5747_v37 = vadd.f32 %v1288_v58, %v1069_v34 }
 0x14a   : > { %v1078_v51 = vpop.f32.mrf.mxu1  ;;  %v1292_v41 = vpop.f32.mrf.mxu0 }
 0x14b   : > { %v1079_v38 = vadd.f32 %v1078_v51, %v893_v4  ;;  %v5749_v46 = vadd.f32 %v1292_v41, %v1073_v36 }
 0x14c   : > { %v1080_v48 = vpop.f32.mrf.mxu1  ;;  %v1294_v59 = vpop.f32.mrf.mxu0 }
 0x14d   : > { %7843 = vst [vmem:[#allocation4_spill] sm:$0xff] %v5749_v46  ;;  %v1081_v43 = vadd.f32 %v1080_v48, %v895_v13  ;;  %v5751_v62 = vadd.f32 %v1294_v59, %v1075_v9 }
 0x14e   : > { %v1084_v0 = vpop.f32.mrf.mxu1  ;;  %v1298_v15 = vpop.f32.mrf.mxu0 }
 0x14f   : > { %7844 = vst [vmem:[#allocation5_spill] sm:$0xff] %v5751_v62  ;;  %v1085_v60 = vadd.f32 %v1084_v0, %v899_v49  ;;  %v5753_v33 = vadd.f32 %v1298_v15, %v1079_v38 }
 0x150   : > { %v1086_v12 = vpop.f32.mrf.mxu1  ;;  %v1300_v17 = vpop.f32.mrf.mxu0 }
 0x151   : > { %7845 = vst [vmem:[#allocation6_spill] sm:$0xff] %v5753_v33  ;;  %v1087_v63 = vadd.f32 %v1086_v12, %v901_v52  ;;  %v5755_v16 = vadd.f32 %v1300_v17, %v1081_v43 }
 0x152   : > { %v1090_v23 = vpop.f32.mrf.mxu1  ;;  %v1304_v14 = vpop.f32.mrf.mxu0 }
 0x153   : > { %7846 = vst [vmem:[#allocation7_spill] sm:$0xff] %v5755_v16  ;;  %v1091_v4 = vadd.f32 %v1090_v23, %v905_v54  ;;  %v5757_v26 = vadd.f32 %v1304_v14, %v1085_v60 }
 0x154   : > { %v1092_v27 = vpop.f32.mrf.mxu1  ;;  %v1306_v2 = vpop.f32.mrf.mxu0 }
 0x155   : > { %v1093_v13 = vadd.f32 %v1092_v27, %v907_v32  ;;  %v5759_v28 = vadd.f32 %v1306_v2, %v1087_v63 }
 0x156   : > { %v1096_v29 = vpop.f32.mrf.mxu1  ;;  %v1310_v49 = vpop.f32.mrf.mxu0 }
 0x157   : > { %v5761_v34 = vadd.f32 %v1310_v49, %v1091_v4  ;;  %v1097_v52 = vadd.f32 %v1096_v29, %v5699_v6 }
 0x158   : > { %v1098_v5 = vpop.f32.mrf.mxu1  ;;  %v1312_v35 = vpop.f32.mrf.mxu0 }
 0x159   : > { %v5764_v36 = vadd.f32 %v1312_v35, %v1093_v13  ;;  %v1099_v24 = vadd.f32 %v1098_v5, %v5701_v44 }
 0x15a   : > { %v1102_v53 = vpop.f32.mrf.mxu1  ;;  %v1316_v54 = vpop.f32.mrf.mxu0 }
 0x15b   : > { %v5767_v9 = vadd.f32 %v1316_v54, %v1097_v52  ;;  %v1103_v51 = vadd.f32 %v1102_v53, %v5705_v61 }
 0x15c   : > { %v1104_v32 = vpop.f32.mrf.mxu1  ;;  %v1318_v58 = vpop.f32.mrf.mxu0 }
 0x15d   : > { %v5770_v38 = vadd.f32 %v1318_v58, %v1099_v24  ;;  %v1105_v43 = vadd.f32 %v1104_v32, %v5707_v11 }
 0x15e   : > { %v1108_v41 = vpop.f32.mrf.mxu1  ;;  %v1322_v48 = vpop.f32.mrf.mxu0 }
 0x15f   : > { %v5773_v59 = vadd.f32 %v1322_v48, %v1103_v51  ;;  %v1109_v60 = vadd.f32 %v1108_v41, %v5709_v30 }
 0x160   : > { %v1110_v6 = vpop.f32.mrf.mxu1  ;;  %v1324_v0 = vpop.f32.mrf.mxu0 }
 0x161   : > { %v5776_v15 = vadd.f32 %v1324_v0, %v1105_v43  ;;  %v1111_v63 = vadd.f32 %v1110_v6, %v5711_v55 }
 0x162   : > { %v1114_v44 = vpop.f32.mrf.mxu1  ;;  %v1328_v12 = vpop.f32.mrf.mxu0 }
 0x163   : > { %v5779_v17 = vadd.f32 %v1328_v12, %v1109_v60  ;;  %v1115_v4 = vadd.f32 %v1114_v44, %v5713_v22  ;;  %v1057_v60 = vadd.f32 %v5733_v19, %v5703_v42 }
 0x164   : > { %v1116_v61 = vpop.f32.mrf.mxu1  ;;  %v1330_v23 = vpop.f32.mrf.mxu0 }
 0x165   : > { %v5782_v14 = vadd.f32 %v1330_v23, %v1111_v63  ;;  %v1117_v30 = vadd.f32 %v1116_v61, %v5715_v56  ;;  %v1360_v61 = vadd.f32 %v5739_v7, %v1057_v60 }
 0x166   : > { %v1120_v11 = vpop.f32.mrf.mxu1  ;;  %v1334_v13 = vpop.f32.mrf.mxu0 }
 0x167   : > { %v1121_v27 = vadd.f32 %v1120_v11, %v5717_v57  ;;  %v5786_v2 = vadd.f32 %v1334_v13, %v1115_v4 }
 0x168   : > { %v1122_v29 = vpop.f32.mrf.mxu1  ;;  %v1336_v49 = vpop.f32.mrf.mxu0 }
 0x169   : > { %v5788_v5 = vadd.f32 %v1336_v49, %v1117_v30  ;;  %v1123_v22 = vadd.f32 %v1122_v29, %v5719_v3 }
 0x16a   : > { %v1126_v55 = vpop.f32.mrf.mxu1  ;;  %v1340_v52 = vpop.f32.mrf.mxu0 }
 0x16b   : > { %v1127_v35 = vadd.f32 %v1126_v55, %v5721_v1  ;;  %v5792_v53 = vadd.f32 %v1340_v52, %v1121_v27  ;;  %v1051_v1 = vadd.f32 %v5729_v31, %v5697_v40 }
 0x16c   : > { %v5794_v54 = vpop.f32.mrf.mxu1  ;;  %v1342_v57 = vpop.f32.mrf.mxu0 }
 0x16d   : > { %v5796_v24 = vadd.f32 %v1342_v57, %v1123_v22  ;;  %v1358_v48 = vadd.f32 %v5735_v20, %v1051_v1  ;;  %v1129_v46 = vadd.f32 %v5794_v54, %v5723_v39  ;;  %v1890_v39 = vld [vmem:[%s7828_s2] sm:$0x3] }
 0x16e   : > { %v5798_v56 = vpop.f32.mrf.mxu1  ;;  %v1346_v32 = vpop.f32.mrf.mxu0 }
 0x16f   : > { %v5800_v58 = vadd.f32 %v1346_v32, %v1127_v35 }
 0x170   : > { %v5802_v51 = vpop.f32.mrf.mxu1  ;;  %v5806_v41 = vpop.f32.mrf.mxu0 }
 0x172   : > { %v1518_v3 = vpop.f32.mrf.mxu1  ;;  %v5809_v43 = vpop.f32.mrf.mxu0 }
 0x173   : > { %v1607_v6 = vadd.f32 %v1518_v3, %v5731_v18 }
 0x174   : > { %v1520_v0 = vpop.f32.mrf.mxu1  ;;  %v5814_v44 = vpop.f32.mrf.mxu0 }
 0x175   : > { %v1608_v12 = vadd.f32 %v1520_v0, %v1358_v48 }
 0x176   : > { %v1524_v63 = vpop.f32.mrf.mxu1  ;;  %v1771_v31 = vpop.f32.mrf.mxu0 }
 0x177   : > { %v1609_v40 = vadd.f32 %v1524_v63, %v5737_v25  ;;  %v5818_v23 = vadd.f32 %v1771_v31, %v1607_v6 }
 0x178   : > { %v1526_v20 = vpop.f32.mrf.mxu1  ;;  %v1773_v11 = vpop.f32.mrf.mxu0 }
 0x179   : > { %7847 = vst [vmem:[#allocation8_spill] sm:$0xff] %v5818_v23  ;;  %v1610_v4 = vadd.f32 %v1526_v20, %v1360_v61  ;;  %v5820_v27 = vadd.f32 %v1773_v11, %v1608_v12 }
 0x17a   : > { %v1530_v18 = vpop.f32.mrf.mxu1  ;;  %v1777_v42 = vpop.f32.mrf.mxu0 }
 0x17b   : > { %7848 = vst [vmem:[#allocation9_spill] sm:$0xff] %v5820_v27  ;;  %v1611_v13 = vadd.f32 %v1530_v18, %v5741_v50  ;;  %v5823_v19 = vadd.f32 %v1777_v42, %v1609_v40 }
 0x17c   : > { %v1532_v30 = vpop.f32.mrf.mxu1  ;;  %v1779_v7 = vpop.f32.mrf.mxu0 }
 0x17d   : > { %7849 = vst [vmem:[#allocation10_spill] sm:$0xff] %v5823_v19  ;;  %v1612_v29 = vadd.f32 %v1532_v30, %v5743_v10  ;;  %v5826_v49 = vadd.f32 %v1779_v7, %v1610_v4 }
 0x17e   : > { %v1536_v25 = vpop.f32.mrf.mxu1  ;;  %v1783_v35 = vpop.f32.mrf.mxu0 }
 0x17f   : > { %7850 = vst [vmem:[#allocation11_spill] sm:$0xff] %v5826_v49  ;;  %v1613_v55 = vadd.f32 %v1536_v25, %v5745_v8  ;;  %v5829_v52 = vadd.f32 %v1783_v35, %v1611_v13 }
 0x180   : > { %v1538_v22 = vpop.f32.mrf.mxu1  ;;  %v1785_v32 = vpop.f32.mrf.mxu0 }
 0x181   : > { %7851 = vst [vmem:[#allocation12_spill] sm:$0xff] %v5829_v52  ;;  %v1614_v57 = vadd.f32 %v1538_v22, %v5747_v37  ;;  %v5832_v50 = vadd.f32 %v1785_v32, %v1612_v29 }
 0x182   : > { %v5834_v1 = vpop.f32.mrf.mxu1  ;;  %v1789_v3 = vpop.f32.mrf.mxu0 }
 0x183   : > { %7852 = vst [vmem:[#allocation13_spill] sm:$0xff] %v5832_v50  ;;  %7853 = vst [vmem:[#allocation14_spill] sm:$0xff] %v5834_v1  ;;  %v5836_v48 = vadd.f32 %v1789_v3, %v1613_v55  ;;  %v1892_v50 = vlaneseq }
 0x184   : > { %v5838_v10 = vpop.f32.mrf.mxu1  ;;  %v1791_v6 = vpop.f32.mrf.mxu0 }
 0x185   : > { %7854 = vst [vmem:[#allocation15_spill] sm:$0xff] %v5836_v48  ;;  %7855 = vst [vmem:[#allocation16_spill] sm:$0xff] %v5838_v10  ;;  %v5840_v0 = vadd.f32 %v1791_v6, %v1614_v57 }
 0x186   : > { %v5842_v8 = vpop.f32.mrf.mxu1  ;;  %v5844_v60 = vpop.f32.mrf.mxu0 }
 0x187   : > { %7856 = vst [vmem:[#allocation17_spill] sm:$0xff] %v5840_v0  ;;  %7857 = vst [vmem:[#allocation18_spill] sm:$0xff] %v5842_v8  ;;  %v1384_v8 = vadd.f32 %v5806_v41, %v1129_v46 }
 0x188   : > { %7858 = vst [vmem:[#allocation19_spill] sm:$0xff] %v5844_v60  ;;  %v5846_v12 = vpop.f32.mrf.mxu1  ;;  %v5848_v37 = vpop.f32.mrf.mxu0 }
 0x189   : > { %7859 = vst [vmem:[#allocation20_spill] sm:$0xff] %v5846_v12  ;;  %7860 = vst [vmem:[#allocation21_spill] sm:$0xff] %v5848_v37 }
 0x18a   : > { %v5850_v63 = vpop.f32.mrf.mxu1  ;;  %v5852_v61 = vpop.f32.mrf.mxu0 }
 0x18b   : > { %7861 = vst [vmem:[#allocation22_spill] sm:$0xff] %v5850_v63  ;;  %7862 = vst [vmem:[#allocation23_spill] sm:$0xff] %v5852_v61  ;;  %v1893_v61 = vshrl.u32 %v1892_v50, 7 }
 0x18c   : > { %v5854_v40 = vpop.f32.mrf.mxu1  ;;  %v5856_v31 = vpop.f32.mrf.mxu0 }
 0x18d   : > { %7863 = vst [vmem:[#allocation24_spill] sm:$0xff] %v5856_v31  ;;  %v1133_v31 = vadd.f32 %v5798_v56, %v5725_v45  ;;  %v5898_v45 = vsub.s32 1, %v1893_v61 }
 0x18e   : > { %v5858_v20 = vpop.f32.mrf.mxu1  ;;  %v5860_v4 = vpop.f32.mrf.mxu0 }
 0x18f   : > { %7864 = vst [vmem:[#allocation25_spill] sm:$0xff] %v5860_v4  ;;  %v1135_v4 = vadd.f32 %v5802_v51, %v5727_v21  ;;  %v1385_v33 = vadd.f32 %v5809_v43, %v1133_v31 }
 0x190   : > { %v5862_v11 = vpop.f32.mrf.mxu1  ;;  %v5864_v18 = vpop.f32.mrf.mxu0 }
 0x191   : > { %7865 = vst [vmem:[#allocation26_spill] sm:$0xff] %v5864_v18  ;;  %v5892_v18 = vsub.s32 0, %v1893_v61  ;;  %v1386_v16 = vadd.f32 %v5814_v44, %v1135_v4  ;;  %v5907_v61 = vrot.slane %v1890_v39, %v5898_v45 }
 0x192   : > { %v5866_v13 = vpop.f32.mrf.mxu1  ;;  %v5868_v42 = vpop.f32.mrf.mxu0 }
 0x193   : > { %7866 = vst [vmem:[#allocation27_spill] sm:$0xff] %v5868_v42  ;;  %v5903_v42 = vrot.slane %v1890_v39, %v5892_v18 }
 0x194   : > { %v5870_v30 = vpop.f32.mrf.mxu1  ;;  %v5872_v29 = vpop.f32.mrf.mxu0 }
 0x196   : > { %v5874_v7 = vpop.f32.mrf.mxu1  ;;  %v5876_v25 = vpop.f32.mrf.mxu0 }
 0x198   : > { %v1574_v55 = vpop.f32.mrf.mxu1  ;;  %v5878_v35 = vpop.f32.mrf.mxu0 }
 0x19a   : > { %v1578_v22 = vpop.f32.mrf.mxu1  ;;  %v5880_v57 = vpop.f32.mrf.mxu0 }
 0x19c   : > { %v1580_v32 = vpop.f32.mrf.mxu1  ;;  %v5882_v3 = vpop.f32.mrf.mxu0 }
 0x19e   : > { %v1584_v6 = vpop.f32.mrf.mxu1  ;;  %v1831_v47 = vpop.f32.mrf.mxu0 }
 0x1a0   : > { %v1586_v23 = vpop.f32.mrf.mxu1  ;;  %v1833_v27 = vpop.f32.mrf.mxu0 }
 0x1a2   : > { %v1590_v19 = vpop.f32.mrf.mxu1  ;;  %v1837_v49 = vpop.f32.mrf.mxu0 }
 0x1a3   : > { %v1631_v44 = vadd.f32 %v1590_v19, %v5792_v53  ;;  %v1627_v53 = vadd.f32 %v1578_v22, %v5779_v17  ;;  %v1624_v17 = vadd.f32 %v5870_v30, %v5770_v38  ;;  %v1622_v30 = vadd.f32 %v5862_v11, %v5764_v36 }
 0x1a4   : > { %v1592_v52 = vpop.f32.mrf.mxu1  ;;  %v1839_v48 = vpop.f32.mrf.mxu0  ;;  %v1620_v36 = vadd.f32 %v5854_v40, %v5759_v28  ;;  %v7869_v28 = vld [vmem:[#allocation7_spill] sm:$0xff]  ;;  %v7870_v40 = vld [vmem:[#allocation20_spill] sm:$0xff] }
 0x1a5   : > { %v1632_v46 = vadd.f32 %v1592_v52, %v5796_v24  ;;  %v1628_v52 = vadd.f32 %v1580_v32, %v5782_v14  ;;  %v1625_v14 = vadd.f32 %v5874_v7, %v5773_v59  ;;  %v1875_v11 = vadd.f32 %v5872_v29, %v1622_v30 }
 0x1a6   : > { %v1596_v0 = vpop.f32.mrf.mxu1  ;;  %v1843_v60 = vpop.f32.mrf.mxu0  ;;  %v1618_v29 = vadd.f32 %v7870_v40, %v7869_v28  ;;  %v7886_v40 = vld [vmem:[#allocation12_spill] sm:$0xff] }
 0x1a7   : > { %v1633_v21 = vadd.f32 %v1596_v0, %v5800_v58  ;;  %v1629_v0 = vadd.f32 %v1584_v6, %v5786_v2  ;;  %v1884_v24 = vadd.f32 %v1843_v60, %v1631_v44  ;;  %v1878_v59 = vadd.f32 %v5880_v57, %v1625_v14 }
 0x1a8   : > { %v1598_v37 = vpop.f32.mrf.mxu1  ;;  %v1845_v1 = vpop.f32.mrf.mxu0 }
 0x1a9   : > { %v1634_v54 = vadd.f32 %v1598_v37, %v1384_v8  ;;  %v1882_v19 = vadd.f32 %v1837_v49, %v1629_v0  ;;  %v1926_v60 = vadd.f32 %v5903_v42, %v1884_v24  ;;  %v1920_v39 = vadd.f32 %v5903_v42, %v1878_v59  ;;  %v7877_v24 = vld [vmem:[#allocation24_spill] sm:$0xff] }
 0x1aa   : > { %v1602_v10 = vpop.f32.mrf.mxu1  ;;  %v1849_v62 = vpop.f32.mrf.mxu0 }
 0x1ab   : > { %v1635_v56 = vadd.f32 %v1602_v10, %v1385_v33  ;;  %v1886_v4 = vadd.f32 %v1849_v62, %v1633_v21  ;;  %v1630_v33 = vadd.f32 %v1586_v23, %v5788_v5  ;;  %v1885_v10 = vadd.f32 %v1845_v1, %v1632_v46 }
 0x1ac   : > { %v1604_v12 = vpop.f32.mrf.mxu1  ;;  %v1851_v50 = vpop.f32.mrf.mxu0  ;;  %v1626_v5 = vadd.f32 %v1574_v55, %v5776_v15  ;;  %v1881_v23 = vadd.f32 %v1833_v27, %v1628_v52  ;;  %v1924_v7 = vadd.f32 %v5903_v42, %v1882_v19  ;;  %v1877_v55 = vadd.f32 %v5878_v35, %v1624_v17  ;;  %v7880_v19 = vld [vmem:[#allocation23_spill] sm:$0xff] }
 0x1ad   : > { %v1636_v41 = vadd.f32 %v1604_v12, %v1386_v16  ;;  %v1887_v43 = vadd.f32 %v1851_v50, %v1634_v54  ;;  %v1883_v8 = vadd.f32 %v1839_v48, %v1630_v33  ;;  %v1928_v37 = vadd.f32 %v5903_v42, %v1886_v4  ;;  %v7882_v17 = vld [vmem:[#allocation19_spill] sm:$0xff] }
 0x1ae   : > { %v1855_v51 = vpop.f32.mrf.mxu0  ;;  %v1927_v2 = vadd.f32 %v5907_v61, %v1885_v10  ;;  %v1880_v48 = vadd.f32 %v1831_v47, %v1627_v53  ;;  %v1879_v49 = vadd.f32 %v5882_v3, %v1626_v5  ;;  %v1623_v47 = vadd.f32 %v5866_v13, %v5767_v9  ;;  %v7875_v10 = vld [vmem:[#allocation5_spill] sm:$0xff] }
 0x1af   : > { %v1888_v31 = vadd.f32 %v1855_v51, %v1635_v56  ;;  %v1929_v12 = vadd.f32 %v5907_v61, %v1887_v43  ;;  %v1925_v15 = vadd.f32 %v5907_v61, %v1883_v8  ;;  %v5940_v38 = vmax.f32 %v1928_v37, 0.0  ;;  %v7871_v56 = vld [vmem:[#allocation26_spill] sm:$0xff] }
 0x1b0   : > { %v1857_v63 = vpop.f32.mrf.mxu0  ;;  %v1923_v22 = vadd.f32 %v5907_v61, %v1881_v23  ;;  %v5950_v9 = vmax.f32 %v1927_v2, 0.0  ;;  %v1621_v13 = vadd.f32 %v5858_v20, %v5761_v34  ;;  %v1876_v57 = vadd.f32 %v5876_v25, %v1623_v47  ;;  %v7867_v34 = vld [vmem:[#allocation22_spill] sm:$0xff]  ;;  %v7868_v25 = vld [vmem:[#allocation27_spill] sm:$0xff]  ;;  %v7881_v2 = vld [vmem:[#allocation21_spill] sm:$0xff] }
 0x1b1   : > { %v1889_v58 = vadd.f32 %v1857_v63, %v1636_v41  ;;  %v1930_v16 = vadd.f32 %v5903_v42, %v1888_v31  ;;  %v5930_v27 = vmax.f32 %v1929_v12, 0.0  ;;  %v1922_v32 = vadd.f32 %v5903_v42, %v1880_v48  ;;  %v7873_v41 = vld [vmem:[#allocation18_spill] sm:$0xff]  ;;  %v7874_v31 = vld [vmem:[#allocation25_spill] sm:$0xff]  ;;  %v7878_v12 = vld [vmem:[#allocation4_spill] sm:$0xff] }
 0x1b2   : > { %v5958_v3 = vmax.f32 %v1926_v60, 0.0  ;;  %v1921_v35 = vadd.f32 %v5907_v61, %v1879_v49  ;;  %v5966_v6 = vmax.f32 %v1925_v15, 0.0  ;;  %v1619_v20 = vadd.f32 %v7867_v34, %v5757_v26  ;;  %v7872_v26 = vld [vmem:[#allocation6_spill] sm:$0xff]  ;;  %v7884_v34 = vld [vmem:[#allocation15_spill] sm:$0xff] }
 0x1b3   : > { %v1931_v62 = vadd.f32 %v5907_v61, %v1889_v58  ;;  %v5924_v63 = vmax.f32 %v1930_v16, 0.0  ;;  %v1874_v50 = vadd.f32 %v7868_v25, %v1621_v13  ;;  %v5974_v54 = vmax.f32 %v1924_v7, 0.0  ;;  %v7876_v58 = vld [vmem:[#allocation16_spill] sm:$0xff] }
 0x1b4   : > { %v1873_v21 = vadd.f32 %v7871_v56, %v1620_v36  ;;  %v1919_v51 = vadd.f32 %v5907_v61, %v1877_v55  ;;  %v5982_v46 = vmax.f32 %v1923_v22, 0.0  ;;  %v1617_v43 = vadd.f32 %v7873_v41, %v7872_v26  ;;  %v7883_v36 = vld [vmem:[#allocation17_spill] sm:$0xff]  ;;  %v7888_v41 = vld [vmem:[#allocation10_spill] sm:$0xff] }
 0x1b5   : > { %v5919_v1 = vmax.f32 %v1931_v62, 0.0  ;;  %v1872_v44 = vadd.f32 %v7874_v31, %v1619_v20  ;;  %v1918_v4 = vadd.f32 %v5903_v42, %v1876_v57  ;;  %v5990_v33 = vmax.f32 %v1922_v32, 0.0  ;;  %v7879_v62 = vld [vmem:[#allocation14_spill] sm:$0xff] }
 0x1b6   : > { %v1616_v0 = vadd.f32 %v7876_v58, %v7875_v10  ;;  %v1871_v16 = vadd.f32 %v7877_v24, %v1618_v29  ;;  %v1917_v52 = vadd.f32 %v5907_v61, %v1875_v11  ;;  %v5998_v8 = vmax.f32 %v1921_v35, 0.0  ;;  %v7890_v58 = vld [vmem:[#allocation8_spill] sm:$0xff] }
 0x1b7   : > { %4316 = vmatprep.subr.msk.mxu1 %vm1392_vm14, %v5919_v1  ;;  %4340 = vmatprep.subr.msk.mxu0 %vm1392_vm14, %v5919_v1  ;;  %v1615_v53 = vadd.f32 %v7879_v62, %v7878_v12  ;;  %v1870_v37 = vadd.f32 %v7880_v19, %v1617_v43  ;;  %v1916_v5 = vadd.f32 %v5903_v42, %v1874_v50  ;;  %v6006_v23 = vmax.f32 %v1920_v39, 0.0  ;;  %v7885_v50 = vld [vmem:[#allocation13_spill] sm:$0xff]  ;;  %v1962_v12 = vld [vmem:[%s7829_s3] sm:$0xff]  ;;  %v4335_v62 = vld [vmem:[%s7829_s3 + $0x50] sm:$0xff] }
 0x1b8   : > { %4317 = vmatpush1.msk.msra.mxu1 %vm1392_vm14, %v5924_v63  ;;  %4341 = vmatpush1.msk.msra.mxu0 %vm1392_vm14, %v5924_v63  ;;  %v1869_v14 = vadd.f32 %v7881_v2, %v1616_v0  ;;  %v1915_v48 = vadd.f32 %v5907_v61, %v1873_v21  ;;  %v6012_v60 = vmax.f32 %v1919_v51, 0.0  ;;  %v1914_v15 = vadd.f32 %v5903_v42, %v1872_v44  ;;  %v7887_v21 = vld [vmem:[#allocation11_spill] sm:$0xff]  ;;  %v7889_v44 = vld [vmem:[#allocation9_spill] sm:$0xff]  ;;  %v2360_v2 = vld [vmem:[%s7830_s4 + $0xc0] sm:$0xff] }
 0x1b9   : > { %1993 = vmatprep.subr.mxu1 %v5930_v27  ;;  %2235 = vmatprep.subr.mxu0 %v5930_v27  ;;  %v1868_v49 = vadd.f32 %v7882_v17, %v1615_v53  ;;  %v6018_v47 = vmax.f32 %v1918_v4, 0.0  ;;  %v1913_v59 = vadd.f32 %v5907_v61, %v1871_v16  ;;  %v6023_v7 = vmax.f32 %v1917_v52, 0.0  ;;  %v1963_v19 = vld [vmem:[%s7829_s3 + $0x8] sm:$0xff] }
 0x1ba   : > { %1994 = vmatpush1.msra.mxu1 %v5940_v38  ;;  %2236 = vmatpush1.msra.mxu0 %v5940_v38  ;;  %v1912_v30 = vadd.f32 %v5903_v42, %v1870_v37  ;;  %v6028_v55 = vmax.f32 %v1916_v5, 0.0  ;;  %v1911_v22 = vadd.f32 %v5907_v61, %v1869_v14  ;;  %v6033_v13 = vmax.f32 %v1915_v48, 0.0  ;;  %v2363_v37 = vld [vmem:[%s7830_s4 + $0xd8] sm:$0xff]  ;;  %v2362_v5 = vld [vmem:[%s7830_s4 + $0xd0] sm:$0xff]  ;;  %v4323_v17 = vld [vmem:[%s7829_s3 + $0x28] sm:$0xff] }
 0x1bb   : > { %1995 = vmatprep.subr.mxu1 %v5950_v9  ;;  %2237 = vmatprep.subr.mxu0 %v5950_v9  ;;  %v1910_v57 = vadd.f32 %v5903_v42, %v1868_v49  ;;  %v6038_v32 = vmax.f32 %v1914_v15, 0.0  ;;  %v1909_v11 = vadd.f32 %v5907_v61, %v7883_v36  ;;  %v6044_v35 = vmax.f32 %v1913_v59, 0.0  ;;  %v2359_v14 = vld [vmem:[%s7830_s4 + $0xb8] sm:$0xff]  ;;  %v2358_v48 = vld [vmem:[%s7830_s4 + $0xb0] sm:$0xff]  ;;  %v2356_v59 = vld [vmem:[%s7830_s4 + $0xa0] sm:$0xff] }
 0x1bc   : > { %1996 = vmatpush1.msra.mxu1 %v5958_v3  ;;  %2238 = vmatpush1.msra.mxu0 %v5958_v3  ;;  %v1908_v20 = vadd.f32 %v5903_v42, %v7884_v34  ;;  %v6050_v25 = vmax.f32 %v1912_v30, 0.0  ;;  %v1907_v39 = vadd.f32 %v5907_v61, %v7885_v50  ;;  %v6056_v28 = vmax.f32 %v1911_v22, 0.0  ;;  %v4378_v49 = vld [vmem:[%s7830_s4 + $0x278] sm:$0xff]  ;;  %v4377_v15 = vld [vmem:[%s7830_s4 + $0x270] sm:$0xff]  ;;  %v4371_v36 = vld [vmem:[%s7830_s4 + $0x240] sm:$0xff] }
 0x1bd   : > { %1997 = vmatprep.subr.mxu1 %v5966_v6  ;;  %2239 = vmatprep.subr.mxu0 %v5966_v6  ;;  %v1906_v29 = vadd.f32 %v5903_v42, %v7886_v40  ;;  %v6062_v56 = vmax.f32 %v1910_v57, 0.0  ;;  %v1905_v51 = vadd.f32 %v5907_v61, %v7887_v21  ;;  %v6068_v26 = vmax.f32 %v1909_v11, 0.0  ;;  %v2355_v30 = vld [vmem:[%s7830_s4 + $0x98] sm:$0xff]  ;;  %v4372_v57 = vld [vmem:[%s7830_s4 + $0x248] sm:$0xff]  ;;  %v4326_v40 = vld [vmem:[%s7829_s3 + $0x40] sm:$0xff] }
 0x1be   : > { %1998 = vmatpush1.msra.mxu1 %v5974_v54  ;;  %2240 = vmatpush1.msra.mxu0 %v5974_v54  ;;  %v1904_v43 = vadd.f32 %v5903_v42, %v7888_v41  ;;  %v6074_v31 = vmax.f32 %v1908_v20, 0.0  ;;  %v1903_v4 = vadd.f32 %v5907_v61, %v7889_v44  ;;  %v6080_v10 = vmax.f32 %v1907_v39, 0.0  ;;  %v4374_v22 = vld [vmem:[%s7830_s4 + $0x258] sm:$0xff]  ;;  %v2353_v11 = vld [vmem:[%s7830_s4 + $0x88] sm:$0xff]  ;;  %v2352_v20 = vld [vmem:[%s7830_s4 + $0x80] sm:$0xff] }
 0x1bf   : > { %1999 = vmatprep.subr.mxu1 %v5982_v46  ;;  %2241 = vmatprep.subr.mxu0 %v5982_v46  ;;  %v1902_v0 = vadd.f32 %v5903_v42, %v7890_v58  ;;  %v6086_v24 = vmax.f32 %v1906_v29, 0.0  ;;  %v6090_v16 = vmax.f32 %v1905_v51, 0.0  ;;  %v7891_v53 = vmov 0.0   ;;  %v4370_v34 = vld [vmem:[%s7830_s4 + $0x238] sm:$0xff]  ;;  %v4368_v39 = vld [vmem:[%s7830_s4 + $0x228] sm:$0xff]  ;;  %v2348_v51 = vld [vmem:[%s7830_s4 + $0x60] sm:$0xff] }
 0x1c0   : > { %2000 = vmatpush1.msra.mxu1 %v5990_v33  ;;  %2242 = vmatpush1.msra.mxu0 %v5990_v33  ;;  %v6094_v61 = vmax.f32 %v1904_v43, 0.0  ;;  %v6098_v52 = vmax.f32 %v1903_v4, 0.0  ;;  %v2351_v50 = vld [vmem:[%s7830_s4 + $0x78] sm:$0xff]  ;;  %v2349_v29 = vld [vmem:[%s7830_s4 + $0x68] sm:$0xff]  ;;  %v2346_v44 = vld [vmem:[%s7830_s4 + $0x50] sm:$0xff] }
 0x1c1   : > { %2001 = vmatprep.subr.mxu1 %v5998_v8  ;;  %2243 = vmatprep.subr.mxu0 %v5998_v8  ;;  %v6102_v42 = vmax.f32 %v1902_v0, 0.0  ;;  %v4366_v21 = vld [vmem:[%s7830_s4 + $0x218] sm:$0xff]  ;;  %v4327_v43 = vld [vmem:[%s7829_s3 + $0x48] sm:$0x7f]  ;;  %v4363_v4 = vld [vmem:[%s7830_s4 + $0x200] sm:$0xff] }
 0x1c2   : > { %2002 = vmatpush1.msra.mxu1 %v6006_v23  ;;  %2244 = vmatpush1.msra.mxu0 %v6006_v23  ;;  %v2347_v41 = vld [vmem:[%s7830_s4 + $0x58] sm:$0xff]  ;;  %v2344_v0 = vld [vmem:[%s7830_s4 + $0x40] sm:$0xff] }
 0x1c3   : > { %2003 = vmatprep.subr.mxu1 %v6012_v60  ;;  %2245 = vmatprep.subr.mxu0 %v6012_v60  ;;  %v4362_v58 = vld [vmem:[%s7830_s4 + $0x1f8] sm:$0xff] }
 0x1c4   : > { %2004 = vmatpush1.msra.mxu1 %v6018_v47  ;;  %2246 = vmatpush1.msra.mxu0 %v6018_v47 }
 0x1c5   : > { %2005 = vmatprep.subr.mxu1 %v6023_v7  ;;  %2247 = vmatprep.subr.mxu0 %v6023_v7 }
 0x1c6   : > { %2006 = vmatpush1.msra.mxu1 %v6028_v55  ;;  %2248 = vmatpush1.msra.mxu0 %v6028_v55 }
 0x1c7   : > { %2007 = vmatprep.subr.mxu1 %v6033_v13  ;;  %2249 = vmatprep.subr.mxu0 %v6033_v13 }
 0x1c8   : > { %2008 = vmatpush1.msra.mxu1 %v6038_v32  ;;  %2250 = vmatpush1.msra.mxu0 %v6038_v32 }
 0x1c9   : > { %2009 = vmatprep.subr.mxu1 %v6044_v35  ;;  %2251 = vmatprep.subr.mxu0 %v6044_v35 }
 0x1ca   : > { %2010 = vmatpush1.msra.mxu1 %v6050_v25  ;;  %2252 = vmatpush1.msra.mxu0 %v6050_v25 }
 0x1cb   : > { %2011 = vmatprep.subr.mxu1 %v6056_v28  ;;  %2253 = vmatprep.subr.mxu0 %v6056_v28 }
 0x1cc   : > { %2012 = vmatpush1.msra.mxu1 %v6062_v56  ;;  %2254 = vmatpush1.msra.mxu0 %v6062_v56 }
 0x1cd   : > { %2013 = vmatprep.subr.mxu1 %v6068_v26  ;;  %2255 = vmatprep.subr.mxu0 %v6068_v26 }
 0x1ce   : > { %2014 = vmatpush1.msra.mxu1 %v6074_v31  ;;  %2256 = vmatpush1.msra.mxu0 %v6074_v31 }
 0x1cf   : > { %2015 = vmatprep.subr.mxu1 %v6080_v10  ;;  %2257 = vmatprep.subr.mxu0 %v6080_v10 }
 0x1d0   : > { %2016 = vmatpush1.msra.mxu1 %v6086_v24  ;;  %2258 = vmatpush1.msra.mxu0 %v6086_v24 }
 0x1d1   : > { %2017 = vmatprep.subr.mxu1 %v6090_v16  ;;  %2259 = vmatprep.subr.mxu0 %v6090_v16 }
 0x1d2   : > { %2018 = vmatpush1.msra.mxu1 %v6094_v61  ;;  %2260 = vmatpush1.msra.mxu0 %v6094_v61 }
 0x1d3   : > { %2019 = vmatprep.subr.mxu1 %v6098_v52  ;;  %2261 = vmatprep.subr.mxu0 %v6098_v52 }
 0x1d4   : > { %2020 = vmatpush1.msra.mxu1 %v6102_v42  ;;  %2262 = vmatpush1.msra.mxu0 %v6102_v42 }
 0x1d5   : > { %4328 = vmatprep.subr.msk.mxu1 %vm1392_vm14, %v5919_v1  ;;  %4318 = vmatmul.mubr.msk.f32.vlgmr.msra.gmra.mxu1 %vm1967_vm7, %v1962_v12  ;;  %v4336_v1 = vld [vmem:[%s7829_s3 + $0x58] sm:$0xff]  ;;  %v2341_v12 = vld [vmem:[%s7830_s4 + $0x28] sm:$0xff] }
 0x1d6   : > { %4329 = vmatpush1.msk.msra.mxu1 %vm1392_vm14, %v5924_v63  ;;  %2059 = vmatprep.mubr.f32.mxu1 %v7891_v53  ;;  %v1964_v63 = vld [vmem:[%s7829_s3 + $0x10] sm:$0xff] }
 0x1d7   : > { %2109 = vmatprep.subr.mxu1 %v5930_v27  ;;  %4342 = vmatmul.mubr.msk.f32.vlgmr.msra.gmra.mxu0 %vm1967_vm7, %v4335_v62  ;;  %v4337_v27 = vld [vmem:[%s7829_s3 + $0x60] sm:$0xff]  ;;  %v4358_v62 = vld [vmem:[%s7830_s4 + $0x1d8] sm:$0xff] }
 0x1d8   : > { %2110 = vmatpush1.msra.mxu1 %v5940_v38  ;;  %2301 = vmatprep.mubr.f32.mxu0 %v7891_v53  ;;  %v1965_v38 = vld [vmem:[%s7829_s3 + $0x18] sm:$0xff] }
 0x1d9   : > { %2111 = vmatprep.subr.mxu1 %v5950_v9  ;;  %4319 = vmatmul.mubr.msk.f32.gmra.mxu1 %vm1967_vm7, %v1963_v19  ;;  %v4338_v9 = vld [vmem:[%s7829_s3 + $0x68] sm:$0xff]  ;;  %v2340_v19 = vld [vmem:[%s7830_s4 + $0x20] sm:$0xff] }
 0x1da   : > { %2112 = vmatpush1.msra.mxu1 %v5958_v3  ;;  %2065 = vmatprep.mubr.f32.mxu1 %v7891_v53  ;;  %v1966_v3 = vld [vmem:[%s7829_s3 + $0x20] sm:$0x7f] }
 0x1db   : > { %2113 = vmatprep.subr.mxu1 %v5966_v6  ;;  %4343 = vmatmul.mubr.msk.f32.gmra.mxu0 %vm1967_vm7, %v4336_v1  ;;  %v4339_v6 = vld [vmem:[%s7829_s3 + $0x70] sm:$0x7f] }
 0x1dc   : > { %2114 = vmatpush1.msra.mxu1 %v5974_v54  ;;  %2307 = vmatprep.mubr.f32.mxu0 %v7891_v53  ;;  %v2367_v54 = vld [vmem:[%s7830_s4 + $0xf8] sm:$0xff]  ;;  %v4357_v1 = vld [vmem:[%s7830_s4 + $0x1d0] sm:$0xff] }
 0x1dd   : > { %2115 = vmatprep.subr.mxu1 %v5982_v46  ;;  %4320 = vmatmul.mubr.msk.f32.gmra.mxu1 %vm1967_vm7, %v1964_v63  ;;  %v2366_v46 = vld [vmem:[%s7830_s4 + $0xf0] sm:$0xff]  ;;  %v2339_v63 = vld [vmem:[%s7830_s4 + $0x18] sm:$0xff] }
 0x1de   : > { %2116 = vmatpush1.msra.mxu1 %v5990_v33  ;;  %2071 = vmatprep.mubr.f32.mxu1 %v7891_v53  ;;  %v2365_v33 = vld [vmem:[%s7830_s4 + $0xe8] sm:$0xff] }
 0x1df   : > { %2117 = vmatprep.subr.mxu1 %v5998_v8  ;;  %4344 = vmatmul.mubr.msk.f32.gmra.mxu0 %vm1967_vm7, %v4337_v27  ;;  %v2364_v8 = vld [vmem:[%s7830_s4 + $0xe0] sm:$0xff]  ;;  %v4356_v27 = vld [vmem:[%s7830_s4 + $0x1c8] sm:$0xff] }
 0x1e0   : > { %2118 = vmatpush1.msra.mxu1 %v6006_v23  ;;  %2313 = vmatprep.mubr.f32.mxu0 %v7891_v53  ;;  %v2361_v23 = vld [vmem:[%s7830_s4 + $0xc8] sm:$0xff] }
 0x1e1   : > { %2119 = vmatprep.subr.mxu1 %v6012_v60  ;;  %4321 = vmatmul.mubr.msk.f32.gmra.mxu1 %vm1967_vm7, %v1965_v38  ;;  %v2357_v60 = vld [vmem:[%s7830_s4 + $0xa8] sm:$0xff]  ;;  %v2338_v38 = vld [vmem:[%s7830_s4 + $0x10] sm:$0xff] }
 0x1e2   : > { %2120 = vmatpush1.msra.mxu1 %v6018_v47  ;;  %2077 = vmatprep.mubr.f32.mxu1 %v7891_v53  ;;  %v4376_v47 = vld [vmem:[%s7830_s4 + $0x268] sm:$0xff] }
 0x1e3   : > { %2121 = vmatprep.subr.mxu1 %v6023_v7  ;;  %4345 = vmatmul.mubr.msk.f32.gmra.mxu0 %vm1967_vm7, %v4338_v9  ;;  %v4375_v7 = vld [vmem:[%s7830_s4 + $0x260] sm:$0xff] }
 0x1e4   : > { %2122 = vmatpush1.msra.mxu1 %v6028_v55  ;;  %2319 = vmatprep.mubr.f32.mxu0 %v7891_v53  ;;  %v4324_v55 = vld [vmem:[%s7829_s3 + $0x30] sm:$0xff]  ;;  %v4355_v9 = vld [vmem:[%s7830_s4 + $0x1c0] sm:$0xff] }
 0x1e5   : > { %2123 = vmatprep.subr.mxu1 %v6033_v13  ;;  %4322 = vmatmul.mubr.msk.f32.gmra.mxu1 %vm1967_vm7, %v1966_v3  ;;  %v4373_v13 = vld [vmem:[%s7830_s4 + $0x250] sm:$0xff]  ;;  %v2337_v3 = vld [vmem:[%s7830_s4 + $0x8] sm:$0xff] }
 0x1e6   : > { %2124 = vmatpush1.msra.mxu1 %v6038_v32  ;;  %2169 = vmatprep.mubr.f32.mxu1 %v7891_v53  ;;  %v2354_v32 = vld [vmem:[%s7830_s4 + $0x90] sm:$0xff] }
 0x1e7   : > { %2125 = vmatprep.subr.mxu1 %v6044_v35  ;;  %4346 = vmatmul.mubr.msk.f32.gmra.mxu0 %vm1967_vm7, %v4339_v6  ;;  %v4325_v35 = vld [vmem:[%s7829_s3 + $0x38] sm:$0xff] }
 0x1e8   : > { %2126 = vmatpush1.msra.mxu1 %v6050_v25  ;;  %2582 = vmatprep.subr.mxu0 %v2367_v54  ;;  %v4369_v25 = vld [vmem:[%s7830_s4 + $0x230] sm:$0xff]  ;;  %v4354_v6 = vld [vmem:[%s7830_s4 + $0x1b8] sm:$0xff]  ;;  %v2336_v54 = vld [vmem:[%s7830_s4] sm:$0xff] }
 0x1e9   : > { %2127 = vmatprep.subr.mxu1 %v6056_v28  ;;  %2583 = vmatpush1.msra.mxu0 %v2366_v46  ;;  %v2350_v28 = vld [vmem:[%s7830_s4 + $0x70] sm:$0xff] }
 0x1ea   : > { %2128 = vmatpush1.msra.mxu1 %v6062_v56  ;;  %2584 = vmatprep.subr.mxu0 %v2365_v33  ;;  %v4367_v56 = vld [vmem:[%s7830_s4 + $0x220] sm:$0xff]  ;;  %v4353_v46 = vld [vmem:[%s7830_s4 + $0x1b0] sm:$0xff]  ;;  %v2383_v33 = vld [vmem:[%s7830_s4 + $0x178] sm:$0xff] }
 0x1eb   : > { %2129 = vmatprep.subr.mxu1 %v6068_v26  ;;  %2585 = vmatpush1.msra.mxu0 %v2364_v8  ;;  %v4365_v26 = vld [vmem:[%s7830_s4 + $0x210] sm:$0xff]  ;;  %v4352_v8 = vld [vmem:[%s7830_s4 + $0x1a8] sm:$0xff] }
 0x1ec   : > { %2130 = vmatpush1.msra.mxu1 %v6074_v31  ;;  %2586 = vmatprep.subr.mxu0 %v2363_v37  ;;  %v4364_v31 = vld [vmem:[%s7830_s4 + $0x208] sm:$0xff]  ;;  %v2382_v37 = vld [vmem:[%s7830_s4 + $0x170] sm:$0xff] }
 0x1ed   : > { %2131 = vmatprep.subr.mxu1 %v6080_v10  ;;  %2587 = vmatpush1.msra.mxu0 %v2362_v5  ;;  %v2345_v10 = vld [vmem:[%s7830_s4 + $0x48] sm:$0xff]  ;;  %v4351_v5 = vld [vmem:[%s7830_s4 + $0x1a0] sm:$0xff] }
 0x1ee   : > { %2132 = vmatpush1.msra.mxu1 %v6086_v24  ;;  %2588 = vmatprep.subr.mxu0 %v2361_v23  ;;  %v4361_v24 = vld [vmem:[%s7830_s4 + $0x1f0] sm:$0xff]  ;;  %v2381_v23 = vld [vmem:[%s7830_s4 + $0x168] sm:$0xff] }
 0x1ef   : > { %2133 = vmatprep.subr.mxu1 %v6090_v16  ;;  %2589 = vmatpush1.msra.mxu0 %v2360_v2  ;;  %v2343_v16 = vld [vmem:[%s7830_s4 + $0x38] sm:$0xff] }
 0x1f0   : > { %2134 = vmatpush1.msra.mxu1 %v6094_v61  ;;  %2590 = vmatprep.subr.mxu0 %v2359_v14  ;;  %v4360_v61 = vld [vmem:[%s7830_s4 + $0x1e8] sm:$0xff]  ;;  %v4350_v2 = vld [vmem:[%s7830_s4 + $0x198] sm:$0xff]  ;;  %v2380_v14 = vld [vmem:[%s7830_s4 + $0x160] sm:$0xff] }
 0x1f1   : > { %2135 = vmatprep.subr.mxu1 %v6098_v52  ;;  %2591 = vmatpush1.msra.mxu0 %v2358_v48  ;;  %v2342_v52 = vld [vmem:[%s7830_s4 + $0x30] sm:$0xff] }
 0x1f2   : > { %2136 = vmatpush1.msra.mxu1 %v6102_v42  ;;  %2592 = vmatprep.subr.mxu0 %v2357_v60  ;;  %v4359_v42 = vld [vmem:[%s7830_s4 + $0x1e0] sm:$0xff]  ;;  %v4349_v48 = vld [vmem:[%s7830_s4 + $0x190] sm:$0xff]  ;;  %v2379_v60 = vld [vmem:[%s7830_s4 + $0x158] sm:$0xff] }
 0x1f3   : > { %4330 = vmatmul.mubr.msk.f32.vlgmr.msra.gmra.mxu1 %vm1967_vm7, %v4323_v17  ;;  %2477 = vmatprep.subr.mxu1 %v4378_v49  ;;  %v4348_v17 = vld [vmem:[%s7830_s4 + $0x188] sm:$0xff]  ;;  %v2378_v49 = vld [vmem:[%s7830_s4 + $0x150] sm:$0xff] }
 0x1f4   : > { %2175 = vmatprep.mubr.f32.mxu1 %v7891_v53  ;;  %2478 = vmatpush1.msra.mxu1 %v4377_v15  ;;  %v4347_v15 = vld [vmem:[%s7830_s4 + $0x180] sm:$0xff] }
 0x1f5   : > { %2479 = vmatprep.subr.mxu1 %v4376_v47  ;;  %2593 = vmatpush1.msra.mxu0 %v2356_v59  ;;  %v2377_v47 = vld [vmem:[%s7830_s4 + $0x148] sm:$0xff]  ;;  %v4394_v59 = vld [vmem:[%s7830_s4 + $0x2f8] sm:$0xff] }
 0x1f6   : > { %2480 = vmatpush1.msra.mxu1 %v4375_v7  ;;  %2594 = vmatprep.subr.mxu0 %v2355_v30  ;;  %v2376_v7 = vld [vmem:[%s7830_s4 + $0x140] sm:$0xff]  ;;  %v4393_v30 = vld [vmem:[%s7830_s4 + $0x2f0] sm:$0xff] }
 0x1f7   : > { %4331 = vmatmul.mubr.msk.f32.gmra.mxu1 %vm1967_vm7, %v4324_v55  ;;  %2481 = vmatprep.subr.mxu1 %v4374_v22  ;;  %v2375_v55 = vld [vmem:[%s7830_s4 + $0x138] sm:$0xff]  ;;  %v4392_v22 = vld [vmem:[%s7830_s4 + $0x2e8] sm:$0xff] }
 0x1f8   : > { %2181 = vmatprep.mubr.f32.mxu1 %v7891_v53  ;;  %2482 = vmatpush1.msra.mxu1 %v4373_v13  ;;  %v2374_v13 = vld [vmem:[%s7830_s4 + $0x130] sm:$0xff] }
 0x1f9   : > { %2483 = vmatprep.subr.mxu1 %v4372_v57  ;;  %2595 = vmatpush1.msra.mxu0 %v2354_v32  ;;  %v4391_v57 = vld [vmem:[%s7830_s4 + $0x2e0] sm:$0xff]  ;;  %v2373_v32 = vld [vmem:[%s7830_s4 + $0x128] sm:$0xff] }
 0x1fa   : > { %2484 = vmatpush1.msra.mxu1 %v4371_v36  ;;  %2596 = vmatprep.subr.mxu0 %v2353_v11  ;;  %v4390_v36 = vld [vmem:[%s7830_s4 + $0x2d8] sm:$0xff]  ;;  %v2372_v11 = vld [vmem:[%s7830_s4 + $0x120] sm:$0xff] }
 0x1fb   : > { %4332 = vmatmul.mubr.msk.f32.gmra.mxu1 %vm1967_vm7, %v4325_v35  ;;  %2485 = vmatprep.subr.mxu1 %v4370_v34  ;;  %v4389_v35 = vld [vmem:[%s7830_s4 + $0x2d0] sm:$0xff]  ;;  %v2371_v34 = vld [vmem:[%s7830_s4 + $0x118] sm:$0xff] }
 0x1fc   : > { %2187 = vmatprep.mubr.f32.mxu1 %v7891_v53  ;;  %2597 = vmatpush1.msra.mxu0 %v2352_v20  ;;  %v4388_v20 = vld [vmem:[%s7830_s4 + $0x2c8] sm:$0xff] }
 0x1fd   : > { %2486 = vmatpush1.msra.mxu1 %v4369_v25  ;;  %2598 = vmatprep.subr.mxu0 %v2351_v50  ;;  %v2370_v25 = vld [vmem:[%s7830_s4 + $0x110] sm:$0xff]  ;;  %v4387_v50 = vld [vmem:[%s7830_s4 + $0x2c0] sm:$0xff] }
 0x1fe   : > { %2487 = vmatprep.subr.mxu1 %v4368_v39  ;;  %2599 = vmatpush1.msra.mxu0 %v2350_v28  ;;  %v2369_v39 = vld [vmem:[%s7830_s4 + $0x108] sm:$0xff]  ;;  %v4386_v28 = vld [vmem:[%s7830_s4 + $0x2b8] sm:$0xff] }
 0x1ff   : > { %4333 = vmatmul.mubr.msk.f32.gmra.mxu1 %vm1967_vm7, %v4326_v40  ;;  %2600 = vmatprep.subr.mxu0 %v2349_v29  ;;  %v2368_v40 = vld [vmem:[%s7830_s4 + $0x100] sm:$0xff]  ;;  %v4385_v29 = vld [vmem:[%s7830_s4 + $0x2b0] sm:$0xff] }
 0x200   : > { %2193 = vmatprep.mubr.f32.mxu1 %v7891_v53  ;;  %2488 = vmatpush1.msra.mxu1 %v4367_v56  ;;  %v4489_v56 = vld [vmem:[%s7830_s4 + $0x578] sm:$0xff] }
 0x201   : > { %2489 = vmatprep.subr.mxu1 %v4366_v21  ;;  %2601 = vmatpush1.msra.mxu0 %v2348_v51  ;;  %v4384_v21 = vld [vmem:[%s7830_s4 + $0x2a8] sm:$0xff]  ;;  %v4383_v51 = vld [vmem:[%s7830_s4 + $0x2a0] sm:$0xff] }
 0x202   : > { %2490 = vmatpush1.msra.mxu1 %v4365_v26  ;;  %2602 = vmatprep.subr.mxu0 %v2347_v41  ;;  %v4382_v26 = vld [vmem:[%s7830_s4 + $0x298] sm:$0xff]  ;;  %v4381_v41 = vld [vmem:[%s7830_s4 + $0x290] sm:$0xff] }
 0x203   : > { %4334 = vmatmul.mubr.msk.f32.gmra.mxu1 %vm1967_vm7, %v4327_v43  ;;  %2491 = vmatprep.subr.mxu1 %v4364_v31  ;;  %v4380_v43 = vld [vmem:[%s7830_s4 + $0x288] sm:$0xff]  ;;  %v4379_v31 = vld [vmem:[%s7830_s4 + $0x280] sm:$0xff] }
 0x204   : > { %2603 = vmatpush1.msra.mxu0 %v2346_v44  ;;  %2492 = vmatpush1.msra.mxu1 %v4363_v4  ;;  %v4436_v44 = vld [vmem:[%s7830_s4 + $0x3f8] sm:$0xff] }
 0x205   : > { %2604 = vmatprep.subr.mxu0 %v2345_v10  ;;  %2493 = vmatprep.subr.mxu1 %v4362_v58 }
 0x206   : > { %2605 = vmatpush1.msra.mxu0 %v2344_v0  ;;  %2494 = vmatpush1.msra.mxu1 %v4361_v24 }
 0x207   : > { %2606 = vmatprep.subr.mxu0 %v2343_v16  ;;  %2495 = vmatprep.subr.mxu1 %v4360_v61 }
 0x208   : > { %2607 = vmatpush1.msra.mxu0 %v2342_v52  ;;  %2496 = vmatpush1.msra.mxu1 %v4359_v42 }
 0x209   : > { %2608 = vmatprep.subr.mxu0 %v2341_v12  ;;  %2497 = vmatprep.subr.mxu1 %v4358_v62 }
 0x20a   : > { %2609 = vmatpush1.msra.mxu0 %v2340_v19  ;;  %2498 = vmatpush1.msra.mxu1 %v4357_v1 }
 0x20b   : > { %2610 = vmatprep.subr.mxu0 %v2339_v63  ;;  %2499 = vmatprep.subr.mxu1 %v4356_v27 }
 0x20c   : > { %2611 = vmatpush1.msra.mxu0 %v2338_v38  ;;  %2500 = vmatpush1.msra.mxu1 %v4355_v9 }
 0x20d   : > { %2612 = vmatprep.subr.mxu0 %v2337_v3  ;;  %2501 = vmatprep.subr.mxu1 %v4354_v6 }
 0x20e   : > { %2613 = vmatpush1.msra.mxu0 %v2336_v54  ;;  %2502 = vmatpush1.msra.mxu1 %v4353_v46 }
 0x20f   : > { %2630 = vmatprep.subr.mxu0 %v2383_v33  ;;  %2503 = vmatprep.subr.mxu1 %v4352_v8 }
 0x210   : > { %2631 = vmatpush2.msra.mxu0 %v2382_v37  ;;  %2504 = vmatpush1.msra.mxu1 %v4351_v5 }
 0x211   : > { %2632 = vmatprep.subr.mxu0 %v2381_v23  ;;  %2505 = vmatprep.subr.mxu1 %v4350_v2  ;;  %v4488_v23 = vld [vmem:[%s7830_s4 + $0x570] sm:$0xff] }
 0x212   : > { %2633 = vmatpush2.msra.mxu0 %v2380_v14  ;;  %2506 = vmatpush1.msra.mxu1 %v4349_v48 }
 0x213   : > { %2634 = vmatprep.subr.mxu0 %v2379_v60  ;;  %2507 = vmatprep.subr.mxu1 %v4348_v17  ;;  %v4487_v60 = vld [vmem:[%s7830_s4 + $0x568] sm:$0xff] }
 0x214   : > { %2635 = vmatpush2.msra.mxu0 %v2378_v49  ;;  %2508 = vmatpush1.msra.mxu1 %v4347_v15  ;;  %v4486_v49 = vld [vmem:[%s7830_s4 + $0x560] sm:$0xff] }
 0x215   : > { %2636 = vmatprep.subr.mxu0 %v2377_v47  ;;  %2525 = vmatprep.subr.mxu1 %v4394_v59  ;;  %v4485_v59 = vld [vmem:[%s7830_s4 + $0x558] sm:$0xff] }
 0x216   : > { %2637 = vmatpush2.msra.mxu0 %v2376_v7  ;;  %2526 = vmatpush2.msra.mxu1 %v4393_v30  ;;  %v4484_v30 = vld [vmem:[%s7830_s4 + $0x550] sm:$0xff] }
 0x217   : > { %2638 = vmatprep.subr.mxu0 %v2375_v55  ;;  %2527 = vmatprep.subr.mxu1 %v4392_v22 }
 0x218   : > { %2639 = vmatpush2.msra.mxu0 %v2374_v13  ;;  %2528 = vmatpush2.msra.mxu1 %v4391_v57  ;;  %v4483_v57 = vld [vmem:[%s7830_s4 + $0x548] sm:$0xff] }
 0x219   : > { %2640 = vmatprep.subr.mxu0 %v2373_v32  ;;  %2529 = vmatprep.subr.mxu1 %v4390_v36 }
 0x21a   : > { %2641 = vmatpush2.msra.mxu0 %v2372_v11  ;;  %2530 = vmatpush2.msra.mxu1 %v4389_v35 }
 0x21b   : > { %2642 = vmatprep.subr.mxu0 %v2371_v34  ;;  %2531 = vmatprep.subr.mxu1 %v4388_v20  ;;  %v4482_v34 = vld [vmem:[%s7830_s4 + $0x540] sm:$0xff] }
 0x21c   : > { %2643 = vmatpush2.msra.mxu0 %v2370_v25  ;;  %2532 = vmatpush2.msra.mxu1 %v4387_v50 }
 0x21d   : > { %2644 = vmatprep.subr.mxu0 %v2369_v39  ;;  %2533 = vmatprep.subr.mxu1 %v4386_v28  ;;  %v4435_v39 = vld [vmem:[%s7830_s4 + $0x3f0] sm:$0xff] }
 0x21e   : > { %2645 = vmatpush2.msra.mxu0 %v2368_v40  ;;  %2534 = vmatpush2.msra.mxu1 %v4385_v29 }
 0x21f   : > { %2946 = vmatprep.subr.mxu0 %v4489_v56  ;;  %2535 = vmatprep.subr.mxu1 %v4384_v21  ;;  %v4481_v56 = vld [vmem:[%s7830_s4 + $0x538] sm:$0xff] }
 0x220   : > { %2536 = vmatpush2.msra.mxu1 %v4383_v51 }
 0x221   : > { %2537 = vmatprep.subr.mxu1 %v4382_v26  ;;  %v4434_v26 = vld [vmem:[%s7830_s4 + $0x3e8] sm:$0xff] }
 0x222   : > { %2538 = vmatpush2.msra.mxu1 %v4381_v41  ;;  %v4480_v41 = vld [vmem:[%s7830_s4 + $0x530] sm:$0xff] }
 0x223   : > { %2539 = vmatprep.subr.mxu1 %v4380_v43 }
 0x224   : > { %2540 = vmatpush2.msra.mxu1 %v4379_v31 }
 0x225   : > { %2759 = vmatprep.subr.mxu1 %v4436_v44  ;;  %v4433_v44 = vld [vmem:[%s7830_s4 + $0x3e0] sm:$0xff] }
 0x295   : > { %v2055_v4 = vpop.f32.mrf.mxu1 }
 0x297   : > { %v2057_v10 = vpop.f32.mrf.mxu1  ;;  %v2297_v61 = vpop.f32.mrf.mxu0 }
 0x299   : > { %v2061_v58 = vpop.f32.mrf.mxu1  ;;  %v2299_v42 = vpop.f32.mrf.mxu0 }
 0x29b   : > { %v2063_v0 = vpop.f32.mrf.mxu1  ;;  %v2303_v62 = vpop.f32.mrf.mxu0 }
 0x29d   : > { %v2067_v24 = vpop.f32.mrf.mxu1  ;;  %v2305_v1 = vpop.f32.mrf.mxu0 }
 0x29f   : > { %v2069_v16 = vpop.f32.mrf.mxu1  ;;  %v2309_v27 = vpop.f32.mrf.mxu0 }
 0x2a1   : > { %v6509_v52 = vpop.f32.mrf.mxu1  ;;  %v2311_v6 = vpop.f32.mrf.mxu0 }
 0x2a3   : > { %v6511_v12 = vpop.f32.mrf.mxu1  ;;  %v2315_v2 = vpop.f32.mrf.mxu0 }
 0x2a5   : > { %v6513_v19 = vpop.f32.mrf.mxu1  ;;  %v2317_v22 = vpop.f32.mrf.mxu0 }
 0x2a7   : > { %v6515_v63 = vpop.f32.mrf.mxu1  ;;  %v2321_v21 = vpop.f32.mrf.mxu0 }
 0x2b3   : > { %v2171_v38 = vpop.f32.mrf.mxu1 }
 0x2b4   : > { %v2200_v9 = vmax.f32 %v2055_v4, %v2171_v38  ;;  %v4479_v4 = vld [vmem:[%s7830_s4 + $0x528] sm:$0xff] }
 0x2b5   : > { %v2173_v3 = vpop.f32.mrf.mxu1 }
 0x2b6   : > { %v2201_v54 = vmax.f32 %v2057_v10, %v2173_v3  ;;  %v6519_v37 = vmax.f32 %v2200_v9, %v2297_v61  ;;  %v4477_v9 = vld [vmem:[%s7830_s4 + $0x518] sm:$0xff]  ;;  %v4430_v3 = vld [vmem:[%s7830_s4 + $0x3c8] sm:$0xff] }
 0x2b7   : > { %v2177_v46 = vpop.f32.mrf.mxu1 }
 0x2b8   : > { %v2202_v33 = vmax.f32 %v2061_v58, %v2177_v46  ;;  %v6517_v8 = vmax.f32 %v2201_v54, %v2299_v42  ;;  %v2443_v20 = vrot.slane %v6519_v37, 1  ;;  %v2323_v42 = vpop.f32.mrf.mxu0  ;;  %v4429_v54 = vld [vmem:[%s7830_s4 + $0x3c0] sm:$0xff]  ;;  %v4475_v46 = vld [vmem:[%s7830_s4 + $0x508] sm:$0xff] }
 0x2b9   : > { %v2179_v5 = vpop.f32.mrf.mxu1 }
 0x2ba   : > { %v2203_v14 = vmax.f32 %v2063_v0, %v2179_v5  ;;  %v6524_v48 = vmax.f32 %v2202_v33, %v2303_v62  ;;  %4400 = vmatprep.mubr.msk.f32.mxu0 %vm2466_vm9, %v6517_v8  ;;  %v2446_v32 = vrot.slane %v6517_v8, 1  ;;  %v3103_v5 = vrot.slane %v6517_v8, 4 }
 0x2bb   : > { %v2183_v17 = vpop.f32.mrf.mxu1  ;;  %2647 = vmatmul.mubr.f32.vlgmr.msra.gmra.mxu0 %v6519_v37 }
 0x2bc   : > { %v2204_v15 = vmax.f32 %v2067_v24, %v2183_v17  ;;  %v6535_v47 = vmax.f32 %v2203_v14, %v2305_v1  ;;  %2947 = vmatpush1.msra.mxu0 %v4488_v23  ;;  %v2444_v55 = vrot.slane %v6524_v48, 1  ;;  %v4432_v24 = vld [vmem:[%s7830_s4 + $0x3d8] sm:$0xff]  ;;  %v4431_v1 = vld [vmem:[%s7830_s4 + $0x3d0] sm:$0xff] }
 0x2bd   : > { %2948 = vmatprep.subr.mxu0 %v4487_v60  ;;  %v2185_v7 = vpop.f32.mrf.mxu1  ;;  %v4428_v17 = vld [vmem:[%s7830_s4 + $0x3b8] sm:$0xff] }
 0x2be   : > { %v2205_v13 = vmax.f32 %v2069_v16, %v2185_v7  ;;  %2949 = vmatpush1.msra.mxu0 %v4486_v49  ;;  %4401 = vmatprep.mubr.msk.f32.mxu0 %vm2466_vm9, %v6535_v47  ;;  %v2447_v36 = vrot.slane %v6535_v47, 1  ;;  %v6551_v11 = vmax.f32 %v2204_v15, %v2309_v27  ;;  %v2445_v29 = vsel %vm736_vm4, %v2443_v20, %v2444_v55  ;;  %v4474_v49 = vld [vmem:[%s7830_s4 + $0x500] sm:$0xff]  ;;  %v4427_v7 = vld [vmem:[%s7830_s4 + $0x3b0] sm:$0xff] }
 0x2bf   : > { %2950 = vmatprep.subr.mxu0 %v4485_v59  ;;  %v2189_v35 = vpop.f32.mrf.mxu1  ;;  %2653 = vmatmul.mubr.f32.gmra.mxu0 %v6524_v48  ;;  %v3104_v23 = vrot.slane %v6535_v47, 4  ;;  %v4472_v20 = vld [vmem:[%s7830_s4 + $0x4f0] sm:$0xff] }
 0x2c0   : > { %v6558_v25 = vmax.f32 %v2205_v13, %v2311_v6  ;;  %2951 = vmatpush1.msra.mxu0 %v4484_v30  ;;  %v2448_v50 = vsel %vm736_vm4, %v2446_v32, %v2447_v36  ;;  %v2206_v28 = vmax.f32 %v6509_v52, %v2189_v35  ;;  %v2449_v10 = vrot.slane %v6551_v11, 1  ;;  %v4478_v52 = vld [vmem:[%s7830_s4 + $0x520] sm:$0xff]  ;;  %v4476_v6 = vld [vmem:[%s7830_s4 + $0x510] sm:$0xff] }
 0x2c1   : > { %2952 = vmatprep.subr.mxu0 %v4483_v57  ;;  %v2191_v40 = vpop.f32.mrf.mxu1  ;;  %4395 = vmatprep.mubr.msk.f32.mxu1 %vm2466_vm9, %v2448_v50  ;;  %v6642_v15 = vsel %vm1643_vm15, %v3103_v5, %v3104_v23  ;;  %v4473_v57 = vld [vmem:[%s7830_s4 + $0x4f8] sm:$0xff]  ;;  %v2917_v50 = vrot.slane %v6535_v47, 3  ;;  %v4463_v5 = vld [vmem:[%s7830_s4 + $0x4a8] sm:$0xff] }
 0x2c2   : > { %v2207_v51 = vmax.f32 %v6511_v12, %v2191_v40  ;;  %2953 = vmatpush1.msra.mxu0 %v4482_v34  ;;  %2542 = vmatmul.mubr.f32.vlgmr.msra.gmra.mxu1 %v2445_v29  ;;  %v2451_v43 = vrot.slane %v6558_v25, 1  ;;  %v6594_v16 = vmax.f32 %v2206_v28, %v2315_v2  ;;  %v2450_v38 = vsel %vm736_vm4, %v2444_v55, %v2449_v10  ;;  %v4426_v34 = vld [vmem:[%s7830_s4 + $0x3a8] sm:$0xff]  ;;  %v4425_v29 = vld [vmem:[%s7830_s4 + $0x3a0] sm:$0xff] }
 0x2c3   : > { %4402 = vmatprep.mubr.msk.f32.mxu0 %vm2466_vm9, %v6558_v25  ;;  %2760 = vmatpush1.msra.mxu1 %v4435_v39  ;;  %v2195_v31 = vpop.f32.mrf.mxu1  ;;  %v3100_v2 = vrot.slane %v6519_v37, 4  ;;  %v3108_v55 = vrot.slane %v6558_v25, 4 }
 0x2c4   : > { %2954 = vmatprep.subr.mxu0 %v4481_v56  ;;  %v6587_v58 = vmax.f32 %v2207_v51, %v2317_v22  ;;  %2659 = vmatmul.mubr.f32.gmra.mxu0 %v6551_v11  ;;  %v2452_v0 = vsel %vm736_vm4, %v2447_v36, %v2451_v43  ;;  %v2208_v12 = vmax.f32 %v6513_v19, %v2195_v31  ;;  %v3101_v19 = vrot.slane %v6524_v48, 4  ;;  %v4471_v56 = vld [vmem:[%s7830_s4 + $0x4e8] sm:$0xff] }
 0x2c5   : > { %2761 = vmatprep.subr.mxu1 %v4434_v26  ;;  %2955 = vmatpush1.msra.mxu0 %v4480_v41  ;;  %v2197_v61 = vpop.f32.mrf.mxu1  ;;  %v2453_v33 = vrot.slane %v6594_v16, 1  ;;  %v3106_v22 = vrot.slane %v6551_v11, 4  ;;  %v3110_v36 = vrot.slane %v6594_v16, 4  ;;  %v6669_v39 = vsel %vm1643_vm15, %v3104_v23, %v3108_v55  ;;  %v4416_v23 = vld [vmem:[%s7830_s4 + $0x358] sm:$0xff] }
 0x2c6   : > { %2762 = vmatpush1.msra.mxu1 %v4433_v44  ;;  %2956 = vmatprep.subr.mxu0 %v4479_v4  ;;  %v2209_v62 = vmax.f32 %v6515_v63, %v2197_v61  ;;  %v2455_v27 = vrot.slane %v6587_v58, 1  ;;  %v6631_v14 = vmax.f32 %v2208_v12, %v2321_v21  ;;  %v6645_v59 = vsel %vm1643_vm15, %v3100_v2, %v3101_v19  ;;  %v4424_v4 = vld [vmem:[%s7830_s4 + $0x398] sm:$0xff]  ;;  %v4423_v61 = vld [vmem:[%s7830_s4 + $0x390] sm:$0xff]  ;;  %v4462_v2 = vld [vmem:[%s7830_s4 + $0x4a0] sm:$0xff] }
 0x2c7   : > { %4396 = vmatprep.mubr.msk.f32.mxu1 %vm2466_vm9, %v2452_v0  ;;  %2763 = vmatprep.subr.mxu1 %v4432_v24  ;;  %v2454_v13 = vsel %vm736_vm4, %v2449_v10, %v2453_v33  ;;  %v3112_v32 = vrot.slane %v6587_v58, 4  ;;  %v6672_v28 = vsel %vm1643_vm15, %v3101_v19, %v3106_v22  ;;  %v6687_v51 = vsel %vm1643_vm15, %v3106_v22, %v3110_v36  ;;  %v4470_v10 = vld [vmem:[%s7830_s4 + $0x4e0] sm:$0xff]  ;;  %v4469_v24 = vld [vmem:[%s7830_s4 + $0x4d8] sm:$0xff]  ;;  %v4468_v12 = vld [vmem:[%s7830_s4 + $0x4d0] sm:$0xff] }
 0x2c8   : > { %2957 = vmatpush1.msra.mxu0 %v4478_v52  ;;  %2548 = vmatmul.mubr.f32.gmra.mxu1 %v2450_v38  ;;  %v6611_v63 = vmax.f32 %v2209_v62, %v2323_v42  ;;  %v2456_v60 = vsel %vm736_vm4, %v2451_v43, %v2455_v27  ;;  %v3114_v40 = vrot.slane %v6631_v14, 4  ;;  %v2916_v41 = vrot.slane %v6517_v8, 3  ;;  %v4422_v42 = vld [vmem:[%s7830_s4 + $0x388] sm:$0xff]  ;;  %v4421_v62 = vld [vmem:[%s7830_s4 + $0x380] sm:$0xff]  ;;  %v4465_v19 = vld [vmem:[%s7830_s4 + $0x4b8] sm:$0xff] }
 0x2c9   : > { %4403 = vmatprep.mubr.msk.f32.mxu0 %vm2466_vm9, %v6587_v58  ;;  %2764 = vmatpush1.msra.mxu1 %v4431_v1  ;;  %v6684_v21 = vsel %vm1643_vm15, %v3108_v55, %v3112_v32  ;;  %v2457_v31 = vrot.slane %v6631_v14, 1  ;;  %v4467_v1 = vld [vmem:[%s7830_s4 + $0x4c8] sm:$0xff]  ;;  %v4466_v38 = vld [vmem:[%s7830_s4 + $0x4c0] sm:$0xff]  ;;  %v4412_v22 = vld [vmem:[%s7830_s4 + $0x338] sm:$0xff] }
 0x2ca   : > { %2958 = vmatprep.subr.mxu0 %v4477_v9  ;;  %2665 = vmatmul.mubr.f32.gmra.mxu0 %v6594_v16  ;;  %v2459_v30 = vrot.slane %v6611_v63, 1  ;;  %v3116_v35 = vrot.slane %v6611_v63, 4  ;;  %v6701_v44 = vsel %vm1643_vm15, %v3110_v36, %v3114_v40  ;;  %v2918_v0 = vsel %vm1392_vm14, %v2916_v41, %v2917_v50  ;;  %v4459_v55 = vld [vmem:[%s7830_s4 + $0x488] sm:$0xff]  ;;  %v4502_v41 = vld [vmem:[%s7830_s4 + $0x5e0] sm:$0xff] }
 0x2cb   : > { %2765 = vmatprep.subr.mxu1 %v4430_v3  ;;  %2959 = vmatpush1.msra.mxu0 %v4476_v6  ;;  %v2458_v52 = vsel %vm736_vm4, %v2453_v33, %v2457_v31  ;;  %v2730_v9 = vrot.slane %v6535_v47, 2  ;;  %v4419_v3 = vld [vmem:[%s7830_s4 + $0x370] sm:$0xff]  ;;  %v2729_v6 = vrot.slane %v6517_v8, 2  ;;  %v4417_v8 = vld [vmem:[%s7830_s4 + $0x360] sm:$0xff]  ;;  %v4410_v36 = vld [vmem:[%s7830_s4 + $0x328] sm:$0xff]  ;;  %v2738_v47 = vrot.slane %v6587_v58, 2 }
 0x2cc   : > { %2766 = vmatpush1.msra.mxu1 %v4429_v54  ;;  %2960 = vmatprep.subr.mxu0 %v4475_v46  ;;  %v6692_v26 = vsel %vm1643_vm15, %v3112_v32, %v3116_v35  ;;  %v2460_v43 = vsel %vm736_vm4, %v2455_v27, %v2459_v30  ;;  %v4420_v27 = vld [vmem:[%s7830_s4 + $0x378] sm:$0xff]  ;;  %v4418_v54 = vld [vmem:[%s7830_s4 + $0x368] sm:$0xff]  ;;  %v4464_v46 = vld [vmem:[%s7830_s4 + $0x4b0] sm:$0xff]  ;;  %vm3275_vm4 = vcmask 1042432  }
 0x2cd   : > { %4397 = vmatprep.mubr.msk.f32.mxu1 %vm2466_vm9, %v2456_v60  ;;  %2767 = vmatprep.subr.mxu1 %v4428_v17  ;;  %v2731_v33 = vsel %vm1142_vm5, %v2729_v6, %v2730_v9  ;;  %v4415_v60 = vld [vmem:[%s7830_s4 + $0x350] sm:$0xff]  ;;  %v4461_v17 = vld [vmem:[%s7830_s4 + $0x498] sm:$0xff] }
 0x2ce   : > { %2961 = vmatpush1.msra.mxu0 %v4474_v49  ;;  %2554 = vmatmul.mubr.f32.gmra.mxu1 %v2454_v13  ;;  %v4414_v49 = vld [vmem:[%s7830_s4 + $0x348] sm:$0xff]  ;;  %v4458_v13 = vld [vmem:[%s7830_s4 + $0x480] sm:$0xff]  ;;  %v4505_v32 = vld [vmem:[%s7830_s4 + $0x5f8] sm:$0xff] }
 0x2cf   : > { %4404 = vmatprep.mubr.msk.f32.mxu0 %vm2466_vm9, %v6611_v63  ;;  %2768 = vmatpush1.msra.mxu1 %v4427_v7  ;;  %v4460_v7 = vld [vmem:[%s7830_s4 + $0x490] sm:$0xff] }
 0x2d0   : > { %2962 = vmatprep.subr.mxu0 %v4473_v57  ;;  %2671 = vmatmul.mubr.f32.gmra.mxu0 %v6631_v14  ;;  %v4411_v57 = vld [vmem:[%s7830_s4 + $0x330] sm:$0xff] }
 0x2d1   : > { %2769 = vmatprep.subr.mxu1 %v4426_v34  ;;  %2963 = vmatpush1.msra.mxu0 %v4472_v20  ;;  %v4504_v34 = vld [vmem:[%s7830_s4 + $0x5f0] sm:$0xff]  ;;  %v4409_v20 = vld [vmem:[%s7830_s4 + $0x320] sm:$0xff] }
 0x2d2   : > { %2770 = vmatpush1.msra.mxu1 %v4425_v29  ;;  %2964 = vmatprep.subr.mxu0 %v4471_v56  ;;  %v4503_v29 = vld [vmem:[%s7830_s4 + $0x5e8] sm:$0xff]  ;;  %v4408_v56 = vld [vmem:[%s7830_s4 + $0x318] sm:$0xff]  ;;  %v4447_v6 = vld [vmem:[%s7830_s4 + $0x450] sm:$0xff] }
 0x2d3   : > { %4506 = vmatprep.mubr.msk.f32.mxu0 %vm2466_vm9, %v2918_v0  ;;  %4398 = vmatprep.mubr.msk.f32.mxu1 %vm2466_vm9, %v2460_v43  ;;  %v4407_v43 = vld [vmem:[%s7830_s4 + $0x310] sm:$0xff]  ;;  %v4405_v0 = vld [vmem:[%s7830_s4 + $0x300] sm:$0xff] }
 0x2d4   : > { %2771 = vmatprep.subr.mxu1 %v4424_v4  ;;  %2965 = vmatpush1.msra.mxu0 %v4470_v10  ;;  %v4406_v4 = vld [vmem:[%s7830_s4 + $0x308] sm:$0xff]  ;;  %v4500_v10 = vld [vmem:[%s7830_s4 + $0x5d0] sm:$0xff] }
 0x2d5   : > { %2560 = vmatmul.mubr.f32.gmra.mxu1 %v2458_v52  ;;  %2966 = vmatprep.subr.mxu0 %v4469_v24  ;;  %v4499_v24 = vld [vmem:[%s7830_s4 + $0x5c8] sm:$0xff]  ;;  %v4498_v52 = vld [vmem:[%s7830_s4 + $0x5c0] sm:$0xff] }
 0x2d6   : > { %2772 = vmatpush1.msra.mxu1 %v4423_v61  ;;  %4399 = vmatprep.mubr.msk.f32.mxu1 %vm2466_vm9, %v2459_v30  ;;  %v4413_v30 = vld [vmem:[%s7830_s4 + $0x340] sm:$0xff]  ;;  %v4452_v61 = vld [vmem:[%s7830_s4 + $0x478] sm:$0xff] }
 0x2d7   : > { %2773 = vmatprep.subr.mxu1 %v4422_v42  ;;  %2967 = vmatpush1.msra.mxu0 %v4468_v12  ;;  %v4451_v42 = vld [vmem:[%s7830_s4 + $0x470] sm:$0xff]  ;;  %v4497_v12 = vld [vmem:[%s7830_s4 + $0x5b8] sm:$0xff] }
 0x2d8   : > { %2774 = vmatpush1.msra.mxu1 %v4421_v62  ;;  %2968 = vmatprep.subr.mxu0 %v4467_v1  ;;  %v4450_v62 = vld [vmem:[%s7830_s4 + $0x468] sm:$0xff]  ;;  %v4496_v1 = vld [vmem:[%s7830_s4 + $0x5b0] sm:$0xff] }
 0x2d9   : > { %2775 = vmatprep.subr.mxu1 %v4420_v27  ;;  %2969 = vmatpush1.msra.mxu0 %v4466_v38  ;;  %v4449_v27 = vld [vmem:[%s7830_s4 + $0x460] sm:$0xff]  ;;  %v4495_v38 = vld [vmem:[%s7830_s4 + $0x5a8] sm:$0xff] }
 0x2da   : > { %2566 = vmatmul.mubr.f32.gmra.mxu1 %v2457_v31  ;;  %2970 = vmatprep.subr.mxu0 %v4465_v19  ;;  %v4501_v31 = vld [vmem:[%s7830_s4 + $0x5d8] sm:$0xff] }
 0x2db   : > { %2776 = vmatpush1.msra.mxu1 %v4419_v3  ;;  %4453 = vmatprep.mubr.msk.f32.mxu1 %vm2466_vm9, %v2731_v33  ;;  %v4448_v19 = vld [vmem:[%s7830_s4 + $0x458] sm:$0xff]  ;;  %v4494_v3 = vld [vmem:[%s7830_s4 + $0x5a0] sm:$0xff]  ;;  %v4492_v33 = vld [vmem:[%s7830_s4 + $0x590] sm:$0xff] }
 0x2dc   : > { %2777 = vmatprep.subr.mxu1 %v4418_v54  ;;  %2971 = vmatpush1.msra.mxu0 %v4464_v46  ;;  %v4493_v54 = vld [vmem:[%s7830_s4 + $0x598] sm:$0xff]  ;;  %v4446_v46 = vld [vmem:[%s7830_s4 + $0x448] sm:$0xff] }
 0x2dd   : > { %2778 = vmatpush1.msra.mxu1 %v4417_v8  ;;  %2972 = vmatprep.subr.mxu0 %v4463_v5  ;;  %v4445_v8 = vld [vmem:[%s7830_s4 + $0x440] sm:$0xff]  ;;  %v4491_v5 = vld [vmem:[%s7830_s4 + $0x588] sm:$0xff] }
 0x2de   : > { %2779 = vmatprep.subr.mxu1 %v4416_v23  ;;  %2973 = vmatpush1.msra.mxu0 %v4462_v2  ;;  %v2914_v23 = vrot.slane %v6524_v48, 3  ;;  %v4444_v2 = vld [vmem:[%s7830_s4 + $0x438] sm:$0xff] }
 0x2df   : > { %2780 = vmatpush1.msra.mxu1 %v4415_v60  ;;  %2974 = vmatprep.subr.mxu0 %v4461_v17  ;;  %v4490_v60 = vld [vmem:[%s7830_s4 + $0x580] sm:$0xff]  ;;  %v2921_v17 = vrot.slane %v6558_v25, 3 }
 0x2e0   : > { %2781 = vmatprep.subr.mxu1 %v4414_v49  ;;  %2975 = vmatpush1.msra.mxu0 %v4460_v7  ;;  %v4443_v49 = vld [vmem:[%s7830_s4 + $0x430] sm:$0xff]  ;;  %v2913_v7 = vrot.slane %v6519_v37, 3 }
 0x2e1   : > { %2782 = vmatpush1.msra.mxu1 %v4413_v30  ;;  %2976 = vmatprep.subr.mxu0 %v4459_v55  ;;  %v4442_v30 = vld [vmem:[%s7830_s4 + $0x428] sm:$0xff] }
 0x2e2   : > { %2783 = vmatprep.subr.mxu1 %v4412_v22  ;;  %2977 = vmatpush1.msra.mxu0 %v4458_v13  ;;  %v2915_v55 = vsel %vm1392_vm14, %v2913_v7, %v2914_v23  ;;  %v4441_v22 = vld [vmem:[%s7830_s4 + $0x420] sm:$0xff]  ;;  %v2919_v13 = vrot.slane %v6551_v11, 3 }
 0x2e3   : > { %2784 = vmatpush1.msra.mxu1 %v4411_v57  ;;  %2994 = vmatprep.subr.mxu0 %v4505_v32  ;;  %v2922_v57 = vsel %vm1392_vm14, %v2917_v50, %v2921_v17  ;;  %v4440_v32 = vld [vmem:[%s7830_s4 + $0x418] sm:$0xff]  ;;  %v2727_v50 = vrot.slane %v6524_v48, 2  ;;  %v4527_v7 = vld [vmem:[%s7830_s4 + $0x680] sm:$0xff] }
 0x2e4   : > { %2785 = vmatprep.subr.mxu1 %v4410_v36  ;;  %2995 = vmatpush2.msra.mxu0 %v4504_v34  ;;  %v2925_v36 = vrot.slane %v6587_v58, 3  ;;  %v4439_v34 = vld [vmem:[%s7830_s4 + $0x410] sm:$0xff]  ;;  %v4542_v48 = vld [vmem:[%s7830_s4 + $0x6f8] sm:$0xff] }
 0x2e5   : > { %2786 = vmatpush1.msra.mxu1 %v4409_v20  ;;  %2996 = vmatprep.subr.mxu0 %v4503_v29  ;;  %v4438_v20 = vld [vmem:[%s7830_s4 + $0x408] sm:$0xff]  ;;  %v2920_v29 = vsel %vm1392_vm14, %v2914_v23, %v2919_v13  ;;  %v4531_v23 = vld [vmem:[%s7830_s4 + $0x6a0] sm:$0xff] }
 0x2e6   : > { %2787 = vmatprep.subr.mxu1 %v4408_v56  ;;  %2997 = vmatpush2.msra.mxu0 %v4502_v41  ;;  %v4437_v56 = vld [vmem:[%s7830_s4 + $0x400] sm:$0xff]  ;;  %v2734_v41 = vrot.slane %v6558_v25, 2 }
 0x2e7   : > { %2788 = vmatpush1.msra.mxu1 %v4407_v43  ;;  %2998 = vmatprep.subr.mxu0 %v4501_v31  ;;  %v2923_v43 = vrot.slane %v6594_v16, 3  ;;  %v2926_v31 = vsel %vm1392_vm14, %v2921_v17, %v2925_v36 }
 0x2e8   : > { %2789 = vmatprep.subr.mxu1 %v4406_v4  ;;  %2999 = vmatpush2.msra.mxu0 %v4500_v10  ;;  %v2726_v4 = vrot.slane %v6519_v37, 2  ;;  %v2929_v10 = vrot.slane %v6611_v63, 3  ;;  %v2735_v37 = vsel %vm1142_vm5, %v2730_v9, %v2734_v41  ;;  %v2927_v9 = vrot.slane %v6631_v14, 3 }
 0x2e9   : > { %2790 = vmatpush1.msra.mxu1 %v4405_v0  ;;  %3000 = vmatprep.subr.mxu0 %v4499_v24  ;;  %v4541_v0 = vld [vmem:[%s7830_s4 + $0x6f0] sm:$0xff]  ;;  %v2924_v24 = vsel %vm1392_vm14, %v2919_v13, %v2923_v43  ;;  %v2739_v58 = vsel %vm1142_vm5, %v2734_v41, %v2738_v47  ;;  %v4523_v13 = vld [vmem:[%s7830_s4 + $0x660] sm:$0xff] }
 0x2ea   : > { %2807 = vmatprep.subr.mxu1 %v4452_v61  ;;  %3001 = vmatpush2.msra.mxu0 %v4498_v52  ;;  %v2728_v25 = vsel %vm1142_vm5, %v2726_v4, %v2727_v50  ;;  %v4540_v61 = vld [vmem:[%s7830_s4 + $0x6e8] sm:$0xff]  ;;  %v2732_v52 = vrot.slane %v6551_v11, 2  ;;  %v4538_v11 = vld [vmem:[%s7830_s4 + $0x6d8] sm:$0xff]  ;;  %v4513_v41 = vld [vmem:[%s7830_s4 + $0x610] sm:$0xff] }
 0x2eb   : > { %2808 = vmatpush2.msra.mxu1 %v4451_v42  ;;  %3002 = vmatprep.subr.mxu0 %v4497_v12  ;;  %v2930_v42 = vsel %vm1392_vm14, %v2925_v36, %v2929_v10  ;;  %v4539_v12 = vld [vmem:[%s7830_s4 + $0x6e0] sm:$0xff]  ;;  %v4520_v36 = vld [vmem:[%s7830_s4 + $0x648] sm:$0xff]  ;;  %v4558_v4 = vld [vmem:[%s7830_s4 + $0x778] sm:$0xff] }
 0x2ec   : > { %2809 = vmatprep.subr.mxu1 %v4450_v62  ;;  %3003 = vmatpush2.msra.mxu0 %v4496_v1  ;;  %v2733_v62 = vsel %vm1142_vm5, %v2727_v50, %v2732_v52  ;;  %v4537_v1 = vld [vmem:[%s7830_s4 + $0x6d0] sm:$0xff]  ;;  %v4516_v50 = vld [vmem:[%s7830_s4 + $0x628] sm:$0xff] }
 0x2ed   : > { %2810 = vmatpush2.msra.mxu1 %v4449_v27  ;;  %3004 = vmatprep.subr.mxu0 %v4495_v38  ;;  %v2928_v27 = vsel %vm1392_vm14, %v2923_v43, %v2927_v9  ;;  %v4536_v38 = vld [vmem:[%s7830_s4 + $0x6c8] sm:$0xff] }
 0x2ee   : > { %2811 = vmatprep.subr.mxu1 %v4448_v19  ;;  %3005 = vmatpush2.msra.mxu0 %v4494_v3  ;;  %v2736_v19 = vrot.slane %v6594_v16, 2  ;;  %v4535_v3 = vld [vmem:[%s7830_s4 + $0x6c0] sm:$0xff]  ;;  %v4512_v43 = vld [vmem:[%s7830_s4 + $0x608] sm:$0xff] }
 0x2ef   : > { %2812 = vmatpush2.msra.mxu1 %v4447_v6  ;;  %3006 = vmatprep.subr.mxu0 %v4493_v54  ;;  %v2742_v6 = vrot.slane %v6611_v63, 2  ;;  %v4534_v54 = vld [vmem:[%s7830_s4 + $0x6b8] sm:$0xff] }
 0x2f0   : > { %2813 = vmatprep.subr.mxu1 %v4446_v46  ;;  %3007 = vmatpush2.msra.mxu0 %v4492_v33  ;;  %v2737_v16 = vsel %vm1142_vm5, %v2732_v52, %v2736_v19  ;;  %v4533_v46 = vld [vmem:[%s7830_s4 + $0x6b0] sm:$0xff]  ;;  %v4550_v52 = vld [vmem:[%s7830_s4 + $0x738] sm:$0xff] }
 0x2f1   : > { %2814 = vmatpush2.msra.mxu1 %v4445_v8  ;;  %3008 = vmatprep.subr.mxu0 %v4491_v5  ;;  %v2743_v33 = vsel %vm1142_vm5, %v2738_v47, %v2742_v6  ;;  %v4532_v8 = vld [vmem:[%s7830_s4 + $0x6a8] sm:$0xff]  ;;  %v2740_v5 = vrot.slane %v6631_v14, 2  ;;  %v4547_v47 = vld [vmem:[%s7830_s4 + $0x720] sm:$0xff] }
 0x2f2   : > { %2815 = vmatprep.subr.mxu1 %v4444_v2  ;;  %3009 = vmatpush2.msra.mxu0 %v4490_v60  ;;  %v4530_v2 = vld [vmem:[%s7830_s4 + $0x698] sm:$0xff]  ;;  %v4529_v60 = vld [vmem:[%s7830_s4 + $0x690] sm:$0xff] }
 0x2f3   : > { %2816 = vmatpush2.msra.mxu1 %v4443_v49  ;;  %3011 = vmatmul.mubr.f32.vlgmr.msra.gmra.mxu0 %v2915_v55  ;;  %v2741_v17 = vsel %vm1142_vm5, %v2736_v19, %v2740_v5  ;;  %v4528_v49 = vld [vmem:[%s7830_s4 + $0x688] sm:$0xff]  ;;  %v4525_v55 = vld [vmem:[%s7830_s4 + $0x670] sm:$0xff] }
 0x2f4   : > { %2817 = vmatprep.subr.mxu1 %v4442_v30  ;;  %4507 = vmatprep.mubr.msk.f32.mxu0 %vm2466_vm9, %v2922_v57  ;;  %v4526_v30 = vld [vmem:[%s7830_s4 + $0x678] sm:$0xff] }
 0x2f5   : > { %2818 = vmatpush2.msra.mxu1 %v4441_v22  ;;  %v4524_v22 = vld [vmem:[%s7830_s4 + $0x668] sm:$0xff]  ;;  %v4522_v57 = vld [vmem:[%s7830_s4 + $0x658] sm:$0xff] }
 0x2f6   : > { %2819 = vmatprep.subr.mxu1 %v4440_v32  ;;  %v4521_v32 = vld [vmem:[%s7830_s4 + $0x650] sm:$0xff] }
 0x2f7   : > { %2820 = vmatpush2.msra.mxu1 %v4439_v34  ;;  %3017 = vmatmul.mubr.f32.gmra.mxu0 %v2920_v29  ;;  %v4519_v34 = vld [vmem:[%s7830_s4 + $0x640] sm:$0xff] }
 0x2f8   : > { %2821 = vmatprep.subr.mxu1 %v4438_v20  ;;  %4508 = vmatprep.mubr.msk.f32.mxu0 %vm2466_vm9, %v2926_v31  ;;  %v4517_v20 = vld [vmem:[%s7830_s4 + $0x630] sm:$0xff]  ;;  %v4515_v29 = vld [vmem:[%s7830_s4 + $0x620] sm:$0xff] }
 0x2f9   : > { %2822 = vmatpush2.msra.mxu1 %v4437_v56  ;;  %v4514_v56 = vld [vmem:[%s7830_s4 + $0x618] sm:$0xff]  ;;  %v4511_v31 = vld [vmem:[%s7830_s4 + $0x600] sm:$0xff] }
 0x2fa   : > { %2824 = vmatmul.mubr.f32.vlgmr.msra.gmra.mxu1 %v2728_v25  ;;  %3133 = vmatprep.subr.mxu1 %v4542_v48  ;;  %v4557_v48 = vld [vmem:[%s7830_s4 + $0x770] sm:$0xff]  ;;  %v4555_v25 = vld [vmem:[%s7830_s4 + $0x760] sm:$0xff] }
 0x2fb   : > { %4454 = vmatprep.mubr.msk.f32.mxu1 %vm2466_vm9, %v2735_v37  ;;  %3023 = vmatmul.mubr.f32.gmra.mxu0 %v2924_v24  ;;  %v4553_v37 = vld [vmem:[%s7830_s4 + $0x750] sm:$0xff]  ;;  %v4552_v24 = vld [vmem:[%s7830_s4 + $0x748] sm:$0xff] }
 0x2fc   : > { %3134 = vmatpush1.msra.mxu1 %v4541_v0  ;;  %4509 = vmatprep.mubr.msk.f32.mxu0 %vm2466_vm9, %v2930_v42  ;;  %v4554_v0 = vld [vmem:[%s7830_s4 + $0x758] sm:$0xff]  ;;  %v4549_v42 = vld [vmem:[%s7830_s4 + $0x730] sm:$0xff] }
 0x2fd   : > { %3135 = vmatprep.subr.mxu1 %v4540_v61  ;;  %v4551_v61 = vld [vmem:[%s7830_s4 + $0x740] sm:$0xff] }
 0x2fe   : > { %3136 = vmatpush1.msra.mxu1 %v4539_v12  ;;  %v4548_v12 = vld [vmem:[%s7830_s4 + $0x728] sm:$0xff] }
 0x2ff   : > { %2830 = vmatmul.mubr.f32.gmra.mxu1 %v2733_v62  ;;  %3137 = vmatprep.subr.mxu1 %v4538_v11  ;;  %v4545_v11 = vld [vmem:[%s7830_s4 + $0x710] sm:$0xff]  ;;  %v4544_v62 = vld [vmem:[%s7830_s4 + $0x708] sm:$0xff] }
 0x300   : > { %4455 = vmatprep.mubr.msk.f32.mxu1 %vm2466_vm9, %v2739_v58  ;;  %3029 = vmatmul.mubr.f32.gmra.mxu0 %v2928_v27 }
 0x301   : > { %3138 = vmatpush1.msra.mxu1 %v4537_v1  ;;  %4510 = vmatprep.mubr.msk.f32.mxu0 %vm2466_vm9, %v2929_v10  ;;  %v4556_v10 = vld [vmem:[%s7830_s4 + $0x768] sm:$0xff]  ;;  %v4543_v1 = vld [vmem:[%s7830_s4 + $0x700] sm:$0xff] }
 0x302   : > { %3139 = vmatprep.subr.mxu1 %v4536_v38 }
 0x303   : > { %3140 = vmatpush1.msra.mxu1 %v4535_v3 }
 0x304   : > { %2836 = vmatmul.mubr.f32.gmra.mxu1 %v2737_v16  ;;  %3141 = vmatprep.subr.mxu1 %v4534_v54 }
 0x305   : > { %4456 = vmatprep.mubr.msk.f32.mxu1 %vm2466_vm9, %v2743_v33  ;;  %3035 = vmatmul.mubr.f32.gmra.mxu0 %v2927_v9  ;;  %v4546_v9 = vld [vmem:[%s7830_s4 + $0x718] sm:$0xff] }
 0x306   : > { %3142 = vmatpush1.msra.mxu1 %v4533_v46  ;;  %3346 = vmatprep.mubr.f32.mxu0 %v7891_v53 }
 0x307   : > { %3143 = vmatprep.subr.mxu1 %v4532_v8 }
 0x308   : > { %3144 = vmatpush1.msra.mxu1 %v4531_v23 }
 0x309   : > { %2842 = vmatmul.mubr.f32.gmra.mxu1 %v2741_v17  ;;  %3145 = vmatprep.subr.mxu1 %v4530_v2 }
 0x30a   : > { %4457 = vmatprep.mubr.msk.f32.mxu1 %vm2466_vm9, %v2742_v6  ;;  %3146 = vmatpush1.msra.mxu1 %v4529_v60 }
 0x30b   : > { %3147 = vmatprep.subr.mxu1 %v4528_v49 }
 0x30c   : > { %3148 = vmatpush1.msra.mxu1 %v4527_v7 }
 0x30d   : > { %2848 = vmatmul.mubr.f32.gmra.mxu1 %v2740_v5  ;;  %3149 = vmatprep.subr.mxu1 %v4526_v30 }
 0x30e   : > { %3150 = vmatpush1.msra.mxu1 %v4525_v55  ;;  %4559 = vmatprep.mubr.msk.f32.mxu1 %vm2466_vm9, %v6642_v15  ;;  %v4518_v15 = vld [vmem:[%s7830_s4 + $0x638] sm:$0xff] }
 0x30f   : > { %3151 = vmatprep.subr.mxu1 %v4524_v22 }
 0x310   : > { %3152 = vmatpush1.msra.mxu1 %v4523_v13 }
 0x311   : > { %3153 = vmatprep.subr.mxu1 %v4522_v57 }
 0x312   : > { %3154 = vmatpush1.msra.mxu1 %v4521_v32 }
 0x313   : > { %3155 = vmatprep.subr.mxu1 %v4520_v36 }
 0x314   : > { %3156 = vmatpush1.msra.mxu1 %v4519_v34 }
 0x315   : > { %3157 = vmatprep.subr.mxu1 %v4518_v15 }
 0x316   : > { %3158 = vmatpush1.msra.mxu1 %v4517_v20 }
 0x317   : > { %3159 = vmatprep.subr.mxu1 %v4516_v50 }
 0x318   : > { %3160 = vmatpush1.msra.mxu1 %v4515_v29 }
 0x319   : > { %3161 = vmatprep.subr.mxu1 %v4514_v56 }
 0x31a   : > { %3162 = vmatpush1.msra.mxu1 %v4513_v41 }
 0x31b   : > { %3163 = vmatprep.subr.mxu1 %v4512_v43 }
 0x31c   : > { %3164 = vmatpush1.msra.mxu1 %v4511_v31 }
 0x31d   : > { %3181 = vmatprep.subr.mxu1 %v4558_v4 }
 0x31e   : > { %3182 = vmatpush2.msra.mxu1 %v4557_v48 }
 0x31f   : > { %3183 = vmatprep.subr.mxu1 %v4556_v10 }
 0x320   : > { %3184 = vmatpush2.msra.mxu1 %v4555_v25 }
 0x321   : > { %3185 = vmatprep.subr.mxu1 %v4554_v0 }
 0x322   : > { %3186 = vmatpush2.msra.mxu1 %v4553_v37 }
 0x323   : > { %3187 = vmatprep.subr.mxu1 %v4552_v24 }
 0x324   : > { %3188 = vmatpush2.msra.mxu1 %v4551_v61 }
 0x325   : > { %3189 = vmatprep.subr.mxu1 %v4550_v52 }
 0x326   : > { %3190 = vmatpush2.msra.mxu1 %v4549_v42 }
 0x327   : > { %3191 = vmatprep.subr.mxu1 %v4548_v12 }
 0x328   : > { %3192 = vmatpush2.msra.mxu1 %v4547_v47 }
 0x329   : > { %3193 = vmatprep.subr.mxu1 %v4546_v9 }
 0x32a   : > { %3194 = vmatpush2.msra.mxu1 %v4545_v11 }
 0x32b   : > { %3195 = vmatprep.subr.mxu1 %v4544_v62 }
 0x32c   : > { %3196 = vmatpush2.msra.mxu1 %v4543_v1 }
 0x32d   : > { %3198 = vmatmul.mubr.f32.vlgmr.msra.gmra.mxu1 %v6645_v59 }
 0x32e   : > { %4560 = vmatprep.mubr.msk.f32.mxu1 %vm2466_vm9, %v6669_v39 }
 0x331   : > { %3204 = vmatmul.mubr.f32.gmra.mxu1 %v6672_v28 }
 0x332   : > { %4561 = vmatprep.mubr.msk.f32.mxu1 %vm2466_vm9, %v6684_v21 }
 0x335   : > { %3210 = vmatmul.mubr.f32.gmra.mxu1 %v6687_v51 }
 0x336   : > { %4562 = vmatprep.mubr.msk.f32.mxu1 %vm2466_vm9, %v6692_v26 }
 0x339   : > { %3216 = vmatmul.mubr.f32.gmra.mxu1 %v6701_v44 }
 0x33a   : > { %4563 = vmatprep.mubr.msk.f32.mxu1 %vm2466_vm9, %v3116_v35 }
 0x33d   : > { %3222 = vmatmul.mubr.f32.gmra.mxu1 %v3114_v40 }
 0x33e   : > { %3500 = vmatprep.mubr.f32.mxu1 %v7891_v53 }
 0x37b   : > { %v2648_v58 = vpop.f32.mrf.mxu0 }
 0x37d   : > { %v2650_v26 = vpop.f32.mrf.mxu0 }
 0x37f   : > { %v2654_v44 = vpop.f32.mrf.mxu0 }
 0x381   : > { %v2656_v63 = vpop.f32.mrf.mxu0 }
 0x382   : > { %v7116_v59 = vpop.f32.mrf.mxu1 }
 0x384   : > { %v2545_v39 = vpop.f32.mrf.mxu1  ;;  %v2660_v35 = vpop.f32.mrf.mxu0 }
 0x385   : > { %v2651_v11 = vadd.f32 %v2650_v26, %v2545_v39 }
 0x386   : > { %v2662_v14 = vpop.f32.mrf.mxu0 }
 0x388   : > { %v2549_v28 = vpop.f32.mrf.mxu1 }
 0x389   : > { %v2655_v62 = vadd.f32 %v2654_v44, %v2549_v28 }
 0x38a   : > { %v2551_v21 = vpop.f32.mrf.mxu1  ;;  %v2666_v54 = vpop.f32.mrf.mxu0 }
 0x38b   : > { %v2657_v12 = vadd.f32 %v2656_v63, %v2551_v21 }
 0x38c   : > { %v2668_v46 = vpop.f32.mrf.mxu0 }
 0x38e   : > { %v2555_v51 = vpop.f32.mrf.mxu1 }
 0x38f   : > { %v2661_v24 = vadd.f32 %v2660_v35, %v2555_v51 }
 0x390   : > { %v2557_v27 = vpop.f32.mrf.mxu1  ;;  %v2672_v8 = vpop.f32.mrf.mxu0 }
 0x391   : > { %v2663_v10 = vadd.f32 %v2662_v14, %v2557_v27 }
 0x392   : > { %v2674_v23 = vpop.f32.mrf.mxu0 }
 0x395   : > { %v2561_v38 = vpop.f32.mrf.mxu1 }
 0x396   : > { %v2667_v4 = vadd.f32 %v2666_v54, %v2561_v38  ;;  %v3238_v38 = vld [vmem:[%s7831_s5] sm:$0x3] }
 0x397   : > { %v2563_v19 = vpop.f32.mrf.mxu1  ;;  %v3243_v44 = vrot.slane %v3238_v38, %v5892_v18 }
 0x398   : > { %v2669_v43 = vadd.f32 %v2668_v46, %v2563_v19 }
 0x39a   : > { %v2567_v3 = vpop.f32.mrf.mxu1 }
 0x39b   : > { %v2673_v31 = vadd.f32 %v2672_v8, %v2567_v3  ;;  %v2649_v3 = vadd.f32 %v2648_v58, %v7116_v59 }
 0x39c   : > { %v2569_v6 = vpop.f32.mrf.mxu1 }
 0x39d   : > { %v2675_v25 = vadd.f32 %v2674_v23, %v2569_v6  ;;  %v3247_v23 = vrot.slane %v3238_v38, %v5898_v45  ;;  %v3690_v38 = vld [vmem:[%s7833_s7 + $0xc8] sm:$0xff] }
 0x3b3   : > { %v7118_v60 = vpop.f32.mrf.mxu0 }
 0x3b5   : > { %v3014_v49 = vpop.f32.mrf.mxu0 }
 0x3b7   : > { %v3018_v30 = vpop.f32.mrf.mxu0 }
 0x3b9   : > { %v3020_v22 = vpop.f32.mrf.mxu0 }
 0x3ba   : > { %v2825_v40 = vpop.f32.mrf.mxu1 }
 0x3bb   : > { %v3024_v57 = vpop.f32.mrf.mxu0  ;;  %v2854_v26 = vadd.f32 %v2825_v40, %v2649_v3  ;;  %v4613_v3 = vld [vmem:[%s7833_s7 + $0x2f0] sm:$0xff] }
 0x3bc   : > { %v2827_v16 = vpop.f32.mrf.mxu1 }
 0x3bd   : > { %v3026_v36 = vpop.f32.mrf.mxu0  ;;  %v2855_v51 = vadd.f32 %v2827_v16, %v2651_v11  ;;  %v3693_v11 = vld [vmem:[%s7833_s7 + $0xe0] sm:$0xff] }
 0x3bf   : > { %v2831_v33 = vpop.f32.mrf.mxu1 }
 0x3c0   : > { %v3030_v20 = vpop.f32.mrf.mxu0  ;;  %v2856_v35 = vadd.f32 %v2831_v33, %v2655_v62  ;;  %v3692_v62 = vld [vmem:[%s7833_s7 + $0xd8] sm:$0xff] }
 0x3c1   : > { %v2833_v5 = vpop.f32.mrf.mxu1 }
 0x3c2   : > { %v3032_v56 = vpop.f32.mrf.mxu0  ;;  %v3043_v58 = vadd.f32 %v3018_v30, %v2856_v35  ;;  %v4612_v35 = vld [vmem:[%s7833_s7 + $0x2e8] sm:$0xff] }
 0x3c4   : > { %v2837_v2 = vpop.f32.mrf.mxu1 }
 0x3c5   : > { %v3036_v61 = vpop.f32.mrf.mxu0  ;;  %v2858_v1 = vadd.f32 %v2837_v2, %v2661_v24  ;;  %v4571_v24 = vld [vmem:[%s7832_s6 + $0x10] sm:$0x7f] }
 0x3c6   : > { %v2839_v17 = vpop.f32.mrf.mxu1 }
 0x3c7   : > { %v2859_v47 = vadd.f32 %v2839_v17, %v2663_v10  ;;  %v3038_v6 = vpop.f32.mrf.mxu0  ;;  %v3045_v46 = vadd.f32 %v3024_v57, %v2858_v1  ;;  %v3691_v1 = vld [vmem:[%s7833_s7 + $0xd0] sm:$0xff] }
 0x3c9   : > { %v2843_v7 = vpop.f32.mrf.mxu1  ;;  %v3046_v63 = vadd.f32 %v3026_v36, %v2859_v47  ;;  %v3695_v47 = vld [vmem:[%s7833_s7 + $0xf0] sm:$0xff] }
 0x3ca   : > { %v2860_v52 = vadd.f32 %v2843_v7, %v2667_v4  ;;  %v3042_v7 = vadd.f32 %v3014_v49, %v2855_v51  ;;  %v3689_v51 = vld [vmem:[%s7833_s7 + $0xc0] sm:$0xff] }
 0x3cb   : > { %v2845_v55 = vpop.f32.mrf.mxu1 }
 0x3cc   : > { %v2861_v0 = vadd.f32 %v2845_v55, %v2669_v43  ;;  %v3047_v14 = vadd.f32 %v3030_v20, %v2860_v52  ;;  %v7894_v52 = vmov 0.0  }
 0x3cd   : > { %v2849_v13 = vpop.f32.mrf.mxu1 }
 0x3ce   : > { %v2862_v37 = vadd.f32 %v2849_v13, %v2673_v31  ;;  %v3048_v27 = vadd.f32 %v3032_v56, %v2861_v0 }
 0x3cf   : > { %v2851_v32 = vpop.f32.mrf.mxu1 }
 0x3d0   : > { %v2863_v9 = vadd.f32 %v2851_v32, %v2675_v25  ;;  %v3049_v19 = vadd.f32 %v3036_v61, %v2862_v37  ;;  %v3041_v32 = vadd.f32 %v7118_v60, %v2854_v26  ;;  %v3270_v37 = vld [vmem:[%s7832_s6] sm:$0x7f]  ;;  %v4567_v61 = vld [vmem:[%s7832_s6 + $0x8] sm:$0x7f] }
 0x3d1   : > { %v4608_v26 = vld [vmem:[%s7833_s7 + $0x2c8] sm:$0xff] }
 0x3d2   : > { %v3050_v28 = vadd.f32 %v3038_v6, %v2863_v9  ;;  %v3694_v9 = vld [vmem:[%s7833_s7 + $0xe8] sm:$0xff]  ;;  %v3688_v6 = vld [vmem:[%s7833_s7 + $0xb8] sm:$0xff] }
 0x3ed   : > { %v7120_v34 = vpop.f32.mrf.mxu1 }
 0x3ee   : > { %7892 = vst [vmem:[#allocation22_spill] sm:$0xff] %v7120_v34  ;;  %v2857_v34 = vadd.f32 %v2833_v5, %v2657_v12  ;;  %v3696_v12 = vld [vmem:[%s7833_s7 + $0xf8] sm:$0xff] }
 0x3ef   : > { %v3201_v15 = vpop.f32.mrf.mxu1 }
 0x3f0   : > { %v3044_v2 = vadd.f32 %v3020_v22, %v2857_v34  ;;  %v3229_v57 = vadd.f32 %v3201_v15, %v3042_v7  ;;  %v4602_v7 = vld [vmem:[%s7833_s7 + $0x298] sm:$0xff] }
 0x3f1   : > { %v3205_v50 = vpop.f32.mrf.mxu1 }
 0x3f2   : > { %v3230_v40 = vadd.f32 %v3205_v50, %v3043_v58  ;;  %v3251_v15 = vadd.f32 %v3247_v23, %v3229_v57  ;;  %v3680_v58 = vld [vmem:[%s7833_s7 + $0x78] sm:$0xff]  ;;  %v3675_v57 = vld [vmem:[%s7833_s7 + $0x50] sm:$0xff] }
 0x3f3   : > { %v3207_v29 = vpop.f32.mrf.mxu1 }
 0x3f4   : > { %v3231_v55 = vadd.f32 %v3207_v29, %v3044_v2  ;;  %v3252_v60 = vadd.f32 %v3243_v44, %v3230_v40  ;;  %v7154_v25 = vmax.f32 %v3251_v15, 0.0  ;;  %v4605_v2 = vld [vmem:[%s7833_s7 + $0x2b0] sm:$0xff]  ;;  %v3676_v40 = vld [vmem:[%s7833_s7 + $0x58] sm:$0xff] }
 0x3f5   : > { %v3211_v41 = vpop.f32.mrf.mxu1  ;;  %v7893_v43 = vld [vmem:[#allocation22_spill] sm:$0xff] }
 0x3f6   : > { %v3232_v16 = vadd.f32 %v3211_v41, %v3045_v46  ;;  %v3228_v22 = vadd.f32 %v7893_v43, %v3041_v32  ;;  %v3253_v30 = vadd.f32 %v3247_v23, %v3231_v55  ;;  %v3262_v10 = vmax.f32 %v3252_v60, 0.0  ;;  %v4607_v46 = vld [vmem:[%s7833_s7 + $0x2c0] sm:$0xff]  ;;  %v3678_v55 = vld [vmem:[%s7833_s7 + $0x68] sm:$0xff]  ;;  %v4597_v43 = vld [vmem:[%s7833_s7 + $0x270] sm:$0xff] }
 0x3f7   : > { %v3213_v48 = vpop.f32.mrf.mxu1  ;;  %v4600_v32 = vld [vmem:[%s7833_s7 + $0x288] sm:$0xff]  ;;  %v4594_v60 = vld [vmem:[%s7833_s7 + $0x258] sm:$0xff]  ;;  %v4593_v15 = vld [vmem:[%s7833_s7 + $0x250] sm:$0xff] }
 0x3f8   : > { %v3233_v17 = vadd.f32 %v3213_v48, %v3046_v63  ;;  %v3254_v34 = vadd.f32 %v3243_v44, %v3232_v16  ;;  %v3250_v29 = vadd.f32 %v3243_v44, %v3228_v22  ;;  %v3263_v48 = vmax.f32 %v3253_v30, 0.0  ;;  %v4610_v63 = vld [vmem:[%s7833_s7 + $0x2d8] sm:$0xff]  ;;  %v4603_v16 = vld [vmem:[%s7833_s7 + $0x2a0] sm:$0xff] }
 0x3f9   : > { %v3217_v42 = vpop.f32.mrf.mxu1  ;;  %v3673_v22 = vld [vmem:[%s7833_s7 + $0x40] sm:$0xff] }
 0x3fa   : > { %v3234_v8 = vadd.f32 %v3217_v42, %v3047_v14  ;;  %v3255_v20 = vadd.f32 %v3247_v23, %v3233_v17  ;;  %v3264_v4 = vmax.f32 %v3254_v34, 0.0  ;;  %v7156_v0 = vmax.f32 %v3250_v29, 0.0  ;;  %v4579_v42 = vld [vmem:[%s7832_s6 + $0x20] sm:$0x7f]  ;;  %v4596_v34 = vld [vmem:[%s7833_s7 + $0x268] sm:$0xff] }
 0x3fb   : > { %v3219_v53 = vpop.f32.mrf.mxu1  ;;  %v4611_v14 = vld [vmem:[%s7833_s7 + $0x2e0] sm:$0xff]  ;;  %v4592_v29 = vld [vmem:[%s7833_s7 + $0x248] sm:$0xff] }
 0x3fc   : > { %v3235_v54 = vadd.f32 %v3219_v53, %v3048_v27  ;;  %v3256_v36 = vadd.f32 %v3243_v44, %v3234_v8  ;;  %v7146_v50 = vmax.f32 %v3255_v20, 0.0  ;;  %v4575_v27 = vld [vmem:[%s7832_s6 + $0x18] sm:$0x7f]  ;;  %v3683_v8 = vld [vmem:[%s7833_s7 + $0x90] sm:$0xff]  ;;  %v3681_v17 = vld [vmem:[%s7833_s7 + $0x80] sm:$0xff] }
 0x3fd   : > { %v3223_v21 = vpop.f32.mrf.mxu1  ;;  %v4598_v20 = vld [vmem:[%s7833_s7 + $0x278] sm:$0xff]  ;;  %v4595_v30 = vld [vmem:[%s7833_s7 + $0x260] sm:$0xff] }
 0x3fe   : > { %v3236_v39 = vadd.f32 %v3223_v21, %v3049_v19  ;;  %v3257_v13 = vadd.f32 %v3247_v23, %v3235_v54  ;;  %v7140_v49 = vmax.f32 %v3256_v36, 0.0  ;;  %v4614_v19 = vld [vmem:[%s7833_s7 + $0x2f8] sm:$0xff]  ;;  %v3687_v21 = vld [vmem:[%s7833_s7 + $0xb0] sm:$0xff]  ;;  %v3686_v54 = vld [vmem:[%s7833_s7 + $0xa8] sm:$0xff] }
 0x3ff   : > { %v3225_v5 = vpop.f32.mrf.mxu1  ;;  %v4599_v36 = vld [vmem:[%s7833_s7 + $0x280] sm:$0xff] }
 0x400   : > { %v3237_v59 = vadd.f32 %v3225_v5, %v3050_v28  ;;  %v3258_v33 = vadd.f32 %v3243_v44, %v3236_v39  ;;  %v7134_v41 = vmax.f32 %v3257_v13, 0.0  ;;  %v4609_v39 = vld [vmem:[%s7833_s7 + $0x2d0] sm:$0xff]  ;;  %v3685_v28 = vld [vmem:[%s7833_s7 + $0xa0] sm:$0xff]  ;;  %v3684_v44 = vld [vmem:[%s7833_s7 + $0x98] sm:$0xff] }
 0x401   : > { %v4606_v5 = vld [vmem:[%s7833_s7 + $0x2b8] sm:$0xff]  ;;  %v4601_v13 = vld [vmem:[%s7833_s7 + $0x290] sm:$0xff] }
 0x402   : > { %v3259_v53 = vadd.f32 %v3247_v23, %v3237_v59  ;;  %v7132_v31 = vmax.f32 %v3258_v33, 0.0  ;;  %v3682_v23 = vld [vmem:[%s7833_s7 + $0x88] sm:$0xff]  ;;  %v3679_v33 = vld [vmem:[%s7833_s7 + $0x70] sm:$0xff] }
 0x403   : > { %v4604_v59 = vld [vmem:[%s7833_s7 + $0x2a8] sm:$0xff] }
 0x404   : > { %v7129_v56 = vmax.f32 %v3259_v53, 0.0  ;;  %v3677_v53 = vld [vmem:[%s7833_s7 + $0x60] sm:$0xff] }
 0x406   : > { %4564 = vmatprep.subr.msk.mxu0 %vm3275_vm4, %v7129_v56  ;;  %4572 = vmatprep.subr.msk.mxu1 %vm3275_vm4, %v7129_v56 }
 0x407   : > { %4565 = vmatpush1.msk.msra.mxu0 %vm3275_vm4, %v7132_v31  ;;  %4573 = vmatpush1.msk.msra.mxu1 %vm3275_vm4, %v7132_v31 }
 0x408   : > { %3306 = vmatprep.subr.mxu0 %v7134_v41  ;;  %3460 = vmatprep.subr.mxu1 %v7134_v41 }
 0x409   : > { %3307 = vmatpush1.msra.mxu0 %v7140_v49  ;;  %3461 = vmatpush1.msra.mxu1 %v7140_v49 }
 0x40a   : > { %3308 = vmatprep.subr.mxu0 %v7146_v50  ;;  %3462 = vmatprep.subr.mxu1 %v7146_v50 }
 0x40b   : > { %3309 = vmatpush1.msra.mxu0 %v3264_v4  ;;  %3463 = vmatpush1.msra.mxu1 %v3264_v4 }
 0x40c   : > { %3310 = vmatprep.subr.mxu0 %v3263_v48  ;;  %3464 = vmatprep.subr.mxu1 %v3263_v48 }
 0x40d   : > { %3311 = vmatpush1.msra.mxu0 %v3262_v10  ;;  %3465 = vmatpush1.msra.mxu1 %v3262_v10 }
 0x40e   : > { %3312 = vmatprep.subr.mxu0 %v7154_v25  ;;  %3466 = vmatprep.subr.mxu1 %v7154_v25 }
 0x40f   : > { %3313 = vmatpush1.msra.mxu0 %v7156_v0  ;;  %3467 = vmatpush1.msra.mxu1 %v7156_v0 }
 0x410   : > { %4568 = vmatprep.subr.msk.mxu0 %vm3275_vm4, %v7129_v56  ;;  %4580 = vmatprep.subr.msk.mxu1 %vm3275_vm4, %v7129_v56 }
 0x411   : > { %4566 = vmatmul.mubr.msk.f32.vlgmr.msra.gmra.mxu0 %vm3271_vm10, %v3270_v37  ;;  %4574 = vmatmul.mubr.msk.f32.vlgmr.msra.gmra.mxu1 %vm3271_vm10, %v4571_v24  ;;  %v4589_v37 = vld [vmem:[%s7833_s7 + $0x230] sm:$0xff]  ;;  %v3665_v24 = vld [vmem:[%s7833_s7] sm:$0xff] }
 0x412   : > { %4569 = vmatpush1.msk.msra.mxu0 %vm3275_vm4, %v7132_v31  ;;  %4581 = vmatpush1.msk.msra.mxu1 %vm3275_vm4, %v7132_v31 }
 0x413   : > { %3382 = vmatprep.subr.mxu0 %v7134_v41  ;;  %3616 = vmatprep.subr.mxu1 %v7134_v41 }
 0x414   : > { %3383 = vmatpush1.msra.mxu0 %v7140_v49  ;;  %3617 = vmatpush1.msra.mxu1 %v7140_v49 }
 0x415   : > { %3384 = vmatprep.subr.mxu0 %v7146_v50  ;;  %3618 = vmatprep.subr.mxu1 %v7146_v50 }
 0x416   : > { %3385 = vmatpush1.msra.mxu0 %v3264_v4  ;;  %3619 = vmatpush1.msra.mxu1 %v3264_v4 }
 0x417   : > { %3386 = vmatprep.subr.mxu0 %v3263_v48  ;;  %3620 = vmatprep.subr.mxu1 %v3263_v48 }
 0x418   : > { %3387 = vmatpush1.msra.mxu0 %v3262_v10  ;;  %3621 = vmatpush1.msra.mxu1 %v3262_v10 }
 0x419   : > { %3388 = vmatprep.subr.mxu0 %v7154_v25  ;;  %3622 = vmatprep.subr.mxu1 %v7154_v25 }
 0x41a   : > { %3389 = vmatpush1.msra.mxu0 %v7156_v0  ;;  %3623 = vmatpush1.msra.mxu1 %v7156_v0 }
 0x41b   : > { %3422 = vmatprep.mubr.f32.mxu0 %v7894_v52  ;;  %4576 = vmatprep.subr.msk.mxu0 %vm3275_vm4, %v7129_v56  ;;  %v3674_v56 = vld [vmem:[%s7833_s7 + $0x48] sm:$0xff] }
 0x41c   : > { %4570 = vmatmul.mubr.msk.f32.vlgmr.msra.gmra.mxu0 %vm3271_vm10, %v4567_v61  ;;  %3656 = vmatprep.mubr.f32.mxu1 %v7894_v52  ;;  %v4588_v61 = vld [vmem:[%s7833_s7 + $0x228] sm:$0xff] }
 0x41d   : > { %4577 = vmatpush1.msk.msra.mxu0 %vm3275_vm4, %v7132_v31  ;;  %3578 = vmatprep.mubr.f32.mxu0 %v7894_v52  ;;  %v3672_v31 = vld [vmem:[%s7833_s7 + $0x38] sm:$0xff] }
 0x41e   : > { %3538 = vmatprep.subr.mxu0 %v7134_v41  ;;  %4582 = vmatmul.mubr.msk.f32.vlgmr.msra.gmra.mxu1 %vm3271_vm10, %v4579_v42  ;;  %v3671_v41 = vld [vmem:[%s7833_s7 + $0x30] sm:$0xff]  ;;  %v3728_v52 = vld [vmem:[%s7833_s7 + $0x1f8] sm:$0xff]  ;;  %v4587_v42 = vld [vmem:[%s7833_s7 + $0x220] sm:$0xff] }
 0x41f   : > { %3539 = vmatpush1.msra.mxu0 %v7140_v49  ;;  %3871 = vmatprep.subr.mxu1 %v3696_v12  ;;  %v3670_v49 = vld [vmem:[%s7833_s7 + $0x28] sm:$0xff]  ;;  %v3727_v12 = vld [vmem:[%s7833_s7 + $0x1f0] sm:$0xff] }
 0x420   : > { %3540 = vmatprep.subr.mxu0 %v7146_v50  ;;  %3872 = vmatpush1.msra.mxu1 %v3695_v47  ;;  %v3669_v50 = vld [vmem:[%s7833_s7 + $0x20] sm:$0xff]  ;;  %v4586_v47 = vld [vmem:[%s7833_s7 + $0x218] sm:$0xff] }
 0x421   : > { %3541 = vmatpush1.msra.mxu0 %v3264_v4  ;;  %3873 = vmatprep.subr.mxu1 %v3694_v9  ;;  %v3668_v4 = vld [vmem:[%s7833_s7 + $0x18] sm:$0xff]  ;;  %v3726_v9 = vld [vmem:[%s7833_s7 + $0x1e8] sm:$0xff] }
 0x422   : > { %3542 = vmatprep.subr.mxu0 %v3263_v48  ;;  %3874 = vmatpush1.msra.mxu1 %v3693_v11  ;;  %v4591_v48 = vld [vmem:[%s7833_s7 + $0x240] sm:$0xff]  ;;  %v4585_v11 = vld [vmem:[%s7833_s7 + $0x210] sm:$0xff] }
 0x423   : > { %3543 = vmatpush1.msra.mxu0 %v3262_v10  ;;  %3875 = vmatprep.subr.mxu1 %v3692_v62  ;;  %v3667_v10 = vld [vmem:[%s7833_s7 + $0x10] sm:$0xff]  ;;  %v3725_v62 = vld [vmem:[%s7833_s7 + $0x1e0] sm:$0xff] }
 0x424   : > { %3544 = vmatprep.subr.mxu0 %v7154_v25  ;;  %3876 = vmatpush1.msra.mxu1 %v3691_v1  ;;  %v4590_v25 = vld [vmem:[%s7833_s7 + $0x238] sm:$0xff]  ;;  %v4584_v1 = vld [vmem:[%s7833_s7 + $0x208] sm:$0xff] }
 0x425   : > { %3545 = vmatpush1.msra.mxu0 %v7156_v0  ;;  %3877 = vmatprep.subr.mxu1 %v3690_v38  ;;  %v3666_v0 = vld [vmem:[%s7833_s7 + $0x8] sm:$0xff]  ;;  %v3724_v38 = vld [vmem:[%s7833_s7 + $0x1d8] sm:$0xff] }
 0x426   : > { %4578 = vmatmul.mubr.msk.f32.vlgmr.msra.gmra.mxu0 %vm3271_vm10, %v4575_v27  ;;  %3800 = vmatprep.subr.mxu0 %v4614_v19  ;;  %v4583_v27 = vld [vmem:[%s7833_s7 + $0x200] sm:$0xff]  ;;  %v3723_v19 = vld [vmem:[%s7833_s7 + $0x1d0] sm:$0xff] }
 0x427   : > { %3801 = vmatpush1.msra.mxu0 %v4613_v3  ;;  %3878 = vmatpush1.msra.mxu1 %v3689_v51  ;;  %v4646_v3 = vld [vmem:[%s7833_s7 + $0x3f8] sm:$0xff]  ;;  %v4645_v51 = vld [vmem:[%s7833_s7 + $0x3f0] sm:$0xff] }
 0x428   : > { %3802 = vmatprep.subr.mxu0 %v4612_v35  ;;  %3879 = vmatprep.subr.mxu1 %v3688_v6  ;;  %v4644_v35 = vld [vmem:[%s7833_s7 + $0x3e8] sm:$0xff]  ;;  %v4643_v6 = vld [vmem:[%s7833_s7 + $0x3e0] sm:$0xff] }
 0x429   : > { %3803 = vmatpush1.msra.mxu0 %v4611_v14  ;;  %3880 = vmatpush1.msra.mxu1 %v3687_v21  ;;  %v4642_v14 = vld [vmem:[%s7833_s7 + $0x3d8] sm:$0xff]  ;;  %v4641_v21 = vld [vmem:[%s7833_s7 + $0x3d0] sm:$0xff] }
 0x42a   : > { %3804 = vmatprep.subr.mxu0 %v4610_v63  ;;  %3881 = vmatprep.subr.mxu1 %v3686_v54  ;;  %v4640_v63 = vld [vmem:[%s7833_s7 + $0x3c8] sm:$0xff]  ;;  %v4639_v54 = vld [vmem:[%s7833_s7 + $0x3c0] sm:$0xff] }
 0x42b   : > { %3805 = vmatpush1.msra.mxu0 %v4609_v39  ;;  %3882 = vmatpush1.msra.mxu1 %v3685_v28  ;;  %v4638_v39 = vld [vmem:[%s7833_s7 + $0x3b8] sm:$0xff]  ;;  %v4637_v28 = vld [vmem:[%s7833_s7 + $0x3b0] sm:$0xff] }
 0x42c   : > { %3806 = vmatprep.subr.mxu0 %v4608_v26  ;;  %3883 = vmatprep.subr.mxu1 %v3684_v44  ;;  %v4636_v26 = vld [vmem:[%s7833_s7 + $0x3a8] sm:$0xff]  ;;  %v4635_v44 = vld [vmem:[%s7833_s7 + $0x3a0] sm:$0xff] }
 0x42d   : > { %3807 = vmatpush1.msra.mxu0 %v4607_v46  ;;  %3884 = vmatpush1.msra.mxu1 %v3683_v8  ;;  %v4634_v46 = vld [vmem:[%s7833_s7 + $0x398] sm:$0xff]  ;;  %v4633_v8 = vld [vmem:[%s7833_s7 + $0x390] sm:$0xff] }
 0x42e   : > { %3808 = vmatprep.subr.mxu0 %v4606_v5  ;;  %3885 = vmatprep.subr.mxu1 %v3682_v23  ;;  %v4632_v5 = vld [vmem:[%s7833_s7 + $0x388] sm:$0xff] }
 0x42f   : > { %3809 = vmatpush1.msra.mxu0 %v4605_v2  ;;  %3886 = vmatpush1.msra.mxu1 %v3681_v17  ;;  %v3722_v23 = vld [vmem:[%s7833_s7 + $0x1c8] sm:$0xff]  ;;  %v4631_v2 = vld [vmem:[%s7833_s7 + $0x380] sm:$0xff] }
 0x430   : > { %3810 = vmatprep.subr.mxu0 %v4604_v59  ;;  %3887 = vmatprep.subr.mxu1 %v3680_v58  ;;  %v3721_v17 = vld [vmem:[%s7833_s7 + $0x1c0] sm:$0xff]  ;;  %v4630_v59 = vld [vmem:[%s7833_s7 + $0x378] sm:$0xff] }
 0x431   : > { %3811 = vmatpush1.msra.mxu0 %v4603_v16  ;;  %3888 = vmatpush1.msra.mxu1 %v3679_v33  ;;  %v3720_v58 = vld [vmem:[%s7833_s7 + $0x1b8] sm:$0xff]  ;;  %v4629_v16 = vld [vmem:[%s7833_s7 + $0x370] sm:$0xff] }
 0x432   : > { %3812 = vmatprep.subr.mxu0 %v4602_v7  ;;  %3889 = vmatprep.subr.mxu1 %v3678_v55  ;;  %v3719_v33 = vld [vmem:[%s7833_s7 + $0x1b0] sm:$0xff]  ;;  %v4628_v7 = vld [vmem:[%s7833_s7 + $0x368] sm:$0xff] }
 0x433   : > { %3813 = vmatpush1.msra.mxu0 %v4601_v13  ;;  %3890 = vmatpush1.msra.mxu1 %v3677_v53  ;;  %v3718_v55 = vld [vmem:[%s7833_s7 + $0x1a8] sm:$0xff]  ;;  %v3717_v13 = vld [vmem:[%s7833_s7 + $0x1a0] sm:$0xff]  ;;  %v3716_v53 = vld [vmem:[%s7833_s7 + $0x198] sm:$0xff] }
 0x434   : > { %3814 = vmatprep.subr.mxu0 %v4600_v32  ;;  %3891 = vmatprep.subr.mxu1 %v3676_v40  ;;  %v3715_v32 = vld [vmem:[%s7833_s7 + $0x190] sm:$0xff]  ;;  %v3714_v40 = vld [vmem:[%s7833_s7 + $0x188] sm:$0xff] }
 0x435   : > { %3815 = vmatpush1.msra.mxu0 %v4599_v36  ;;  %3892 = vmatpush1.msra.mxu1 %v3675_v57  ;;  %v3713_v36 = vld [vmem:[%s7833_s7 + $0x180] sm:$0xff] }
 0x436   : > { %3816 = vmatprep.subr.mxu0 %v4598_v20  ;;  %3893 = vmatprep.subr.mxu1 %v3674_v56  ;;  %v4627_v57 = vld [vmem:[%s7833_s7 + $0x360] sm:$0xff]  ;;  %v4626_v20 = vld [vmem:[%s7833_s7 + $0x358] sm:$0xff] }
 0x437   : > { %3817 = vmatpush1.msra.mxu0 %v4597_v43  ;;  %3894 = vmatpush1.msra.mxu1 %v3673_v22  ;;  %v3712_v56 = vld [vmem:[%s7833_s7 + $0x178] sm:$0xff]  ;;  %v3711_v43 = vld [vmem:[%s7833_s7 + $0x170] sm:$0xff] }
 0x438   : > { %3818 = vmatprep.subr.mxu0 %v4596_v34  ;;  %3895 = vmatprep.subr.mxu1 %v3672_v31  ;;  %v4625_v22 = vld [vmem:[%s7833_s7 + $0x350] sm:$0xff]  ;;  %v4624_v34 = vld [vmem:[%s7833_s7 + $0x348] sm:$0xff] }
 0x439   : > { %3819 = vmatpush1.msra.mxu0 %v4595_v30  ;;  %3896 = vmatpush1.msra.mxu1 %v3671_v41  ;;  %v3710_v31 = vld [vmem:[%s7833_s7 + $0x168] sm:$0xff]  ;;  %v3709_v30 = vld [vmem:[%s7833_s7 + $0x160] sm:$0xff]  ;;  %v3708_v41 = vld [vmem:[%s7833_s7 + $0x158] sm:$0xff] }
 0x43a   : > { %3820 = vmatprep.subr.mxu0 %v4594_v60  ;;  %3897 = vmatprep.subr.mxu1 %v3670_v49  ;;  %v3707_v60 = vld [vmem:[%s7833_s7 + $0x150] sm:$0xff]  ;;  %v3706_v49 = vld [vmem:[%s7833_s7 + $0x148] sm:$0xff] }
 0x43b   : > { %3821 = vmatpush1.msra.mxu0 %v4593_v15  ;;  %3898 = vmatpush1.msra.mxu1 %v3669_v50  ;;  %v3705_v15 = vld [vmem:[%s7833_s7 + $0x140] sm:$0xff] }
 0x43c   : > { %3822 = vmatprep.subr.mxu0 %v4592_v29  ;;  %3899 = vmatprep.subr.mxu1 %v3668_v4  ;;  %v4623_v50 = vld [vmem:[%s7833_s7 + $0x340] sm:$0xff]  ;;  %v3704_v29 = vld [vmem:[%s7833_s7 + $0x138] sm:$0xff] }
 0x43d   : > { %3823 = vmatpush1.msra.mxu0 %v4591_v48  ;;  %3900 = vmatpush1.msra.mxu1 %v3667_v10  ;;  %v4622_v4 = vld [vmem:[%s7833_s7 + $0x338] sm:$0xff]  ;;  %v4621_v48 = vld [vmem:[%s7833_s7 + $0x330] sm:$0xff] }
 0x43e   : > { %3824 = vmatprep.subr.mxu0 %v4590_v25  ;;  %3901 = vmatprep.subr.mxu1 %v3666_v0  ;;  %v3703_v10 = vld [vmem:[%s7833_s7 + $0x130] sm:$0xff]  ;;  %v4620_v25 = vld [vmem:[%s7833_s7 + $0x328] sm:$0xff] }
 0x43f   : > { %3825 = vmatpush1.msra.mxu0 %v4589_v37  ;;  %3902 = vmatpush1.msra.mxu1 %v3665_v24  ;;  %v3702_v0 = vld [vmem:[%s7833_s7 + $0x128] sm:$0xff]  ;;  %v4619_v37 = vld [vmem:[%s7833_s7 + $0x320] sm:$0xff] }
 0x440   : > { %3826 = vmatprep.subr.mxu0 %v4588_v61  ;;  %3903 = vmatprep.subr.mxu1 %v3728_v52  ;;  %v3701_v24 = vld [vmem:[%s7833_s7 + $0x120] sm:$0xff]  ;;  %v4618_v61 = vld [vmem:[%s7833_s7 + $0x318] sm:$0xff] }
 0x441   : > { %3827 = vmatpush1.msra.mxu0 %v4587_v42  ;;  %3904 = vmatpush2.msra.mxu1 %v3727_v12  ;;  %v3700_v52 = vld [vmem:[%s7833_s7 + $0x118] sm:$0xff]  ;;  %v4617_v42 = vld [vmem:[%s7833_s7 + $0x310] sm:$0xff]  ;;  %v4616_v12 = vld [vmem:[%s7833_s7 + $0x308] sm:$0xff] }
 0x442   : > { %3828 = vmatprep.subr.mxu0 %v4586_v47  ;;  %3905 = vmatprep.subr.mxu1 %v3726_v9  ;;  %v4615_v47 = vld [vmem:[%s7833_s7 + $0x300] sm:$0xff]  ;;  %v3699_v9 = vld [vmem:[%s7833_s7 + $0x110] sm:$0xff] }
 0x443   : > { %3829 = vmatpush1.msra.mxu0 %v4585_v11  ;;  %3906 = vmatpush2.msra.mxu1 %v3725_v62  ;;  %v3698_v11 = vld [vmem:[%s7833_s7 + $0x108] sm:$0xff]  ;;  %v3697_v62 = vld [vmem:[%s7833_s7 + $0x100] sm:$0xff] }
 0x444   : > { %3830 = vmatprep.subr.mxu0 %v4584_v1  ;;  %3907 = vmatprep.subr.mxu1 %v3724_v38  ;;  %v4678_v1 = vld [vmem:[%s7833_s7 + $0x4f8] sm:$0xff] }
 0x445   : > { %3831 = vmatpush1.msra.mxu0 %v4583_v27  ;;  %3908 = vmatpush2.msra.mxu1 %v3723_v19 }
 0x446   : > { %3832 = vmatprep.subr.mxu0 %v4646_v3  ;;  %3909 = vmatprep.subr.mxu1 %v3722_v23 }
 0x447   : > { %3833 = vmatpush2.msra.mxu0 %v4645_v51  ;;  %3910 = vmatpush2.msra.mxu1 %v3721_v17  ;;  %v4677_v17 = vld [vmem:[%s7833_s7 + $0x4f0] sm:$0xff] }
 0x448   : > { %3834 = vmatprep.subr.mxu0 %v4644_v35  ;;  %3911 = vmatprep.subr.mxu1 %v3720_v58 }
 0x449   : > { %3835 = vmatpush2.msra.mxu0 %v4643_v6  ;;  %3912 = vmatpush2.msra.mxu1 %v3719_v33  ;;  %v4674_v33 = vld [vmem:[%s7833_s7 + $0x4d8] sm:$0xff] }
 0x44a   : > { %3836 = vmatprep.subr.mxu0 %v4642_v14  ;;  %3913 = vmatprep.subr.mxu1 %v3718_v55  ;;  %v4672_v55 = vld [vmem:[%s7833_s7 + $0x4c8] sm:$0xff] }
 0x44b   : > { %3837 = vmatpush2.msra.mxu0 %v4641_v21  ;;  %3914 = vmatpush2.msra.mxu1 %v3717_v13  ;;  %v4671_v13 = vld [vmem:[%s7833_s7 + $0x4c0] sm:$0xff] }
 0x44c   : > { %3838 = vmatprep.subr.mxu0 %v4640_v63  ;;  %3915 = vmatprep.subr.mxu1 %v3716_v53  ;;  %v4670_v53 = vld [vmem:[%s7833_s7 + $0x4b8] sm:$0xff] }
 0x44d   : > { %3839 = vmatpush2.msra.mxu0 %v4639_v54  ;;  %3916 = vmatpush2.msra.mxu1 %v3715_v32  ;;  %v4669_v32 = vld [vmem:[%s7833_s7 + $0x4b0] sm:$0xff] }
 0x44e   : > { %3840 = vmatprep.subr.mxu0 %v4638_v39  ;;  %3917 = vmatprep.subr.mxu1 %v3714_v40  ;;  %v4668_v40 = vld [vmem:[%s7833_s7 + $0x4a8] sm:$0xff] }
 0x44f   : > { %3841 = vmatpush2.msra.mxu0 %v4637_v28  ;;  %3918 = vmatpush2.msra.mxu1 %v3713_v36  ;;  %v4667_v36 = vld [vmem:[%s7833_s7 + $0x4a0] sm:$0xff] }
 0x450   : > { %3842 = vmatprep.subr.mxu0 %v4636_v26  ;;  %3919 = vmatprep.subr.mxu1 %v3712_v56  ;;  %v4664_v56 = vld [vmem:[%s7833_s7 + $0x488] sm:$0xff] }
 0x451   : > { %3843 = vmatpush2.msra.mxu0 %v4635_v44  ;;  %3920 = vmatpush2.msra.mxu1 %v3711_v43  ;;  %v4663_v43 = vld [vmem:[%s7833_s7 + $0x480] sm:$0xff] }
 0x452   : > { %3844 = vmatprep.subr.mxu0 %v4634_v46  ;;  %3921 = vmatprep.subr.mxu1 %v3710_v31  ;;  %v4660_v31 = vld [vmem:[%s7833_s7 + $0x468] sm:$0xff] }
 0x453   : > { %3845 = vmatpush2.msra.mxu0 %v4633_v8  ;;  %3922 = vmatpush2.msra.mxu1 %v3709_v30  ;;  %v4659_v30 = vld [vmem:[%s7833_s7 + $0x460] sm:$0xff] }
 0x454   : > { %3846 = vmatprep.subr.mxu0 %v4632_v5  ;;  %3923 = vmatprep.subr.mxu1 %v3708_v41  ;;  %v4658_v41 = vld [vmem:[%s7833_s7 + $0x458] sm:$0xff] }
 0x455   : > { %3847 = vmatpush2.msra.mxu0 %v4631_v2  ;;  %3924 = vmatpush2.msra.mxu1 %v3707_v60  ;;  %v4657_v60 = vld [vmem:[%s7833_s7 + $0x450] sm:$0xff] }
 0x456   : > { %3848 = vmatprep.subr.mxu0 %v4630_v59  ;;  %3925 = vmatprep.subr.mxu1 %v3706_v49  ;;  %v4676_v59 = vld [vmem:[%s7833_s7 + $0x4e8] sm:$0xff] }
 0x457   : > { %3849 = vmatpush2.msra.mxu0 %v4629_v16  ;;  %3926 = vmatpush2.msra.mxu1 %v3705_v15  ;;  %v4675_v16 = vld [vmem:[%s7833_s7 + $0x4e0] sm:$0xff]  ;;  %v4656_v49 = vld [vmem:[%s7833_s7 + $0x448] sm:$0xff] }
 0x458   : > { %3850 = vmatprep.subr.mxu0 %v4628_v7  ;;  %3927 = vmatprep.subr.mxu1 %v3704_v29  ;;  %v4673_v7 = vld [vmem:[%s7833_s7 + $0x4d0] sm:$0xff]  ;;  %v4655_v15 = vld [vmem:[%s7833_s7 + $0x440] sm:$0xff] }
 0x459   : > { %3851 = vmatpush2.msra.mxu0 %v4627_v57  ;;  %3928 = vmatpush2.msra.mxu1 %v3703_v10  ;;  %v4666_v57 = vld [vmem:[%s7833_s7 + $0x498] sm:$0xff]  ;;  %v4653_v29 = vld [vmem:[%s7833_s7 + $0x430] sm:$0xff] }
 0x45a   : > { %3852 = vmatprep.subr.mxu0 %v4626_v20  ;;  %3929 = vmatprep.subr.mxu1 %v3702_v0  ;;  %v4665_v20 = vld [vmem:[%s7833_s7 + $0x490] sm:$0xff]  ;;  %v4650_v10 = vld [vmem:[%s7833_s7 + $0x418] sm:$0xff]  ;;  %v4648_v0 = vld [vmem:[%s7833_s7 + $0x408] sm:$0xff] }
 0x45b   : > { %3853 = vmatpush2.msra.mxu0 %v4625_v22  ;;  %3930 = vmatpush2.msra.mxu1 %v3701_v24  ;;  %v4662_v22 = vld [vmem:[%s7833_s7 + $0x478] sm:$0xff] }
 0x45c   : > { %3854 = vmatprep.subr.mxu0 %v4624_v34  ;;  %3931 = vmatprep.subr.mxu1 %v3700_v52  ;;  %v4661_v34 = vld [vmem:[%s7833_s7 + $0x470] sm:$0xff]  ;;  %v4710_v24 = vld [vmem:[%s7833_s7 + $0x5f8] sm:$0xff]  ;;  %v4708_v52 = vld [vmem:[%s7833_s7 + $0x5e8] sm:$0xff] }
 0x45d   : > { %3855 = vmatpush2.msra.mxu0 %v4623_v50  ;;  %3932 = vmatpush2.msra.mxu1 %v3699_v9  ;;  %v4654_v50 = vld [vmem:[%s7833_s7 + $0x438] sm:$0xff]  ;;  %v4704_v9 = vld [vmem:[%s7833_s7 + $0x5c8] sm:$0xff] }
 0x45e   : > { %3856 = vmatprep.subr.mxu0 %v4622_v4  ;;  %3933 = vmatprep.subr.mxu1 %v3698_v11  ;;  %v4652_v4 = vld [vmem:[%s7833_s7 + $0x428] sm:$0xff]  ;;  %v4703_v11 = vld [vmem:[%s7833_s7 + $0x5c0] sm:$0xff] }
 0x45f   : > { %3857 = vmatpush2.msra.mxu0 %v4621_v48  ;;  %3934 = vmatpush2.msra.mxu1 %v3697_v62  ;;  %v4651_v48 = vld [vmem:[%s7833_s7 + $0x420] sm:$0xff]  ;;  %v4702_v62 = vld [vmem:[%s7833_s7 + $0x5b8] sm:$0xff] }
 0x460   : > { %3858 = vmatprep.subr.mxu0 %v4620_v25  ;;  %v4649_v25 = vld [vmem:[%s7833_s7 + $0x410] sm:$0xff] }
 0x461   : > { %3859 = vmatpush2.msra.mxu0 %v4619_v37  ;;  %v4647_v37 = vld [vmem:[%s7833_s7 + $0x400] sm:$0xff] }
 0x462   : > { %3860 = vmatprep.subr.mxu0 %v4618_v61  ;;  %v4709_v61 = vld [vmem:[%s7833_s7 + $0x5f0] sm:$0xff] }
 0x463   : > { %3861 = vmatpush2.msra.mxu0 %v4617_v42  ;;  %v4707_v42 = vld [vmem:[%s7833_s7 + $0x5e0] sm:$0xff] }
 0x464   : > { %3862 = vmatprep.subr.mxu0 %v4616_v12  ;;  %v4706_v12 = vld [vmem:[%s7833_s7 + $0x5d8] sm:$0xff] }
 0x465   : > { %3863 = vmatpush2.msra.mxu0 %v4615_v47  ;;  %v4705_v47 = vld [vmem:[%s7833_s7 + $0x5d0] sm:$0xff] }
 0x466   : > { %4011 = vmatprep.subr.mxu0 %v4678_v1  ;;  %v4701_v1 = vld [vmem:[%s7833_s7 + $0x5b0] sm:$0xff] }
 0x4d1   : > { %v3348_v38 = vpop.f32.mrf.mxu0  ;;  %v3502_v51 = vpop.f32.mrf.mxu1 }
 0x4d3   : > { %v3350_v27 = vpop.f32.mrf.mxu0  ;;  %v3504_v14 = vpop.f32.mrf.mxu1 }
 0x4dc   : > { %v3424_v19 = vpop.f32.mrf.mxu0 }
 0x4dd   : > { %v3429_v35 = vmax.f32 %v3348_v38, %v3424_v19  ;;  %v4700_v38 = vld [vmem:[%s7833_s7 + $0x5a8] sm:$0xff]  ;;  %v4698_v19 = vld [vmem:[%s7833_s7 + $0x598] sm:$0xff] }
 0x4de   : > { %v3426_v3 = vpop.f32.mrf.mxu0  ;;  %v3658_v54 = vpop.f32.mrf.mxu1 }
 0x4df   : > { %v3430_v6 = vmax.f32 %v3350_v27, %v3426_v3  ;;  %v3507_v21 = vmax.f32 %v3429_v35, %v3502_v51  ;;  %v4699_v27 = vld [vmem:[%s7833_s7 + $0x5a0] sm:$0xff]  ;;  %v4697_v3 = vld [vmem:[%s7833_s7 + $0x590] sm:$0xff]  ;;  %v4696_v51 = vld [vmem:[%s7833_s7 + $0x588] sm:$0xff] }
 0x4e0   : > { %v3660_v8 = vpop.f32.mrf.mxu1  ;;  %v4695_v35 = vld [vmem:[%s7833_s7 + $0x580] sm:$0xff] }
 0x4e1   : > { %v3508_v39 = vmax.f32 %v3430_v6, %v3504_v14  ;;  %v4694_v6 = vld [vmem:[%s7833_s7 + $0x578] sm:$0xff]  ;;  %v4693_v14 = vld [vmem:[%s7833_s7 + $0x570] sm:$0xff] }
 0x4e6   : > { %v3580_v63 = vpop.f32.mrf.mxu0 }
 0x4e7   : > { %v3585_v28 = vmax.f32 %v3507_v21, %v3580_v63  ;;  %v4692_v21 = vld [vmem:[%s7833_s7 + $0x568] sm:$0xff]  ;;  %v4691_v63 = vld [vmem:[%s7833_s7 + $0x560] sm:$0xff] }
 0x4e8   : > { %v3582_v26 = vpop.f32.mrf.mxu0 }
 0x4e9   : > { %v3586_v44 = vmax.f32 %v3508_v39, %v3582_v26  ;;  %v7599_v46 = vmax.f32 %v3585_v28, %v3658_v54  ;;  %v4690_v54 = vld [vmem:[%s7833_s7 + $0x558] sm:$0xff]  ;;  %v4689_v39 = vld [vmem:[%s7833_s7 + $0x550] sm:$0xff]  ;;  %v4688_v28 = vld [vmem:[%s7833_s7 + $0x548] sm:$0xff] }
 0x4ea   : > { %v4687_v26 = vld [vmem:[%s7833_s7 + $0x540] sm:$0xff] }
 0x4eb   : > { %v3664_v5 = vmax.f32 %v3586_v44, %v3660_v8  ;;  %v3796_v2 = vrot.slane %v7599_v46, 1  ;;  %v4686_v44 = vld [vmem:[%s7833_s7 + $0x538] sm:$0xff]  ;;  %v4685_v8 = vld [vmem:[%s7833_s7 + $0x530] sm:$0xff] }
 0x4ed   : > { %v3797_v23 = vrot.slane %v3664_v5, 1  ;;  %3935 = vmatprep.mubr.f32.mxu1 %v3664_v5  ;;  %v4008_v58 = vrot.slane %v3664_v5, 2  ;;  %v4684_v5 = vld [vmem:[%s7833_s7 + $0x528] sm:$0xff] }
 0x4ee   : > { %3936 = vmatmul.mubr.f32.vlgmr.msra.gmra.mxu1 %v7599_v46 }
 0x4ef   : > { %3864 = vmatprep.mubr.f32.mxu0 %v3797_v23  ;;  %v4683_v23 = vld [vmem:[%s7833_s7 + $0x520] sm:$0xff] }
 0x4f0   : > { %3865 = vmatmul.mubr.f32.vlgmr.msra.gmra.mxu0 %v3796_v2  ;;  %v4682_v2 = vld [vmem:[%s7833_s7 + $0x518] sm:$0xff] }
 0x4f1   : > { %4012 = vmatpush1.msra.mxu0 %v4677_v17  ;;  %4075 = vmatprep.mubr.f32.mxu0 %v4008_v58  ;;  %v4681_v17 = vld [vmem:[%s7833_s7 + $0x510] sm:$0xff]  ;;  %v4679_v58 = vld [vmem:[%s7833_s7 + $0x500] sm:$0xff] }
 0x4f2   : > { %4013 = vmatprep.subr.mxu0 %v4676_v59  ;;  %v4680_v59 = vld [vmem:[%s7833_s7 + $0x508] sm:$0xff] }
 0x4f3   : > { %4014 = vmatpush1.msra.mxu0 %v4675_v16  ;;  %v4007_v16 = vrot.slane %v7599_v46, 2 }
 0x4f4   : > { %4015 = vmatprep.subr.mxu0 %v4674_v33 }
 0x4f5   : > { %4016 = vmatpush1.msra.mxu0 %v4673_v7 }
 0x4f6   : > { %4017 = vmatprep.subr.mxu0 %v4672_v55  ;;  %v4084_v55 = vld [vmem:[%s7834_s8] sm:$0x3] }
 0x4f7   : > { %4018 = vmatpush1.msra.mxu0 %v4671_v13  ;;  %v4089_v46 = vrot.slane %v4084_v55, %v5892_v18 }
 0x4f8   : > { %4019 = vmatprep.subr.mxu0 %v4670_v53 }
 0x4f9   : > { %4020 = vmatpush1.msra.mxu0 %v4669_v32 }
 0x4fa   : > { %4021 = vmatprep.subr.mxu0 %v4668_v40 }
 0x4fb   : > { %4022 = vmatpush1.msra.mxu0 %v4667_v36 }
 0x4fc   : > { %4023 = vmatprep.subr.mxu0 %v4666_v57 }
 0x4fd   : > { %4024 = vmatpush1.msra.mxu0 %v4665_v20  ;;  %v4093_v20 = vrot.slane %v4084_v55, %v5898_v45 }
 0x4fe   : > { %4025 = vmatprep.subr.mxu0 %v4664_v56 }
 0x4ff   : > { %4026 = vmatpush1.msra.mxu0 %v4663_v43 }
 0x500   : > { %4027 = vmatprep.subr.mxu0 %v4662_v22 }
 0x501   : > { %4028 = vmatpush1.msra.mxu0 %v4661_v34 }
 0x502   : > { %4029 = vmatprep.subr.mxu0 %v4660_v31 }
 0x503   : > { %4030 = vmatpush1.msra.mxu0 %v4659_v30 }
 0x504   : > { %4031 = vmatprep.subr.mxu0 %v4658_v41 }
 0x505   : > { %4032 = vmatpush1.msra.mxu0 %v4657_v60 }
 0x506   : > { %4033 = vmatprep.subr.mxu0 %v4656_v49 }
 0x507   : > { %4034 = vmatpush1.msra.mxu0 %v4655_v15 }
 0x508   : > { %4035 = vmatprep.subr.mxu0 %v4654_v50 }
 0x509   : > { %4036 = vmatpush1.msra.mxu0 %v4653_v29 }
 0x50a   : > { %4037 = vmatprep.subr.mxu0 %v4652_v4 }
 0x50b   : > { %4038 = vmatpush1.msra.mxu0 %v4651_v48 }
 0x50c   : > { %4039 = vmatprep.subr.mxu0 %v4650_v10 }
 0x50d   : > { %4040 = vmatpush1.msra.mxu0 %v4649_v25 }
 0x50e   : > { %4041 = vmatprep.subr.mxu0 %v4648_v0 }
 0x50f   : > { %4042 = vmatpush1.msra.mxu0 %v4647_v37 }
 0x510   : > { %4043 = vmatprep.subr.mxu0 %v4710_v24 }
 0x511   : > { %4044 = vmatpush2.msra.mxu0 %v4709_v61 }
 0x512   : > { %4045 = vmatprep.subr.mxu0 %v4708_v52 }
 0x513   : > { %4046 = vmatpush2.msra.mxu0 %v4707_v42 }
 0x514   : > { %4047 = vmatprep.subr.mxu0 %v4706_v12 }
 0x515   : > { %4048 = vmatpush2.msra.mxu0 %v4705_v47 }
 0x516   : > { %4049 = vmatprep.subr.mxu0 %v4704_v9 }
 0x517   : > { %4050 = vmatpush2.msra.mxu0 %v4703_v11 }
 0x518   : > { %4051 = vmatprep.subr.mxu0 %v4702_v62 }
 0x519   : > { %4052 = vmatpush2.msra.mxu0 %v4701_v1 }
 0x51a   : > { %4053 = vmatprep.subr.mxu0 %v4700_v38 }
 0x51b   : > { %4054 = vmatpush2.msra.mxu0 %v4699_v27 }
 0x51c   : > { %4055 = vmatprep.subr.mxu0 %v4698_v19 }
 0x51d   : > { %4056 = vmatpush2.msra.mxu0 %v4697_v3 }
 0x51e   : > { %4057 = vmatprep.subr.mxu0 %v4696_v51 }
 0x51f   : > { %4058 = vmatpush2.msra.mxu0 %v4695_v35 }
 0x520   : > { %4059 = vmatprep.subr.mxu0 %v4694_v6 }
 0x521   : > { %4060 = vmatpush2.msra.mxu0 %v4693_v14 }
 0x522   : > { %4061 = vmatprep.subr.mxu0 %v4692_v21 }
 0x523   : > { %4062 = vmatpush2.msra.mxu0 %v4691_v63 }
 0x524   : > { %4063 = vmatprep.subr.mxu0 %v4690_v54 }
 0x525   : > { %4064 = vmatpush2.msra.mxu0 %v4689_v39 }
 0x526   : > { %4065 = vmatprep.subr.mxu0 %v4688_v28 }
 0x527   : > { %4066 = vmatpush2.msra.mxu0 %v4687_v26 }
 0x528   : > { %4067 = vmatprep.subr.mxu0 %v4686_v44 }
 0x529   : > { %4068 = vmatpush2.msra.mxu0 %v4685_v8 }
 0x52a   : > { %4069 = vmatprep.subr.mxu0 %v4684_v5 }
 0x52b   : > { %4070 = vmatpush2.msra.mxu0 %v4683_v23 }
 0x52c   : > { %4071 = vmatprep.subr.mxu0 %v4682_v2 }
 0x52d   : > { %4072 = vmatpush2.msra.mxu0 %v4681_v17 }
 0x52e   : > { %4073 = vmatprep.subr.mxu0 %v4680_v59 }
 0x52f   : > { %4074 = vmatpush2.msra.mxu0 %v4679_v58 }
 0x530   : > { %4076 = vmatmul.mubr.f32.vlgmr.msra.gmra.mxu0 %v4007_v16 }
 0x5ae   : > { %v3937_v7 = vpop.f32.mrf.mxu1 }
 0x5b0   : > { %v3866_v33 = vpop.f32.mrf.mxu0  ;;  %v3939_v32 = vpop.f32.mrf.mxu1 }
 0x5b1   : > { %v3938_v53 = vadd.f32 %v3937_v7, %v3866_v33 }
 0x5b2   : > { %v3868_v13 = vpop.f32.mrf.mxu0 }
 0x5b3   : > { %v3940_v36 = vadd.f32 %v3939_v32, %v3868_v13 }
 0x5f0   : > { %v4077_v40 = vpop.f32.mrf.mxu0 }
 0x5f1   : > { %v4082_v57 = vadd.f32 %v4077_v40, %v3938_v53 }
 0x5f2   : > { %v4079_v56 = vpop.f32.mrf.mxu0 }
 0x5f3   : > { %v4096_v43 = vadd.f32 %v4089_v46, %v4082_v57  ;;  %v4083_v22 = vadd.f32 %v4079_v56, %v3940_v36 }
 0x5f5   : > { %v4098_v34 = vmax.f32 %v4096_v43, 0.0  ;;  %v4097_v31 = vadd.f32 %v4093_v20, %v4083_v22 }
 0x5f7   : > { %4100 = vst [vmem:[%s518_s29] sm:$0x1f] %v4098_v34  ;;  %v4099_v30 = vmax.f32 %v4097_v31, 0.0 }
 0x5f9   : > { %4102 = vst.msk [vmem:[%s518_s29 + $0x8] sm:$0x1f] %vm4101_vm11, %v4099_v30 }
 0x5fa PF: > { %s19_s15 = sadd.s32 1, %s4862_s15   ;;  %s7895_s18 = sld [smem:[#allocation3_spill]] }
 0x5fb   : > { %p16_p12 = scmp.ge.s32.totalorder %s19_s15, 14   ;;  %s7896_s30 = smov %s4842_s10 }
 0x5fc   : > { %s7897_s10 = smov %s4966_s22  ;;  %s7898_s11 = smov %s4854_s13 }
 0x5fd   : > { %s7899_s12 = smov %s4858_s14  ;;  %s7900_s13 = smov %s7903_s16 }
 0x5fe   :  { %18 = sbr.rel (!%p16_p12) target bundleno = 4 (0x4), region = 146 }
 0x600   : > { %s7901_s14 = smov %s7895_s18 }

// kernel: baseline_widar3_forward.4
= control target key start
LH: loop header
LB: loop body
LE: loop exit
PB: predicated region body
PF: predicated region fallthrough
CT: control target
= control target key end

     0   :  { %v734_v0 = vmov 0.0   ;;  %vm71_vm0 = vcmask 261120   ;;  %vm735_vm1 = vmmov 0   ;;  %vm375_vm2 = vcmask 523264   ;;  %s1184_s1 = inlined_call_operand.vmem [shape: f32[160,128], index: 1, kind: input, shape index: {}]   ;;  %s1185_s0 = inlined_call_operand.vmem [shape: f32[72,160], index: 0, kind: input, shape index: {}]   ;;  %s1186_s3 = inlined_call_operand.vmem [shape: f32[128,64], index: 3, kind: input, shape index: {}]   ;;  %s1187_s2 = inlined_call_operand.vmem [shape: f32[1,128], index: 2, kind: input, shape index: {}]   ;;  %s1188_s5 = inlined_call_operand.vmem [shape: f32[64,32], index: 5, kind: input, shape index: {}]   ;;  %s1189_s4 = inlined_call_operand.vmem [shape: f32[1,64], index: 4, kind: input, shape index: {}]   ;;  %s1190_s6 = inlined_call_operand.vmem [shape: f32[1,32], index: 6, kind: input, shape index: {}]   ;;  %s1191_s7 = inlined_call_operand.vmem [shape: f32[72,32], index: 7, kind: output, shape index: {}]  }
   0x1   :  { %99 = vmatprep.subr.mxu0 %v734_v0  ;;  %v59_v1 = vld [vmem:[%s1184_s1 + $0x78] sm:$0xff]  ;;  %v58_v2 = vld [vmem:[%s1184_s1 + $0x70] sm:$0xff]  ;;  %700 = vmatprep.subr.mxu1 %v734_v0  ;;  %v57_v3 = vld [vmem:[%s1184_s1 + $0x68] sm:$0xff] }
   0x2   :  { %100 = vmatpush1.msra.mxu0 %v59_v1  ;;  %v56_v4 = vld [vmem:[%s1184_s1 + $0x60] sm:$0xff]  ;;  %v55_v5 = vld [vmem:[%s1184_s1 + $0x58] sm:$0xff]  ;;  %v27_v6 = vld [vmem:[%s1185_s0 + $0x8] sm:$0xff]  ;;  %639 = vmatprep.mubr.msk.f32.mxu1 %vm735_vm1, %v734_v0 }
   0x3   :  { %101 = vmatprep.subr.mxu0 %v734_v0  ;;  %536 = vmatprep.mubr.msk.f32.mxu0 %vm71_vm0, %v27_v6  ;;  %v54_v7 = vld [vmem:[%s1184_s1 + $0x50] sm:$0xff]  ;;  %v53_v8 = vld [vmem:[%s1184_s1 + $0x48] sm:$0xff]  ;;  %v52_v9 = vld [vmem:[%s1184_s1 + $0x40] sm:$0xff] }
   0x4   :  { %102 = vmatpush1.msra.mxu0 %v58_v2  ;;  %v815_v10 = vld [vmem:[%s1186_s3 + $0x78] sm:$0xff]  ;;  %v825_v12 = vld [vmem:[%s1186_s3 + $0x70] sm:$0xff]  ;;  %v836_v14 = vld [vmem:[%s1186_s3 + $0x68] sm:$0xff] }
   0x5   :  { %103 = vmatprep.subr.mxu0 %v734_v0  ;;  %716 = vmatpush3.msra.mxu1 %v815_v10  ;;  %v51_v11 = vld [vmem:[%s1184_s1 + $0x38] sm:$0xff]  ;;  %v50_v13 = vld [vmem:[%s1184_s1 + $0x30] sm:$0xff]  ;;  %v49_v15 = vld [vmem:[%s1184_s1 + $0x28] sm:$0xff] }
   0x6   :  { %104 = vmatpush1.msra.mxu0 %v57_v3  ;;  %701 = vmatprep.subr.mxu1 %v734_v0  ;;  %v847_v16 = vld [vmem:[%s1186_s3 + $0x60] sm:$0xff]  ;;  %v858_v18 = vld [vmem:[%s1186_s3 + $0x58] sm:$0xff]  ;;  %v869_v20 = vld [vmem:[%s1186_s3 + $0x50] sm:$0xff] }
   0x7   :  { %105 = vmatprep.subr.mxu0 %v734_v0  ;;  %717 = vmatpush3.msra.mxu1 %v825_v12  ;;  %v48_v17 = vld [vmem:[%s1184_s1 + $0x20] sm:$0xff]  ;;  %v47_v19 = vld [vmem:[%s1184_s1 + $0x18] sm:$0xff]  ;;  %v46_v21 = vld [vmem:[%s1184_s1 + $0x10] sm:$0xff] }
   0x8   :  { %106 = vmatpush1.msra.mxu0 %v56_v4  ;;  %702 = vmatprep.subr.mxu1 %v734_v0  ;;  %v880_v22 = vld [vmem:[%s1186_s3 + $0x48] sm:$0xff]  ;;  %v891_v24 = vld [vmem:[%s1186_s3 + $0x40] sm:$0xff]  ;;  %v902_v26 = vld [vmem:[%s1186_s3 + $0x38] sm:$0xff] }
   0x9   :  { %107 = vmatprep.subr.mxu0 %v734_v0  ;;  %718 = vmatpush3.msra.mxu1 %v836_v14  ;;  %v45_v23 = vld [vmem:[%s1184_s1 + $0x8] sm:$0xff]  ;;  %v44_v25 = vld [vmem:[%s1184_s1] sm:$0xff]  ;;  %v63_v27 = vld [vmem:[%s1184_s1 + $0x98] sm:$0xff] }
   0xa   :  { %108 = vmatpush1.msra.mxu0 %v55_v5  ;;  %703 = vmatprep.subr.mxu1 %v734_v0  ;;  %v913_v28 = vld [vmem:[%s1186_s3 + $0x30] sm:$0xff]  ;;  %v924_v30 = vld [vmem:[%s1186_s3 + $0x28] sm:$0xff]  ;;  %v935_v32 = vld [vmem:[%s1186_s3 + $0x20] sm:$0xff] }
   0xb   :  { %109 = vmatprep.subr.mxu0 %v734_v0  ;;  %719 = vmatpush3.msra.mxu1 %v847_v16  ;;  %v62_v29 = vld [vmem:[%s1184_s1 + $0x90] sm:$0xff]  ;;  %v61_v31 = vld [vmem:[%s1184_s1 + $0x88] sm:$0xff]  ;;  %v60_v33 = vld [vmem:[%s1184_s1 + $0x80] sm:$0xff] }
   0xc   :  { %110 = vmatpush1.msra.mxu0 %v54_v7  ;;  %704 = vmatprep.subr.mxu1 %v734_v0  ;;  %v946_v34 = vld [vmem:[%s1186_s3 + $0x18] sm:$0xff]  ;;  %v26_v35 = vld [vmem:[%s1185_s0] sm:$0xff]  ;;  %v220_v37 = vld [vmem:[%s1186_s3 + $0x10] sm:$0xff] }
   0xd   :  { %111 = vmatprep.subr.mxu0 %v734_v0  ;;  %720 = vmatpush3.msra.mxu1 %v858_v18  ;;  %v29_v36 = vld [vmem:[%s1185_s0 + $0x18] sm:$0xff]  ;;  %v28_v38 = vld [vmem:[%s1185_s0 + $0x10] sm:$0xff]  ;;  %v31_v39 = vld [vmem:[%s1185_s0 + $0x28] sm:$0xff] }
   0xe   :  { %112 = vmatpush1.msra.mxu0 %v53_v8  ;;  %705 = vmatprep.subr.mxu1 %v734_v0  ;;  %v30_v40 = vld [vmem:[%s1185_s0 + $0x20] sm:$0xff]  ;;  %v33_v41 = vld [vmem:[%s1185_s0 + $0x38] sm:$0xff]  ;;  %v32_v42 = vld [vmem:[%s1185_s0 + $0x30] sm:$0xff] }
   0xf   :  { %113 = vmatprep.subr.mxu0 %v734_v0  ;;  %721 = vmatpush3.msra.mxu1 %v869_v20  ;;  %v35_v43 = vld [vmem:[%s1185_s0 + $0x48] sm:$0xff]  ;;  %v34_v44 = vld [vmem:[%s1185_s0 + $0x40] sm:$0xff]  ;;  %v37_v45 = vld [vmem:[%s1185_s0 + $0x58] sm:$0xff] }
  0x10   :  { %114 = vmatpush1.msra.mxu0 %v52_v9  ;;  %706 = vmatprep.subr.mxu1 %v734_v0  ;;  %v36_v46 = vld [vmem:[%s1185_s0 + $0x50] sm:$0xff]  ;;  %v39_v47 = vld [vmem:[%s1185_s0 + $0x68] sm:$0xff]  ;;  %v38_v48 = vld [vmem:[%s1185_s0 + $0x60] sm:$0xff] }
  0x11   :  { %115 = vmatprep.subr.mxu0 %v734_v0  ;;  %722 = vmatpush3.msra.mxu1 %v880_v22  ;;  %v41_v49 = vld [vmem:[%s1185_s0 + $0x78] sm:$0xff]  ;;  %v40_v50 = vld [vmem:[%s1185_s0 + $0x70] sm:$0xff]  ;;  %v43_v51 = vld [vmem:[%s1185_s0 + $0x88] sm:$0xff] }
  0x12   :  { %116 = vmatpush1.msra.mxu0 %v51_v11  ;;  %707 = vmatprep.subr.mxu1 %v734_v0  ;;  %v42_v52 = vld [vmem:[%s1185_s0 + $0x80] sm:$0xff]  ;;  %v219_v53 = vld [vmem:[%s1186_s3 + $0x8] sm:$0xff]  ;;  %v367_v9 = vld [vmem:[%s1188_s5 + $0x38] sm:$0xff] }
  0x13   :  { %117 = vmatprep.subr.mxu0 %v734_v0  ;;  %723 = vmatpush3.msra.mxu1 %v891_v24  ;;  %v218_v54 = vld [vmem:[%s1186_s3] sm:$0xff] }
  0x14   :  { %118 = vmatpush1.msra.mxu0 %v50_v13  ;;  %708 = vmatprep.subr.mxu1 %v734_v0  ;;  %v1059_v55 = vld [vmem:[%s1187_s2] ss:$0 sm:$0xff] }
  0x15   :  { %119 = vmatprep.subr.mxu0 %v734_v0  ;;  %724 = vmatpush3.msra.mxu1 %v902_v26 }
  0x16   :  { %120 = vmatpush1.msra.mxu0 %v49_v15  ;;  %709 = vmatprep.subr.mxu1 %v734_v0  ;;  %v365_v15 = vld [vmem:[%s1188_s5 + $0x28] sm:$0xff] }
  0x17   :  { %121 = vmatprep.subr.mxu0 %v734_v0  ;;  %725 = vmatpush3.msra.mxu1 %v913_v28 }
  0x18   :  { %122 = vmatpush1.msra.mxu0 %v48_v17  ;;  %710 = vmatprep.subr.mxu1 %v734_v0 }
  0x19   :  { %123 = vmatprep.subr.mxu0 %v734_v0  ;;  %726 = vmatpush3.msra.mxu1 %v924_v30 }
  0x1a   :  { %124 = vmatpush1.msra.mxu0 %v47_v19  ;;  %711 = vmatprep.subr.mxu1 %v734_v0 }
  0x1b   :  { %125 = vmatprep.subr.mxu0 %v734_v0  ;;  %727 = vmatpush3.msra.mxu1 %v935_v32 }
  0x1c   :  { %126 = vmatpush1.msra.mxu0 %v46_v21  ;;  %712 = vmatprep.subr.mxu1 %v734_v0  ;;  %v363_v21 = vld [vmem:[%s1188_s5 + $0x18] sm:$0xff] }
  0x1d   :  { %127 = vmatprep.subr.mxu0 %v734_v0  ;;  %728 = vmatpush3.msra.mxu1 %v946_v34 }
  0x1e   :  { %128 = vmatpush1.msra.mxu0 %v45_v23  ;;  %713 = vmatprep.subr.mxu1 %v734_v0 }
  0x1f   :  { %129 = vmatprep.subr.mxu0 %v734_v0  ;;  %729 = vmatpush3.msra.mxu1 %v220_v37 }
  0x20   :  { %130 = vmatpush1.msra.mxu0 %v44_v25  ;;  %714 = vmatprep.subr.mxu1 %v734_v0 }
  0x21   :  { %155 = vmatprep.subr.mxu0 %v734_v0  ;;  %730 = vmatpush3.msra.mxu1 %v219_v53 }
  0x22   :  { %156 = vmatpush2.msra.mxu0 %v63_v27  ;;  %715 = vmatprep.subr.mxu1 %v734_v0  ;;  %v361_v27 = vld [vmem:[%s1188_s5 + $0x8] sm:$0xff] }
  0x23   :  { %157 = vmatprep.subr.mxu0 %v734_v0  ;;  %731 = vmatpush3.msra.mxu1 %v218_v54 }
  0x24   :  { %158 = vmatpush2.msra.mxu0 %v62_v29  ;;  %657 = vmatprep.subr.mxu1 %v734_v0 }
  0x25   :  { %159 = vmatprep.subr.mxu0 %v734_v0 }
  0x26   :  { %160 = vmatpush2.msra.mxu0 %v61_v31 }
  0x27   :  { %161 = vmatprep.subr.mxu0 %v734_v0 }
  0x28   :  { %162 = vmatpush2.msra.mxu0 %v60_v33 }
  0x29   :  { %164 = vmatmul.mubr.f32.vlgmr.msra.gmra.mxu0 %v26_v35  ;;  %598 = vmatprep.subr.mxu0 %v734_v0 }
  0x2a   :  { %537 = vmatprep.mubr.msk.f32.mxu0 %vm71_vm0, %v29_v36  ;;  %599 = vmatpush3.msra.mxu0 %v815_v10  ;;  %v360_v36 = vld [vmem:[%s1188_s5] sm:$0xff] }
  0x2b   :  { %600 = vmatprep.subr.mxu0 %v734_v0 }
  0x2c   :  { %601 = vmatpush3.msra.mxu0 %v825_v12  ;;  %v366_v12 = vld [vmem:[%s1188_s5 + $0x30] sm:$0xff] }
  0x2d   :  { %169 = vmatmul.mubr.f32.gmra.mxu0 %v28_v38  ;;  %602 = vmatprep.subr.mxu0 %v734_v0 }
  0x2e   :  { %538 = vmatprep.mubr.msk.f32.mxu0 %vm71_vm0, %v31_v39  ;;  %603 = vmatpush3.msra.mxu0 %v836_v14 }
  0x2f   :  { %604 = vmatprep.subr.mxu0 %v734_v0 }
  0x30   :  { %605 = vmatpush3.msra.mxu0 %v847_v16 }
  0x31   :  { %174 = vmatmul.mubr.f32.gmra.mxu0 %v30_v40  ;;  %606 = vmatprep.subr.mxu0 %v734_v0 }
  0x32   :  { %539 = vmatprep.mubr.msk.f32.mxu0 %vm71_vm0, %v33_v41  ;;  %607 = vmatpush3.msra.mxu0 %v858_v18  ;;  %v364_v18 = vld [vmem:[%s1188_s5 + $0x20] sm:$0xff] }
  0x33   :  { %608 = vmatprep.subr.mxu0 %v734_v0 }
  0x34   :  { %609 = vmatpush3.msra.mxu0 %v869_v20 }
  0x35   :  { %179 = vmatmul.mubr.f32.gmra.mxu0 %v32_v42  ;;  %610 = vmatprep.subr.mxu0 %v734_v0 }
  0x36   :  { %540 = vmatprep.mubr.msk.f32.mxu0 %vm71_vm0, %v35_v43  ;;  %611 = vmatpush3.msra.mxu0 %v880_v22 }
  0x37   :  { %612 = vmatprep.subr.mxu0 %v734_v0 }
  0x38   :  { %613 = vmatpush3.msra.mxu0 %v891_v24  ;;  %v362_v24 = vld [vmem:[%s1188_s5 + $0x10] sm:$0xff] }
  0x39   :  { %184 = vmatmul.mubr.f32.gmra.mxu0 %v34_v44  ;;  %614 = vmatprep.subr.mxu0 %v734_v0 }
  0x3a   :  { %541 = vmatprep.mubr.msk.f32.mxu0 %vm71_vm0, %v37_v45  ;;  %615 = vmatpush3.msra.mxu0 %v902_v26 }
  0x3b   :  { %616 = vmatprep.subr.mxu0 %v734_v0 }
  0x3c   :  { %617 = vmatpush3.msra.mxu0 %v913_v28 }
  0x3d   :  { %189 = vmatmul.mubr.f32.gmra.mxu0 %v36_v46  ;;  %618 = vmatprep.subr.mxu0 %v734_v0 }
  0x3e   :  { %542 = vmatprep.mubr.msk.f32.mxu0 %vm71_vm0, %v39_v47  ;;  %619 = vmatpush3.msra.mxu0 %v924_v30 }
  0x3f   :  { %620 = vmatprep.subr.mxu0 %v734_v0 }
  0x40   :  { %621 = vmatpush3.msra.mxu0 %v935_v32 }
  0x41   :  { %194 = vmatmul.mubr.f32.gmra.mxu0 %v38_v48  ;;  %622 = vmatprep.subr.mxu0 %v734_v0 }
  0x42   :  { %543 = vmatprep.mubr.msk.f32.mxu0 %vm71_vm0, %v41_v49  ;;  %623 = vmatpush3.msra.mxu0 %v946_v34 }
  0x43   :  { %624 = vmatprep.subr.mxu0 %v734_v0 }
  0x44   :  { %625 = vmatpush3.msra.mxu0 %v220_v37  ;;  %v545_v37 = vld [vmem:[%s1189_s4] ss:$0 sm:$0xff] }
  0x45   :  { %199 = vmatmul.mubr.f32.gmra.mxu0 %v40_v50  ;;  %626 = vmatprep.subr.mxu0 %v734_v0 }
  0x46   :  { %544 = vmatprep.mubr.msk.f32.mxu0 %vm71_vm0, %v43_v51  ;;  %627 = vmatpush3.msra.mxu0 %v219_v53 }
  0x47   :  { %628 = vmatprep.subr.mxu0 %v734_v0 }
  0x48   :  { %629 = vmatpush3.msra.mxu0 %v218_v54 }
  0x49   :  { %204 = vmatmul.mubr.f32.gmra.mxu0 %v42_v52 }
  0x4a   :  { %630 = vmatprep.mubr.msk.f32.mxu0 %vm735_vm1, %v734_v0 }
  0xe9   :  { %v165_v56 = vpop.f32.mrf.mxu0 }
  0xea   :  { %v166_v57 = vadd.f32 %v1059_v55, %v165_v56 }
  0xeb   :  { %v167_v58 = vpop.f32.mrf.mxu0 }
  0xec   :  { %v209_v59 = vmax.f32 %v166_v57, 0.0 }
  0xed   :  { %v170_v60 = vpop.f32.mrf.mxu0 }
  0xee   :  { %v171_v61 = vadd.f32 %v1059_v55, %v170_v60  ;;  %631 = vmatmul.mubr.f32.vlgmr.msra.gmra.mxu0 %v209_v59 }
  0xef   :  { %v172_v62 = vpop.f32.mrf.mxu0  ;;  %633 = vmatprep.mubr.msk.f32.mxu0 %vm735_vm1, %v734_v0 }
  0xf0   :  { %v210_v63 = vmax.f32 %v171_v61, 0.0 }
  0xf1   :  { %v175_v1 = vpop.f32.mrf.mxu0 }
  0xf2   :  { %v176_v2 = vadd.f32 %v1059_v55, %v175_v1  ;;  %634 = vmatmul.mubr.f32.gmra.mxu0 %v210_v63 }
  0xf3   :  { %v177_v3 = vpop.f32.mrf.mxu0  ;;  %636 = vmatprep.mubr.msk.f32.mxu0 %vm735_vm1, %v734_v0 }
  0xf4   :  { %v211_v4 = vmax.f32 %v176_v2, 0.0 }
  0xf5   :  { %v180_v5 = vpop.f32.mrf.mxu0 }
  0xf6   :  { %v181_v6 = vadd.f32 %v1059_v55, %v180_v5  ;;  %637 = vmatmul.mubr.f32.gmra.mxu0 %v211_v4 }
  0xf7   :  { %v182_v7 = vpop.f32.mrf.mxu0 }
  0xf8   :  { %v212_v8 = vmax.f32 %v181_v6, 0.0 }
  0xf9   :  { %v185_v10 = vpop.f32.mrf.mxu0 }
  0xfa   :  { %v186_v11 = vadd.f32 %v1059_v55, %v185_v10  ;;  %640 = vmatmul.mubr.f32.vlgmr.msra.gmra.mxu1 %v212_v8 }
  0xfb   :  { %v187_v13 = vpop.f32.mrf.mxu0  ;;  %642 = vmatprep.mubr.msk.f32.mxu1 %vm735_vm1, %v734_v0  ;;  %658 = vmatpush3.msra.mxu1 %v367_v9 }
  0xfc   :  { %v213_v14 = vmax.f32 %v186_v11, 0.0  ;;  %659 = vmatprep.subr.mxu1 %v734_v0  ;;  %v546_v11 = vld [vmem:[%s1190_s6] ss:$0 sm:$0xff] }
  0xfd   :  { %v190_v16 = vpop.f32.mrf.mxu0  ;;  %660 = vmatpush3.msra.mxu1 %v366_v12 }
  0xfe   :  { %v191_v17 = vadd.f32 %v1059_v55, %v190_v16  ;;  %643 = vmatmul.mubr.f32.gmra.mxu1 %v213_v14  ;;  %661 = vmatprep.subr.mxu1 %v734_v0 }
  0xff   :  { %v192_v19 = vpop.f32.mrf.mxu0  ;;  %645 = vmatprep.mubr.msk.f32.mxu1 %vm735_vm1, %v734_v0  ;;  %662 = vmatpush3.msra.mxu1 %v365_v15 }
 0x100   :  { %v214_v20 = vmax.f32 %v191_v17, 0.0  ;;  %663 = vmatprep.subr.mxu1 %v734_v0 }
 0x101   :  { %v195_v22 = vpop.f32.mrf.mxu0  ;;  %664 = vmatpush3.msra.mxu1 %v364_v18 }
 0x102   :  { %v196_v23 = vadd.f32 %v1059_v55, %v195_v22  ;;  %646 = vmatmul.mubr.f32.gmra.mxu1 %v214_v20  ;;  %665 = vmatprep.subr.mxu1 %v734_v0 }
 0x103   :  { %v197_v25 = vpop.f32.mrf.mxu0  ;;  %648 = vmatprep.mubr.msk.f32.mxu1 %vm735_vm1, %v734_v0  ;;  %666 = vmatpush3.msra.mxu1 %v363_v21 }
 0x104   :  { %v215_v26 = vmax.f32 %v196_v23, 0.0  ;;  %667 = vmatprep.subr.mxu1 %v734_v0 }
 0x105   :  { %v200_v28 = vpop.f32.mrf.mxu0  ;;  %668 = vmatpush3.msra.mxu1 %v362_v24 }
 0x106   :  { %v201_v29 = vadd.f32 %v1059_v55, %v200_v28  ;;  %649 = vmatmul.mubr.f32.gmra.mxu1 %v215_v26  ;;  %669 = vmatprep.subr.mxu1 %v734_v0 }
 0x107   :  { %v202_v30 = vpop.f32.mrf.mxu0  ;;  %651 = vmatprep.mubr.msk.f32.mxu1 %vm735_vm1, %v734_v0  ;;  %670 = vmatpush3.msra.mxu1 %v361_v27 }
 0x108   :  { %v216_v31 = vmax.f32 %v201_v29, 0.0  ;;  %671 = vmatprep.subr.mxu1 %v734_v0 }
 0x109   :  { %v205_v32 = vpop.f32.mrf.mxu0  ;;  %672 = vmatpush3.msra.mxu1 %v360_v36 }
 0x10a   :  { %v206_v33 = vadd.f32 %v1059_v55, %v205_v32  ;;  %652 = vmatmul.mubr.f32.gmra.mxu1 %v216_v31 }
 0x10b   :  { %v207_v34 = vpop.f32.mrf.mxu0  ;;  %654 = vmatprep.mubr.msk.f32.mxu1 %vm735_vm1, %v734_v0 }
 0x10c   :  { %v217_v35 = vmax.f32 %v206_v33, 0.0 }
 0x10e   :  { %655 = vmatmul.mubr.f32.gmra.mxu1 %v217_v35 }
 0x10f   :  { %673 = vmatprep.mubr.msk.f32.mxu1 %vm735_vm1, %v734_v0 }
 0x1ae   :  { %v307_v38 = vpop.f32.mrf.mxu0 }
 0x1af   :  { %v308_v39 = vadd.f32 %v545_v37, %v307_v38 }
 0x1b0   :  { %v632_v40 = vpop.f32.mrf.mxu0 }
 0x1b1   :  { %v351_v41 = vmax.f32 %v308_v39, 0.0 }
 0x1b2   :  { %v312_v42 = vpop.f32.mrf.mxu0 }
 0x1b3   :  { %v313_v43 = vadd.f32 %v545_v37, %v312_v42  ;;  %674 = vmatmul.mubr.msk.f32.vlgmr.msra.gmra.mxu1 %vm375_vm2, %v351_v41 }
 0x1b4   :  { %v635_v44 = vpop.f32.mrf.mxu0  ;;  %676 = vmatprep.mubr.msk.f32.mxu1 %vm735_vm1, %v734_v0 }
 0x1b5   :  { %v352_v45 = vmax.f32 %v313_v43, 0.0 }
 0x1b6   :  { %v317_v46 = vpop.f32.mrf.mxu0 }
 0x1b7   :  { %v318_v47 = vadd.f32 %v545_v37, %v317_v46  ;;  %677 = vmatmul.mubr.msk.f32.gmra.mxu1 %vm375_vm2, %v352_v45 }
 0x1b8   :  { %v638_v48 = vpop.f32.mrf.mxu0  ;;  %679 = vmatprep.mubr.msk.f32.mxu1 %vm735_vm1, %v734_v0 }
 0x1b9   :  { %v353_v49 = vmax.f32 %v318_v47, 0.0 }
 0x1ba   :  { %v322_v50 = vpop.f32.mrf.mxu1 }
 0x1bb   :  { %v323_v51 = vadd.f32 %v545_v37, %v322_v50  ;;  %680 = vmatmul.mubr.msk.f32.gmra.mxu1 %vm375_vm2, %v353_v49 }
 0x1bc   :  { %v641_v52 = vpop.f32.mrf.mxu1  ;;  %682 = vmatprep.mubr.msk.f32.mxu1 %vm735_vm1, %v734_v0 }
 0x1bd   :  { %v354_v53 = vmax.f32 %v323_v51, 0.0 }
 0x1be   :  { %v327_v54 = vpop.f32.mrf.mxu1 }
 0x1bf   :  { %v328_v55 = vadd.f32 %v545_v37, %v327_v54  ;;  %683 = vmatmul.mubr.msk.f32.gmra.mxu1 %vm375_vm2, %v354_v53 }
 0x1c0   :  { %v644_v56 = vpop.f32.mrf.mxu1  ;;  %685 = vmatprep.mubr.msk.f32.mxu1 %vm735_vm1, %v734_v0 }
 0x1c1   :  { %v355_v57 = vmax.f32 %v328_v55, 0.0 }
 0x1c2   :  { %v332_v58 = vpop.f32.mrf.mxu1 }
 0x1c3   :  { %v333_v59 = vadd.f32 %v545_v37, %v332_v58  ;;  %686 = vmatmul.mubr.msk.f32.gmra.mxu1 %vm375_vm2, %v355_v57 }
 0x1c4   :  { %v647_v60 = vpop.f32.mrf.mxu1  ;;  %688 = vmatprep.mubr.msk.f32.mxu1 %vm735_vm1, %v734_v0 }
 0x1c5   :  { %v356_v61 = vmax.f32 %v333_v59, 0.0 }
 0x1c6   :  { %v337_v62 = vpop.f32.mrf.mxu1 }
 0x1c7   :  { %v338_v63 = vadd.f32 %v545_v37, %v337_v62  ;;  %689 = vmatmul.mubr.msk.f32.gmra.mxu1 %vm375_vm2, %v356_v61 }
 0x1c8   :  { %v650_v1 = vpop.f32.mrf.mxu1  ;;  %691 = vmatprep.mubr.msk.f32.mxu1 %vm735_vm1, %v734_v0 }
 0x1c9   :  { %v357_v2 = vmax.f32 %v338_v63, 0.0 }
 0x1ca   :  { %v342_v3 = vpop.f32.mrf.mxu1 }
 0x1cb   :  { %v343_v4 = vadd.f32 %v545_v37, %v342_v3  ;;  %692 = vmatmul.mubr.msk.f32.gmra.mxu1 %vm375_vm2, %v357_v2 }
 0x1cc   :  { %v653_v5 = vpop.f32.mrf.mxu1  ;;  %694 = vmatprep.mubr.msk.f32.mxu1 %vm735_vm1, %v734_v0 }
 0x1cd   :  { %v358_v6 = vmax.f32 %v343_v4, 0.0 }
 0x1ce   :  { %v347_v7 = vpop.f32.mrf.mxu1 }
 0x1cf   :  { %v348_v8 = vadd.f32 %v545_v37, %v347_v7  ;;  %695 = vmatmul.mubr.msk.f32.gmra.mxu1 %vm375_vm2, %v358_v6 }
 0x1d0   :  { %v656_v9 = vpop.f32.mrf.mxu1  ;;  %697 = vmatprep.mubr.msk.f32.mxu1 %vm735_vm1, %v734_v0 }
 0x1d1   :  { %v359_v10 = vmax.f32 %v348_v8, 0.0 }
 0x1d3   :  { %698 = vmatmul.mubr.msk.f32.gmra.mxu1 %vm375_vm2, %v359_v10 }
 0x273   :  { %v469_v12 = vpop.f32.mrf.mxu1 }
 0x274   :  { %v470_v13 = vadd.f32 %v546_v11, %v469_v12 }
 0x275   :  { %v675_v14 = vpop.f32.mrf.mxu1 }
 0x276   :  { %v513_v15 = vmax.f32 %v470_v13, 0.0 }
 0x277   :  { %v474_v16 = vpop.f32.mrf.mxu1 }
 0x278   :  { %522 = vst.msk [vmem:[%s1191_s7] sm:$0xff] %vm71_vm0, %v513_v15  ;;  %v475_v17 = vadd.f32 %v546_v11, %v474_v16 }
 0x279   :  { %v678_v18 = vpop.f32.mrf.mxu1 }
 0x27a   :  { %v514_v0 = vmax.f32 %v475_v17, 0.0 }
 0x27b   :  { %v479_v19 = vpop.f32.mrf.mxu1 }
 0x27c   :  { %523 = vst.msk [vmem:[%s1191_s7 + $0x8] sm:$0xff] %vm71_vm0, %v514_v0  ;;  %v480_v20 = vadd.f32 %v546_v11, %v479_v19 }
 0x27d   :  { %v681_v21 = vpop.f32.mrf.mxu1 }
 0x27e   :  { %v515_v22 = vmax.f32 %v480_v20, 0.0 }
 0x27f   :  { %v484_v23 = vpop.f32.mrf.mxu1 }
 0x280   :  { %524 = vst.msk [vmem:[%s1191_s7 + $0x10] sm:$0xff] %vm71_vm0, %v515_v22  ;;  %v485_v24 = vadd.f32 %v546_v11, %v484_v23 }
 0x281   :  { %v684_v25 = vpop.f32.mrf.mxu1 }
 0x282   :  { %v516_v26 = vmax.f32 %v485_v24, 0.0 }
 0x283   :  { %v489_v27 = vpop.f32.mrf.mxu1 }
 0x284   :  { %525 = vst.msk [vmem:[%s1191_s7 + $0x18] sm:$0xff] %vm71_vm0, %v516_v26  ;;  %v490_v28 = vadd.f32 %v546_v11, %v489_v27 }
 0x285   :  { %v687_v29 = vpop.f32.mrf.mxu1 }
 0x286   :  { %v517_v30 = vmax.f32 %v490_v28, 0.0 }
 0x287   :  { %v494_v31 = vpop.f32.mrf.mxu1 }
 0x288   :  { %526 = vst.msk [vmem:[%s1191_s7 + $0x20] sm:$0xff] %vm71_vm0, %v517_v30  ;;  %v495_v32 = vadd.f32 %v546_v11, %v494_v31 }
 0x289   :  { %v690_v33 = vpop.f32.mrf.mxu1 }
 0x28a   :  { %v518_v34 = vmax.f32 %v495_v32, 0.0 }
 0x28b   :  { %v499_v35 = vpop.f32.mrf.mxu1 }
 0x28c   :  { %527 = vst.msk [vmem:[%s1191_s7 + $0x28] sm:$0xff] %vm71_vm0, %v518_v34  ;;  %v500_v36 = vadd.f32 %v546_v11, %v499_v35 }
 0x28d   :  { %v693_v37 = vpop.f32.mrf.mxu1 }
 0x28e   :  { %v519_v38 = vmax.f32 %v500_v36, 0.0 }
 0x28f   :  { %v504_v39 = vpop.f32.mrf.mxu1 }
 0x290   :  { %528 = vst.msk [vmem:[%s1191_s7 + $0x30] sm:$0xff] %vm71_vm0, %v519_v38  ;;  %v505_v40 = vadd.f32 %v546_v11, %v504_v39 }
 0x291   :  { %v696_v41 = vpop.f32.mrf.mxu1 }
 0x292   :  { %v520_v42 = vmax.f32 %v505_v40, 0.0 }
 0x293   :  { %v509_v43 = vpop.f32.mrf.mxu1 }
 0x294   :  { %529 = vst.msk [vmem:[%s1191_s7 + $0x38] sm:$0xff] %vm71_vm0, %v520_v42  ;;  %v510_v44 = vadd.f32 %v546_v11, %v509_v43 }
 0x295   :  { %v699_v45 = vpop.f32.mrf.mxu1 }
 0x296   :  { %v521_v46 = vmax.f32 %v510_v44, 0.0 }
 0x298   :  { %530 = vst.msk [vmem:[%s1191_s7 + $0x40] sm:$0xff] %vm71_vm0, %v521_v46 }

// kernel: baseline_widar3_forward.5
= control target key start
LH: loop header
LB: loop body
LE: loop exit
PB: predicated region body
PF: predicated region fallthrough
CT: control target
= control target key end

     0   :  { %v3915_v4 = vmov 0.0   ;;  %vm126_vm0 = vcmask 523264   ;;  %s3905_s0 = inlined_call_operand.vmem [shape: f32[12,192], index: 0, kind: input, shape index: {}]   ;;  %s3906_s1 = inlined_call_operand.vmem [shape: f32[192,384], index: 1, kind: input, shape index: {}]   ;;  %s3907_s2 = inlined_call_operand.vmem [shape: f32[1,384], index: 2, kind: input, shape index: {}]   ;;  %s3908_s3 = inlined_call_operand.vmem [shape: f32[128,384], index: 3, kind: input, shape index: {}]   ;;  %s3909_s4 = inlined_call_operand.vmem [shape: f32[1,384], index: 4, kind: input, shape index: {}]   ;;  %s3910_s5 = inlined_call_operand.vmem [shape: f32[768,128], index: 5, kind: input, shape index: {}]   ;;  %s3911_s6 = inlined_call_operand.vmem [shape: f32[1,128], index: 6, kind: input, shape index: {}]   ;;  %s3912_s7 = inlined_call_operand.vmem [shape: f32[128,10], index: 7, kind: input, shape index: {}]   ;;  %s3913_s8 = inlined_call_operand.vmem [shape: f32[1,10], index: 8, kind: input, shape index: {}]   ;;  %s3914_s9 = inlined_call_operand.hbm [shape: f32[2,10], index: 9, kind: output, shape index: {}]  }
   0x1   :  { %v83_v0 = vld [vmem:[%s3906_s1 + $0x170] sm:$0xff]  ;;  %v82_v1 = vld [vmem:[%s3906_s1 + $0x168] sm:$0xff]  ;;  %v80_v2 = vld [vmem:[%s3906_s1 + $0x158] sm:$0xff]  ;;  %210 = vmatprep.subr.mxu1 %v3915_v4 }
   0x2   :  { %133 = vmatprep.subr.mxu0 %v83_v0  ;;  %v79_v3 = vld [vmem:[%s3906_s1 + $0x150] sm:$0xff]  ;;  %v77_v5 = vld [vmem:[%s3906_s1 + $0x140] sm:$0xff]  ;;  %v76_v6 = vld [vmem:[%s3906_s1 + $0x138] sm:$0xff] }
   0x3   :  { %134 = vmatpush1.msra.mxu0 %v82_v1  ;;  %v74_v7 = vld [vmem:[%s3906_s1 + $0x128] sm:$0xff]  ;;  %v73_v8 = vld [vmem:[%s3906_s1 + $0x120] sm:$0xff]  ;;  %v71_v9 = vld [vmem:[%s3906_s1 + $0x110] sm:$0xff] }
   0x4   :  { %135 = vmatprep.subr.mxu0 %v80_v2  ;;  %v70_v10 = vld [vmem:[%s3906_s1 + $0x108] sm:$0xff]  ;;  %v68_v11 = vld [vmem:[%s3906_s1 + $0xf8] sm:$0xff]  ;;  %v67_v12 = vld [vmem:[%s3906_s1 + $0xf0] sm:$0xff] }
   0x5   :  { %136 = vmatpush1.msra.mxu0 %v79_v3  ;;  %v65_v13 = vld [vmem:[%s3906_s1 + $0xe0] sm:$0xff]  ;;  %v64_v14 = vld [vmem:[%s3906_s1 + $0xd8] sm:$0xff]  ;;  %v62_v16 = vld [vmem:[%s3906_s1 + $0xc8] sm:$0xff] }
   0x6   :  { %137 = vmatprep.subr.mxu0 %v77_v5  ;;  %v84_v15 = vld [vmem:[%s3906_s1 + $0x178] sm:$0xff]  ;;  %v81_v17 = vld [vmem:[%s3906_s1 + $0x160] sm:$0xff]  ;;  %v78_v19 = vld [vmem:[%s3906_s1 + $0x148] sm:$0xff] }
   0x7   :  { %138 = vmatpush1.msra.mxu0 %v76_v6  ;;  %211 = vmatpush1.msra.mxu1 %v84_v15  ;;  %v61_v18 = vld [vmem:[%s3906_s1 + $0xc0] sm:$0xff]  ;;  %v59_v20 = vld [vmem:[%s3906_s1 + $0xb0] sm:$0xff]  ;;  %v58_v21 = vld [vmem:[%s3906_s1 + $0xa8] sm:$0xff] }
   0x8   :  { %139 = vmatprep.subr.mxu0 %v74_v7  ;;  %212 = vmatprep.subr.mxu1 %v3915_v4  ;;  %v75_v22 = vld [vmem:[%s3906_s1 + $0x130] sm:$0xff]  ;;  %v56_v23 = vld [vmem:[%s3906_s1 + $0x98] sm:$0xff]  ;;  %v53_v26 = vld [vmem:[%s3906_s1 + $0x80] sm:$0xff] }
   0x9   :  { %140 = vmatpush1.msra.mxu0 %v73_v8  ;;  %213 = vmatpush1.msra.mxu1 %v81_v17  ;;  %v55_v24 = vld [vmem:[%s3906_s1 + $0x90] sm:$0xff]  ;;  %v72_v25 = vld [vmem:[%s3906_s1 + $0x118] sm:$0xff]  ;;  %v69_v28 = vld [vmem:[%s3906_s1 + $0x100] sm:$0xff] }
   0xa   :  { %141 = vmatprep.subr.mxu0 %v71_v9  ;;  %214 = vmatprep.subr.mxu1 %v3915_v4  ;;  %v52_v27 = vld [vmem:[%s3906_s1 + $0x78] sm:$0xff]  ;;  %v50_v29 = vld [vmem:[%s3906_s1 + $0x68] sm:$0xff]  ;;  %v49_v30 = vld [vmem:[%s3906_s1 + $0x60] sm:$0xff] }
   0xb   :  { %142 = vmatpush1.msra.mxu0 %v70_v10  ;;  %215 = vmatpush1.msra.mxu1 %v78_v19  ;;  %v66_v31 = vld [vmem:[%s3906_s1 + $0xe8] sm:$0xff]  ;;  %v47_v32 = vld [vmem:[%s3906_s1 + $0x50] sm:$0xff]  ;;  %v44_v35 = vld [vmem:[%s3906_s1 + $0x38] sm:$0xff] }
   0xc   :  { %143 = vmatprep.subr.mxu0 %v68_v11  ;;  %216 = vmatprep.subr.mxu1 %v3915_v4  ;;  %v46_v33 = vld [vmem:[%s3906_s1 + $0x48] sm:$0xff]  ;;  %v63_v36 = vld [vmem:[%s3906_s1 + $0xd0] sm:$0xff]  ;;  %v41_v38 = vld [vmem:[%s3906_s1 + $0x20] sm:$0xff] }
   0xd   :  { %144 = vmatpush1.msra.mxu0 %v67_v12  ;;  %217 = vmatpush1.msra.mxu1 %v75_v22  ;;  %v2571_v34 = vld [vmem:[%s3905_s0 + $0x8] sm:$0xff]  ;;  %v43_v37 = vld [vmem:[%s3906_s1 + $0x30] sm:$0xff]  ;;  %v60_v39 = vld [vmem:[%s3906_s1 + $0xb8] sm:$0xff] }
   0xe   :  { %145 = vmatprep.subr.mxu0 %v65_v13  ;;  %218 = vmatprep.subr.mxu1 %v3915_v4  ;;  %v40_v40 = vld [vmem:[%s3906_s1 + $0x18] sm:$0xff]  ;;  %v38_v41 = vld [vmem:[%s3906_s1 + $0x8] sm:$0xff]  ;;  %v57_v42 = vld [vmem:[%s3906_s1 + $0xa0] sm:$0xff] }
   0xf   :  { %146 = vmatpush1.msra.mxu0 %v64_v14  ;;  %219 = vmatpush1.msra.mxu1 %v72_v25  ;;  %v37_v43 = vld [vmem:[%s3906_s1] sm:$0xff]  ;;  %v107_v44 = vld [vmem:[%s3906_s1 + $0x230] sm:$0xff]  ;;  %v54_v45 = vld [vmem:[%s3906_s1 + $0x88] sm:$0xff] }
  0x10   :  { %147 = vmatprep.subr.mxu0 %v62_v16  ;;  %220 = vmatprep.subr.mxu1 %v3915_v4  ;;  %v106_v46 = vld [vmem:[%s3906_s1 + $0x228] sm:$0xff]  ;;  %v104_v47 = vld [vmem:[%s3906_s1 + $0x218] sm:$0xff]  ;;  %v51_v48 = vld [vmem:[%s3906_s1 + $0x70] sm:$0xff] }
  0x11   :  { %148 = vmatpush1.msra.mxu0 %v61_v18  ;;  %221 = vmatpush1.msra.mxu1 %v69_v28  ;;  %v103_v49 = vld [vmem:[%s3906_s1 + $0x210] sm:$0xff]  ;;  %v101_v50 = vld [vmem:[%s3906_s1 + $0x200] sm:$0xff]  ;;  %v48_v51 = vld [vmem:[%s3906_s1 + $0x58] sm:$0xff] }
  0x12   :  { %149 = vmatprep.subr.mxu0 %v59_v20  ;;  %222 = vmatprep.subr.mxu1 %v3915_v4  ;;  %v100_v52 = vld [vmem:[%s3906_s1 + $0x1f8] sm:$0xff]  ;;  %v98_v53 = vld [vmem:[%s3906_s1 + $0x1e8] sm:$0xff]  ;;  %v45_v54 = vld [vmem:[%s3906_s1 + $0x40] sm:$0xff] }
  0x13   :  { %150 = vmatpush1.msra.mxu0 %v58_v21  ;;  %223 = vmatpush1.msra.mxu1 %v66_v31  ;;  %v97_v55 = vld [vmem:[%s3906_s1 + $0x1e0] sm:$0xff]  ;;  %v95_v56 = vld [vmem:[%s3906_s1 + $0x1d0] sm:$0xff]  ;;  %v42_v57 = vld [vmem:[%s3906_s1 + $0x28] sm:$0xff] }
  0x14   :  { %151 = vmatprep.subr.mxu0 %v56_v23  ;;  %224 = vmatprep.subr.mxu1 %v3915_v4  ;;  %v94_v58 = vld [vmem:[%s3906_s1 + $0x1c8] sm:$0xff]  ;;  %v92_v59 = vld [vmem:[%s3906_s1 + $0x1b8] sm:$0xff]  ;;  %v39_v60 = vld [vmem:[%s3906_s1 + $0x10] sm:$0xff] }
  0x15   :  { %152 = vmatpush1.msra.mxu0 %v55_v24  ;;  %1803 = vmatprep.mubr.msk.f32.mxu0 %vm126_vm0, %v2571_v34  ;;  %v91_v61 = vld [vmem:[%s3906_s1 + $0x1b0] sm:$0xff] }
  0x16   :  { %153 = vmatprep.subr.mxu0 %v53_v26  ;;  %225 = vmatpush1.msra.mxu1 %v63_v36 }
  0x17   :  { %154 = vmatpush1.msra.mxu0 %v52_v27  ;;  %226 = vmatprep.subr.mxu1 %v3915_v4 }
  0x18   :  { %155 = vmatprep.subr.mxu0 %v50_v29  ;;  %227 = vmatpush1.msra.mxu1 %v60_v39 }
  0x19   :  { %156 = vmatpush1.msra.mxu0 %v49_v30  ;;  %228 = vmatprep.subr.mxu1 %v3915_v4 }
  0x1a   :  { %157 = vmatprep.subr.mxu0 %v47_v32  ;;  %229 = vmatpush1.msra.mxu1 %v57_v42 }
  0x1b   :  { %158 = vmatpush1.msra.mxu0 %v46_v33  ;;  %230 = vmatprep.subr.mxu1 %v3915_v4 }
  0x1c   :  { %159 = vmatprep.subr.mxu0 %v44_v35  ;;  %231 = vmatpush1.msra.mxu1 %v54_v45 }
  0x1d   :  { %160 = vmatpush1.msra.mxu0 %v43_v37  ;;  %232 = vmatprep.subr.mxu1 %v3915_v4 }
  0x1e   :  { %161 = vmatprep.subr.mxu0 %v41_v38  ;;  %233 = vmatpush1.msra.mxu1 %v51_v48 }
  0x1f   :  { %162 = vmatpush1.msra.mxu0 %v40_v40  ;;  %234 = vmatprep.subr.mxu1 %v3915_v4 }
  0x20   :  { %163 = vmatprep.subr.mxu0 %v38_v41  ;;  %235 = vmatpush1.msra.mxu1 %v48_v51 }
  0x21   :  { %164 = vmatpush1.msra.mxu0 %v37_v43  ;;  %236 = vmatprep.subr.mxu1 %v3915_v4 }
  0x22   :  { %181 = vmatprep.subr.mxu0 %v107_v44  ;;  %237 = vmatpush1.msra.mxu1 %v45_v54 }
  0x23   :  { %182 = vmatpush2.msra.mxu0 %v106_v46  ;;  %238 = vmatprep.subr.mxu1 %v3915_v4 }
  0x24   :  { %183 = vmatprep.subr.mxu0 %v104_v47  ;;  %239 = vmatpush1.msra.mxu1 %v42_v57 }
  0x25   :  { %184 = vmatpush2.msra.mxu0 %v103_v49 }
  0x26   :  { %185 = vmatprep.subr.mxu0 %v101_v50 }
  0x27   :  { %186 = vmatpush2.msra.mxu0 %v100_v52 }
  0x28   :  { %187 = vmatprep.subr.mxu0 %v98_v53 }
  0x29   :  { %188 = vmatpush2.msra.mxu0 %v97_v55 }
  0x2a   :  { %189 = vmatprep.subr.mxu0 %v95_v56 }
  0x2b   :  { %14 = vsyncpa [#allocation3], 0  ;;  %190 = vmatpush2.msra.mxu0 %v94_v58  ;;  %v89_v62 = vld [vmem:[%s3906_s1 + $0x1a0] sm:$0xff]  ;;  %240 = vmatprep.subr.mxu1 %v3915_v4  ;;  %v108_v63 = vld [vmem:[%s3906_s1 + $0x238] sm:$0xff]  ;;  %vm2410_vm1 = vmmov 0   ;;  %s2411_s29 = smov [#allocation2]  }
  0x2c   :  { %191 = vmatprep.subr.mxu0 %v92_v59  ;;  %v88_v0 = vld [vmem:[%s3906_s1 + $0x198] sm:$0xff]  ;;  %241 = vmatpush1.msra.mxu1 %v39_v60  ;;  %v86_v1 = vld [vmem:[%s3906_s1 + $0x188] sm:$0xff]  ;;  %v105_v2 = vld [vmem:[%s3906_s1 + $0x220] sm:$0xff]  ;;  %s1795_s30 = sshll.u32 %s2411_s29, 4  ;;  %vm1787_vm2 = vcmask 74752   ;;  %s1796_s30 = int_to_ptr.vmem [resolvable:$true] %s1795_s30 }
  0x2d   :  { %192 = vmatpush2.msra.mxu0 %v91_v61  ;;  %258 = vmatprep.subr.mxu1 %v3915_v4  ;;  %v85_v3 = vld [vmem:[%s3906_s1 + $0x180] sm:$0xff]  ;;  %v2692_v6 = vld [vmem:[%s3908_s3 + $0x170] sm:$0xff]  ;;  %v2698_v7 = vld [vmem:[%s3908_s3 + $0x168] sm:$0xff]  ;;  %p2392_p1 = scmp.lt.s32.totalorder %s1796_s30, %s1796_s30 }
  0x2e   :  { %193 = vmatprep.subr.mxu0 %v89_v62  ;;  %259 = vmatpush2.msra.mxu1 %v108_v63  ;;  %v2687_v5 = vld [vmem:[%s3905_s0] sm:$0xff]  ;;  %3940 = vst [vmem:[#allocation5_spill] sm:$0xff] %v2692_v6  ;;  %v102_v8 = vld [vmem:[%s3906_s1 + $0x208] sm:$0xff]  ;;  %v2706_v9 = vld [vmem:[%s3908_s3 + $0x158] sm:$0xff]  ;;  %v111_v62 = vlaneseq }
  0x2f   :  { %194 = vmatpush2.msra.mxu0 %v88_v0  ;;  %260 = vmatprep.subr.mxu1 %v3915_v4  ;;  %v2714_v10 = vld [vmem:[%s3908_s3 + $0x150] sm:$0xff]  ;;  %v2723_v12 = vld [vmem:[%s3908_s3 + $0x140] sm:$0xff]  ;;  %v2729_v13 = vld [vmem:[%s3908_s3 + $0x138] sm:$0xff] }
  0x30   :  { %195 = vmatprep.subr.mxu0 %v86_v1  ;;  %261 = vmatpush2.msra.mxu1 %v105_v2  ;;  %v99_v11 = vld [vmem:[%s3906_s1 + $0x1f0] sm:$0xff]  ;;  %v2735_v14 = vld [vmem:[%s3905_s0 + $0x18] sm:$0xf]  ;;  %v2741_v15 = vld [vmem:[%s3908_s3 + $0x128] sm:$0xff]  ;;  %v112_v63 = vshrl.u32 %v111_v62, 7 }
  0x31   :  { %196 = vmatpush2.msra.mxu0 %v85_v3  ;;  %262 = vmatprep.subr.mxu1 %v3915_v4  ;;  %v96_v16 = vld [vmem:[%s3906_s1 + $0x1d8] sm:$0xff]  ;;  %v2750_v17 = vld [vmem:[%s3908_s3 + $0x120] sm:$0xff]  ;;  %v2757_v18 = vld [vmem:[%s3908_s3 + $0x110] sm:$0xff] }
  0x32   :  { %198 = vmatmul.mubr.f32.vlgmr.msra.gmra.mxu0 %v2687_v5  ;;  %350 = vmatprep.subr.mxu0 %v2692_v6  ;;  %v2764_v19 = vld [vmem:[%s3905_s0 + $0x10] sm:$0xf]  ;;  %v2770_v20 = vld [vmem:[%s3908_s3 + $0x108] sm:$0xff]  ;;  %v93_v21 = vld [vmem:[%s3906_s1 + $0x1c0] sm:$0xff]  ;;  %v113_v1 = vsub.s32 0, %v112_v63  ;;  %v117_v3 = vsub.s32 1, %v112_v63 }
  0x33   :  { %351 = vmatpush1.msra.mxu0 %v2698_v7  ;;  %263 = vmatpush2.msra.mxu1 %v102_v8  ;;  %v2779_v22 = vld [vmem:[%s3908_s3 + $0xf8] sm:$0xff]  ;;  %v2786_v23 = vld [vmem:[%s3908_s3 + $0xf0] sm:$0xff]  ;;  %v90_v24 = vld [vmem:[%s3906_s1 + $0x1a8] sm:$0xff] }
  0x34   :  { %352 = vmatprep.subr.mxu0 %v2706_v9  ;;  %264 = vmatprep.subr.mxu1 %v3915_v4  ;;  %v2796_v25 = vld [vmem:[%s3908_s3 + $0xe0] sm:$0xff]  ;;  %v2802_v26 = vld [vmem:[%s3908_s3 + $0xd8] sm:$0xff]  ;;  %v87_v27 = vld [vmem:[%s3906_s1 + $0x190] sm:$0xff] }
  0x35   :  { %353 = vmatpush1.msra.mxu0 %v2714_v10  ;;  %265 = vmatpush2.msra.mxu1 %v99_v11  ;;  %v2812_v28 = vld [vmem:[%s3908_s3 + $0xc8] sm:$0xff]  ;;  %v2818_v29 = vld [vmem:[%s3908_s3 + $0xc0] sm:$0xff]  ;;  %v2825_v30 = vld [vmem:[%s3908_s3 + $0xb0] sm:$0xff] }
  0x36   :  { %354 = vmatprep.subr.mxu0 %v2723_v12  ;;  %266 = vmatprep.subr.mxu1 %v3915_v4  ;;  %v2831_v31 = vld [vmem:[%s3908_s3 + $0xa8] sm:$0xff]  ;;  %v2838_v32 = vld [vmem:[%s3908_s3 + $0x98] sm:$0xff]  ;;  %v2851_v35 = vld [vmem:[%s3908_s3 + $0x90] sm:$0xff] }
  0x37   :  { %355 = vmatpush1.msra.mxu0 %v2729_v13  ;;  %1804 = vmatprep.mubr.msk.f32.mxu0 %vm126_vm0, %v2735_v14  ;;  %v2845_v33 = vld [vmem:[%s3908_s3 + $0x178] sm:$0xff]  ;;  %v2864_v36 = vld [vmem:[%s3908_s3 + $0x160] sm:$0xff]  ;;  %v2877_v38 = vld [vmem:[%s3908_s3 + $0x68] sm:$0xff] }
  0x38   :  { %356 = vmatprep.subr.mxu0 %v2741_v15  ;;  %267 = vmatpush2.msra.mxu1 %v96_v16  ;;  %v2870_v37 = vld [vmem:[%s3908_s3 + $0x78] sm:$0xff]  ;;  %v2883_v39 = vld [vmem:[%s3908_s3 + $0x148] sm:$0xff]  ;;  %v2889_v40 = vld [vmem:[%s3908_s3 + $0x60] sm:$0xff] }
  0x39   :  { %357 = vmatpush1.msra.mxu0 %v2750_v17  ;;  %268 = vmatprep.subr.mxu1 %v3915_v4  ;;  %v2896_v41 = vld [vmem:[%s3908_s3 + $0x50] sm:$0xff]  ;;  %v2908_v43 = vld [vmem:[%s3908_s3 + $0x48] sm:$0xff]  ;;  %v2915_v44 = vld [vmem:[%s3908_s3 + $0x38] sm:$0xff] }
  0x3a   :  { %358 = vmatprep.subr.mxu0 %v2757_v18  ;;  %204 = vmatmul.mubr.f32.gmra.mxu0 %v2764_v19  ;;  %v2902_v42 = vld [vmem:[%s3908_s3 + $0x130] sm:$0xff]  ;;  %v2921_v45 = vld [vmem:[%s3908_s3 + $0x118] sm:$0xff]  ;;  %v2934_v47 = vld [vmem:[%s3908_s3 + $0x20] sm:$0xff] }
  0x3b   :  { %359 = vmatpush1.msra.mxu0 %v2770_v20  ;;  %269 = vmatpush2.msra.mxu1 %v93_v21  ;;  %v2927_v46 = vld [vmem:[%s3908_s3 + $0x30] sm:$0xff]  ;;  %3941 = vst [vmem:[#allocation6_spill] sm:$0xff] %v2934_v47  ;;  %v2940_v48 = vld [vmem:[%s3908_s3 + $0x100] sm:$0xff]  ;;  %v2946_v49 = vld [vmem:[%s3908_s3 + $0x18] sm:$0xff] }
  0x3c   :  { %360 = vmatprep.subr.mxu0 %v2779_v22  ;;  %270 = vmatprep.subr.mxu1 %v3915_v4  ;;  %3942 = vst [vmem:[#allocation7_spill] sm:$0xff] %v2946_v49  ;;  %v2953_v50 = vld [vmem:[%s3908_s3 + $0x8] sm:$0xff]  ;;  %v2965_v52 = vld [vmem:[%s3908_s3] sm:$0xff]  ;;  %v2973_v53 = vld [vmem:[%s3908_s3 + $0xd0] sm:$0xff] }
  0x3d   :  { %361 = vmatpush1.msra.mxu0 %v2786_v23  ;;  %271 = vmatpush2.msra.mxu1 %v90_v24  ;;  %3943 = vst [vmem:[#allocation8_spill] sm:$0xff] %v2953_v50  ;;  %v2959_v51 = vld [vmem:[%s3908_s3 + $0xe8] sm:$0xff]  ;;  %3944 = vst [vmem:[#allocation9_spill] sm:$0xff] %v2965_v52  ;;  %v2982_v54 = vld [vmem:[%s3908_s3 + $0xb8] sm:$0xff] }
  0x3e   :  { %362 = vmatprep.subr.mxu0 %v2796_v25  ;;  %272 = vmatprep.subr.mxu1 %v3915_v4  ;;  %v2990_v55 = vld [vmem:[%s3908_s3 + $0xa0] sm:$0xff]  ;;  %v3000_v56 = vld [vmem:[%s3908_s3 + $0x88] sm:$0xff]  ;;  %v3010_v57 = vld [vmem:[%s3908_s3 + $0x70] sm:$0xff] }
  0x3f   :  { %363 = vmatpush1.msra.mxu0 %v2802_v26  ;;  %273 = vmatpush2.msra.mxu1 %v87_v27  ;;  %v3019_v58 = vld [vmem:[%s3908_s3 + $0x58] sm:$0xff]  ;;  %v3028_v59 = vld [vmem:[%s3908_s3 + $0x40] sm:$0xff]  ;;  %v3037_v60 = vld [vmem:[%s3908_s3 + $0x28] sm:$0xff] }
  0x40   :  { %364 = vmatprep.subr.mxu0 %v2812_v28  ;;  %414 = vmatprep.mubr.f32.mxu0 %v3915_v4  ;;  %3945 = vst [vmem:[#allocation10_spill] sm:$0xff] %v3028_v59  ;;  %3946 = vst [vmem:[#allocation11_spill] sm:$0xff] %v3037_v60  ;;  %v3046_v61 = vld [vmem:[%s3908_s3 + $0x10] sm:$0xff]  ;;  %v109_v2 = vld [vmem:[%s3907_s2] sm:$0x7] }
  0x41   :  { %365 = vmatpush1.msra.mxu0 %v2818_v29  ;;  %1805 = vmatprep.mubr.msk.f32.mxu1 %vm126_vm0, %v2571_v34  ;;  %v2858_v34 = vld [vmem:[%s3908_s3 + $0x80] sm:$0xff]  ;;  %3947 = vst [vmem:[#allocation12_spill] sm:$0xff] %v3046_v61  ;;  %v114_v8 = vrot.slane %v109_v2, %v113_v1 }
  0x42   :  { %366 = vmatprep.subr.mxu0 %v2825_v30  ;;  %2045 = vmatprep.subr.mxu1 %v3915_v4  ;;  %v333_v62 = vld [vmem:[%s3909_s4] sm:$0x7] }
  0x43   :  { %367 = vmatpush1.msra.mxu0 %v2831_v31  ;;  %275 = vmatmul.mubr.f32.vlgmr.msra.gmra.mxu1 %v2687_v5 }
  0x44   :  { %368 = vmatprep.subr.mxu0 %v2838_v32  ;;  %2046 = vmatpush3.msra.mxu1 %v2845_v33 }
  0x45   :  { %369 = vmatpush1.msra.mxu0 %v2851_v35  ;;  %2047 = vmatprep.subr.mxu1 %v3915_v4 }
  0x46   :  { %370 = vmatprep.subr.mxu0 %v2858_v34  ;;  %2048 = vmatpush3.msra.mxu1 %v2864_v36 }
  0x47   :  { %371 = vmatpush1.msra.mxu0 %v2870_v37  ;;  %2049 = vmatprep.subr.mxu1 %v3915_v4 }
  0x48   :  { %372 = vmatprep.subr.mxu0 %v2877_v38  ;;  %2050 = vmatpush3.msra.mxu1 %v2883_v39 }
  0x49   :  { %373 = vmatpush1.msra.mxu0 %v2889_v40  ;;  %2051 = vmatprep.subr.mxu1 %v3915_v4 }
  0x4a   :  { %374 = vmatprep.subr.mxu0 %v2896_v41  ;;  %2052 = vmatpush3.msra.mxu1 %v2902_v42 }
  0x4b   :  { %375 = vmatpush1.msra.mxu0 %v2908_v43  ;;  %2053 = vmatprep.subr.mxu1 %v3915_v4 }
  0x4c   :  { %376 = vmatprep.subr.mxu0 %v2915_v44  ;;  %2054 = vmatpush3.msra.mxu1 %v2921_v45 }
  0x4d   :  { %377 = vmatpush1.msra.mxu0 %v2927_v46  ;;  %2055 = vmatprep.subr.mxu1 %v3915_v4 }
  0x4e   :  { %378 = vmatprep.subr.mxu0 %v2934_v47  ;;  %2056 = vmatpush3.msra.mxu1 %v2940_v48 }
  0x4f   :  { %379 = vmatpush1.msra.mxu0 %v2946_v49  ;;  %2057 = vmatprep.subr.mxu1 %v3915_v4 }
  0x50   :  { %380 = vmatprep.subr.mxu0 %v2953_v50  ;;  %2058 = vmatpush3.msra.mxu1 %v2959_v51 }
  0x51   :  { %381 = vmatpush1.msra.mxu0 %v2965_v52  ;;  %2059 = vmatprep.subr.mxu1 %v3915_v4 }
  0x52   :  { %415 = vmatmul.mubr.f32.vlgmr.msra.gmra.mxu0 %v3915_v4  ;;  %2060 = vmatpush3.msra.mxu1 %v2973_v53 }
  0x53   :  { %2061 = vmatprep.subr.mxu1 %v3915_v4  ;;  %1806 = vmatprep.mubr.msk.f32.mxu1 %vm126_vm0, %v2735_v14  ;;  %v118_v14 = vrot.slane %v109_v2, %v117_v3 }
  0x54   :  { %2062 = vmatpush3.msra.mxu1 %v2982_v54  ;;  %512 = vmatprep.subr.mxu0 %v2692_v6 }
  0x55   :  { %2063 = vmatprep.subr.mxu1 %v3915_v4  ;;  %280 = vmatmul.mubr.f32.gmra.mxu1 %v2764_v19 }
  0x56   :  { %2064 = vmatpush3.msra.mxu1 %v2990_v55  ;;  %2077 = vmatprep.mubr.msk.f32.mxu1 %vm2410_vm1, %v3915_v4 }
  0x57   :  { %2065 = vmatprep.subr.mxu1 %v3915_v4  ;;  %513 = vmatpush1.msra.mxu0 %v2698_v7 }
  0x58   :  { %2066 = vmatpush3.msra.mxu1 %v3000_v56  ;;  %514 = vmatprep.subr.mxu0 %v2706_v9 }
  0x59   :  { %2067 = vmatprep.subr.mxu1 %v3915_v4  ;;  %515 = vmatpush1.msra.mxu0 %v2714_v10 }
  0x5a   :  { %2068 = vmatpush3.msra.mxu1 %v3010_v57  ;;  %516 = vmatprep.subr.mxu0 %v2723_v12 }
  0x5b   :  { %2069 = vmatprep.subr.mxu1 %v3915_v4  ;;  %517 = vmatpush1.msra.mxu0 %v2729_v13 }
  0x5c   :  { %2070 = vmatpush3.msra.mxu1 %v3019_v58  ;;  %518 = vmatprep.subr.mxu0 %v2741_v15 }
  0x5d   :  { %2071 = vmatprep.subr.mxu1 %v3915_v4  ;;  %519 = vmatpush1.msra.mxu0 %v2750_v17 }
  0x5e   :  { %2072 = vmatpush3.msra.mxu1 %v3028_v59  ;;  %520 = vmatprep.subr.mxu0 %v2757_v18 }
  0x5f   :  { %2073 = vmatprep.subr.mxu1 %v3915_v4  ;;  %521 = vmatpush1.msra.mxu0 %v2770_v20 }
  0x60   :  { %2074 = vmatpush3.msra.mxu1 %v3037_v60  ;;  %522 = vmatprep.subr.mxu0 %v2779_v22 }
  0x61   :  { %2075 = vmatprep.subr.mxu1 %v3915_v4  ;;  %523 = vmatpush1.msra.mxu0 %v2786_v23 }
  0x62   :  { %2076 = vmatpush3.msra.mxu1 %v3046_v61  ;;  %524 = vmatprep.subr.mxu0 %v2796_v25 }
  0x63   :  { %2078 = vmatmul.mubr.f32.vlgmr.msra.gmra.mxu1 %v3915_v4  ;;  %2080 = vmatprep.subr.mxu1 %v3915_v4 }
  0x64   :  { %2081 = vmatpush3.msra.mxu1 %v2845_v33  ;;  %525 = vmatpush1.msra.mxu0 %v2802_v26 }
  0x65   :  { %2082 = vmatprep.subr.mxu1 %v3915_v4  ;;  %526 = vmatprep.subr.mxu0 %v2812_v28 }
  0x66   :  { %2083 = vmatpush3.msra.mxu1 %v2864_v36  ;;  %527 = vmatpush1.msra.mxu0 %v2818_v29 }
  0x67   :  { %2084 = vmatprep.subr.mxu1 %v3915_v4  ;;  %528 = vmatprep.subr.mxu0 %v2825_v30 }
  0x68   :  { %2085 = vmatpush3.msra.mxu1 %v2883_v39  ;;  %529 = vmatpush1.msra.mxu0 %v2831_v31 }
  0x69   :  { %2086 = vmatprep.subr.mxu1 %v3915_v4  ;;  %530 = vmatprep.subr.mxu0 %v2838_v32 }
  0x6a   :  { %2087 = vmatpush3.msra.mxu1 %v2902_v42  ;;  %531 = vmatpush1.msra.mxu0 %v2851_v35 }
  0x6b   :  { %2088 = vmatprep.subr.mxu1 %v3915_v4  ;;  %532 = vmatprep.subr.mxu0 %v2858_v34 }
  0x6c   :  { %2089 = vmatpush3.msra.mxu1 %v2921_v45  ;;  %533 = vmatpush1.msra.mxu0 %v2870_v37 }
  0x6d   :  { %2090 = vmatprep.subr.mxu1 %v3915_v4  ;;  %534 = vmatprep.subr.mxu0 %v2877_v38 }
  0x6e   :  { %2091 = vmatpush3.msra.mxu1 %v2940_v48  ;;  %535 = vmatpush1.msra.mxu0 %v2889_v40 }
  0x6f   :  { %2092 = vmatprep.subr.mxu1 %v3915_v4  ;;  %536 = vmatprep.subr.mxu0 %v2896_v41 }
  0x70   :  { %2093 = vmatpush3.msra.mxu1 %v2959_v51  ;;  %537 = vmatpush1.msra.mxu0 %v2908_v43 }
  0x71   :  { %2094 = vmatprep.subr.mxu1 %v3915_v4  ;;  %538 = vmatprep.subr.mxu0 %v2915_v44 }
  0x72   :  { %2095 = vmatpush3.msra.mxu1 %v2973_v53  ;;  %539 = vmatpush1.msra.mxu0 %v2927_v46 }
  0x73   :  { %2096 = vmatprep.subr.mxu1 %v3915_v4  ;;  %540 = vmatprep.subr.mxu0 %v2934_v47 }
  0x74   :  { %2097 = vmatpush3.msra.mxu1 %v2982_v54  ;;  %541 = vmatpush1.msra.mxu0 %v2946_v49 }
  0x75   :  { %2098 = vmatprep.subr.mxu1 %v3915_v4  ;;  %542 = vmatprep.subr.mxu0 %v2953_v50  ;;  %v3126_v50 = vrot.slane %v333_v62, %v117_v3 }
  0x76   :  { %2099 = vmatpush3.msra.mxu1 %v2990_v55  ;;  %543 = vmatpush1.msra.mxu0 %v2965_v52 }
  0x77   :  { %2100 = vmatprep.subr.mxu1 %v3915_v4  ;;  %576 = vmatprep.mubr.f32.mxu0 %v3915_v4 }
  0x78   :  { %2101 = vmatpush3.msra.mxu1 %v3000_v56  ;;  %2112 = vmatprep.mubr.msk.f32.mxu1 %vm2410_vm1, %v3915_v4 }
  0x79   :  { %2102 = vmatprep.subr.mxu1 %v3915_v4  ;;  %689 = vmatprep.subr.mxu0 %v2692_v6  ;;  %v121_v6 = vsub.s32 2, %v112_v63 }
  0x7a   :  { %2103 = vmatpush3.msra.mxu1 %v3010_v57 }
  0x7b   :  { %2104 = vmatprep.subr.mxu1 %v3915_v4 }
  0x7c   :  { %2105 = vmatpush3.msra.mxu1 %v3019_v58 }
  0x7d   :  { %2106 = vmatprep.subr.mxu1 %v3915_v4 }
  0x7e   :  { %2107 = vmatpush3.msra.mxu1 %v3028_v59 }
  0x7f   :  { %2108 = vmatprep.subr.mxu1 %v3915_v4 }
  0x80   :  { %2109 = vmatpush3.msra.mxu1 %v3037_v60 }
  0x81   :  { %2110 = vmatprep.subr.mxu1 %v3915_v4 }
  0x82   :  { %2111 = vmatpush3.msra.mxu1 %v3046_v61 }
  0x83   :  { %2115 = vmatprep.subr.mxu1 %v3915_v4  ;;  %v3122_v4 = vrot.slane %v333_v62, %v113_v1 }
  0x85   :  { %3950 = vst [vmem:[#allocation15_spill] sm:$0xff] %v3122_v4 }
  0xf2   :  { %v199_v0 = vpop.f32.mrf.mxu0 }
  0xf3   :  { %v3124_v52 = vadd.f32 %v199_v0, %v114_v8 }
  0xf4   :  { %v201_v5 = vpop.f32.mrf.mxu0 }
  0xf5   :  { %v3133_v59 = vadd.f32 %v201_v5, %v118_v14 }
  0xfa   :  { %v205_v11 = vpop.f32.mrf.mxu0 }
  0xfb   :  { %v3115_v16 = vadd.f32 %v205_v11, %v114_v8 }
  0xfc   :  { %v207_v19 = vpop.f32.mrf.mxu0 }
  0xfd   :  { %3948 = vst [vmem:[#allocation13_spill] sm:$0xff] %v3115_v16  ;;  %v3117_v21 = vadd.f32 %v207_v19, %v118_v14  ;;  %v122_v16 = vrot.slane %v109_v2, %v121_v6 }
  0xff   :  { %3949 = vst [vmem:[#allocation14_spill] sm:$0xff] %v3117_v21 }
 0x103   :  { %v276_v24 = vpop.f32.mrf.mxu1 }
 0x105   :  { %v278_v27 = vpop.f32.mrf.mxu1 }
 0x112   :  { %v416_v61 = vpop.f32.mrf.mxu0 }
 0x113   :  { %v417_v11 = vadd.f32 %v416_v61, %v3122_v4 }
 0x114   :  { %v418_v60 = vpop.f32.mrf.mxu0 }
 0x115   :  { %v491_v19 = vadd.f32 %v417_v11, %v3124_v52  ;;  %v281_v21 = vpop.f32.mrf.mxu1  ;;  %v419_v47 = vadd.f32 %v418_v60, %v3126_v50  ;;  %v3136_v11 = vrot.slane %v333_v62, %v121_v6  ;;  %v3953_v6 = vmov 0.0   ;;  %v3956_v62 = vld [vmem:[#allocation7_spill] sm:$0xff] }
 0x116   :  { %v3130_v27 = vadd.f32 %v281_v21, %v122_v16 }
 0x117   :  { %v1807_v49 = vmul.f32 -1.442695, %v491_v19  ;;  %v283_v1 = vpop.f32.mrf.mxu1  ;;  %v498_v63 = vadd.f32 %v419_v47, %v3133_v59 }
 0x118   :  { %3951 = vst [vmem:[#allocation16_spill] sm:$0xff] %v3130_v27  ;;  %v3139_v1 = vadd.f32 %v276_v24, %v122_v16  ;;  %v3954_v16 = vld [vmem:[#allocation10_spill] sm:$0xff] }
 0x119   :  { %2293 = vpow2.f32 %v1807_v49  ;;  %v1808_v0 = vmul.f32 -1.442695, %v498_v63  ;;  %v3955_v24 = vld [vmem:[#allocation6_spill] sm:$0xff] }
 0x11b   :  { %2295 = vpow2.f32 %v1808_v0 }
 0x123   :  { %v487_v3 = vpop.f32.mrf.mxu1 }
 0x124   :  { %v488_v19 = vadd.f32 %v487_v3, %v3136_v11  ;;  %v3958_v3 = vld [vmem:[#allocation8_spill] sm:$0xff] }
 0x125   :  { %v2079_v61 = vpop.f32.mrf.mxu1 }
 0x126   :  { %v2294_v2 = vpop.eup %2293 }
 0x127   :  { %v495_v8 = vadd.f32 1.0, %v2294_v2 }
 0x128   :  { %v2296_v21 = vpop.eup %2295 }
 0x129   :  { %2297 = vrcp.f32 %v495_v8  ;;  %v502_v27 = vadd.f32 1.0, %v2296_v21  ;;  %v3959_v8 = vld [vmem:[#allocation9_spill] sm:$0xff]  ;;  %v3960_v21 = vld [vmem:[#allocation12_spill] sm:$0xff] }
 0x12b   :  { %2299 = vrcp.f32 %v502_v27  ;;  %v3957_v27 = vld [vmem:[#allocation11_spill] sm:$0xff] }
 0x136   :  { %v2298_v60 = vpop.eup %2297 }
 0x137   :  { %v505_v49 = vmul.f32 %v2298_v60, %v488_v19  ;;  %v3961_v19 = vld [vmem:[#allocation5_spill] sm:$0xff] }
 0x138   :  { %v2300_v5 = vpop.eup %2299 }
 0x139   :  { %v506_v47 = vadd.f32 %v505_v49, %v3139_v1  ;;  %v508_v14 = vsub.f32 1.0, %v2300_v5  ;;  %v510_v61 = vmul.f32 0.0, %v2300_v5 }
 0x13b   :  { %2301 = vtanh.f32 %v506_v47 }
 0x148   :  { %v2302_v63 = vpop.eup %2301 }
 0x149   :  { %v509_v0 = vmul.f32 %v2302_v63, %v508_v14 }
 0x14b   :  { %v3142_v2 = vadd.f32 %v510_v61, %v509_v0 }
 0x14d   :  { %3952 = vst [vmem:[#allocation17_spill] sm:$0xff] %v3142_v2  ;;  %577 = vmatmul.mubr.f32.vlgmr.msra.gmra.mxu0 %v3142_v2  ;;  %2113 = vmatmul.mubr.f32.vlgmr.msra.gmra.mxu1 %v3142_v2 }
 0x14e   :  { %690 = vmatpush1.msra.mxu0 %v2698_v7  ;;  %2116 = vmatpush3.msra.mxu1 %v2845_v33 }
 0x14f   :  { %691 = vmatprep.subr.mxu0 %v2706_v9  ;;  %2117 = vmatprep.subr.mxu1 %v3953_v6 }
 0x150   :  { %692 = vmatpush1.msra.mxu0 %v2714_v10  ;;  %2118 = vmatpush3.msra.mxu1 %v2864_v36 }
 0x151   :  { %693 = vmatprep.subr.mxu0 %v2723_v12  ;;  %2119 = vmatprep.subr.mxu1 %v3953_v6 }
 0x152   :  { %694 = vmatpush1.msra.mxu0 %v2729_v13  ;;  %2120 = vmatpush3.msra.mxu1 %v2883_v39 }
 0x153   :  { %695 = vmatprep.subr.mxu0 %v2741_v15  ;;  %2121 = vmatprep.subr.mxu1 %v3953_v6 }
 0x154   :  { %696 = vmatpush1.msra.mxu0 %v2750_v17  ;;  %2122 = vmatpush3.msra.mxu1 %v2902_v42 }
 0x155   :  { %697 = vmatprep.subr.mxu0 %v2757_v18  ;;  %2123 = vmatprep.subr.mxu1 %v3953_v6 }
 0x156   :  { %698 = vmatpush1.msra.mxu0 %v2770_v20  ;;  %2124 = vmatpush3.msra.mxu1 %v2921_v45 }
 0x157   :  { %699 = vmatprep.subr.mxu0 %v2779_v22  ;;  %2125 = vmatprep.subr.mxu1 %v3953_v6 }
 0x158   :  { %700 = vmatpush1.msra.mxu0 %v2786_v23  ;;  %2126 = vmatpush3.msra.mxu1 %v2940_v48 }
 0x159   :  { %701 = vmatprep.subr.mxu0 %v2796_v25  ;;  %2127 = vmatprep.subr.mxu1 %v3953_v6 }
 0x15a   :  { %702 = vmatpush1.msra.mxu0 %v2802_v26  ;;  %2128 = vmatpush3.msra.mxu1 %v2959_v51 }
 0x15b   :  { %703 = vmatprep.subr.mxu0 %v2812_v28  ;;  %2129 = vmatprep.subr.mxu1 %v3953_v6 }
 0x15c   :  { %704 = vmatpush1.msra.mxu0 %v2818_v29  ;;  %2130 = vmatpush3.msra.mxu1 %v2973_v53 }
 0x15d   :  { %705 = vmatprep.subr.mxu0 %v2825_v30  ;;  %2131 = vmatprep.subr.mxu1 %v3953_v6 }
 0x15e   :  { %706 = vmatpush1.msra.mxu0 %v2831_v31  ;;  %2132 = vmatpush3.msra.mxu1 %v2982_v54 }
 0x15f   :  { %707 = vmatprep.subr.mxu0 %v2838_v32  ;;  %2133 = vmatprep.subr.mxu1 %v3953_v6 }
 0x160   :  { %708 = vmatpush1.msra.mxu0 %v2851_v35  ;;  %2134 = vmatpush3.msra.mxu1 %v2990_v55 }
 0x161   :  { %709 = vmatprep.subr.mxu0 %v2858_v34  ;;  %2135 = vmatprep.subr.mxu1 %v3953_v6 }
 0x162   :  { %710 = vmatpush1.msra.mxu0 %v2870_v37  ;;  %2136 = vmatpush3.msra.mxu1 %v3000_v56 }
 0x163   :  { %711 = vmatprep.subr.mxu0 %v2877_v38  ;;  %2137 = vmatprep.subr.mxu1 %v3953_v6 }
 0x164   :  { %712 = vmatpush1.msra.mxu0 %v2889_v40  ;;  %2138 = vmatpush3.msra.mxu1 %v3010_v57 }
 0x165   :  { %713 = vmatprep.subr.mxu0 %v2896_v41  ;;  %2139 = vmatprep.subr.mxu1 %v3953_v6 }
 0x166   :  { %714 = vmatpush1.msra.mxu0 %v2908_v43  ;;  %2140 = vmatpush3.msra.mxu1 %v3019_v58 }
 0x167   :  { %715 = vmatprep.subr.mxu0 %v2915_v44  ;;  %2141 = vmatprep.subr.mxu1 %v3953_v6 }
 0x168   :  { %716 = vmatpush1.msra.mxu0 %v2927_v46  ;;  %2142 = vmatpush3.msra.mxu1 %v3954_v16 }
 0x169   :  { %717 = vmatprep.subr.mxu0 %v3955_v24  ;;  %2143 = vmatprep.subr.mxu1 %v3953_v6 }
 0x16a   :  { %718 = vmatpush1.msra.mxu0 %v3956_v62  ;;  %2144 = vmatpush3.msra.mxu1 %v3957_v27 }
 0x16b   :  { %719 = vmatprep.subr.mxu0 %v3958_v3  ;;  %2145 = vmatprep.subr.mxu1 %v3953_v6 }
 0x16c   :  { %720 = vmatpush1.msra.mxu0 %v3959_v8  ;;  %753 = vmatprep.mubr.f32.mxu0 %v3953_v6 }
 0x16d   :  { %2146 = vmatpush3.msra.mxu1 %v3960_v21  ;;  %2147 = vmatprep.mubr.msk.f32.mxu1 %vm2410_vm1, %v3953_v6 }
 0x16e   :  { %865 = vmatprep.subr.mxu0 %v3961_v19  ;;  %2150 = vmatprep.subr.mxu1 %v3953_v6 }
 0x20d   :  { %v578_v60 = vpop.f32.mrf.mxu0  ;;  %v649_v49 = vpop.f32.mrf.mxu1 }
 0x20e   :  { %v579_v47 = vadd.f32 %v578_v60, %v3122_v4  ;;  %v650_v60 = vadd.f32 %v649_v49, %v3136_v11  ;;  %v3966_v49 = vld [vmem:[#allocation11_spill] sm:$0xff] }
 0x20f   :  { %v580_v5 = vpop.f32.mrf.mxu0  ;;  %v2114_v14 = vpop.f32.mrf.mxu1 }
 0x210   :  { %v654_v63 = vrot.slane %v579_v47, 6  ;;  %v581_v0 = vadd.f32 %v580_v5, %v3126_v50  ;;  %v674_v14 = vrot.slane %v650_v60, 6  ;;  %v3968_v60 = vld [vmem:[#allocation9_spill] sm:$0xff] }
 0x212   :  { %v656_v61 = vadd.f32 %v654_v63, %v3124_v52  ;;  %v664_v21 = vrot.slane %v581_v0, 6 }
 0x214   :  { %v1809_v8 = vmul.f32 -1.442695, %v656_v61  ;;  %v666_v3 = vadd.f32 %v664_v21, %v3133_v59  ;;  %v682_v21 = vrot.slane %v3142_v2, 6  ;;  %v3967_v61 = vld [vmem:[#allocation8_spill] sm:$0xff] }
 0x216   :  { %2303 = vpow2.f32 %v1809_v8  ;;  %v1810_v27 = vmul.f32 -1.442695, %v666_v3 }
 0x218   :  { %2305 = vpow2.f32 %v1810_v27 }
 0x223   :  { %v2304_v19 = vpop.eup %2303 }
 0x224   :  { %v660_v62 = vadd.f32 1.0, %v2304_v19 }
 0x225   :  { %v2306_v24 = vpop.eup %2305 }
 0x226   :  { %2307 = vrcp.f32 %v660_v62  ;;  %v670_v4 = vadd.f32 1.0, %v2306_v24  ;;  %v3965_v24 = vld [vmem:[#allocation7_spill] sm:$0xff] }
 0x228   :  { %2309 = vrcp.f32 %v670_v4  ;;  %v3963_v4 = vld [vmem:[#allocation10_spill] sm:$0xff] }
 0x233   :  { %v2308_v47 = vpop.eup %2307 }
 0x234   :  { %v676_v16 = vmul.f32 %v2308_v47, %v674_v14  ;;  %v3969_v14 = vld [vmem:[#allocation12_spill] sm:$0xff]  ;;  %v3970_v47 = vld [vmem:[#allocation5_spill] sm:$0xff] }
 0x235   :  { %v2310_v63 = vpop.eup %2309 }
 0x236   :  { %v677_v5 = vadd.f32 %v676_v16, %v3139_v1  ;;  %v679_v8 = vsub.f32 1.0, %v2310_v63  ;;  %v684_v0 = vmul.f32 %v2310_v63, %v682_v21  ;;  %v3964_v16 = vld [vmem:[#allocation6_spill] sm:$0xff] }
 0x238   :  { %2311 = vtanh.f32 %v677_v5 }
 0x245   :  { %v2312_v3 = vpop.eup %2311 }
 0x246   :  { %v680_v27 = vmul.f32 %v2312_v3, %v679_v8  ;;  %v3971_v8 = vld [vmem:[#allocation15_spill] sm:$0xff] }
 0x248   :  { %v3220_v19 = vadd.f32 %v684_v0, %v680_v27 }
 0x24a   :  { %v3223_v62 = vrot.slane %v3220_v19, 2 }
 0x24c   :  { %3962 = vst [vmem:[#allocation18_spill] sm:$0xff] %v3223_v62  ;;  %754 = vmatmul.mubr.f32.vlgmr.msra.gmra.mxu0 %v3223_v62  ;;  %2148 = vmatmul.mubr.f32.vlgmr.msra.gmra.mxu1 %v3223_v62 }
 0x24d   :  { %866 = vmatpush1.msra.mxu0 %v2698_v7  ;;  %2151 = vmatpush3.msra.mxu1 %v2845_v33 }
 0x24e   :  { %867 = vmatprep.subr.mxu0 %v2706_v9  ;;  %2152 = vmatprep.subr.mxu1 %v3953_v6 }
 0x24f   :  { %868 = vmatpush1.msra.mxu0 %v2714_v10  ;;  %2153 = vmatpush3.msra.mxu1 %v2864_v36 }
 0x250   :  { %869 = vmatprep.subr.mxu0 %v2723_v12  ;;  %2154 = vmatprep.subr.mxu1 %v3953_v6 }
 0x251   :  { %870 = vmatpush1.msra.mxu0 %v2729_v13  ;;  %2155 = vmatpush3.msra.mxu1 %v2883_v39 }
 0x252   :  { %871 = vmatprep.subr.mxu0 %v2741_v15  ;;  %2156 = vmatprep.subr.mxu1 %v3953_v6 }
 0x253   :  { %872 = vmatpush1.msra.mxu0 %v2750_v17  ;;  %2157 = vmatpush3.msra.mxu1 %v2902_v42 }
 0x254   :  { %873 = vmatprep.subr.mxu0 %v2757_v18  ;;  %2158 = vmatprep.subr.mxu1 %v3953_v6 }
 0x255   :  { %874 = vmatpush1.msra.mxu0 %v2770_v20  ;;  %2159 = vmatpush3.msra.mxu1 %v2921_v45 }
 0x256   :  { %875 = vmatprep.subr.mxu0 %v2779_v22  ;;  %2160 = vmatprep.subr.mxu1 %v3953_v6 }
 0x257   :  { %876 = vmatpush1.msra.mxu0 %v2786_v23  ;;  %2161 = vmatpush3.msra.mxu1 %v2940_v48 }
 0x258   :  { %877 = vmatprep.subr.mxu0 %v2796_v25  ;;  %2162 = vmatprep.subr.mxu1 %v3953_v6 }
 0x259   :  { %878 = vmatpush1.msra.mxu0 %v2802_v26  ;;  %2163 = vmatpush3.msra.mxu1 %v2959_v51 }
 0x25a   :  { %879 = vmatprep.subr.mxu0 %v2812_v28  ;;  %2164 = vmatprep.subr.mxu1 %v3953_v6 }
 0x25b   :  { %880 = vmatpush1.msra.mxu0 %v2818_v29  ;;  %2165 = vmatpush3.msra.mxu1 %v2973_v53 }
 0x25c   :  { %881 = vmatprep.subr.mxu0 %v2825_v30  ;;  %2166 = vmatprep.subr.mxu1 %v3953_v6 }
 0x25d   :  { %882 = vmatpush1.msra.mxu0 %v2831_v31  ;;  %2167 = vmatpush3.msra.mxu1 %v2982_v54 }
 0x25e   :  { %883 = vmatprep.subr.mxu0 %v2838_v32  ;;  %2168 = vmatprep.subr.mxu1 %v3953_v6 }
 0x25f   :  { %884 = vmatpush1.msra.mxu0 %v2851_v35  ;;  %2169 = vmatpush3.msra.mxu1 %v2990_v55 }
 0x260   :  { %885 = vmatprep.subr.mxu0 %v2858_v34  ;;  %2170 = vmatprep.subr.mxu1 %v3953_v6 }
 0x261   :  { %886 = vmatpush1.msra.mxu0 %v2870_v37  ;;  %2171 = vmatpush3.msra.mxu1 %v3000_v56 }
 0x262   :  { %887 = vmatprep.subr.mxu0 %v2877_v38  ;;  %2172 = vmatprep.subr.mxu1 %v3953_v6 }
 0x263   :  { %888 = vmatpush1.msra.mxu0 %v2889_v40  ;;  %2173 = vmatpush3.msra.mxu1 %v3010_v57 }
 0x264   :  { %889 = vmatprep.subr.mxu0 %v2896_v41  ;;  %2174 = vmatprep.subr.mxu1 %v3953_v6 }
 0x265   :  { %890 = vmatpush1.msra.mxu0 %v2908_v43  ;;  %2175 = vmatpush3.msra.mxu1 %v3019_v58 }
 0x266   :  { %891 = vmatprep.subr.mxu0 %v2915_v44  ;;  %2176 = vmatprep.subr.mxu1 %v3953_v6 }
 0x267   :  { %892 = vmatpush1.msra.mxu0 %v2927_v46  ;;  %2177 = vmatpush3.msra.mxu1 %v3963_v4 }
 0x268   :  { %893 = vmatprep.subr.mxu0 %v3964_v16  ;;  %2178 = vmatprep.subr.mxu1 %v3953_v6 }
 0x269   :  { %894 = vmatpush1.msra.mxu0 %v3965_v24  ;;  %2179 = vmatpush3.msra.mxu1 %v3966_v49 }
 0x26a   :  { %895 = vmatprep.subr.mxu0 %v3967_v61  ;;  %2180 = vmatprep.subr.mxu1 %v3953_v6 }
 0x26b   :  { %896 = vmatpush1.msra.mxu0 %v3968_v60  ;;  %929 = vmatprep.mubr.f32.mxu0 %v3953_v6 }
 0x26c   :  { %2181 = vmatpush3.msra.mxu1 %v3969_v14  ;;  %2182 = vmatprep.mubr.msk.f32.mxu1 %vm2410_vm1, %v3953_v6 }
 0x26d   :  { %1041 = vmatprep.subr.mxu0 %v3970_v47  ;;  %2185 = vmatprep.subr.mxu1 %v3953_v6 }
 0x30c   :  { %v755_v5 = vpop.f32.mrf.mxu0  ;;  %v826_v63 = vpop.f32.mrf.mxu1 }
 0x30d   :  { %v756_v21 = vadd.f32 %v755_v5, %v3971_v8  ;;  %v827_v5 = vadd.f32 %v826_v63, %v3136_v11 }
 0x30e   :  { %v757_v3 = vpop.f32.mrf.mxu0  ;;  %v2149_v27 = vpop.f32.mrf.mxu1 }
 0x30f   :  { %v831_v0 = vrot.slane %v756_v21, 4  ;;  %v758_v2 = vadd.f32 %v757_v3, %v3126_v50  ;;  %v851_v27 = vrot.slane %v827_v5, 4 }
 0x311   :  { %v833_v62 = vadd.f32 %v831_v0, %v3124_v52  ;;  %v841_v14 = vrot.slane %v758_v2, 4 }
 0x313   :  { %v1811_v60 = vmul.f32 -1.442695, %v833_v62  ;;  %v843_v61 = vadd.f32 %v841_v14, %v3133_v59  ;;  %v858_v62 = vrot.slane %v3220_v19, 6 }
 0x315   :  { %2313 = vpow2.f32 %v1811_v60  ;;  %v1812_v49 = vmul.f32 -1.442695, %v843_v61 }
 0x317   :  { %2315 = vpow2.f32 %v1812_v49 }
 0x322   :  { %v2314_v47 = vpop.eup %2313 }
 0x323   :  { %v837_v24 = vadd.f32 1.0, %v2314_v47 }
 0x324   :  { %v2316_v16 = vpop.eup %2315 }
 0x325   :  { %2317 = vrcp.f32 %v837_v24  ;;  %v847_v8 = vadd.f32 1.0, %v2316_v16 }
 0x327   :  { %2319 = vrcp.f32 %v847_v8 }
 0x332   :  { %v2318_v21 = vpop.eup %2317 }
 0x333   :  { %v853_v4 = vmul.f32 %v2318_v21, %v851_v27  ;;  %v2354_v27 = vld [vmem:[%s3908_s3 + $0x168] sm:$0xff]  ;;  %v2356_v21 = vld [vmem:[%s3908_s3 + $0x158] sm:$0xff] }
 0x334   :  { %v2320_v2 = vpop.eup %2319 }
 0x335   :  { %v854_v3 = vadd.f32 %v853_v4, %v3139_v1  ;;  %v856_v60 = vsub.f32 1.0, %v2320_v2  ;;  %v860_v14 = vmul.f32 %v2320_v2, %v858_v62  ;;  %v2358_v2 = vld [vmem:[%s3908_s3 + $0x160] sm:$0xff] }
 0x336   :  { %v2359_v62 = vld [vmem:[%s3908_s3 + $0x140] sm:$0xff] }
 0x337   :  { %2321 = vtanh.f32 %v854_v3  ;;  %v2357_v3 = vld [vmem:[%s3908_s3 + $0x150] sm:$0xff] }
 0x344   :  { %v2322_v61 = vpop.eup %2321 }
 0x345   :  { %v857_v49 = vmul.f32 %v2322_v61, %v856_v60  ;;  %v2360_v60 = vld [vmem:[%s3908_s3 + $0x138] sm:$0xff]  ;;  %v2361_v61 = vld [vmem:[%s3908_s3 + $0x128] sm:$0xff] }
 0x347   :  { %v3301_v0 = vadd.f32 %v860_v14, %v857_v49  ;;  %v2362_v49 = vld [vmem:[%s3908_s3 + $0x120] sm:$0xff]  ;;  %v2363_v14 = vld [vmem:[%s3908_s3 + $0x110] sm:$0xff] }
 0x349   :  { %v3304_v24 = vrot.slane %v3301_v0, 4  ;;  %v1034_v4 = vrot.slane %v3301_v0, 6  ;;  %v2365_v0 = vld [vmem:[%s3908_s3 + $0xf8] sm:$0xff] }
 0x34b   :  { %930 = vmatmul.mubr.f32.vlgmr.msra.gmra.mxu0 %v3304_v24  ;;  %2183 = vmatmul.mubr.f32.vlgmr.msra.gmra.mxu1 %v3304_v24 }
 0x34c   :  { %1042 = vmatpush1.msra.mxu0 %v2698_v7  ;;  %2186 = vmatpush3.msra.mxu1 %v2845_v33  ;;  %v3972_v7 = vld [vmem:[#allocation10_spill] sm:$0xff] }
 0x34d   :  { %1043 = vmatprep.subr.mxu0 %v2706_v9  ;;  %2187 = vmatprep.subr.mxu1 %v3953_v6  ;;  %v3973_v9 = vld [vmem:[#allocation6_spill] sm:$0xff] }
 0x34e   :  { %1044 = vmatpush1.msra.mxu0 %v2714_v10  ;;  %2188 = vmatpush3.msra.mxu1 %v2864_v36  ;;  %v3974_v10 = vld [vmem:[#allocation7_spill] sm:$0xff] }
 0x34f   :  { %1045 = vmatprep.subr.mxu0 %v2723_v12  ;;  %2189 = vmatprep.subr.mxu1 %v3953_v6  ;;  %v3975_v12 = vld [vmem:[#allocation11_spill] sm:$0xff] }
 0x350   :  { %1046 = vmatpush1.msra.mxu0 %v2729_v13  ;;  %2190 = vmatpush3.msra.mxu1 %v2883_v39  ;;  %v3976_v13 = vld [vmem:[#allocation8_spill] sm:$0xff] }
 0x351   :  { %1047 = vmatprep.subr.mxu0 %v2741_v15  ;;  %2191 = vmatprep.subr.mxu1 %v3953_v6  ;;  %v3977_v15 = vld [vmem:[#allocation9_spill] sm:$0xff] }
 0x352   :  { %1048 = vmatpush1.msra.mxu0 %v2750_v17  ;;  %2192 = vmatpush3.msra.mxu1 %v2902_v42  ;;  %v3978_v17 = vld [vmem:[#allocation12_spill] sm:$0xff] }
 0x353   :  { %1049 = vmatprep.subr.mxu0 %v2757_v18  ;;  %2193 = vmatprep.subr.mxu1 %v3953_v6  ;;  %v2353_v18 = vld [vmem:[%s3908_s3 + $0x170] sm:$0xff] }
 0x354   :  { %1050 = vmatpush1.msra.mxu0 %v2770_v20  ;;  %2194 = vmatpush3.msra.mxu1 %v2921_v45 }
 0x355   :  { %1051 = vmatprep.subr.mxu0 %v2779_v22  ;;  %2195 = vmatprep.subr.mxu1 %v3953_v6 }
 0x356   :  { %1052 = vmatpush1.msra.mxu0 %v2786_v23  ;;  %2196 = vmatpush3.msra.mxu1 %v2940_v48  ;;  %v3979_v23 = vld [vmem:[#allocation15_spill] sm:$0xff] }
 0x357   :  { %1053 = vmatprep.subr.mxu0 %v2796_v25  ;;  %2197 = vmatprep.subr.mxu1 %v3953_v6 }
 0x358   :  { %1054 = vmatpush1.msra.mxu0 %v2802_v26  ;;  %2198 = vmatpush3.msra.mxu1 %v2959_v51 }
 0x359   :  { %1055 = vmatprep.subr.mxu0 %v2812_v28  ;;  %2199 = vmatprep.subr.mxu1 %v3953_v6 }
 0x35a   :  { %1056 = vmatpush1.msra.mxu0 %v2818_v29  ;;  %2200 = vmatpush3.msra.mxu1 %v2973_v53 }
 0x35b   :  { %1057 = vmatprep.subr.mxu0 %v2825_v30  ;;  %2201 = vmatprep.subr.mxu1 %v3953_v6 }
 0x35c   :  { %1058 = vmatpush1.msra.mxu0 %v2831_v31  ;;  %2202 = vmatpush3.msra.mxu1 %v2982_v54 }
 0x35d   :  { %1059 = vmatprep.subr.mxu0 %v2838_v32  ;;  %2203 = vmatprep.subr.mxu1 %v3953_v6 }
 0x35e   :  { %1060 = vmatpush1.msra.mxu0 %v2851_v35  ;;  %2204 = vmatpush3.msra.mxu1 %v2990_v55 }
 0x35f   :  { %1061 = vmatprep.subr.mxu0 %v2858_v34  ;;  %2205 = vmatprep.subr.mxu1 %v3953_v6 }
 0x360   :  { %1062 = vmatpush1.msra.mxu0 %v2870_v37  ;;  %2206 = vmatpush3.msra.mxu1 %v3000_v56 }
 0x361   :  { %1063 = vmatprep.subr.mxu0 %v2877_v38  ;;  %2207 = vmatprep.subr.mxu1 %v3953_v6 }
 0x362   :  { %1064 = vmatpush1.msra.mxu0 %v2889_v40  ;;  %2208 = vmatpush3.msra.mxu1 %v3010_v57 }
 0x363   :  { %1065 = vmatprep.subr.mxu0 %v2896_v41  ;;  %2209 = vmatprep.subr.mxu1 %v3953_v6 }
 0x364   :  { %1066 = vmatpush1.msra.mxu0 %v2908_v43  ;;  %2210 = vmatpush3.msra.mxu1 %v3019_v58 }
 0x365   :  { %1067 = vmatprep.subr.mxu0 %v2915_v44  ;;  %2211 = vmatprep.subr.mxu1 %v3953_v6 }
 0x366   :  { %1068 = vmatpush1.msra.mxu0 %v2927_v46  ;;  %2212 = vmatpush3.msra.mxu1 %v3972_v7 }
 0x367   :  { %1069 = vmatprep.subr.mxu0 %v3973_v9  ;;  %2213 = vmatprep.subr.mxu1 %v3953_v6  ;;  %v2367_v9 = vld [vmem:[%s3908_s3 + $0xe0] sm:$0xff] }
 0x368   :  { %1070 = vmatpush1.msra.mxu0 %v3974_v10  ;;  %2214 = vmatpush3.msra.mxu1 %v3975_v12  ;;  %v2369_v10 = vld [vmem:[%s3908_s3 + $0xc8] sm:$0xff] }
 0x369   :  { %1071 = vmatprep.subr.mxu0 %v3976_v13  ;;  %2215 = vmatprep.subr.mxu1 %v3953_v6  ;;  %v2371_v13 = vld [vmem:[%s3908_s3 + $0xb0] sm:$0xff] }
 0x36a   :  { %1072 = vmatpush1.msra.mxu0 %v3977_v15  ;;  %1105 = vmatprep.mubr.f32.mxu0 %v3953_v6  ;;  %v2373_v15 = vld [vmem:[%s3908_s3 + $0x98] sm:$0xff] }
 0x36b   :  { %2216 = vmatpush3.msra.mxu1 %v3978_v17  ;;  %2217 = vmatprep.mubr.msk.f32.mxu1 %vm2410_vm1, %v3953_v6 }
 0x36c   :  { %1203 = vmatprep.subr.mxu0 %v2353_v18  ;;  %2220 = vmatprep.subr.mxu1 %v3953_v6  ;;  %v2375_v18 = vld [vmem:[%s3908_s3 + $0x80] sm:$0xff] }
 0x40b   :  { %v931_v20 = vpop.f32.mrf.mxu0  ;;  %v1002_v22 = vpop.f32.mrf.mxu1 }
 0x40c   :  { %v932_v25 = vadd.f32 %v931_v20, %v3979_v23  ;;  %v1003_v40 = vadd.f32 %v1002_v22, %v3136_v11  ;;  %v2377_v20 = vld [vmem:[%s3908_s3 + $0x68] sm:$0xff]  ;;  %v2379_v22 = vld [vmem:[%s3908_s3 + $0x50] sm:$0xff] }
 0x40d   :  { %v933_v26 = vpop.f32.mrf.mxu0  ;;  %v2184_v28 = vpop.f32.mrf.mxu1 }
 0x40e   :  { %v1007_v29 = vrot.slane %v932_v25, 2  ;;  %v934_v30 = vadd.f32 %v933_v26, %v3126_v50  ;;  %v1027_v43 = vrot.slane %v1003_v40, 2  ;;  %v2381_v25 = vld [vmem:[%s3908_s3 + $0x38] sm:$0xff]  ;;  %v2383_v26 = vld [vmem:[%s3908_s3 + $0x20] sm:$0xff]  ;;  %v2385_v28 = vld [vmem:[%s3908_s3 + $0x8] sm:$0xff] }
 0x410   :  { %v1009_v31 = vadd.f32 %v1007_v29, %v3124_v52  ;;  %v1017_v33 = vrot.slane %v934_v30, 2  ;;  %v1443_v29 = vld [vmem:[%s3910_s5 + $0x1f8] sm:$0xff] }
 0x412   :  { %v1813_v32 = vmul.f32 -1.442695, %v1009_v31  ;;  %v1019_v35 = vadd.f32 %v1017_v33, %v3133_v59 }
 0x414   :  { %2323 = vpow2.f32 %v1813_v32  ;;  %v1814_v34 = vmul.f32 -1.442695, %v1019_v35  ;;  %v3980_v35 = vld [vmem:[#allocation13_spill] sm:$0xff] }
 0x416   :  { %2325 = vpow2.f32 %v1814_v34 }
 0x421   :  { %v2324_v36 = vpop.eup %2323 }
 0x422   :  { %v1013_v37 = vadd.f32 1.0, %v2324_v36 }
 0x423   :  { %v2326_v38 = vpop.eup %2325 }
 0x424   :  { %2327 = vrcp.f32 %v1013_v37  ;;  %v1023_v41 = vadd.f32 1.0, %v2326_v38  ;;  %v3981_v38 = vld [vmem:[#allocation14_spill] sm:$0xff] }
 0x426   :  { %2329 = vrcp.f32 %v1023_v41 }
 0x431   :  { %v2328_v44 = vpop.eup %2327 }
 0x432   :  { %v1029_v46 = vmul.f32 %v2328_v44, %v1027_v43 }
 0x433   :  { %v2330_v19 = vpop.eup %2329 }
 0x434   :  { %v1030_v52 = vadd.f32 %v1029_v46, %v3139_v1  ;;  %v1032_v59 = vsub.f32 1.0, %v2330_v19  ;;  %v1036_v8 = vmul.f32 %v2330_v19, %v1034_v4  ;;  %v2355_v1 = vld [vmem:[%s3908_s3 + $0x178] sm:$0xff] }
 0x436   :  { %2331 = vtanh.f32 %v1030_v52 }
 0x443   :  { %v2332_v16 = vpop.eup %2331 }
 0x444   :  { %v1033_v63 = vmul.f32 %v2332_v16, %v1032_v59  ;;  %v3982_v16 = vld [vmem:[#allocation16_spill] sm:$0xff] }
 0x446   :  { %v1037_v47 = vadd.f32 %v1036_v8, %v1033_v63 }
 0x448   :  { %v3384_v5 = vrot.slane %v1037_v47, 6 }
 0x44a   :  { %1106 = vmatmul.mubr.f32.vlgmr.msra.gmra.mxu0 %v3384_v5  ;;  %2218 = vmatmul.mubr.f32.vlgmr.msra.gmra.mxu1 %v3384_v5 }
 0x44b   :  { %1204 = vmatpush1.msra.mxu0 %v2354_v27  ;;  %2221 = vmatpush3.msra.mxu1 %v2355_v1 }
 0x44c   :  { %1205 = vmatprep.subr.mxu0 %v2356_v21  ;;  %2222 = vmatprep.subr.mxu1 %v3953_v6 }
 0x44d   :  { %1206 = vmatpush1.msra.mxu0 %v2357_v3  ;;  %2223 = vmatpush3.msra.mxu1 %v2358_v2  ;;  %v1395_v2 = vld [vmem:[%s3910_s5 + $0x78] sm:$0xff] }
 0x44e   :  { %1207 = vmatprep.subr.mxu0 %v2359_v62  ;;  %2224 = vmatprep.subr.mxu1 %v3953_v6  ;;  %v1427_v62 = vld [vmem:[%s3910_s5 + $0x178] sm:$0xff] }
 0x44f   :  { %1208 = vmatpush1.msra.mxu0 %v2360_v60  ;;  %2225 = vmatpush3.msra.mxu1 %v2883_v39  ;;  %v2364_v39 = vld [vmem:[%s3908_s3 + $0x108] sm:$0xff]  ;;  %v1410_v60 = vld [vmem:[%s3910_s5 + $0xf0] sm:$0xff] }
 0x450   :  { %1209 = vmatprep.subr.mxu0 %v2361_v61  ;;  %2226 = vmatprep.subr.mxu1 %v3953_v6  ;;  %v1442_v61 = vld [vmem:[%s3910_s5 + $0x1f0] sm:$0xff] }
 0x451   :  { %1210 = vmatpush1.msra.mxu0 %v2362_v49  ;;  %2227 = vmatpush3.msra.mxu1 %v2902_v42  ;;  %v2366_v42 = vld [vmem:[%s3908_s3 + $0xf0] sm:$0xff] }
 0x452   :  { %1211 = vmatprep.subr.mxu0 %v2363_v14  ;;  %2228 = vmatprep.subr.mxu1 %v3953_v6  ;;  %v1394_v49 = vld [vmem:[%s3910_s5 + $0x70] sm:$0xff] }
 0x453   :  { %1212 = vmatpush1.msra.mxu0 %v2364_v39  ;;  %2229 = vmatpush3.msra.mxu1 %v2921_v45  ;;  %v2368_v45 = vld [vmem:[%s3908_s3 + $0xd8] sm:$0xff]  ;;  %v1426_v14 = vld [vmem:[%s3910_s5 + $0x170] sm:$0xff] }
 0x454   :  { %1213 = vmatprep.subr.mxu0 %v2365_v0  ;;  %2230 = vmatprep.subr.mxu1 %v3953_v6  ;;  %v3983_v39 = vld [vmem:[#allocation18_spill] sm:$0xff] }
 0x455   :  { %1214 = vmatpush1.msra.mxu0 %v2366_v42  ;;  %2231 = vmatpush3.msra.mxu1 %v2940_v48  ;;  %v2370_v48 = vld [vmem:[%s3908_s3 + $0xc0] sm:$0xff]  ;;  %v1409_v0 = vld [vmem:[%s3910_s5 + $0xe8] sm:$0xff] }
 0x456   :  { %1215 = vmatprep.subr.mxu0 %v2367_v9  ;;  %2232 = vmatprep.subr.mxu1 %v3953_v6  ;;  %v1441_v42 = vld [vmem:[%s3910_s5 + $0x1e8] sm:$0xff] }
 0x457   :  { %1216 = vmatpush1.msra.mxu0 %v2368_v45  ;;  %2233 = vmatpush3.msra.mxu1 %v2959_v51  ;;  %v2372_v51 = vld [vmem:[%s3908_s3 + $0xa8] sm:$0xff] }
 0x458   :  { %1217 = vmatprep.subr.mxu0 %v2369_v10  ;;  %2234 = vmatprep.subr.mxu1 %v3953_v6  ;;  %v1393_v9 = vld [vmem:[%s3910_s5 + $0x68] sm:$0xff]  ;;  %v1408_v10 = vld [vmem:[%s3910_s5 + $0xe0] sm:$0xff] }
 0x459   :  { %1218 = vmatpush1.msra.mxu0 %v2370_v48  ;;  %2235 = vmatpush3.msra.mxu1 %v2973_v53  ;;  %v2374_v53 = vld [vmem:[%s3908_s3 + $0x90] sm:$0xff]  ;;  %v1425_v45 = vld [vmem:[%s3910_s5 + $0x168] sm:$0xff]  ;;  %v1440_v48 = vld [vmem:[%s3910_s5 + $0x1e0] sm:$0xff] }
 0x45a   :  { %1219 = vmatprep.subr.mxu0 %v2371_v13  ;;  %2236 = vmatprep.subr.mxu1 %v3953_v6  ;;  %v1424_v13 = vld [vmem:[%s3910_s5 + $0x160] sm:$0xff] }
 0x45b   :  { %1220 = vmatpush1.msra.mxu0 %v2372_v51  ;;  %2237 = vmatpush3.msra.mxu1 %v2982_v54  ;;  %v2376_v54 = vld [vmem:[%s3908_s3 + $0x78] sm:$0xff] }
 0x45c   :  { %1221 = vmatprep.subr.mxu0 %v2373_v15  ;;  %2238 = vmatprep.subr.mxu1 %v3953_v6  ;;  %v1407_v51 = vld [vmem:[%s3910_s5 + $0xd8] sm:$0xff] }
 0x45d   :  { %1222 = vmatpush1.msra.mxu0 %v2374_v53  ;;  %2239 = vmatpush3.msra.mxu1 %v2990_v55  ;;  %v2378_v55 = vld [vmem:[%s3908_s3 + $0x60] sm:$0xff]  ;;  %v1439_v15 = vld [vmem:[%s3910_s5 + $0x1d8] sm:$0xff] }
 0x45e   :  { %1223 = vmatprep.subr.mxu0 %v2375_v18  ;;  %2240 = vmatprep.subr.mxu1 %v3953_v6  ;;  %v1391_v53 = vld [vmem:[%s3910_s5 + $0x58] sm:$0xff] }
 0x45f   :  { %1224 = vmatpush1.msra.mxu0 %v2376_v54  ;;  %2241 = vmatpush3.msra.mxu1 %v3000_v56  ;;  %v2380_v56 = vld [vmem:[%s3908_s3 + $0x48] sm:$0xff]  ;;  %v1423_v18 = vld [vmem:[%s3910_s5 + $0x158] sm:$0xff]  ;;  %v1406_v54 = vld [vmem:[%s3910_s5 + $0xd0] sm:$0xff] }
 0x460   :  { %1225 = vmatprep.subr.mxu0 %v2377_v20  ;;  %2242 = vmatprep.subr.mxu1 %v3953_v6  ;;  %v1438_v20 = vld [vmem:[%s3910_s5 + $0x1d0] sm:$0xff] }
 0x461   :  { %1226 = vmatpush1.msra.mxu0 %v2378_v55  ;;  %2243 = vmatpush3.msra.mxu1 %v3010_v57  ;;  %v2382_v57 = vld [vmem:[%s3908_s3 + $0x30] sm:$0xff] }
 0x462   :  { %1227 = vmatprep.subr.mxu0 %v2379_v22  ;;  %2244 = vmatprep.subr.mxu1 %v3953_v6  ;;  %v1390_v55 = vld [vmem:[%s3910_s5 + $0x50] sm:$0xff] }
 0x463   :  { %1228 = vmatpush1.msra.mxu0 %v2380_v56  ;;  %2245 = vmatpush3.msra.mxu1 %v3019_v58  ;;  %v2384_v58 = vld [vmem:[%s3908_s3 + $0x18] sm:$0xff]  ;;  %v1422_v22 = vld [vmem:[%s3910_s5 + $0x150] sm:$0xff]  ;;  %v1405_v56 = vld [vmem:[%s3910_s5 + $0xc8] sm:$0xff] }
 0x464   :  { %1229 = vmatprep.subr.mxu0 %v2381_v25  ;;  %2246 = vmatprep.subr.mxu1 %v3953_v6  ;;  %v1437_v25 = vld [vmem:[%s3910_s5 + $0x1c8] sm:$0xff] }
 0x465   :  { %1230 = vmatpush1.msra.mxu0 %v2382_v57  ;;  %2247 = vmatpush3.msra.mxu1 %v3972_v7  ;;  %v2386_v7 = vld [vmem:[%s3908_s3] sm:$0xff]  ;;  %v1389_v57 = vld [vmem:[%s3910_s5 + $0x48] sm:$0xff] }
 0x466   :  { %1231 = vmatprep.subr.mxu0 %v2383_v26  ;;  %2248 = vmatprep.subr.mxu1 %v3953_v6  ;;  %v1421_v26 = vld [vmem:[%s3910_s5 + $0x148] sm:$0xff] }
 0x467   :  { %1232 = vmatpush1.msra.mxu0 %v2384_v58  ;;  %2249 = vmatpush3.msra.mxu1 %v3975_v12  ;;  %v1411_v12 = vld [vmem:[%s3910_s5 + $0xf8] sm:$0xff]  ;;  %v1404_v58 = vld [vmem:[%s3910_s5 + $0xc0] sm:$0xff] }
 0x468   :  { %1233 = vmatprep.subr.mxu0 %v2385_v28  ;;  %2250 = vmatprep.subr.mxu1 %v3953_v6  ;;  %v1436_v28 = vld [vmem:[%s3910_s5 + $0x1c0] sm:$0xff] }
 0x469   :  { %1234 = vmatpush1.msra.mxu0 %v2386_v7  ;;  %2251 = vmatpush3.msra.mxu1 %v3978_v17  ;;  %v1388_v7 = vld [vmem:[%s3910_s5 + $0x40] sm:$0xff] }
 0x46a   :  { %1267 = vmatprep.mubr.f32.mxu0 %v3953_v6  ;;  %2252 = vmatprep.mubr.msk.f32.mxu1 %vm2410_vm1, %v3953_v6 }
 0x46b   :  { %1923 = vmatprep.subr.mxu0 %v1411_v12  ;;  %1958 = vmatprep.subr.mxu1 %v1443_v29  ;;  %v1420_v12 = vld [vmem:[%s3910_s5 + $0x140] sm:$0xff]  ;;  %v1403_v29 = vld [vmem:[%s3910_s5 + $0xb8] sm:$0xff] }
 0x50a   :  { %v1107_v30 = vpop.f32.mrf.mxu0  ;;  %v1178_v31 = vpop.f32.mrf.mxu1 }
 0x50b   :  { %v1108_v32 = vadd.f32 %v1107_v30, %v3979_v23  ;;  %v1179_v19 = vadd.f32 %v1178_v31, %v3136_v11  ;;  %v1435_v30 = vld [vmem:[%s3910_s5 + $0x1b8] sm:$0xff] }
 0x50c   :  { %v1109_v17 = vpop.f32.mrf.mxu0  ;;  %v2219_v33 = vpop.f32.mrf.mxu1  ;;  %v1387_v31 = vld [vmem:[%s3910_s5 + $0x38] sm:$0xff] }
 0x50d   :  { %v1182_v34 = vadd.f32 %v1108_v32, %v3980_v35  ;;  %v1110_v37 = vadd.f32 %v1109_v17, %v3126_v50  ;;  %v1419_v32 = vld [vmem:[%s3910_s5 + $0x138] sm:$0xff]  ;;  %v1402_v17 = vld [vmem:[%s3910_s5 + $0xb0] sm:$0xff] }
 0x50e   :  { %v1434_v33 = vld [vmem:[%s3910_s5 + $0x1b0] sm:$0xff] }
 0x50f   :  { %v1815_v36 = vmul.f32 -1.442695, %v1182_v34  ;;  %v1189_v40 = vadd.f32 %v1110_v37, %v3981_v38  ;;  %v1386_v34 = vld [vmem:[%s3910_s5 + $0x30] sm:$0xff]  ;;  %v1401_v37 = vld [vmem:[%s3910_s5 + $0xa8] sm:$0xff] }
 0x511   :  { %2333 = vpow2.f32 %v1815_v36  ;;  %v1816_v41 = vmul.f32 -1.442695, %v1189_v40  ;;  %v1418_v36 = vld [vmem:[%s3910_s5 + $0x130] sm:$0xff]  ;;  %v1433_v40 = vld [vmem:[%s3910_s5 + $0x1a8] sm:$0xff] }
 0x513   :  { %2335 = vpow2.f32 %v1816_v41  ;;  %v1385_v41 = vld [vmem:[%s3910_s5 + $0x28] sm:$0xff] }
 0x51e   :  { %v2334_v43 = vpop.eup %2333 }
 0x51f   :  { %v1186_v44 = vadd.f32 1.0, %v2334_v43  ;;  %v1417_v43 = vld [vmem:[%s3910_s5 + $0x128] sm:$0xff] }
 0x520   :  { %v2336_v46 = vpop.eup %2335 }
 0x521   :  { %2337 = vrcp.f32 %v1186_v44  ;;  %v1193_v52 = vadd.f32 1.0, %v2336_v46  ;;  %v1400_v44 = vld [vmem:[%s3910_s5 + $0xa0] sm:$0xff] }
 0x522   :  { %v1432_v46 = vld [vmem:[%s3910_s5 + $0x1a0] sm:$0xff] }
 0x523   :  { %2339 = vrcp.f32 %v1193_v52  ;;  %v1384_v52 = vld [vmem:[%s3910_s5 + $0x20] sm:$0xff] }
 0x52e   :  { %v2338_v4 = vpop.eup %2337 }
 0x52f   :  { %v1196_v59 = vmul.f32 %v2338_v4, %v1179_v19  ;;  %v1416_v19 = vld [vmem:[%s3910_s5 + $0x120] sm:$0xff]  ;;  %v1399_v4 = vld [vmem:[%s3910_s5 + $0x98] sm:$0xff] }
 0x530   :  { %v2340_v8 = vpop.eup %2339 }
 0x531   :  { %v1197_v63 = vadd.f32 %v1196_v59, %v3982_v16  ;;  %v1199_v47 = vsub.f32 1.0, %v2340_v8  ;;  %v1201_v21 = vmul.f32 %v2340_v8, %v3384_v5  ;;  %v1431_v59 = vld [vmem:[%s3910_s5 + $0x198] sm:$0xff] }
 0x532   :  { %v1415_v8 = vld [vmem:[%s3910_s5 + $0x118] sm:$0xff] }
 0x533   :  { %2341 = vtanh.f32 %v1197_v63  ;;  %v1383_v63 = vld [vmem:[%s3910_s5 + $0x18] sm:$0xff] }
 0x540   :  { %v2342_v27 = vpop.eup %2341 }
 0x541   :  { %v1200_v1 = vmul.f32 %v2342_v27, %v1199_v47  ;;  %v1398_v47 = vld [vmem:[%s3910_s5 + $0x90] sm:$0xff] }
 0x542   :  { %v1430_v27 = vld [vmem:[%s3910_s5 + $0x190] sm:$0xff] }
 0x543   :  { %v3532_v3 = vadd.f32 %v1201_v21, %v1200_v1  ;;  %v1382_v1 = vld [vmem:[%s3910_s5 + $0x10] sm:$0xff] }
 0x544   :  { %v1414_v21 = vld [vmem:[%s3910_s5 + $0x110] sm:$0xff] }
 0x545   :  { %1268 = vmatmul.mubr.f32.vlgmr.msra.gmra.mxu0 %v3532_v3  ;;  %2253 = vmatmul.mubr.f32.vlgmr.msra.gmra.mxu1 %v3532_v3 }
 0x546   :  { %1924 = vmatpush3.msra.mxu0 %v1395_v2  ;;  %1959 = vmatpush3.msra.mxu1 %v1427_v62  ;;  %v1397_v2 = vld [vmem:[%s3910_s5 + $0x88] sm:$0xff] }
 0x547   :  { %1925 = vmatprep.subr.mxu0 %v1410_v60  ;;  %1547 = vmatprep.mubr.f32.mxu0 %v3983_v39  ;;  %v1429_v62 = vld [vmem:[%s3910_s5 + $0x188] sm:$0xff]  ;;  %v1380_v39 = vld [vmem:[%s3910_s5] sm:$0xff] }
 0x548   :  { %1960 = vmatprep.subr.mxu1 %v1442_v61  ;;  %1617 = vmatprep.mubr.f32.mxu1 %v3384_v5  ;;  %v1392_v5 = vld [vmem:[%s3910_s5 + $0x60] sm:$0xff]  ;;  %v1381_v60 = vld [vmem:[%s3910_s5 + $0x8] sm:$0xff] }
 0x549   :  { %1926 = vmatpush3.msra.mxu0 %v1394_v49  ;;  %1961 = vmatpush3.msra.mxu1 %v1426_v14  ;;  %v1413_v61 = vld [vmem:[%s3910_s5 + $0x108] sm:$0xff]  ;;  %v1396_v49 = vld [vmem:[%s3910_s5 + $0x80] sm:$0xff] }
 0x54a   :  { %1927 = vmatprep.subr.mxu0 %v1409_v0  ;;  %1962 = vmatprep.subr.mxu1 %v1441_v42  ;;  %v1428_v14 = vld [vmem:[%s3910_s5 + $0x180] sm:$0xff] }
 0x54b   :  { %1928 = vmatpush3.msra.mxu0 %v1393_v9  ;;  %1963 = vmatpush3.msra.mxu1 %v1425_v45  ;;  %v1412_v0 = vld [vmem:[%s3910_s5 + $0x100] sm:$0xff]  ;;  %v1475_v9 = vld [vmem:[%s3910_s5 + $0x2f8] sm:$0xff] }
 0x54c   :  { %1929 = vmatprep.subr.mxu0 %v1408_v10  ;;  %1964 = vmatprep.subr.mxu1 %v1440_v48  ;;  %v3984_v42 = vld [vmem:[#allocation17_spill] sm:$0xff]  ;;  %v1459_v45 = vld [vmem:[%s3910_s5 + $0x278] sm:$0xff]  ;;  %v1474_v10 = vld [vmem:[%s3910_s5 + $0x2f0] sm:$0xff] }
 0x54d   :  { %1930 = vmatpush3.msra.mxu0 %v1392_v5  ;;  %1965 = vmatpush3.msra.mxu1 %v1424_v13  ;;  %v1473_v48 = vld [vmem:[%s3910_s5 + $0x2e8] sm:$0xff]  ;;  %v1472_v13 = vld [vmem:[%s3910_s5 + $0x2e0] sm:$0xff] }
 0x54e   :  { %1931 = vmatprep.subr.mxu0 %v1407_v51  ;;  %1966 = vmatprep.subr.mxu1 %v1439_v15  ;;  %v1457_v5 = vld [vmem:[%s3910_s5 + $0x268] sm:$0xff]  ;;  %v1456_v51 = vld [vmem:[%s3910_s5 + $0x260] sm:$0xff]  ;;  %v1471_v15 = vld [vmem:[%s3910_s5 + $0x2d8] sm:$0xff] }
 0x54f   :  { %1932 = vmatpush3.msra.mxu0 %v1391_v53  ;;  %1967 = vmatpush3.msra.mxu1 %v1423_v18  ;;  %v1455_v53 = vld [vmem:[%s3910_s5 + $0x258] sm:$0xff]  ;;  %v1470_v18 = vld [vmem:[%s3910_s5 + $0x2d0] sm:$0xff] }
 0x550   :  { %1933 = vmatprep.subr.mxu0 %v1406_v54  ;;  %1968 = vmatprep.subr.mxu1 %v1438_v20  ;;  %v1454_v54 = vld [vmem:[%s3910_s5 + $0x250] sm:$0xff]  ;;  %v1469_v20 = vld [vmem:[%s3910_s5 + $0x2c8] sm:$0xff] }
 0x551   :  { %1934 = vmatpush3.msra.mxu0 %v1390_v55  ;;  %1969 = vmatpush3.msra.mxu1 %v1422_v22  ;;  %v1453_v55 = vld [vmem:[%s3910_s5 + $0x248] sm:$0xff]  ;;  %v1468_v22 = vld [vmem:[%s3910_s5 + $0x2c0] sm:$0xff] }
 0x552   :  { %1935 = vmatprep.subr.mxu0 %v1405_v56  ;;  %1970 = vmatprep.subr.mxu1 %v1437_v25  ;;  %v1452_v56 = vld [vmem:[%s3910_s5 + $0x240] sm:$0xff]  ;;  %v1467_v25 = vld [vmem:[%s3910_s5 + $0x2b8] sm:$0xff] }
 0x553   :  { %1936 = vmatpush3.msra.mxu0 %v1389_v57  ;;  %1971 = vmatpush3.msra.mxu1 %v1421_v26  ;;  %v1451_v57 = vld [vmem:[%s3910_s5 + $0x238] sm:$0xff]  ;;  %v1466_v26 = vld [vmem:[%s3910_s5 + $0x2b0] sm:$0xff] }
 0x554   :  { %1937 = vmatprep.subr.mxu0 %v1404_v58  ;;  %1972 = vmatprep.subr.mxu1 %v1436_v28  ;;  %v1450_v58 = vld [vmem:[%s3910_s5 + $0x230] sm:$0xff]  ;;  %v1465_v28 = vld [vmem:[%s3910_s5 + $0x2a8] sm:$0xff] }
 0x555   :  { %1938 = vmatpush3.msra.mxu0 %v1388_v7  ;;  %1973 = vmatpush3.msra.mxu1 %v1420_v12  ;;  %v1449_v7 = vld [vmem:[%s3910_s5 + $0x228] sm:$0xff]  ;;  %v1464_v12 = vld [vmem:[%s3910_s5 + $0x2a0] sm:$0xff] }
 0x556   :  { %1939 = vmatprep.subr.mxu0 %v1403_v29  ;;  %1974 = vmatprep.subr.mxu1 %v1435_v30  ;;  %v1448_v29 = vld [vmem:[%s3910_s5 + $0x220] sm:$0xff]  ;;  %v1463_v30 = vld [vmem:[%s3910_s5 + $0x298] sm:$0xff] }
 0x557   :  { %1940 = vmatpush3.msra.mxu0 %v1387_v31  ;;  %1975 = vmatpush3.msra.mxu1 %v1419_v32  ;;  %v1447_v31 = vld [vmem:[%s3910_s5 + $0x218] sm:$0xff]  ;;  %v1462_v32 = vld [vmem:[%s3910_s5 + $0x290] sm:$0xff] }
 0x558   :  { %1941 = vmatprep.subr.mxu0 %v1402_v17  ;;  %1976 = vmatprep.subr.mxu1 %v1434_v33  ;;  %v1446_v17 = vld [vmem:[%s3910_s5 + $0x210] sm:$0xff]  ;;  %v1461_v33 = vld [vmem:[%s3910_s5 + $0x288] sm:$0xff] }
 0x559   :  { %1942 = vmatpush3.msra.mxu0 %v1386_v34  ;;  %1977 = vmatpush3.msra.mxu1 %v1418_v36  ;;  %v1445_v34 = vld [vmem:[%s3910_s5 + $0x208] sm:$0xff]  ;;  %v1460_v36 = vld [vmem:[%s3910_s5 + $0x280] sm:$0xff] }
 0x55a   :  { %1943 = vmatprep.subr.mxu0 %v1401_v37  ;;  %1978 = vmatprep.subr.mxu1 %v1433_v40  ;;  %v1444_v37 = vld [vmem:[%s3910_s5 + $0x200] sm:$0xff]  ;;  %v1709_v40 = vld [vmem:[%s3912_s7 + $0x78] sm:$0xff] }
 0x55b   :  { %1944 = vmatpush3.msra.mxu0 %v1385_v41  ;;  %1979 = vmatpush3.msra.mxu1 %v1417_v43  ;;  %v1708_v41 = vld [vmem:[%s3912_s7 + $0x70] sm:$0xff]  ;;  %v1707_v43 = vld [vmem:[%s3912_s7 + $0x68] sm:$0xff] }
 0x55c   :  { %1945 = vmatprep.subr.mxu0 %v1400_v44  ;;  %1980 = vmatprep.subr.mxu1 %v1432_v46  ;;  %v1706_v44 = vld [vmem:[%s3912_s7 + $0x60] sm:$0xff]  ;;  %v1705_v46 = vld [vmem:[%s3912_s7 + $0x58] sm:$0xff] }
 0x55d   :  { %1946 = vmatpush3.msra.mxu0 %v1384_v52  ;;  %1981 = vmatpush3.msra.mxu1 %v1416_v19  ;;  %v1704_v52 = vld [vmem:[%s3912_s7 + $0x50] sm:$0xff]  ;;  %v1703_v19 = vld [vmem:[%s3912_s7 + $0x48] sm:$0xff] }
 0x55e   :  { %1947 = vmatprep.subr.mxu0 %v1399_v4  ;;  %1982 = vmatprep.subr.mxu1 %v1431_v59  ;;  %v1702_v4 = vld [vmem:[%s3912_s7 + $0x40] sm:$0xff]  ;;  %v1701_v59 = vld [vmem:[%s3912_s7 + $0x38] sm:$0xff] }
 0x55f   :  { %1948 = vmatpush3.msra.mxu0 %v1383_v63  ;;  %1983 = vmatpush3.msra.mxu1 %v1415_v8  ;;  %v1700_v63 = vld [vmem:[%s3912_s7 + $0x30] sm:$0xff]  ;;  %v1699_v8 = vld [vmem:[%s3912_s7 + $0x28] sm:$0xff] }
 0x560   :  { %1949 = vmatprep.subr.mxu0 %v1398_v47  ;;  %1984 = vmatprep.subr.mxu1 %v1430_v27 }
 0x561   :  { %1950 = vmatpush3.msra.mxu0 %v1382_v1  ;;  %1985 = vmatpush3.msra.mxu1 %v1414_v21 }
 0x562   :  { %1951 = vmatprep.subr.mxu0 %v1397_v2  ;;  %1986 = vmatprep.subr.mxu1 %v1429_v62 }
 0x563   :  { %1952 = vmatpush3.msra.mxu0 %v1381_v60  ;;  %1987 = vmatpush3.msra.mxu1 %v1413_v61 }
 0x564   :  { %1953 = vmatprep.subr.mxu0 %v1396_v49  ;;  %1988 = vmatprep.subr.mxu1 %v1428_v14 }
 0x565   :  { %1954 = vmatpush3.msra.mxu0 %v1380_v39  ;;  %1989 = vmatpush3.msra.mxu1 %v1412_v0 }
 0x566   :  { %1548 = vmatmul.mubr.f32.vlgmr.msra.gmra.mxu0 %v3984_v42  ;;  %1618 = vmatmul.mubr.f32.vlgmr.msra.gmra.mxu1 %v3304_v24  ;;  %v1458_v24 = vld [vmem:[%s3910_s5 + $0x270] sm:$0xff] }
 0x567   :  { %2255 = vmatprep.subr.mxu1 %v3953_v6  ;;  %2287 = vmatprep.mubr.msk.f32.mxu1 %vm2410_vm1, %v3953_v6 }
 0x568   :  { %1993 = vmatprep.subr.mxu0 %v1475_v9  ;;  %2256 = vmatpush3.msra.mxu1 %v1709_v40 }
 0x569   :  { %1994 = vmatpush3.msra.mxu0 %v1459_v45  ;;  %2257 = vmatprep.subr.mxu1 %v3953_v6 }
 0x56a   :  { %1995 = vmatprep.subr.mxu0 %v1474_v10  ;;  %2258 = vmatpush3.msra.mxu1 %v1708_v41 }
 0x56b   :  { %1996 = vmatpush3.msra.mxu0 %v1458_v24  ;;  %2259 = vmatprep.subr.mxu1 %v3953_v6 }
 0x56c   :  { %1997 = vmatprep.subr.mxu0 %v1473_v48  ;;  %2260 = vmatpush3.msra.mxu1 %v1707_v43 }
 0x56d   :  { %1998 = vmatpush3.msra.mxu0 %v1457_v5  ;;  %2261 = vmatprep.subr.mxu1 %v3953_v6 }
 0x56e   :  { %1999 = vmatprep.subr.mxu0 %v1472_v13  ;;  %2262 = vmatpush3.msra.mxu1 %v1706_v44 }
 0x56f   :  { %2000 = vmatpush3.msra.mxu0 %v1456_v51  ;;  %2263 = vmatprep.subr.mxu1 %v3953_v6 }
 0x570   :  { %2001 = vmatprep.subr.mxu0 %v1471_v15  ;;  %2264 = vmatpush3.msra.mxu1 %v1705_v46 }
 0x571   :  { %2002 = vmatpush3.msra.mxu0 %v1455_v53  ;;  %2265 = vmatprep.subr.mxu1 %v3953_v6 }
 0x572   :  { %2003 = vmatprep.subr.mxu0 %v1470_v18  ;;  %2266 = vmatpush3.msra.mxu1 %v1704_v52 }
 0x573   :  { %2004 = vmatpush3.msra.mxu0 %v1454_v54  ;;  %2267 = vmatprep.subr.mxu1 %v3953_v6 }
 0x574   :  { %2005 = vmatprep.subr.mxu0 %v1469_v20  ;;  %2268 = vmatpush3.msra.mxu1 %v1703_v19  ;;  %v1696_v20 = vld [vmem:[%s3912_s7 + $0x10] sm:$0xff] }
 0x575   :  { %2006 = vmatpush3.msra.mxu0 %v1453_v55  ;;  %2269 = vmatprep.subr.mxu1 %v3953_v6  ;;  %v1694_v55 = vld [vmem:[%s3912_s7] sm:$0xff] }
 0x576   :  { %2007 = vmatprep.subr.mxu0 %v1468_v22  ;;  %2270 = vmatpush3.msra.mxu1 %v1702_v4 }
 0x577   :  { %2008 = vmatpush3.msra.mxu0 %v1452_v56  ;;  %2271 = vmatprep.subr.mxu1 %v3953_v6 }
 0x578   :  { %2009 = vmatprep.subr.mxu0 %v1467_v25  ;;  %2272 = vmatpush3.msra.mxu1 %v1701_v59 }
 0x579   :  { %2010 = vmatpush3.msra.mxu0 %v1451_v57  ;;  %2273 = vmatprep.subr.mxu1 %v3953_v6 }
 0x57a   :  { %2011 = vmatprep.subr.mxu0 %v1466_v26  ;;  %2274 = vmatpush3.msra.mxu1 %v1700_v63  ;;  %v1819_v26 = vld [vmem:[%s3911_s6] ss:$0 sm:$0xff]  ;;  %s2387_s6 = scalar_lea.vmem %s1796_s30, 32 }
 0x57b   :  { %2012 = vmatpush3.msra.mxu0 %v1450_v58  ;;  %2275 = vmatprep.subr.mxu1 %v3953_v6  ;;  %p2388_p0 = scmp.ne.s32.totalorder %s1796_s30, %s2387_s6  ;;  %p2393_p2 = scmp.lt.s32.totalorder %s2387_s6, %s2387_s6 }
 0x57c   :  { %2013 = vmatprep.subr.mxu0 %v1465_v28  ;;  %2276 = vmatpush3.msra.mxu1 %v1699_v8 }
 0x57d   :  { %2014 = vmatpush3.msra.mxu0 %v1449_v7  ;;  %2277 = vmatprep.subr.mxu1 %v3953_v6  ;;  %p2394_p3 = por %p2393_p2, %p2392_p1 }
 0x57e   :  { %2015 = vmatprep.subr.mxu0 %v1464_v12 }
 0x57f   :  { %2016 = vmatpush3.msra.mxu0 %v1448_v29  ;;  %p2395_p4 = pnand %p2394_p3, %p2388_p0 }
 0x580   :  { %2017 = vmatprep.subr.mxu0 %v1463_v30 }
 0x581   :  { %2018 = vmatpush3.msra.mxu0 %v1447_v31 }
 0x582   :  { %2019 = vmatprep.subr.mxu0 %v1462_v32 }
 0x583   :  { %2020 = vmatpush3.msra.mxu0 %v1446_v17 }
 0x584   :  { %2021 = vmatprep.subr.mxu0 %v1461_v33 }
 0x585   :  { %2022 = vmatpush3.msra.mxu0 %v1445_v34 }
 0x586   :  { %2023 = vmatprep.subr.mxu0 %v1460_v36 }
 0x587   :  { %2024 = vmatpush3.msra.mxu0 %v1444_v37 }
 0x605   :  { %v1269_v47 = vpop.f32.mrf.mxu0  ;;  %v1340_v27 = vpop.f32.mrf.mxu1 }
 0x606   :  { %v1270_v1 = vadd.f32 %v1269_v47, %v3979_v23  ;;  %v1341_v23 = vadd.f32 %v1340_v27, %v3136_v11  ;;  %v1698_v11 = vld [vmem:[%s3912_s7 + $0x20] sm:$0xff] }
 0x607   :  { %v1271_v21 = vpop.f32.mrf.mxu0  ;;  %v2254_v2 = vpop.f32.mrf.mxu1  ;;  %2278 = vmatpush3.msra.mxu1 %v1698_v11 }
 0x608   :  { %v1345_v62 = vrot.slane %v1270_v1, 6  ;;  %v1272_v60 = vadd.f32 %v1271_v21, %v3126_v50  ;;  %v1365_v24 = vrot.slane %v1341_v23, 6  ;;  %2279 = vmatprep.subr.mxu1 %v3953_v6 }
 0x60a   :  { %v1347_v61 = vadd.f32 %v1345_v62, %v3980_v35  ;;  %v1355_v14 = vrot.slane %v1272_v60, 6 }
 0x60c   :  { %v1817_v49 = vmul.f32 -1.442695, %v1347_v61  ;;  %v1357_v39 = vadd.f32 %v1355_v14, %v3981_v38  ;;  %v1373_v38 = vrot.slane %v3532_v3, 6 }
 0x60e   :  { %2343 = vpow2.f32 %v1817_v49  ;;  %v1818_v0 = vmul.f32 -1.442695, %v1357_v39 }
 0x610   :  { %2345 = vpow2.f32 %v1818_v0 }
 0x61b   :  { %v2344_v42 = vpop.eup %2343 }
 0x61c   :  { %v1351_v9 = vadd.f32 1.0, %v2344_v42 }
 0x61d   :  { %v2346_v45 = vpop.eup %2345 }
 0x61e   :  { %2347 = vrcp.f32 %v1351_v9  ;;  %v1361_v10 = vadd.f32 1.0, %v2346_v45 }
 0x620   :  { %2349 = vrcp.f32 %v1361_v10 }
 0x626   :  { %v1955_v22 = vpop.f32.mrf.mxu0  ;;  %v1990_v25 = vpop.f32.mrf.mxu1 }
 0x628   :  { %v1956_v56 = vpop.f32.mrf.mxu0  ;;  %v1991_v58 = vpop.f32.mrf.mxu1 }
 0x629   :  { %v1957_v57 = vadd.f32 %v1956_v56, %v1955_v22  ;;  %v1992_v12 = vadd.f32 %v1991_v58, %v1990_v25 }
 0x62b   :  { %v2348_v48 = vpop.eup %2347  ;;  %v1550_v28 = vadd.f32 %v1957_v57, %v1819_v26 }
 0x62c   :  { %v1367_v5 = vmul.f32 %v2348_v48, %v1365_v24 }
 0x62d   :  { %v2350_v35 = vpop.eup %2349  ;;  %v1620_v30 = vadd.f32 %v1992_v12, %v1550_v28 }
 0x62e   :  { %v1368_v50 = vadd.f32 %v1367_v5, %v3982_v16  ;;  %v1370_v13 = vsub.f32 1.0, %v2350_v35  ;;  %v1375_v53 = vmul.f32 %v2350_v35, %v1373_v38  ;;  %v1697_v16 = vld [vmem:[%s3912_s7 + $0x18] sm:$0xff] }
 0x62f   :  { %2280 = vmatpush3.msra.mxu1 %v1697_v16 }
 0x630   :  { %2351 = vtanh.f32 %v1368_v50  ;;  %2281 = vmatprep.subr.mxu1 %v3953_v6 }
 0x631   :  { %2282 = vmatpush3.msra.mxu1 %v1696_v20 }
 0x632   :  { %2283 = vmatprep.subr.mxu1 %v3953_v6 }
 0x63d   :  { %v2352_v51 = vpop.eup %2351 }
 0x63e   :  { %v1371_v15 = vmul.f32 %v2352_v51, %v1370_v13 }
 0x640   :  { %v1376_v18 = vadd.f32 %v1375_v53, %v1371_v15 }
 0x642   :  { %v1378_v54 = vrot.slane %v1376_v18, 2 }
 0x644   :  { %1687 = vmatprep.mubr.f32.mxu0 %v1378_v54 }
 0x645   :  { %1688 = vmatmul.mubr.f32.vlgmr.msra.gmra.mxu0 %v3532_v3  ;;  %v1695_v3 = vld [vmem:[%s3912_s7 + $0x8] sm:$0xff] }
 0x646   :  { %2284 = vmatpush3.msra.mxu1 %v1695_v3 }
 0x647   :  { %2285 = vmatprep.subr.mxu1 %v3953_v6  ;;  %v1820_v6 = vld [vmem:[%s3913_s8] ss:$0 sm:$0xff] }
 0x648   :  { %2286 = vmatpush3.msra.mxu1 %v1694_v55 }
 0x705   :  { %v2025_v7 = vpop.f32.mrf.mxu0 }
 0x707   :  { %v2026_v29 = vpop.f32.mrf.mxu0 }
 0x708   :  { %v2027_v31 = vadd.f32 %v2026_v29, %v2025_v7 }
 0x70a   :  { %v1690_v32 = vadd.f32 %v2027_v31, %v1620_v30 }
 0x70c   :  { %v1693_v17 = vmax.f32 %v1690_v32, 0.0 }
 0x70e   :  { %2288 = vmatmul.mubr.f32.vlgmr.msra.gmra.mxu1 %v1693_v17 }
 0x7ce   :  { %v1783_v33 = vpop.f32.mrf.mxu1 }
 0x7cf   :  { %v1784_v34 = vadd.f32 %v1820_v6, %v1783_v33 }
 0x7d0   :  { %v2289_v36 = vpop.f32.mrf.mxu1 }
 0x7d1   :  { %1788 = vst.msk [vmem:[#allocation2] sm:$0x3] %vm1787_vm2, %v1784_v34 }
 0x7d2   :  { %2398 = shalt.err (!%p2395_p4)
}
 0x7d3   :  { %1798 = dma.vmem_to_hbm [thread:$0]  %s1796_s30, 32, %s3914_s9, [#allocation3]  }
 0x7d4   :  { %2407 = dma.done.wait [#allocation3], 32  }
 0x7d5   :  { %2408 = vsyncadd [#allocation3], 4294967264 }
 0x7d6   :  { %1802 = vsyncpa [#allocation3], 1 }

</bundles_post_ra>
